<compile_context>
chip_gen: v5e
topology: v5e:2x2
jax: 0.10.0
libtpu: 0.0.40
codegen_flags: <defaults>
</compile_context>

<pallas_src>
import functools

import jax
import jax.numpy as jnp
from jax.experimental import pallas as pl
from jax.experimental.pallas import tpu as pltpu

# ---- problem sizes (small, consistent with the module) ----------------------
N = 64            # points per cloud
C = 32            # embed_channels
G = 4             # groups
I = C // G        # channels per group
S = 8             # nsample (neighbors per point)
NS = N * S
NUM_COND = 3      # PDNorm conditions
LANES = 128

BN_EPS_POINT = 1e-5   # PointBatchNorm (BatchNorm1d default)
BN_EPS_PD = 1e-3      # PDBatchNorm eps in the pdnorm model

# ---- weight slab layout: [W_ROWS, 128] f32, one row block per fused operand --
R_QKV = 0 * C      # [Wq | Wk | Wv | 0]          (C rows x 128 lanes)
R_FC1 = 1 * C      # [Wfc1 | 0]
R_FC3 = 2 * C      # [Wfc3 | 0]
R_P2 = 3 * C       # [Wp2  | 0]
R_WE1 = 4 * C      # [We1 expanded to CxC | 0]
R_WE2 = 5 * C      # [expand.T @ We2 @ expand / I | 0]
R_P1 = 6 * C       # [Wp1 (3 rows used of 8) | 0]
W_ROWS = 6 * C + 8  # 200

# ---- bias/affine slab rows: [V_ROWS, 128] f32 (per condition / instance) ----
(V_N1G, V_N1B, V_QKVB, V_QKVG, V_QKVBETA, V_BP1, V_PG, V_PB, V_BP2,
 V_BE1, V_WEG, V_WEB, V_BE2, V_N2G, V_N2B, V_N3G, V_N3B) = range(17)
V_ROWS = 24


def block_kernel(coord_ref, feat_ref, idx_ref, wmat_ref, vrow_ref, out_ref):
    f32 = jnp.float32
    dot = functools.partial(jnp.dot, preferred_element_type=f32)  # default MXU precision
    relu = lambda a: jnp.maximum(a, 0.0)

    def wblk(r, rows=C):
        return wmat_ref[r:r + rows, :]               # full-width, unmasked weight load

    def vrow(i, cols=C):
        return vrow_ref[i:i + 1, 0:cols]

    def bn(x, gi, bi, eps, cols=C):
        # Training-mode batch norm over axis 0, single fused pass (E[x^2] - m^2).
        inv_n = 1.0 / x.shape[0]
        mean = jnp.sum(x, axis=0, keepdims=True) * inv_n
        var = jnp.sum(x * x, axis=0, keepdims=True) * inv_n - mean * mean
        var = jnp.maximum(var, 0.0)
        return (x - mean) * jax.lax.rsqrt(var + eps) * vrow(gi, cols) + vrow(bi, cols)

    coord = coord_ref[...]                            # [N, 3]
    feat = feat_ref[...]                              # [N, C]
    identity = feat

    # --- fc1 -> norm1 (PDBatchNorm) -> ReLU -----------------------------------
    x = relu(bn(dot(feat, wblk(R_FC1))[:, :C], V_N1G, V_N1B, BN_EPS_PD))

    # --- fused q/k/v projection: one MXU call ----------------------------------
    qkv = dot(x, wblk(R_QKV)) + vrow(V_QKVB, LANES)   # [N, 128] = [q | k | v | 0]
    qk = relu(bn(qkv, V_QKVG, V_QKVBETA, BN_EPS_POINT, cols=LANES))
    q = qk[:, 0:C]
    k = qk[:, C:2 * C]
    v = qkv[:, 2 * C:3 * C]                           # value path: no BN / ReLU

    # --- Wp1 folded through the gather: N-row matmul instead of NS-row ---------
    pproj = dot(coord, wblk(R_P1, rows=3))[:, :C]     # [N, C] = coord @ Wp1

    # --- single fused data-dependent gather ------------------------------------
    # rhs = [k | v | coord@Wp1 | 1]; padded (idx == -1) rows gather all-zeros,
    # and the trailing ones column gives the validity mask for free.
    idx = idx_ref[...]                                # [NS, 1], neighbor-major
    col = jax.lax.broadcasted_iota(jnp.int32, (NS, N), 1)
    onehot = (idx == col).astype(f32)                 # [NS, N]
    rhs = jnp.concatenate([k, v, pproj, jnp.ones((N, 1), f32)], axis=1)   # [N, 3C+1]
    g3 = dot(onehot, rhs).reshape(S, N, 3 * C + 1)    # [S, N, 3C+1]
    key3 = g3[..., 0:C]
    val3 = g3[..., C:2 * C]
    pg3 = g3[..., 2 * C:3 * C]
    mask3 = g3[..., 3 * C:3 * C + 1]                  # [S, N, 1] in {0, 1}

    # --- pe_bias MLP: masked relative position -> PointBN -> ReLU -> Linear ----
    pe_in = (mask3 * (pg3 - pproj[None, :, :])).reshape(NS, C) + vrow(V_BP1)
    t = relu(bn(pe_in, V_PG, V_PB, BN_EPS_POINT))
    peb = dot(t, wblk(R_P2))[:, :C] + vrow(V_BP2)     # [NS, C]
    peb3 = peb.reshape(S, N, C)

    rel = (key3 - q[None, :, :] + peb3).reshape(NS, C)   # per-point term via broadcast
    val3 = val3 + peb3

    # --- weight encoding in group-expanded (C-lane) space ----------------------
    w1 = relu(bn(dot(rel, wblk(R_WE1))[:, :C] + vrow(V_BE1),
                 V_WEG, V_WEB, BN_EPS_POINT))
    w2 = dot(w1, wblk(R_WE2))[:, :C] + vrow(V_BE2)    # [NS, C], lanes repeat per group
    w3 = w2.reshape(S, N, C)

    # --- softmax over the neighbor axis (padded rows in the denominator, as in
    #     the reference), then mask + grouped aggregation -----------------------
    m = jnp.max(w3, axis=0, keepdims=True)
    ew = jnp.exp(w3 - m)
    den = jnp.sum(ew, axis=0)                          # [N, C]
    num = jnp.sum(val3 * ew * mask3, axis=0)           # [N, C]
    attn = num * pl.reciprocal(den, approx=True)

    # --- norm2 -> ReLU, fc3 -> norm3, residual, ReLU ---------------------------
    y = relu(bn(attn, V_N2G, V_N2B, BN_EPS_PD))
    y = bn(dot(y, wblk(R_FC3))[:, :C], V_N3G, V_N3B, BN_EPS_PD)
    out_ref[...] = relu(identity + y)


# ---------------- parameter packing (wrapper-side glue) ----------------------
def _expand_mat():
    # expand[g, g*I:(g+1)*I] = 1 ; folds the group->channel broadcast into weights.
    return jnp.kron(jnp.eye(G, dtype=jnp.float32), jnp.ones((1, I), jnp.float32))


def _blk(mat, rows):
    return jnp.pad(mat.astype(jnp.float32),
                   ((0, rows - mat.shape[0]), (0, LANES - mat.shape[1])))


def _row(vec):
    return jnp.pad(vec.astype(jnp.float32), ((0, 0), (0, LANES - vec.shape[1])))


def pack_wmat(p):
    expand = _expand_mat()
    we1_exp = p["we1"] @ expand                        # [C, C]
    we2_exp = (expand.T @ p["we2"] @ expand) / I       # [C, C]
    wqkv = jnp.concatenate([p["wq"], p["wk"], p["wv"]], axis=1)   # [C, 3C]
    wmat = jnp.concatenate([
        _blk(wqkv, C), _blk(p["fc1_w"], C), _blk(p["fc3_w"], C), _blk(p["wp2"], C),
        _blk(we1_exp, C), _blk(we2_exp, C), _blk(p["wp1"], 8),
    ], axis=0)
    assert wmat.shape == (W_ROWS, LANES)
    return wmat


def pack_vrow_table(p):
    """Per-condition bias/affine slab table: [NUM_COND, V_ROWS, 128]."""
    expand = _expand_mat()
    ones_c = jnp.ones((1, C), jnp.float32)
    zeros_c = jnp.zeros((1, C), jnp.float32)
    shared = {
        V_QKVB: _row(jnp.concatenate([p["bq"], p["bk"], p["bv"]], axis=1)),
        V_QKVG: _row(jnp.concatenate([p["qbn_g"], p["kbn_g"], ones_c], axis=1)),
        V_QKVBETA: _row(jnp.concatenate([p["qbn_b"], p["kbn_b"], zeros_c], axis=1)),
        V_BP1: _row(p["bp1"]), V_PG: _row(p["pbn_g"]), V_PB: _row(p["pbn_b"]),
        V_BP2: _row(p["bp2"]),
        V_BE1: _row(p["be1"] @ expand), V_WEG: _row(p["webn_g"] @ expand),
        V_WEB: _row(p["webn_b"] @ expand), V_BE2: _row(p["be2"] @ expand),
    }
    tables = []
    for c in range(NUM_COND):
        rows = [jnp.zeros((1, LANES), jnp.float32)] * V_ROWS
        rows[V_N1G] = _row(p["norm1_g"][c:c + 1]); rows[V_N1B] = _row(p["norm1_b"][c:c + 1])
        rows[V_N2G] = _row(p["norm2_g"][c:c + 1]); rows[V_N2B] = _row(p["norm2_b"][c:c + 1])
        rows[V_N3G] = _row(p["norm3_g"][c:c + 1]); rows[V_N3B] = _row(p["norm3_b"][c:c + 1])
        for i, r in shared.items():
            rows[i] = r
        tables.append(jnp.concatenate(rows, axis=0))
    return jnp.stack(tables, axis=0)


def init_params(key):
    ks = iter(jax.random.split(key, 64))

    def w(shape, scale=0.1):
        return (scale * jax.random.normal(next(ks), shape)).astype(jnp.float32)

    def gamma(shape):
        return (1.0 + 0.05 * jax.random.normal(next(ks), shape)).astype(jnp.float32)

    p = {}
    # Linear weights stored pre-transposed as [in, out] (torch stores [out, in]).
    p["fc1_w"] = w((C, C))
    p["norm1_g"] = gamma((NUM_COND, C)); p["norm1_b"] = w((NUM_COND, C), 0.05)
    p["wq"] = w((C, C)); p["bq"] = w((1, C), 0.02)
    p["qbn_g"] = gamma((1, C)); p["qbn_b"] = w((1, C), 0.02)
    p["wk"] = w((C, C)); p["bk"] = w((1, C), 0.02)
    p["kbn_g"] = gamma((1, C)); p["kbn_b"] = w((1, C), 0.02)
    p["wv"] = w((C, C)); p["bv"] = w((1, C), 0.02)
    p["wp1"] = w((3, C)); p["bp1"] = w((1, C), 0.02)
    p["pbn_g"] = gamma((1, C)); p["pbn_b"] = w((1, C), 0.02)
    p["wp2"] = w((C, C)); p["bp2"] = w((1, C), 0.02)
    p["we1"] = w((C, G)); p["be1"] = w((1, G), 0.02)
    p["webn_g"] = gamma((1, G)); p["webn_b"] = w((1, G), 0.02)
    p["we2"] = w((G, G)); p["be2"] = w((1, G), 0.02)
    p["norm2_g"] = gamma((NUM_COND, C)); p["norm2_b"] = w((NUM_COND, C), 0.05)
    p["fc3_w"] = w((C, C))
    p["norm3_g"] = gamma((NUM_COND, C)); p["norm3_b"] = w((NUM_COND, C), 0.05)
    return p


def block_forward(points, reference_index, params):
    """Pallas-backed, batched Block.forward.

    points = [coord, feat, offset, condition, context] with a leading batch dim;
    each batch entry is one independent point cloud of N points (offset = [N]).
    condition is an int32 [B] array of PDNorm condition indices.
    """
    coord, feat, offset, condition, context = points
    B = feat.shape[0]

    wmat = pack_wmat(params)                                   # shared  [W_ROWS, 128]
    vrows = pack_vrow_table(params)[condition]                 # per-cond [B, V_ROWS, 128]
    # neighbor-major flattening: row s*N + n  <->  reference_index[b, n, s]
    idx_sn = jnp.transpose(reference_index, (0, 2, 1)).reshape(B, NS, 1).astype(jnp.int32)

    new_feat = pl.pallas_call(
        block_kernel,
        grid=(B,),
        in_specs=[
            pl.BlockSpec((None, N, 3), lambda b: (b, 0, 0)),
            pl.BlockSpec((None, N, C), lambda b: (b, 0, 0)),
            pl.BlockSpec((None, NS, 1), lambda b: (b, 0, 0)),
            pl.BlockSpec((W_ROWS, LANES), lambda b: (0, 0)),
            pl.BlockSpec((None, V_ROWS, LANES), lambda b: (b, 0, 0)),
        ],
        out_specs=pl.BlockSpec((None, N, C), lambda b: (b, 0, 0)),
        out_shape=jax.ShapeDtypeStruct((B, N, C), jnp.float32),
        compiler_params=pltpu.CompilerParams(dimension_semantics=("parallel",)),
    )(coord.astype(jnp.float32), feat.astype(jnp.float32), idx_sn, wmat, vrows)

    return [coord, new_feat, offset, condition, context]


# ---------------- pure-JAX reference (mirrors the torch semantics) -----------
def block_reference_single(coord, feat, ref_idx, p, condition):
    hp = jax.lax.Precision.HIGHEST
    mm = functools.partial(jnp.matmul, precision=hp)

    def bn2(x, g, b, eps):
        m = x.mean(0, keepdims=True)
        v = jnp.square(x - m).mean(0, keepdims=True)
        return (x - m) * jax.lax.rsqrt(v + eps) * g + b

    def bn3(x, g, b, eps):   # [N,S,D] -> stats over N*S per channel
        x2 = x.reshape(-1, x.shape[-1])
        m = x2.mean(0)
        v = jnp.square(x2 - m).mean(0)
        return (x - m) * jax.lax.rsqrt(v + eps) * g + b

    sel = lambda a: a[condition]
    identity = feat
    x = jnp.maximum(bn2(mm(feat, p["fc1_w"]), sel(p["norm1_g"]), sel(p["norm1_b"]), BN_EPS_PD), 0.0)

    q = jnp.maximum(bn2(mm(x, p["wq"]) + p["bq"], p["qbn_g"], p["qbn_b"], BN_EPS_POINT), 0.0)
    k = jnp.maximum(bn2(mm(x, p["wk"]) + p["bk"], p["kbn_g"], p["kbn_b"], BN_EPS_POINT), 0.0)
    v = mm(x, p["wv"]) + p["bv"]

    mask = (ref_idx >= 0).astype(jnp.float32)                  # [N,S]
    safe = jnp.clip(ref_idx, 0, N - 1)
    key_g = k[safe] * mask[..., None]                          # [N,S,C]
    val_g = v[safe] * mask[..., None]
    pos = (coord[safe] - coord[:, None, :]) * mask[..., None]  # [N,S,3]

    rel = key_g - q[:, None, :]
    t = jnp.maximum(bn3(mm(pos, p["wp1"]) + p["bp1"], p["pbn_g"], p["pbn_b"], BN_EPS_POINT), 0.0)
    peb = mm(t, p["wp2"]) + p["bp2"]
    rel = rel + peb
    val_g = val_g + peb

    w = jnp.maximum(bn3(mm(rel, p["we1"]) + p["be1"], p["webn_g"], p["webn_b"], BN_EPS_POINT), 0.0)
    w = mm(w, p["we2"]) + p["be2"]                             # [N,S,G]
    ew = jnp.exp(w)
    w = ew / ew.sum(axis=1, keepdims=True)
    w = w * mask[..., None]

    val_g = val_g.reshape(N, S, G, I)
    attn = jnp.einsum("nsgi,nsg->ngi", val_g, w, precision=hp).reshape(N, C)

    x = jnp.maximum(bn2(attn, sel(p["norm2_g"]), sel(p["norm2_b"]), BN_EPS_PD), 0.0)
    x = bn2(mm(x, p["fc3_w"]), sel(p["norm3_g"]), sel(p["norm3_b"]), BN_EPS_PD)
    return jnp.maximum(identity + x, 0.0)


block_reference = jax.vmap(block_reference_single, in_axes=(0, 0, 0, None, 0))


if __name__ == "__main__":
    B = 4
    root = jax.random.PRNGKey(0)
    k_coord, k_feat, k_idx, k_pad, k_param = jax.random.split(root, 5)

    coord = jax.random.normal(k_coord, (B, N, 3), dtype=jnp.float32)
    feat = jax.random.normal(k_feat, (B, N, C), dtype=jnp.float32)
    ref_idx = jax.random.randint(k_idx, (B, N, S), 0, N, dtype=jnp.int32)
    pad = jax.random.uniform(k_pad, (B, N, S)) < 0.2
    ref_idx = jnp.where(pad, -1, ref_idx)                      # -1 == invalid neighbor

    offset = jnp.full((B,), N, dtype=jnp.int32)
    condition = jnp.array([0, 1, 2, 1], dtype=jnp.int32)[:B]   # PDNorm condition per cloud
    context = jnp.zeros((B, 16), dtype=jnp.float32)            # unused (adaptive=False)

    params = init_params(k_param)

    points = [coord, feat, offset, condition, context]
    out_points = block_forward(points, ref_idx, params)
    out = jax.block_until_ready(out_points[1])

    ref = jax.block_until_ready(block_reference(coord, feat, ref_idx, params, condition))
    assert out.shape == (B, N, C)
    assert bool(jnp.all(jnp.isfinite(out)))
    # Kernel matmuls run at default MXU precision (with Wp1 folded through the
    # gather) against an exact-index, HIGHEST-precision reference.
    err = float(jnp.max(jnp.abs(out - ref)))
    assert bool(jnp.allclose(out, ref, atol=3e-2, rtol=3e-2)), err

    print("KERNEL_OK")
</pallas_src>

<mosaic_0001>
module attributes {stable_mosaic.version = 11 : i64} {
  func.func @block_kernel(%arg0: i32, %arg1: memref<1x64x3xf32, #tpu.memory_space<vmem>>, %arg2: memref<1x64x32xf32, #tpu.memory_space<vmem>>, %arg3: memref<1x512x1xi32, #tpu.memory_space<vmem>>, %arg4: memref<200x128xf32, #tpu.memory_space<vmem>>, %arg5: memref<1x24x128xf32, #tpu.memory_space<vmem>>, %arg6: memref<1x64x32xf32, #tpu.memory_space<vmem>>) attributes {dimension_semantics = [#tpu.dimension_semantics<parallel>], iteration_bounds = array<i64: 4>, scalar_prefetch = 0 : i64, scratch_operands = 0 : i64, tpu.core_type = #tpu.core_type<tc>, window_params = [{transform_indices = @transform_0, window_bounds = array<i64: 1, 64, 3>}, {transform_indices = @transform_1, window_bounds = array<i64: 1, 64, 32>}, {transform_indices = @transform_2, window_bounds = array<i64: 1, 512, 1>}, {pipeline_mode = #tpu.pipeline_mode<synchronous>, transform_indices = @transform_3, window_bounds = array<i64: 200, 128>}, {transform_indices = @transform_4, window_bounds = array<i64: 1, 24, 128>}, {transform_indices = @transform_5, window_bounds = array<i64: 1, 64, 32>}]} {
    %c0 = arith.constant 0 : index
    %c0_0 = arith.constant 0 : index
    %c0_1 = arith.constant 0 : index
    %0 = vector.load %arg1[%c0, %c0_0, %c0_1] : memref<1x64x3xf32, #tpu.memory_space<vmem>>, vector<1x64x3xf32>
    %1 = vector.shape_cast %0 : vector<1x64x3xf32> to vector<64x3xf32>
    %c0_2 = arith.constant 0 : index
    %c0_3 = arith.constant 0 : index
    %c0_4 = arith.constant 0 : index
    %2 = vector.load %arg2[%c0_2, %c0_3, %c0_4] : memref<1x64x32xf32, #tpu.memory_space<vmem>>, vector<1x64x32xf32>
    %3 = vector.shape_cast %2 : vector<1x64x32xf32> to vector<64x32xf32>
    %c32 = arith.constant 32 : index
    %c0_5 = arith.constant 0 : index
    %4 = vector.load %arg4[%c32, %c0_5] : memref<200x128xf32, #tpu.memory_space<vmem>>, vector<32x128xf32>
    %cst = arith.constant dense<0.000000e+00> : vector<64x128xf32>
    %5 = tpu.matmul %3, %4, %cst {dimension_numbers = #tpu.dot_dimension_numbers<[1], [0], [0], [1], [0, 0, 1, 1], [], []>} : vector<64x32xf32>, vector<32x128xf32>, vector<64x128xf32> -> vector<64x128xf32>
    %6 = vector.extract_strided_slice %5 {offsets = [0, 0], sizes = [64, 32], strides = [1, 1]} : vector<64x128xf32> to vector<64x32xf32>
    %cst_6 = arith.constant dense<0.000000e+00> : vector<32xf32>
    %7 = vector.multi_reduction <add>, %6, %cst_6 [0] : vector<64x32xf32> to vector<32xf32>
    %8 = vector.shape_cast %7 : vector<32xf32> to vector<1x32xf32>
    %cst_7 = arith.constant 1.562500e-02 : f32
    %9 = vector.broadcast %cst_7 : f32 to vector<1x32xf32>
    %10 = arith.mulf %8, %9 : vector<1x32xf32>
    %11 = arith.mulf %6, %6 : vector<64x32xf32>
    %cst_8 = arith.constant dense<0.000000e+00> : vector<32xf32>
    %12 = vector.multi_reduction <add>, %11, %cst_8 [0] : vector<64x32xf32> to vector<32xf32>
    %13 = vector.shape_cast %12 : vector<32xf32> to vector<1x32xf32>
    %cst_9 = arith.constant 1.562500e-02 : f32
    %14 = vector.broadcast %cst_9 : f32 to vector<1x32xf32>
    %15 = arith.mulf %13, %14 : vector<1x32xf32>
    %16 = arith.mulf %10, %10 : vector<1x32xf32>
    %17 = arith.subf %15, %16 : vector<1x32xf32>
    %cst_10 = arith.constant 0.000000e+00 : f32
    %18 = vector.broadcast %cst_10 : f32 to vector<1x32xf32>
    %19 = arith.maximumf %17, %18 : vector<1x32xf32>
    %20 = vector.broadcast %10 : vector<1x32xf32> to vector<64x32xf32>
    %21 = arith.subf %6, %20 : vector<64x32xf32>
    %cst_11 = arith.constant 1.000000e-03 : f32
    %22 = vector.broadcast %cst_11 : f32 to vector<1x32xf32>
    %23 = arith.addf %19, %22 : vector<1x32xf32>
    %24 = math.rsqrt %23 : vector<1x32xf32>
    %25 = vector.broadcast %24 : vector<1x32xf32> to vector<64x32xf32>
    %26 = arith.mulf %21, %25 : vector<64x32xf32>
    %c0_12 = arith.constant 0 : index
    %c0_13 = arith.constant 0 : index
    %c0_14 = arith.constant 0 : index
    %27 = vector.load %arg5[%c0_12, %c0_13, %c0_14] : memref<1x24x128xf32, #tpu.memory_space<vmem>>, vector<1x1x32xf32>
    %28 = vector.shape_cast %27 : vector<1x1x32xf32> to vector<1x32xf32>
    %29 = vector.broadcast %28 : vector<1x32xf32> to vector<64x32xf32>
    %30 = arith.mulf %26, %29 : vector<64x32xf32>
    %c0_15 = arith.constant 0 : index
    %c1 = arith.constant 1 : index
    %c0_16 = arith.constant 0 : index
    %31 = vector.load %arg5[%c0_15, %c1, %c0_16] : memref<1x24x128xf32, #tpu.memory_space<vmem>>, vector<1x1x32xf32>
    %32 = vector.shape_cast %31 : vector<1x1x32xf32> to vector<1x32xf32>
    %33 = vector.broadcast %32 : vector<1x32xf32> to vector<64x32xf32>
    %34 = arith.addf %30, %33 : vector<64x32xf32>
    %cst_17 = arith.constant 0.000000e+00 : f32
    %35 = vector.broadcast %cst_17 : f32 to vector<64x32xf32>
    %36 = arith.maximumf %34, %35 : vector<64x32xf32>
    %c0_18 = arith.constant 0 : index
    %c0_19 = arith.constant 0 : index
    %37 = vector.load %arg4[%c0_18, %c0_19] : memref<200x128xf32, #tpu.memory_space<vmem>>, vector<32x128xf32>
    %cst_20 = arith.constant dense<0.000000e+00> : vector<64x128xf32>
    %38 = tpu.matmul %36, %37, %cst_20 {dimension_numbers = #tpu.dot_dimension_numbers<[1], [0], [0], [1], [0, 0, 1, 1], [], []>} : vector<64x32xf32>, vector<32x128xf32>, vector<64x128xf32> -> vector<64x128xf32>
    %c0_21 = arith.constant 0 : index
    %c2 = arith.constant 2 : index
    %c0_22 = arith.constant 0 : index
    %39 = vector.load %arg5[%c0_21, %c2, %c0_22] : memref<1x24x128xf32, #tpu.memory_space<vmem>>, vector<1x1x128xf32>
    %40 = vector.shape_cast %39 : vector<1x1x128xf32> to vector<1x128xf32>
    %41 = vector.broadcast %40 : vector<1x128xf32> to vector<64x128xf32>
    %42 = arith.addf %38, %41 : vector<64x128xf32>
    %cst_23 = arith.constant dense<0.000000e+00> : vector<128xf32>
    %43 = vector.multi_reduction <add>, %42, %cst_23 [0] : vector<64x128xf32> to vector<128xf32>
    %44 = vector.shape_cast %43 : vector<128xf32> to vector<1x128xf32>
    %cst_24 = arith.constant 1.562500e-02 : f32
    %45 = vector.broadcast %cst_24 : f32 to vector<1x128xf32>
    %46 = arith.mulf %44, %45 : vector<1x128xf32>
    %47 = arith.mulf %42, %42 : vector<64x128xf32>
    %cst_25 = arith.constant dense<0.000000e+00> : vector<128xf32>
    %48 = vector.multi_reduction <add>, %47, %cst_25 [0] : vector<64x128xf32> to vector<128xf32>
    %49 = vector.shape_cast %48 : vector<128xf32> to vector<1x128xf32>
    %cst_26 = arith.constant 1.562500e-02 : f32
    %50 = vector.broadcast %cst_26 : f32 to vector<1x128xf32>
    %51 = arith.mulf %49, %50 : vector<1x128xf32>
    %52 = arith.mulf %46, %46 : vector<1x128xf32>
    %53 = arith.subf %51, %52 : vector<1x128xf32>
    %cst_27 = arith.constant 0.000000e+00 : f32
    %54 = vector.broadcast %cst_27 : f32 to vector<1x128xf32>
    %55 = arith.maximumf %53, %54 : vector<1x128xf32>
    %56 = vector.broadcast %46 : vector<1x128xf32> to vector<64x128xf32>
    %57 = arith.subf %42, %56 : vector<64x128xf32>
    %cst_28 = arith.constant 9.99999974E-6 : f32
    %58 = vector.broadcast %cst_28 : f32 to vector<1x128xf32>
    %59 = arith.addf %55, %58 : vector<1x128xf32>
    %60 = math.rsqrt %59 : vector<1x128xf32>
    %61 = vector.broadcast %60 : vector<1x128xf32> to vector<64x128xf32>
    %62 = arith.mulf %57, %61 : vector<64x128xf32>
    %c0_29 = arith.constant 0 : index
    %c3 = arith.constant 3 : index
    %c0_30 = arith.constant 0 : index
    %63 = vector.load %arg5[%c0_29, %c3, %c0_30] : memref<1x24x128xf32, #tpu.memory_space<vmem>>, vector<1x1x128xf32>
    %64 = vector.shape_cast %63 : vector<1x1x128xf32> to vector<1x128xf32>
    %65 = vector.broadcast %64 : vector<1x128xf32> to vector<64x128xf32>
    %66 = arith.mulf %62, %65 : vector<64x128xf32>
    %c0_31 = arith.constant 0 : index
    %c4 = arith.constant 4 : index
    %c0_32 = arith.constant 0 : index
    %67 = vector.load %arg5[%c0_31, %c4, %c0_32] : memref<1x24x128xf32, #tpu.memory_space<vmem>>, vector<1x1x128xf32>
    %68 = vector.shape_cast %67 : vector<1x1x128xf32> to vector<1x128xf32>
    %69 = vector.broadcast %68 : vector<1x128xf32> to vector<64x128xf32>
    %70 = arith.addf %66, %69 : vector<64x128xf32>
    %cst_33 = arith.constant 0.000000e+00 : f32
    %71 = vector.broadcast %cst_33 : f32 to vector<64x128xf32>
    %72 = arith.maximumf %70, %71 : vector<64x128xf32>
    %73 = vector.extract_strided_slice %72 {offsets = [0, 0], sizes = [64, 32], strides = [1, 1]} : vector<64x128xf32> to vector<64x32xf32>
    %74 = vector.extract_strided_slice %72 {offsets = [0, 32], sizes = [64, 32], strides = [1, 1]} : vector<64x128xf32> to vector<64x32xf32>
    %75 = vector.extract_strided_slice %42 {offsets = [0, 64], sizes = [64, 32], strides = [1, 1]} : vector<64x128xf32> to vector<64x32xf32>
    %c192 = arith.constant 192 : index
    %c0_34 = arith.constant 0 : index
    %76 = vector.load %arg4[%c192, %c0_34] : memref<200x128xf32, #tpu.memory_space<vmem>>, vector<3x128xf32>
    %cst_35 = arith.constant dense<0.000000e+00> : vector<64x128xf32>
    %77 = tpu.matmul %1, %76, %cst_35 {dimension_numbers = #tpu.dot_dimension_numbers<[1], [0], [0], [1], [0, 0, 1, 1], [], []>} : vector<64x3xf32>, vector<3x128xf32>, vector<64x128xf32> -> vector<64x128xf32>
    %78 = vector.extract_strided_slice %77 {offsets = [0, 0], sizes = [64, 32], strides = [1, 1]} : vector<64x128xf32> to vector<64x32xf32>
    %c0_36 = arith.constant 0 : index
    %c0_37 = arith.constant 0 : index
    %c0_38 = arith.constant 0 : index
    %79 = vector.load %arg3[%c0_36, %c0_37, %c0_38] : memref<1x512x1xi32, #tpu.memory_space<vmem>>, vector<1x512x1xi32>
    %80 = vector.shape_cast %79 : vector<1x512x1xi32> to vector<512x1xi32>
    %81 = tpu.iota {dimensions = array<i32: 1>} : vector<512x64xi32>
    %82 = vector.broadcast %80 : vector<512x1xi32> to vector<512x64xi32>
    %83 = arith.cmpi eq, %82, %81 : vector<512x64xi32>
    %84 = arith.extui %83 : vector<512x64xi1> to vector<512x64xi32>
    %85 = arith.sitofp %84 : vector<512x64xi32> to vector<512x64xf32>
    %cst_39 = arith.constant 1.000000e+00 : f32
    %86 = vector.broadcast %cst_39 : f32 to vector<64x1xf32>
    %87 = tpu.concatenate %74, %75, %78, %86 in 1 : vector<64x32xf32>, vector<64x32xf32>, vector<64x32xf32>, vector<64x1xf32> -> vector<64x97xf32>
    %cst_40 = arith.constant dense<0.000000e+00> : vector<512x97xf32>
    %88 = tpu.matmul %85, %87, %cst_40 {dimension_numbers = #tpu.dot_dimension_numbers<[1], [0], [0], [1], [0, 0, 1, 1], [], []>} : vector<512x64xf32>, vector<64x97xf32>, vector<512x97xf32> -> vector<512x97xf32>
    %89 = vector.shape_cast %88 : vector<512x97xf32> to vector<8x64x97xf32>
    %90 = vector.extract_strided_slice %89 {offsets = [0, 0, 0], sizes = [8, 64, 32], strides = [1, 1, 1]} : vector<8x64x97xf32> to vector<8x64x32xf32>
    %91 = vector.extract_strided_slice %89 {offsets = [0, 0, 32], sizes = [8, 64, 32], strides = [1, 1, 1]} : vector<8x64x97xf32> to vector<8x64x32xf32>
    %92 = vector.extract_strided_slice %89 {offsets = [0, 0, 64], sizes = [8, 64, 32], strides = [1, 1, 1]} : vector<8x64x97xf32> to vector<8x64x32xf32>
    %93 = vector.extract_strided_slice %89 {offsets = [0, 0, 96], sizes = [8, 64, 1], strides = [1, 1, 1]} : vector<8x64x97xf32> to vector<8x64x1xf32>
    %94 = vector.shape_cast %78 : vector<64x32xf32> to vector<1x64x32xf32>
    %95 = vector.broadcast %94 : vector<1x64x32xf32> to vector<8x64x32xf32>
    %96 = arith.subf %92, %95 : vector<8x64x32xf32>
    %97 = vector.broadcast %93 : vector<8x64x1xf32> to vector<8x64x32xf32>
    %98 = arith.mulf %97, %96 : vector<8x64x32xf32>
    %99 = vector.shape_cast %98 : vector<8x64x32xf32> to vector<512x32xf32>
    %c0_41 = arith.constant 0 : index
    %c5 = arith.constant 5 : index
    %c0_42 = arith.constant 0 : index
    %100 = vector.load %arg5[%c0_41, %c5, %c0_42] : memref<1x24x128xf32, #tpu.memory_space<vmem>>, vector<1x1x32xf32>
    %101 = vector.shape_cast %100 : vector<1x1x32xf32> to vector<1x32xf32>
    %102 = vector.broadcast %101 : vector<1x32xf32> to vector<512x32xf32>
    %103 = arith.addf %99, %102 : vector<512x32xf32>
    %cst_43 = arith.constant dense<0.000000e+00> : vector<32xf32>
    %104 = vector.multi_reduction <add>, %103, %cst_43 [0] : vector<512x32xf32> to vector<32xf32>
    %105 = vector.shape_cast %104 : vector<32xf32> to vector<1x32xf32>
    %cst_44 = arith.constant 0.001953125 : f32
    %106 = vector.broadcast %cst_44 : f32 to vector<1x32xf32>
    %107 = arith.mulf %105, %106 : vector<1x32xf32>
    %108 = arith.mulf %103, %103 : vector<512x32xf32>
    %cst_45 = arith.constant dense<0.000000e+00> : vector<32xf32>
    %109 = vector.multi_reduction <add>, %108, %cst_45 [0] : vector<512x32xf32> to vector<32xf32>
    %110 = vector.shape_cast %109 : vector<32xf32> to vector<1x32xf32>
    %cst_46 = arith.constant 0.001953125 : f32
    %111 = vector.broadcast %cst_46 : f32 to vector<1x32xf32>
    %112 = arith.mulf %110, %111 : vector<1x32xf32>
    %113 = arith.mulf %107, %107 : vector<1x32xf32>
    %114 = arith.subf %112, %113 : vector<1x32xf32>
    %cst_47 = arith.constant 0.000000e+00 : f32
    %115 = vector.broadcast %cst_47 : f32 to vector<1x32xf32>
    %116 = arith.maximumf %114, %115 : vector<1x32xf32>
    %117 = vector.broadcast %107 : vector<1x32xf32> to vector<512x32xf32>
    %118 = arith.subf %103, %117 : vector<512x32xf32>
    %cst_48 = arith.constant 9.99999974E-6 : f32
    %119 = vector.broadcast %cst_48 : f32 to vector<1x32xf32>
    %120 = arith.addf %116, %119 : vector<1x32xf32>
    %121 = math.rsqrt %120 : vector<1x32xf32>
    %122 = vector.broadcast %121 : vector<1x32xf32> to vector<512x32xf32>
    %123 = arith.mulf %118, %122 : vector<512x32xf32>
    %c0_49 = arith.constant 0 : index
    %c6 = arith.constant 6 : index
    %c0_50 = arith.constant 0 : index
    %124 = vector.load %arg5[%c0_49, %c6, %c0_50] : memref<1x24x128xf32, #tpu.memory_space<vmem>>, vector<1x1x32xf32>
    %125 = vector.shape_cast %124 : vector<1x1x32xf32> to vector<1x32xf32>
    %126 = vector.broadcast %125 : vector<1x32xf32> to vector<512x32xf32>
    %127 = arith.mulf %123, %126 : vector<512x32xf32>
    %c0_51 = arith.constant 0 : index
    %c7 = arith.constant 7 : index
    %c0_52 = arith.constant 0 : index
    %128 = vector.load %arg5[%c0_51, %c7, %c0_52] : memref<1x24x128xf32, #tpu.memory_space<vmem>>, vector<1x1x32xf32>
    %129 = vector.shape_cast %128 : vector<1x1x32xf32> to vector<1x32xf32>
    %130 = vector.broadcast %129 : vector<1x32xf32> to vector<512x32xf32>
    %131 = arith.addf %127, %130 : vector<512x32xf32>
    %cst_53 = arith.constant 0.000000e+00 : f32
    %132 = vector.broadcast %cst_53 : f32 to vector<512x32xf32>
    %133 = arith.maximumf %131, %132 : vector<512x32xf32>
    %c96 = arith.constant 96 : index
    %c0_54 = arith.constant 0 : index
    %134 = vector.load %arg4[%c96, %c0_54] : memref<200x128xf32, #tpu.memory_space<vmem>>, vector<32x128xf32>
    %cst_55 = arith.constant dense<0.000000e+00> : vector<512x128xf32>
    %135 = tpu.matmul %133, %134, %cst_55 {dimension_numbers = #tpu.dot_dimension_numbers<[1], [0], [0], [1], [0, 0, 1, 1], [], []>} : vector<512x32xf32>, vector<32x128xf32>, vector<512x128xf32> -> vector<512x128xf32>
    %136 = vector.extract_strided_slice %135 {offsets = [0, 0], sizes = [512, 32], strides = [1, 1]} : vector<512x128xf32> to vector<512x32xf32>
    %c0_56 = arith.constant 0 : index
    %c8 = arith.constant 8 : index
    %c0_57 = arith.constant 0 : index
    %137 = vector.load %arg5[%c0_56, %c8, %c0_57] : memref<1x24x128xf32, #tpu.memory_space<vmem>>, vector<1x1x32xf32>
    %138 = vector.shape_cast %137 : vector<1x1x32xf32> to vector<1x32xf32>
    %139 = vector.broadcast %138 : vector<1x32xf32> to vector<512x32xf32>
    %140 = arith.addf %136, %139 : vector<512x32xf32>
    %141 = vector.shape_cast %140 : vector<512x32xf32> to vector<8x64x32xf32>
    %142 = vector.shape_cast %73 : vector<64x32xf32> to vector<1x64x32xf32>
    %143 = vector.broadcast %142 : vector<1x64x32xf32> to vector<8x64x32xf32>
    %144 = arith.subf %90, %143 : vector<8x64x32xf32>
    %145 = arith.addf %144, %141 : vector<8x64x32xf32>
    %146 = vector.shape_cast %145 : vector<8x64x32xf32> to vector<512x32xf32>
    %147 = arith.addf %91, %141 : vector<8x64x32xf32>
    %c128 = arith.constant 128 : index
    %c0_58 = arith.constant 0 : index
    %148 = vector.load %arg4[%c128, %c0_58] : memref<200x128xf32, #tpu.memory_space<vmem>>, vector<32x128xf32>
    %cst_59 = arith.constant dense<0.000000e+00> : vector<512x128xf32>
    %149 = tpu.matmul %146, %148, %cst_59 {dimension_numbers = #tpu.dot_dimension_numbers<[1], [0], [0], [1], [0, 0, 1, 1], [], []>} : vector<512x32xf32>, vector<32x128xf32>, vector<512x128xf32> -> vector<512x128xf32>
    %150 = vector.extract_strided_slice %149 {offsets = [0, 0], sizes = [512, 32], strides = [1, 1]} : vector<512x128xf32> to vector<512x32xf32>
    %c0_60 = arith.constant 0 : index
    %c9 = arith.constant 9 : index
    %c0_61 = arith.constant 0 : index
    %151 = vector.load %arg5[%c0_60, %c9, %c0_61] : memref<1x24x128xf32, #tpu.memory_space<vmem>>, vector<1x1x32xf32>
    %152 = vector.shape_cast %151 : vector<1x1x32xf32> to vector<1x32xf32>
    %153 = vector.broadcast %152 : vector<1x32xf32> to vector<512x32xf32>
    %154 = arith.addf %150, %153 : vector<512x32xf32>
    %cst_62 = arith.constant dense<0.000000e+00> : vector<32xf32>
    %155 = vector.multi_reduction <add>, %154, %cst_62 [0] : vector<512x32xf32> to vector<32xf32>
    %156 = vector.shape_cast %155 : vector<32xf32> to vector<1x32xf32>
    %cst_63 = arith.constant 0.001953125 : f32
    %157 = vector.broadcast %cst_63 : f32 to vector<1x32xf32>
    %158 = arith.mulf %156, %157 : vector<1x32xf32>
    %159 = arith.mulf %154, %154 : vector<512x32xf32>
    %cst_64 = arith.constant dense<0.000000e+00> : vector<32xf32>
    %160 = vector.multi_reduction <add>, %159, %cst_64 [0] : vector<512x32xf32> to vector<32xf32>
    %161 = vector.shape_cast %160 : vector<32xf32> to vector<1x32xf32>
    %cst_65 = arith.constant 0.001953125 : f32
    %162 = vector.broadcast %cst_65 : f32 to vector<1x32xf32>
    %163 = arith.mulf %161, %162 : vector<1x32xf32>
    %164 = arith.mulf %158, %158 : vector<1x32xf32>
    %165 = arith.subf %163, %164 : vector<1x32xf32>
    %cst_66 = arith.constant 0.000000e+00 : f32
    %166 = vector.broadcast %cst_66 : f32 to vector<1x32xf32>
    %167 = arith.maximumf %165, %166 : vector<1x32xf32>
    %168 = vector.broadcast %158 : vector<1x32xf32> to vector<512x32xf32>
    %169 = arith.subf %154, %168 : vector<512x32xf32>
    %cst_67 = arith.constant 9.99999974E-6 : f32
    %170 = vector.broadcast %cst_67 : f32 to vector<1x32xf32>
    %171 = arith.addf %167, %170 : vector<1x32xf32>
    %172 = math.rsqrt %171 : vector<1x32xf32>
    %173 = vector.broadcast %172 : vector<1x32xf32> to vector<512x32xf32>
    %174 = arith.mulf %169, %173 : vector<512x32xf32>
    %c0_68 = arith.constant 0 : index
    %c10 = arith.constant 10 : index
    %c0_69 = arith.constant 0 : index
    %175 = vector.load %arg5[%c0_68, %c10, %c0_69] : memref<1x24x128xf32, #tpu.memory_space<vmem>>, vector<1x1x32xf32>
    %176 = vector.shape_cast %175 : vector<1x1x32xf32> to vector<1x32xf32>
    %177 = vector.broadcast %176 : vector<1x32xf32> to vector<512x32xf32>
    %178 = arith.mulf %174, %177 : vector<512x32xf32>
    %c0_70 = arith.constant 0 : index
    %c11 = arith.constant 11 : index
    %c0_71 = arith.constant 0 : index
    %179 = vector.load %arg5[%c0_70, %c11, %c0_71] : memref<1x24x128xf32, #tpu.memory_space<vmem>>, vector<1x1x32xf32>
    %180 = vector.shape_cast %179 : vector<1x1x32xf32> to vector<1x32xf32>
    %181 = vector.broadcast %180 : vector<1x32xf32> to vector<512x32xf32>
    %182 = arith.addf %178, %181 : vector<512x32xf32>
    %cst_72 = arith.constant 0.000000e+00 : f32
    %183 = vector.broadcast %cst_72 : f32 to vector<512x32xf32>
    %184 = arith.maximumf %182, %183 : vector<512x32xf32>
    %c160 = arith.constant 160 : index
    %c0_73 = arith.constant 0 : index
    %185 = vector.load %arg4[%c160, %c0_73] : memref<200x128xf32, #tpu.memory_space<vmem>>, vector<32x128xf32>
    %cst_74 = arith.constant dense<0.000000e+00> : vector<512x128xf32>
    %186 = tpu.matmul %184, %185, %cst_74 {dimension_numbers = #tpu.dot_dimension_numbers<[1], [0], [0], [1], [0, 0, 1, 1], [], []>} : vector<512x32xf32>, vector<32x128xf32>, vector<512x128xf32> -> vector<512x128xf32>
    %187 = vector.extract_strided_slice %186 {offsets = [0, 0], sizes = [512, 32], strides = [1, 1]} : vector<512x128xf32> to vector<512x32xf32>
    %c0_75 = arith.constant 0 : index
    %c12 = arith.constant 12 : index
    %c0_76 = arith.constant 0 : index
    %188 = vector.load %arg5[%c0_75, %c12, %c0_76] : memref<1x24x128xf32, #tpu.memory_space<vmem>>, vector<1x1x32xf32>
    %189 = vector.shape_cast %188 : vector<1x1x32xf32> to vector<1x32xf32>
    %190 = vector.broadcast %189 : vector<1x32xf32> to vector<512x32xf32>
    %191 = arith.addf %187, %190 : vector<512x32xf32>
    %192 = vector.shape_cast %191 : vector<512x32xf32> to vector<8x64x32xf32>
    %cst_77 = arith.constant dense<0xFF800000> : vector<64x32xf32>
    %193 = vector.multi_reduction <maximumf>, %192, %cst_77 [0] : vector<8x64x32xf32> to vector<64x32xf32>
    %194 = vector.shape_cast %193 : vector<64x32xf32> to vector<1x64x32xf32>
    %195 = vector.broadcast %194 : vector<1x64x32xf32> to vector<8x64x32xf32>
    %196 = arith.subf %192, %195 : vector<8x64x32xf32>
    %197 = math.exp %196 : vector<8x64x32xf32>
    %cst_78 = arith.constant dense<0.000000e+00> : vector<64x32xf32>
    %198 = vector.multi_reduction <add>, %197, %cst_78 [0] : vector<8x64x32xf32> to vector<64x32xf32>
    %199 = arith.mulf %147, %197 : vector<8x64x32xf32>
    %200 = vector.broadcast %93 : vector<8x64x1xf32> to vector<8x64x32xf32>
    %201 = arith.mulf %199, %200 : vector<8x64x32xf32>
    %cst_79 = arith.constant dense<0.000000e+00> : vector<64x32xf32>
    %202 = vector.multi_reduction <add>, %201, %cst_79 [0] : vector<8x64x32xf32> to vector<64x32xf32>
    %203 = tpu.reciprocal %198 {approx = true} : vector<64x32xf32> -> vector<64x32xf32>
    %204 = arith.mulf %202, %203 : vector<64x32xf32>
    %cst_80 = arith.constant dense<0.000000e+00> : vector<32xf32>
    %205 = vector.multi_reduction <add>, %204, %cst_80 [0] : vector<64x32xf32> to vector<32xf32>
    %206 = vector.shape_cast %205 : vector<32xf32> to vector<1x32xf32>
    %cst_81 = arith.constant 1.562500e-02 : f32
    %207 = vector.broadcast %cst_81 : f32 to vector<1x32xf32>
    %208 = arith.mulf %206, %207 : vector<1x32xf32>
    %209 = arith.mulf %204, %204 : vector<64x32xf32>
    %cst_82 = arith.constant dense<0.000000e+00> : vector<32xf32>
    %210 = vector.multi_reduction <add>, %209, %cst_82 [0] : vector<64x32xf32> to vector<32xf32>
    %211 = vector.shape_cast %210 : vector<32xf32> to vector<1x32xf32>
    %cst_83 = arith.constant 1.562500e-02 : f32
    %212 = vector.broadcast %cst_83 : f32 to vector<1x32xf32>
    %213 = arith.mulf %211, %212 : vector<1x32xf32>
    %214 = arith.mulf %208, %208 : vector<1x32xf32>
    %215 = arith.subf %213, %214 : vector<1x32xf32>
    %cst_84 = arith.constant 0.000000e+00 : f32
    %216 = vector.broadcast %cst_84 : f32 to vector<1x32xf32>
    %217 = arith.maximumf %215, %216 : vector<1x32xf32>
    %218 = vector.broadcast %208 : vector<1x32xf32> to vector<64x32xf32>
    %219 = arith.subf %204, %218 : vector<64x32xf32>
    %cst_85 = arith.constant 1.000000e-03 : f32
    %220 = vector.broadcast %cst_85 : f32 to vector<1x32xf32>
    %221 = arith.addf %217, %220 : vector<1x32xf32>
    %222 = math.rsqrt %221 : vector<1x32xf32>
    %223 = vector.broadcast %222 : vector<1x32xf32> to vector<64x32xf32>
    %224 = arith.mulf %219, %223 : vector<64x32xf32>
    %c0_86 = arith.constant 0 : index
    %c13 = arith.constant 13 : index
    %c0_87 = arith.constant 0 : index
    %225 = vector.load %arg5[%c0_86, %c13, %c0_87] : memref<1x24x128xf32, #tpu.memory_space<vmem>>, vector<1x1x32xf32>
    %226 = vector.shape_cast %225 : vector<1x1x32xf32> to vector<1x32xf32>
    %227 = vector.broadcast %226 : vector<1x32xf32> to vector<64x32xf32>
    %228 = arith.mulf %224, %227 : vector<64x32xf32>
    %c0_88 = arith.constant 0 : index
    %c14 = arith.constant 14 : index
    %c0_89 = arith.constant 0 : index
    %229 = vector.load %arg5[%c0_88, %c14, %c0_89] : memref<1x24x128xf32, #tpu.memory_space<vmem>>, vector<1x1x32xf32>
    %230 = vector.shape_cast %229 : vector<1x1x32xf32> to vector<1x32xf32>
    %231 = vector.broadcast %230 : vector<1x32xf32> to vector<64x32xf32>
    %232 = arith.addf %228, %231 : vector<64x32xf32>
    %cst_90 = arith.constant 0.000000e+00 : f32
    %233 = vector.broadcast %cst_90 : f32 to vector<64x32xf32>
    %234 = arith.maximumf %232, %233 : vector<64x32xf32>
    %c64 = arith.constant 64 : index
    %c0_91 = arith.constant 0 : index
    %235 = vector.load %arg4[%c64, %c0_91] : memref<200x128xf32, #tpu.memory_space<vmem>>, vector<32x128xf32>
    %cst_92 = arith.constant dense<0.000000e+00> : vector<64x128xf32>
    %236 = tpu.matmul %234, %235, %cst_92 {dimension_numbers = #tpu.dot_dimension_numbers<[1], [0], [0], [1], [0, 0, 1, 1], [], []>} : vector<64x32xf32>, vector<32x128xf32>, vector<64x128xf32> -> vector<64x128xf32>
    %237 = vector.extract_strided_slice %236 {offsets = [0, 0], sizes = [64, 32], strides = [1, 1]} : vector<64x128xf32> to vector<64x32xf32>
    %cst_93 = arith.constant dense<0.000000e+00> : vector<32xf32>
    %238 = vector.multi_reduction <add>, %237, %cst_93 [0] : vector<64x32xf32> to vector<32xf32>
    %239 = vector.shape_cast %238 : vector<32xf32> to vector<1x32xf32>
    %cst_94 = arith.constant 1.562500e-02 : f32
    %240 = vector.broadcast %cst_94 : f32 to vector<1x32xf32>
    %241 = arith.mulf %239, %240 : vector<1x32xf32>
    %242 = arith.mulf %237, %237 : vector<64x32xf32>
    %cst_95 = arith.constant dense<0.000000e+00> : vector<32xf32>
    %243 = vector.multi_reduction <add>, %242, %cst_95 [0] : vector<64x32xf32> to vector<32xf32>
    %244 = vector.shape_cast %243 : vector<32xf32> to vector<1x32xf32>
    %cst_96 = arith.constant 1.562500e-02 : f32
    %245 = vector.broadcast %cst_96 : f32 to vector<1x32xf32>
    %246 = arith.mulf %244, %245 : vector<1x32xf32>
    %247 = arith.mulf %241, %241 : vector<1x32xf32>
    %248 = arith.subf %246, %247 : vector<1x32xf32>
    %cst_97 = arith.constant 0.000000e+00 : f32
    %249 = vector.broadcast %cst_97 : f32 to vector<1x32xf32>
    %250 = arith.maximumf %248, %249 : vector<1x32xf32>
    %251 = vector.broadcast %241 : vector<1x32xf32> to vector<64x32xf32>
    %252 = arith.subf %237, %251 : vector<64x32xf32>
    %cst_98 = arith.constant 1.000000e-03 : f32
    %253 = vector.broadcast %cst_98 : f32 to vector<1x32xf32>
    %254 = arith.addf %250, %253 : vector<1x32xf32>
    %255 = math.rsqrt %254 : vector<1x32xf32>
    %256 = vector.broadcast %255 : vector<1x32xf32> to vector<64x32xf32>
    %257 = arith.mulf %252, %256 : vector<64x32xf32>
    %c0_99 = arith.constant 0 : index
    %c15 = arith.constant 15 : index
    %c0_100 = arith.constant 0 : index
    %258 = vector.load %arg5[%c0_99, %c15, %c0_100] : memref<1x24x128xf32, #tpu.memory_space<vmem>>, vector<1x1x32xf32>
    %259 = vector.shape_cast %258 : vector<1x1x32xf32> to vector<1x32xf32>
    %260 = vector.broadcast %259 : vector<1x32xf32> to vector<64x32xf32>
    %261 = arith.mulf %257, %260 : vector<64x32xf32>
    %c0_101 = arith.constant 0 : index
    %c16 = arith.constant 16 : index
    %c0_102 = arith.constant 0 : index
    %262 = vector.load %arg5[%c0_101, %c16, %c0_102] : memref<1x24x128xf32, #tpu.memory_space<vmem>>, vector<1x1x32xf32>
    %263 = vector.shape_cast %262 : vector<1x1x32xf32> to vector<1x32xf32>
    %264 = vector.broadcast %263 : vector<1x32xf32> to vector<64x32xf32>
    %265 = arith.addf %261, %264 : vector<64x32xf32>
    %266 = arith.addf %3, %265 : vector<64x32xf32>
    %cst_103 = arith.constant 0.000000e+00 : f32
    %267 = vector.broadcast %cst_103 : f32 to vector<64x32xf32>
    %268 = arith.maximumf %266, %267 : vector<64x32xf32>
    %c0_104 = arith.constant 0 : index
    %c0_105 = arith.constant 0 : index
    %c0_106 = arith.constant 0 : index
    %269 = vector.load %arg6[%c0_104, %c0_105, %c0_106] : memref<1x64x32xf32, #tpu.memory_space<vmem>>, vector<1x64x32xf32>
    %270 = vector.shape_cast %269 : vector<1x64x32xf32> to vector<64x32xf32>
    %271 = vector.shape_cast %268 : vector<64x32xf32> to vector<1x64x32xf32>
    tpu.vector_store %arg6[%c0_104, %c0_105, %c0_106], %271 {strides = array<i32>} : memref<1x64x32xf32, #tpu.memory_space<vmem>>, vector<1x64x32xf32>,
    return
  }
  func.func @transform_0(%arg0: i32) -> (i32, i32, i32) {
    %c0_i32 = arith.constant 0 : i32
    %c0_i32_0 = arith.constant 0 : i32
    %c0_i32_1 = arith.constant 0 : i32
    return %arg0, %c0_i32, %c0_i32_0 : i32, i32, i32
  }
  func.func @transform_1(%arg0: i32) -> (i32, i32, i32) {
    %c0_i32 = arith.constant 0 : i32
    %c0_i32_0 = arith.constant 0 : i32
    %c0_i32_1 = arith.constant 0 : i32
    return %arg0, %c0_i32, %c0_i32_0 : i32, i32, i32
  }
  func.func @transform_2(%arg0: i32) -> (i32, i32, i32) {
    %c0_i32 = arith.constant 0 : i32
    %c0_i32_0 = arith.constant 0 : i32
    %c0_i32_1 = arith.constant 0 : i32
    return %arg0, %c0_i32, %c0_i32_0 : i32, i32, i32
  }
  func.func @transform_3(%arg0: i32) -> (i32, i32) {
    %c0_i32 = arith.constant 0 : i32
    %c0_i32_0 = arith.constant 0 : i32
    %c0_i32_1 = arith.constant 0 : i32
    return %c0_i32, %c0_i32_0 : i32, i32
  }
  func.func @transform_4(%arg0: i32) -> (i32, i32, i32) {
    %c0_i32 = arith.constant 0 : i32
    %c0_i32_0 = arith.constant 0 : i32
    %c0_i32_1 = arith.constant 0 : i32
    return %arg0, %c0_i32, %c0_i32_0 : i32, i32, i32
  }
  func.func @transform_5(%arg0: i32) -> (i32, i32, i32) {
    %c0_i32 = arith.constant 0 : i32
    %c0_i32_0 = arith.constant 0 : i32
    %c0_i32_1 = arith.constant 0 : i32
    return %arg0, %c0_i32, %c0_i32_0 : i32, i32, i32
  }
}

</mosaic_0001>

<bundles_post_ra>
// kernel: tpu_custom_call.1
= control target key start
LH: loop header
LB: loop body
LE: loop exit
PB: predicated region body
PF: predicated region fallthrough
CT: control target
= control target key end

     0   :  { %s7620_s18 = smov 0   ;;  %s13358_s0 = inlined_call_operand.vmem [shape: f32[4,64,3], index: 0, kind: input, shape index: {}]   ;;  %s13359_s1 = inlined_call_operand.vmem [shape: f32[4,64,32], index: 1, kind: input, shape index: {}]   ;;  %s13360_s2 = inlined_call_operand.vmem [shape: s32[4,512,1], index: 2, kind: input, shape index: {}]   ;;  %s13361_s3 = inlined_call_operand.vmem [shape: f32[200,128], index: 3, kind: input, shape index: {}]   ;;  %s13362_s4 = inlined_call_operand.vmem [shape: f32[4,24,128], index: 4, kind: input, shape index: {}]   ;;  %s13363_s5 = inlined_call_operand.vmem [shape: f32[4,64,32], index: 5, kind: output, shape index: {}]  }
   0x1 LB: > { %s6951_s19 = sadd.s32 4294967295, %s7582_s18   ;;  %p6955_p0 = scmp.ge.s32.totalorder %s7582_s18, 1  ;;  %s7582_s18 = sphi %s7620_s18, %s15_s18  }
   0x2   : > { %p217_p1 = scmp.lt.s32.totalorder %s7582_s18, 5 }
   0x4   : > { %p218_p2 = pnand %p6955_p0, %p217_p1 }
   0x6   : > { %221 = sbr.rel (%p218_p2) target bundleno = 3709 (0xe7d), region = 40 }
   0xb   : > { %v304_v0 = vld [vmem:[%s13361_s3 + $0x38] sm:$0xff]  ;;  %v303_v1 = vld [vmem:[%s13361_s3 + $0x30] sm:$0xff]  ;;  %p260_p3 = scmp.lt.s32.totalorder %s6951_s19, 3  ;;  %v302_v2 = vld [vmem:[%s13361_s3 + $0x28] sm:$0xff]  ;;  %vm305_vm0 = vcmask 261120   ;;  %vm672_vm4 = vcmask 1042432  }
   0xc   : > { %342 = vmatpush.msra.mxu0 %v304_v0  ;;  %v301_v3 = vld [vmem:[%s13361_s3 + $0x20] sm:$0xff]  ;;  %vm647_vm5 = vcmask 23552   ;;  %s7584_s26 = smov 64   ;;  %s7586_s27 = smov 96   ;;  %vm1271_vm9 = vcmask 523264   ;;  %vm1280_vm10 = vcmask 785408  }
   0xd   : > { %s14308_s19 = smov (!%p260_p3, %s6951_s19), 3 }
   0xe   : > { %343 = vmatpush.msra.mxu0 %v303_v1  ;;  %s7643_s28 = sshll.u32 %s14308_s19, 6  ;;  %s7332_s7 = smul.u32 24, %s14308_s19 }
   0xf   : > { %s7649_s6 = scalar_lea.vmem %s13359_s1, %s7643_s28  ;;  %s7761_s25 = scalar_lea.vmem %s13358_s0, %s7643_s28 }
  0x10   : > { %344 = vmatpush.msra.mxu0 %v302_v2  ;;  %v293_v4 = vld [vmem:[%s7649_s6] sm:$0xff]  ;;  %s7656_s10 = scalar_lea.vmem %s13362_s4, %s7332_s7  ;;  %v294_v5 = vld [vmem:[%s7649_s6 + $0x8] sm:$0xff]  ;;  %v295_v6 = vld [vmem:[%s7649_s6 + $0x10] sm:$0xff]  ;;  %s7322_s29 = sshll.u32 %s14308_s19, 9 }
  0x11   : > { %v296_v7 = vld [vmem:[%s7649_s6 + $0x18] sm:$0xff]  ;;  %v297_v8 = vld [vmem:[%s7649_s6 + $0x20] sm:$0xff]  ;;  %v298_v9 = vld [vmem:[%s7649_s6 + $0x28] sm:$0xff]  ;;  %s7890_s8 = scalar_lea.vmem %s13360_s2, %s7322_s29  ;;  %s284_s24 = scalar_lea.vmem %s13363_s5, %s7643_s28 }
  0x12   : > { %345 = vmatpush.msra.mxu0 %v301_v3  ;;  %v299_v10 = vld [vmem:[%s7649_s6 + $0x30] sm:$0xff]  ;;  %v300_v11 = vld [vmem:[%s7649_s6 + $0x38] sm:$0xff] }
  0x13   : > { %6965 = vmatmul.msk.f32.vlgmr.msra.gmra.mxu0 %vm305_vm0, %v293_v4  ;;  %v484_v3 = vld [vmem:[%s13361_s3 + $0x18] sm:$0xff]  ;;  %v483_v4 = vld [vmem:[%s13361_s3 + $0x10] sm:$0xff] }
  0x14   : > { %523 = vmatpush.msra.mxu1 %v484_v3 }
  0x16   : > { %524 = vmatpush.msra.mxu1 %v483_v4 }
  0x1b   : > { %6966 = vmatmul.msk.f32.gmra.mxu0 %vm305_vm0, %v294_v5 }
  0x23   : > { %6967 = vmatmul.msk.f32.gmra.mxu0 %vm305_vm0, %v295_v6 }
  0x2b   : > { %6968 = vmatmul.msk.f32.gmra.mxu0 %vm305_vm0, %v296_v7  ;;  %v482_v7 = vld [vmem:[%s13361_s3 + $0x8] sm:$0xff] }
  0x2c   : > { %525 = vmatpush.msra.mxu1 %v482_v7 }
  0x33   : > { %6969 = vmatmul.msk.f32.gmra.mxu0 %vm305_vm0, %v297_v8 }
  0x3b   : > { %6970 = vmatmul.msk.f32.gmra.mxu0 %vm305_vm0, %v298_v9 }
  0x43   : > { %6971 = vmatmul.msk.f32.gmra.mxu0 %vm305_vm0, %v299_v10  ;;  %v481_v10 = vld [vmem:[%s13361_s3] sm:$0xff] }
  0x44   : > { %526 = vmatpush.msra.mxu1 %v481_v10  ;;  %v291_v10 = vld [vmem:[%s7761_s25 + $0x30] sm:$0xff] }
  0x4b   : > { %6972 = vmatmul.msk.f32.gmra.mxu0 %vm305_vm0, %v300_v11 }
  0x90   : > { %v7673_v12 = vpop.f32.mrf.mxu0 }
  0x91   : > { %v393_v19 = vmul.f32 %v7673_v12, %v7673_v12  ;;  %v371_v22 = vsel %vm305_vm0, %v7673_v12, 0.0 }
  0x93   : > { %v401_v27 = vsel %vm305_vm0, %v393_v19, 0.0 }
  0x98   : > { %v7675_v13 = vpop.f32.mrf.mxu0 }
  0x99   : > { %v394_v18 = vmul.f32 %v7675_v13, %v7675_v13  ;;  %v372_v20 = vsel %vm305_vm0, %v7675_v13, 0.0 }
  0x9a   : > { %v373_v26 = vadd.f32 %v372_v20, %v371_v22 }
  0x9b   : > { %v402_v23 = vsel %vm305_vm0, %v394_v18, 0.0 }
  0x9c   : > { %v403_v31 = vadd.f32 %v402_v23, %v401_v27 }
  0xa0   : > { %v7677_v14 = vpop.f32.mrf.mxu0 }
  0xa1   : > { %v395_v21 = vmul.f32 %v7677_v14, %v7677_v14  ;;  %v374_v24 = vsel %vm305_vm0, %v7677_v14, 0.0 }
  0xa2   : > { %v375_v32 = vadd.f32 %v374_v24, %v373_v26 }
  0xa3   : > { %v404_v28 = vsel %vm305_vm0, %v395_v21, 0.0 }
  0xa4   : > { %v405_v37 = vadd.f32 %v404_v28, %v403_v31 }
  0xa8   : > { %v7679_v15 = vpop.f32.mrf.mxu0 }
  0xa9   : > { %v396_v25 = vmul.f32 %v7679_v15, %v7679_v15  ;;  %v376_v29 = vsel %vm305_vm0, %v7679_v15, 0.0 }
  0xaa   : > { %v377_v38 = vadd.f32 %v376_v29, %v375_v32  ;;  %v7398_v29 = vld [vmem:[%s7656_s10] ss:$0 sm:$0xff]  ;;  %v7399_v32 = vld [vmem:[%s7656_s10 + $0x1] ss:$0 sm:$0xff] }
  0xab   : > { %v406_v34 = vsel %vm305_vm0, %v396_v25, 0.0 }
  0xac   : > { %v407_v42 = vadd.f32 %v406_v34, %v405_v37 }
  0xb0   : > { %v7681_v16 = vpop.f32.mrf.mxu0 }
  0xb1   : > { %v397_v30 = vmul.f32 %v7681_v16, %v7681_v16  ;;  %v378_v35 = vsel %vm305_vm0, %v7681_v16, 0.0 }
  0xb2   : > { %v379_v43 = vadd.f32 %v378_v35, %v377_v38 }
  0xb3   : > { %v408_v39 = vsel %vm305_vm0, %v397_v30, 0.0 }
  0xb4   : > { %v409_v46 = vadd.f32 %v408_v39, %v407_v42 }
  0xb8   : > { %v7683_v17 = vpop.f32.mrf.mxu0 }
  0xb9   : > { %v398_v36 = vmul.f32 %v7683_v17, %v7683_v17  ;;  %v380_v40 = vsel %vm305_vm0, %v7683_v17, 0.0 }
  0xba   : > { %v381_v47 = vadd.f32 %v380_v40, %v379_v43 }
  0xbb   : > { %v410_v44 = vsel %vm305_vm0, %v398_v36, 0.0 }
  0xbc   : > { %v411_v49 = vadd.f32 %v410_v44, %v409_v46  ;;  %v285_v44 = vld [vmem:[%s7761_s25] sm:$0xff] }
  0xc0   : > { %v7706_v33 = vpop.f32.mrf.mxu0 }
  0xc1   : > { %v399_v41 = vmul.f32 %v7706_v33, %v7706_v33  ;;  %v382_v45 = vsel %vm305_vm0, %v7706_v33, 0.0 }
  0xc2   : > { %v383_v50 = vadd.f32 %v382_v45, %v381_v47 }
  0xc3   : > { %v412_v48 = vsel %vm305_vm0, %v399_v41, 0.0 }
  0xc4   : > { %v413_v54 = vadd.f32 %v412_v48, %v411_v49 }
  0xc8   : > { %v7722_v51 = vpop.f32.mrf.mxu0 }
  0xc9   : > { %v384_v52 = vsel %vm305_vm0, %v7722_v51, 0.0  ;;  %v400_v53 = vmul.f32 %v7722_v51, %v7722_v51 }
  0xca   : > { %v385_v55 = vadd.f32 %v384_v52, %v383_v50  ;;  %v286_v50 = vld [vmem:[%s7761_s25 + $0x8] sm:$0xff] }
  0xcb   : > { %v414_v56 = vsel %vm305_vm0, %v400_v53, 0.0 }
  0xcc   : > { %v386_v57 = vrot.slane %v385_v55, 4  ;;  %v415_v58 = vadd.f32 %v414_v56, %v413_v54  ;;  %v287_v56 = vld [vmem:[%s7761_s25 + $0x10] sm:$0xff] }
  0xce   : > { %v387_v59 = vadd.f32 %v386_v57, %v385_v55  ;;  %v416_v60 = vrot.slane %v415_v58, 4 }
  0xd0   : > { %v388_v61 = vrot.slane %v387_v59, 2  ;;  %v417_v62 = vadd.f32 %v416_v60, %v415_v58  ;;  %v288_v60 = vld [vmem:[%s7761_s25 + $0x18] sm:$0xff] }
  0xd2   : > { %v389_v63 = vadd.f32 %v388_v61, %v387_v59  ;;  %v418_v0 = vrot.slane %v417_v62, 2 }
  0xd4   : > { %v390_v1 = vrot.slane %v389_v63, 1  ;;  %v419_v2 = vadd.f32 %v418_v0, %v417_v62 }
  0xd6   : > { %v391_v5 = vadd.f32 %v390_v1, %v389_v63  ;;  %v420_v6 = vrot.slane %v419_v2, 1  ;;  %v289_v1 = vld [vmem:[%s7761_s25 + $0x20] sm:$0xff] }
  0xd8   : > { %v7738_v8 = vmul.f32 0.015625, %v391_v5  ;;  %v421_v9 = vadd.f32 %v420_v6, %v419_v2  ;;  %v290_v6 = vld [vmem:[%s7761_s25 + $0x28] sm:$0xff] }
  0xda   : > { %v422_v11 = vmul.f32 0.015625, %v421_v9  ;;  %v423_v18 = vmul.f32 %v7738_v8, %v7738_v8  ;;  %v426_v28 = vsub.f32 %v7673_v12, %v7738_v8  ;;  %v427_v34 = vsub.f32 %v7675_v13, %v7738_v8  ;;  %v646_v12 = vld [vmem:[%s13361_s3 + $0xc0] sm:$0x7] }
  0xdb   : > { %v428_v40 = vsub.f32 %v7677_v14, %v7738_v8  ;;  %6981 = vmatpush.msk.msra.mxu2 %vm672_vm4, %v646_v12  ;;  %v429_v14 = vsub.f32 %v7679_v15, %v7738_v8  ;;  %v430_v49 = vsub.f32 %v7681_v16, %v7738_v8  ;;  %v431_v55 = vsub.f32 %v7683_v17, %v7738_v8 }
  0xdc   : > { %v424_v19 = vsub.f32 %v422_v11, %v423_v18  ;;  %6982 = vmatmul.msk.f32.vlgmr.msra.gmra.mxu2 %vm647_vm5, %v285_v44  ;;  %v432_v61 = vsub.f32 %v7706_v33, %v7738_v8  ;;  %v433_v2 = vsub.f32 %v7722_v51, %v7738_v8  ;;  %v292_v51 = vld [vmem:[%s7761_s25 + $0x38] sm:$0xff] }
  0xde   : > { %v425_v20 = vmax.f32 %v424_v19, 0.0 }
  0xe0   : > { %v434_v21 = vadd.f32 0.001, %v425_v20 }
  0xe2   : > { %7410 = vrsqrt.f32 %v434_v21  ;;  %vm441_vm2 = vweird.f32 %v434_v21 }
  0xe4   : > { %6983 = vmatmul.msk.f32.gmra.mxu2 %vm647_vm5, %v286_v50 }
  0xe8   : > { %v7411_v22 = vpop.eup %7410 }
  0xe9   : > { %v436_v23 = vmul.f32 %v7411_v22, %v434_v21  ;;  %vm442_vm1 = vweird.f32 %v7411_v22 }
  0xea   : > { %vm443_vm3 = vmor %vm441_vm2, %vm442_vm1 }
  0xeb   : > { %v437_v24 = vmul.f32 %v7411_v22, %v436_v23 }
  0xec   : > { %6984 = vmatmul.msk.f32.gmra.mxu2 %vm647_vm5, %v287_v56 }
  0xed   : > { %v438_v25 = vmul.f32 0.5, %v437_v24  ;;  %v7400_v24 = vld [vmem:[%s7656_s10 + $0x2] ss:$0 sm:$0xff] }
  0xef   : > { %v439_v26 = vsub.f32 1.5, %v438_v25 }
  0xf1   : > { %v440_v27 = vmul.f32 %v7411_v22, %v439_v26 }
  0xf3   : > { %v444_v30 = vsel %vm443_vm3, %v7411_v22, %v440_v27 }
  0xf4   : > { %v445_v31 = vmul.f32 %v444_v30, %v426_v28  ;;  %v446_v36 = vmul.f32 %v444_v30, %v427_v34  ;;  %v447_v42 = vmul.f32 %v444_v30, %v428_v40  ;;  %v448_v46 = vmul.f32 %v444_v30, %v429_v14  ;;  %6985 = vmatmul.msk.f32.gmra.mxu2 %vm647_vm5, %v288_v60 }
  0xf5   : > { %v449_v15 = vmul.f32 %v444_v30, %v430_v49  ;;  %v450_v58 = vmul.f32 %v444_v30, %v431_v55  ;;  %v451_v63 = vmul.f32 %v444_v30, %v432_v61  ;;  %v452_v3 = vmul.f32 %v444_v30, %v433_v2 }
  0xf6   : > { %v455_v35 = vmul.f32 %v7398_v29, %v445_v31  ;;  %v456_v39 = vmul.f32 %v7398_v29, %v446_v36  ;;  %v457_v43 = vmul.f32 %v7398_v29, %v447_v42  ;;  %v458_v48 = vmul.f32 %v7398_v29, %v448_v46 }
  0xf7   : > { %v459_v54 = vmul.f32 %v7398_v29, %v449_v15  ;;  %v460_v16 = vmul.f32 %v7398_v29, %v450_v58  ;;  %v461_v0 = vmul.f32 %v7398_v29, %v451_v63  ;;  %v462_v33 = vmul.f32 %v7398_v29, %v452_v3 }
  0xf8   : > { %v465_v37 = vadd.f32 %v7399_v32, %v455_v35  ;;  %v466_v41 = vadd.f32 %v7399_v32, %v456_v39  ;;  %v467_v45 = vadd.f32 %v7399_v32, %v457_v43  ;;  %v468_v52 = vadd.f32 %v7399_v32, %v458_v48 }
  0xf9   : > { %v469_v57 = vadd.f32 %v7399_v32, %v459_v54  ;;  %v470_v62 = vadd.f32 %v7399_v32, %v460_v16  ;;  %v471_v4 = vadd.f32 %v7399_v32, %v461_v0  ;;  %v472_v7 = vadd.f32 %v7399_v32, %v462_v33 }
  0xfa   : > { %v473_v38 = vmax.f32 %v465_v37, 0.0  ;;  %v474_v13 = vmax.f32 %v466_v41, 0.0  ;;  %v475_v47 = vmax.f32 %v467_v45, 0.0  ;;  %v476_v53 = vmax.f32 %v468_v52, 0.0 }
  0xfb   : > { %v477_v59 = vmax.f32 %v469_v57, 0.0  ;;  %v478_v17 = vmax.f32 %v470_v62, 0.0  ;;  %v479_v5 = vmax.f32 %v471_v4, 0.0  ;;  %v480_v9 = vmax.f32 %v472_v7, 0.0 }
  0xfc   : > { %6973 = vmatmul.msk.f32.vlgmr.msra.gmra.mxu1 %vm305_vm0, %v473_v38  ;;  %6986 = vmatmul.msk.f32.gmra.mxu2 %vm647_vm5, %v289_v1 }
 0x104   : > { %6974 = vmatmul.msk.f32.gmra.mxu1 %vm305_vm0, %v474_v13  ;;  %6987 = vmatmul.msk.f32.gmra.mxu2 %vm647_vm5, %v290_v6 }
 0x10c   : > { %6975 = vmatmul.msk.f32.gmra.mxu1 %vm305_vm0, %v475_v47  ;;  %6988 = vmatmul.msk.f32.gmra.mxu2 %vm647_vm5, %v291_v10 }
 0x114   : > { %6976 = vmatmul.msk.f32.gmra.mxu1 %vm305_vm0, %v476_v53  ;;  %6989 = vmatmul.msk.f32.gmra.mxu2 %vm647_vm5, %v292_v51 }
 0x11c   : > { %6977 = vmatmul.msk.f32.gmra.mxu1 %vm305_vm0, %v477_v59 }
 0x124   : > { %6978 = vmatmul.msk.f32.gmra.mxu1 %vm305_vm0, %v478_v17 }
 0x12c   : > { %6979 = vmatmul.msk.f32.gmra.mxu1 %vm305_vm0, %v479_v5 }
 0x134   : > { %6980 = vmatmul.msk.f32.gmra.mxu1 %vm305_vm0, %v480_v9 }
 0x15f   : > { %v7796_v18 = vpop.f32.mrf.mxu2 }
 0x167   : > { %v696_v20 = vpop.f32.mrf.mxu2 }
 0x168   : > { %1241 = vrot.lane.b32.xlu1 %v696_v20, %s7584_s26  ;;  %v7585_v20 = vmov 0  }
 0x169   : > { %7387 = vset.pattern.permute.xlu1 %v7585_v20  ;;  %7388 = vset.pattern.permute.xlu2 %v7585_v20 }
 0x16a   : > { %7389 = vset.pattern.permute.xlu0 %v7585_v20  ;;  %v726_v20 = vld [vmem:[%s7890_s8 + $0x48] sm:$0xff] }
 0x16f   : > { %v699_v23 = vpop.f32.mrf.mxu2 }
 0x170   : > { %1243 = vrot.lane.b32.xlu2 %v699_v23, %s7584_s26 }
 0x177   : > { %v702_v26 = vpop.f32.mrf.mxu2 }
 0x178   : > { %1245 = vrot.lane.b32.xlu0 %v702_v26, %s7584_s26 }
 0x179   : > { %v528_v8 = vpop.f32.mrf.mxu1 }
 0x17a   : > { %v7804_v28 = vadd.f32 %v7400_v24, %v528_v8 }
 0x17c   : > { %v566_v32 = vmul.f32 %v7804_v28, %v7804_v28 }
 0x17f   : > { %v705_v38 = vpop.f32.mrf.mxu2 }
 0x180   : > { %1247 = vrot.lane.b32.xlu1 %v705_v38, %s7584_s26 }
 0x181   : > { %v531_v11 = vpop.f32.mrf.mxu1 }
 0x182   : > { %v7801_v27 = vadd.f32 %v7400_v24, %v531_v11 }
 0x184   : > { %v567_v30 = vmul.f32 %v7801_v27, %v7801_v27  ;;  %v552_v34 = vadd.f32 %v7801_v27, %v7804_v28 }
 0x186   : > { %v574_v39 = vadd.f32 %v567_v30, %v566_v32 }
 0x187   : > { %v708_v52 = vpop.f32.mrf.mxu2 }
 0x188   : > { %1249 = vrot.lane.b32.xlu2 %v708_v52, %s7584_s26 }
 0x189   : > { %v534_v19 = vpop.f32.mrf.mxu1 }
 0x18a   : > { %v7806_v29 = vadd.f32 %v7400_v24, %v534_v19 }
 0x18c   : > { %v568_v35 = vmul.f32 %v7806_v29, %v7806_v29  ;;  %v553_v40 = vadd.f32 %v552_v34, %v7806_v29 }
 0x18e   : > { %v575_v42 = vadd.f32 %v574_v39, %v568_v35 }
 0x18f   : > { %v711_v61 = vpop.f32.mrf.mxu2 }
 0x190   : > { %1251 = vrot.lane.b32.xlu1 %v711_v61, %s7584_s26 }
 0x191   : > { %v537_v21 = vpop.f32.mrf.mxu1 }
 0x192   : > { %v7810_v31 = vadd.f32 %v7400_v24, %v537_v21 }
 0x194   : > { %v569_v12 = vmul.f32 %v7810_v31, %v7810_v31  ;;  %v554_v13 = vadd.f32 %v553_v40, %v7810_v31 }
 0x196   : > { %v576_v44 = vadd.f32 %v575_v42, %v569_v12 }
 0x197   : > { %v714_v5 = vpop.f32.mrf.mxu2 }
 0x198   : > { %1253 = vrot.lane.b32.xlu0 %v714_v5, %s7584_s26 }
 0x199   : > { %v540_v22 = vpop.f32.mrf.mxu1 }
 0x19a   : > { %v7818_v36 = vadd.f32 %v7400_v24, %v540_v22 }
 0x19c   : > { %v570_v43 = vmul.f32 %v7818_v36, %v7818_v36  ;;  %v555_v45 = vadd.f32 %v554_v13, %v7818_v36 }
 0x19e   : > { %v577_v47 = vadd.f32 %v576_v44, %v570_v43  ;;  %v7402_v43 = vld [vmem:[%s7656_s10 + $0x4] ss:$0 sm:$0xff] }
 0x1a1   : > { %v543_v25 = vpop.f32.mrf.mxu1 }
 0x1a2   : > { %v7823_v41 = vadd.f32 %v7400_v24, %v543_v25 }
 0x1a4   : > { %v571_v46 = vmul.f32 %v7823_v41, %v7823_v41  ;;  %v556_v48 = vadd.f32 %v555_v45, %v7823_v41 }
 0x1a6   : > { %v578_v15 = vadd.f32 %v577_v47, %v571_v46 }
 0x1a9   : > { %v546_v37 = vpop.f32.mrf.mxu1 }
 0x1aa   : > { %v7829_v14 = vadd.f32 %v7400_v24, %v546_v37  ;;  %v7401_v37 = vld [vmem:[%s7656_s10 + $0x3] ss:$0 sm:$0xff] }
 0x1ac   : > { %v572_v49 = vmul.f32 %v7829_v14, %v7829_v14  ;;  %v557_v53 = vadd.f32 %v556_v48, %v7829_v14 }
 0x1ae   : > { %v579_v55 = vadd.f32 %v578_v15, %v572_v49 }
 0x1b1   : > { %v549_v50 = vpop.f32.mrf.mxu1 }
 0x1b2   : > { %v7838_v54 = vadd.f32 %v7400_v24, %v549_v50 }
 0x1b4   : > { %v558_v56 = vadd.f32 %v557_v53, %v7838_v54  ;;  %v573_v57 = vmul.f32 %v7838_v54, %v7838_v54 }
 0x1b6   : > { %v559_v58 = vrot.slane %v558_v56, 4  ;;  %v580_v59 = vadd.f32 %v579_v55, %v573_v57 }
 0x1b8   : > { %v560_v16 = vadd.f32 %v559_v58, %v558_v56  ;;  %v581_v60 = vrot.slane %v580_v59, 4 }
 0x1ba   : > { %v561_v62 = vrot.slane %v560_v16, 2  ;;  %v582_v63 = vadd.f32 %v581_v60, %v580_v59 }
 0x1bc   : > { %v562_v17 = vadd.f32 %v561_v62, %v560_v16  ;;  %v583_v0 = vrot.slane %v582_v63, 2 }
 0x1be   : > { %v563_v1 = vrot.slane %v562_v17, 1  ;;  %v584_v2 = vadd.f32 %v583_v0, %v582_v63 }
 0x1c0   : > { %v564_v3 = vadd.f32 %v563_v1, %v562_v17  ;;  %v585_v4 = vrot.slane %v584_v2, 1 }
 0x1c2   : > { %v565_v33 = vmul.f32 0.015625, %v564_v3  ;;  %v586_v6 = vadd.f32 %v585_v4, %v584_v2 }
 0x1c4   : > { %v587_v7 = vmul.f32 0.015625, %v586_v6  ;;  %v588_v9 = vmul.f32 %v565_v33, %v565_v33  ;;  %v593_v25 = vsub.f32 %v7806_v29, %v565_v33  ;;  %v594_v26 = vsub.f32 %v7810_v31, %v565_v33 }
 0x1c5   : > { %v596_v30 = vsub.f32 %v7823_v41, %v565_v33  ;;  %v597_v32 = vsub.f32 %v7829_v14, %v565_v33  ;;  %v598_v34 = vsub.f32 %v7838_v54, %v565_v33  ;;  %v595_v38 = vsub.f32 %v7818_v36, %v565_v33 }
 0x1c6   : > { %v589_v10 = vsub.f32 %v587_v7, %v588_v9  ;;  %v591_v53 = vsub.f32 %v7804_v28, %v565_v33  ;;  %v592_v59 = vsub.f32 %v7801_v27, %v565_v33 }
 0x1c8   : > { %v590_v51 = vmax.f32 %v589_v10, 0.0 }
 0x1ca   : > { %v599_v8 = vadd.f32 1e-05, %v590_v51  ;;  %v719_v51 = vld [vmem:[%s7890_s8 + $0x10] sm:$0xff] }
 0x1cc   : > { %7412 = vrsqrt.f32 %v599_v8  ;;  %vm606_vm7 = vweird.f32 %v599_v8 }
 0x1d2   : > { %v7413_v11 = vpop.eup %7412 }
 0x1d3   : > { %v601_v19 = vmul.f32 %v7413_v11, %v599_v8  ;;  %vm607_vm6 = vweird.f32 %v7413_v11  ;;  %v721_v8 = vld [vmem:[%s7890_s8 + $0x20] sm:$0xff] }
 0x1d4   : > { %vm608_vm8 = vmor %vm606_vm7, %vm607_vm6 }
 0x1d5   : > { %v602_v21 = vmul.f32 %v7413_v11, %v601_v19  ;;  %v724_v19 = vld [vmem:[%s7890_s8 + $0x38] sm:$0xff] }
 0x1d7   : > { %v603_v22 = vmul.f32 0.5, %v602_v21  ;;  %v725_v21 = vld [vmem:[%s7890_s8 + $0x40] sm:$0xff] }
 0x1d9   : > { %v604_v23 = vsub.f32 1.5, %v603_v22  ;;  %v727_v22 = vld [vmem:[%s7890_s8 + $0x50] sm:$0xff] }
 0x1db   : > { %v605_v24 = vmul.f32 %v7413_v11, %v604_v23  ;;  %v728_v23 = vld [vmem:[%s7890_s8 + $0x58] sm:$0xff] }
 0x1dd   : > { %v609_v35 = vsel %vm608_vm8, %v7413_v11, %v605_v24  ;;  %v723_v11 = vld [vmem:[%s7890_s8 + $0x30] sm:$0xff]  ;;  %v730_v24 = vld [vmem:[%s7890_s8 + $0x68] sm:$0xff] }
 0x1de   : > { %v613_v39 = vmul.f32 %v609_v35, %v594_v26  ;;  %v612_v40 = vmul.f32 %v609_v35, %v593_v25  ;;  %v615_v12 = vmul.f32 %v609_v35, %v596_v30  ;;  %v616_v42 = vmul.f32 %v609_v35, %v597_v32  ;;  %v732_v25 = vld [vmem:[%s7890_s8 + $0x78] sm:$0xff]  ;;  %v731_v26 = vld [vmem:[%s7890_s8 + $0x70] sm:$0xff]  ;;  %v733_v30 = vld [vmem:[%s7890_s8 + $0x80] sm:$0xff] }
 0x1df   : > { %v617_v13 = vmul.f32 %v609_v35, %v598_v34  ;;  %v614_v44 = vmul.f32 %v609_v35, %v595_v38  ;;  %v610_v16 = vmul.f32 %v609_v35, %v591_v53  ;;  %v611_v0 = vmul.f32 %v609_v35, %v592_v59  ;;  %v735_v32 = vld [vmem:[%s7890_s8 + $0x90] sm:$0xff]  ;;  %v734_v34 = vld [vmem:[%s7890_s8 + $0x88] sm:$0xff]  ;;  %v736_v35 = vld [vmem:[%s7890_s8 + $0x98] sm:$0xff] }
 0x1e0   : > { %v625_v45 = vmul.f32 %v7401_v37, %v615_v12  ;;  %v626_v46 = vmul.f32 %v7401_v37, %v616_v42  ;;  %v623_v48 = vmul.f32 %v7401_v37, %v613_v39  ;;  %v622_v49 = vmul.f32 %v7401_v37, %v612_v40  ;;  %v737_v38 = vld [vmem:[%s7890_s8 + $0xa0] sm:$0xff]  ;;  %v739_v39 = vld [vmem:[%s7890_s8 + $0xb0] sm:$0xff]  ;;  %v740_v12 = vld [vmem:[%s7890_s8 + $0xb8] sm:$0xff] }
 0x1e1   : > { %v627_v47 = vmul.f32 %v7401_v37, %v617_v13  ;;  %v624_v55 = vmul.f32 %v7401_v37, %v614_v44  ;;  %v620_v2 = vmul.f32 %v7401_v37, %v610_v16  ;;  %v741_v40 = vld [vmem:[%s7890_s8 + $0xc0] sm:$0xff]  ;;  %v742_v42 = vld [vmem:[%s7890_s8 + $0xc8] sm:$0xff]  ;;  %v744_v13 = vld [vmem:[%s7890_s8 + $0xd8] sm:$0xff]  ;;  %v7931_v44 = vpop.permute.xlu1 %1241 }
 0x1e2   : > { %v635_v52 = vadd.f32 %v7402_v43, %v625_v45  ;;  %v636_v15 = vadd.f32 %v7402_v43, %v626_v46  ;;  %v633_v60 = vadd.f32 %v7402_v43, %v623_v48  ;;  %v632_v17 = vadd.f32 %v7402_v43, %v622_v49  ;;  %v7933_v45 = vpop.permute.xlu2 %1243  ;;  %v745_v46 = vld [vmem:[%s7890_s8 + $0xe0] sm:$0xff]  ;;  %v746_v48 = vld [vmem:[%s7890_s8 + $0xe8] sm:$0xff] }
 0x1e3   : > { %v637_v50 = vadd.f32 %v7402_v43, %v627_v47  ;;  %v634_v1 = vadd.f32 %v7402_v43, %v624_v55  ;;  %v630_v33 = vadd.f32 %v7402_v43, %v620_v2  ;;  %v747_v47 = vld [vmem:[%s7890_s8 + $0xf0] sm:$0xff]  ;;  %v750_v53 = vld [vmem:[%s7890_s8 + $0x108] sm:$0xff]  ;;  %v749_v55 = vld [vmem:[%s7890_s8 + $0x100] sm:$0xff] }
 0x1e4   : > { %v7857_v57 = vmax.f32 %v635_v52, 0.0  ;;  %v7859_v58 = vmax.f32 %v636_v15, 0.0  ;;  %v7871_v3 = vmax.f32 %v633_v60, 0.0  ;;  %v748_v15 = vld [vmem:[%s7890_s8 + $0xf8] sm:$0xff] }
 0x1e5   : > { %v7855_v56 = vmax.f32 %v637_v50, 0.0  ;;  %v7875_v4 = vmax.f32 %v634_v1, 0.0 }
 0x1e6   : > { %13648 = vst [vmem:[#allocation3_spill] sm:$0xff] %v7857_v57  ;;  %v7357_v61 = vpack.i.bf16 %v7823_v41, %v7857_v57  ;;  %v7352_v62 = vpack.i.bf16 %v7829_v14, %v7859_v58  ;;  %v7873_v41 = vmax.f32 %v632_v17, 0.0  ;;  %v621_v14 = vmul.f32 %v7401_v37, %v611_v0  ;;  %v738_v37 = vld [vmem:[%s7890_s8 + $0xa8] sm:$0xff] }
 0x1e7   : > { %13647 = vst [vmem:[#allocation2_spill] sm:$0xff] %v7855_v56  ;;  %v7347_v63 = vpack.i.bf16 %v7838_v54, %v7855_v56  ;;  %v7367_v54 = vpack.i.bf16 %v7810_v31, %v7871_v3  ;;  %v7362_v6 = vpack.i.bf16 %v7818_v36, %v7875_v4  ;;  %v718_v36 = vld [vmem:[%s7890_s8 + $0x8] sm:$0xff] }
 0x1e8   : > { %13649 = vst [vmem:[#allocation4_spill] sm:$0xff] %v7859_v58  ;;  %7358 = vrot.lane.b32.xlu2 %v7357_v61, %s7586_s27  ;;  %7353 = vrot.lane.b32.xlu1 %v7352_v62, %s7586_s27  ;;  %v7372_v5 = vpack.i.bf16 %v7806_v29, %v7873_v41  ;;  %v631_v7 = vadd.f32 %v7402_v43, %v621_v14  ;;  %v7892_v29 = vmax.f32 %v630_v33, 0.0  ;;  %v743_v43 = vld [vmem:[%s7890_s8 + $0xd0] sm:$0xff]  ;;  %v753_v62 = vld [vmem:[%s7890_s8 + $0x120] sm:$0xff] }
 0x1e9   : > { %7348 = vrot.lane.b32.xlu0 %v7347_v63, %s7586_s27  ;;  %13650 = vst [vmem:[#allocation5_spill] sm:$0xff] %v7871_v3  ;;  %v751_v61 = vld [vmem:[%s7890_s8 + $0x110] sm:$0xff]  ;;  %v752_v63 = vld [vmem:[%s7890_s8 + $0x118] sm:$0xff] }
 0x1ea   : > { %13651 = vst [vmem:[#allocation6_spill] sm:$0xff] %v7873_v41  ;;  %v7894_v31 = vmax.f32 %v631_v7, 0.0  ;;  %v7382_v9 = vpack.i.bf16 %v7804_v28, %v7892_v29  ;;  %v722_v28 = vld [vmem:[%s7890_s8 + $0x28] sm:$0xff]  ;;  %v7938_v49 = vpop.permute.xlu0 %1245  ;;  %v7942_v52 = vpop.permute.xlu2 %1249 }
 0x1eb   : > { %13652 = vst [vmem:[#allocation7_spill] sm:$0xff] %v7875_v4  ;;  %v754_v7 = vld [vmem:[%s7890_s8 + $0x128] sm:$0xff] }
 0x1ec   : > { %13653 = vst [vmem:[#allocation8_spill] sm:$0xff] %v7892_v29  ;;  %v7377_v10 = vpack.i.bf16 %v7801_v27, %v7894_v31  ;;  %v720_v27 = vld [vmem:[%s7890_s8 + $0x18] sm:$0xff] }
 0x1ed   : > { %13654 = vst [vmem:[#allocation9_spill] sm:$0xff] %v7894_v31 }
 0x1f0   : > { %7368 = vrot.lane.b32.xlu2 %v7367_v54, %s7586_s27  ;;  %7373 = vrot.lane.b32.xlu1 %v7372_v5, %s7586_s27 }
 0x1f1   : > { %7363 = vrot.lane.b32.xlu0 %v7362_v6, %s7586_s27 }
 0x1f2   : > { %v7940_v50 = vpop.permute.xlu1 %1247 }
 0x1f8   : > { %7383 = vrot.lane.b32.xlu2 %v7382_v9, %s7586_s27  ;;  %787 = vperm.xlu1 %7387, %v718_v36   ;;  %v756_v36 = vld [vmem:[%s7890_s8 + $0x138] sm:$0xff] }
 0x1f9   : > { %7378 = vrot.lane.b32.xlu0 %v7377_v10, %s7586_s27  ;;  %v755_v10 = vld [vmem:[%s7890_s8 + $0x130] sm:$0xff] }
 0x200   : > { %790 = vperm.xlu2 %7388, %v719_v51   ;;  %796 = vperm.xlu1 %7387, %v721_v8  }
 0x201   : > { %1239 = vrot.lane.b32.xlu0 %v7796_v18, %s7584_s26  ;;  %v729_v18 = vld [vmem:[%s7890_s8 + $0x60] sm:$0xff] }
 0x202   : > { %v7949_v16 = vpop.permute.xlu1 %1251 }
 0x208   : > { %799 = vperm.xlu2 %7388, %v722_v28   ;;  %802 = vperm.xlu1 %7387, %v723_v11  }
 0x209   : > { %793 = vperm.xlu0 %7389, %v720_v27  }
 0x20a   : > { %v7947_v59 = vpop.permute.xlu0 %1253 }
 0x210   : > { %805 = vperm.xlu2 %7388, %v724_v19   ;;  %811 = vperm.xlu1 %7387, %v726_v20  }
 0x211   : > { %808 = vperm.xlu0 %7389, %v725_v21  }
 0x218   : > { %814 = vperm.xlu2 %7388, %v727_v22   ;;  %820 = vperm.xlu1 %7387, %v729_v18  }
 0x219   : > { %817 = vperm.xlu0 %7389, %v728_v23  }
 0x220   : > { %823 = vperm.xlu2 %7388, %v730_v24   ;;  %829 = vperm.xlu1 %7387, %v732_v25  }
 0x221   : > { %826 = vperm.xlu0 %7389, %v731_v26  }
 0x228   : > { %832 = vperm.xlu2 %7388, %v733_v30   ;;  %838 = vperm.xlu1 %7387, %v735_v32  }
 0x229   : > { %835 = vperm.xlu0 %7389, %v734_v34  }
 0x230   : > { %841 = vperm.xlu2 %7388, %v736_v35   ;;  %847 = vperm.xlu1 %7387, %v738_v37   ;;  %v757_v35 = vld [vmem:[%s7890_s8 + $0x140] sm:$0xff]  ;;  %v759_v37 = vld [vmem:[%s7890_s8 + $0x150] sm:$0xff] }
 0x231   : > { %844 = vperm.xlu0 %7389, %v737_v38   ;;  %v758_v38 = vld [vmem:[%s7890_s8 + $0x148] sm:$0xff] }
 0x238   : > { %850 = vperm.xlu2 %7388, %v739_v39   ;;  %856 = vperm.xlu1 %7387, %v741_v40  }
 0x239   : > { %853 = vperm.xlu0 %7389, %v740_v12  }
 0x240   : > { %859 = vperm.xlu2 %7388, %v742_v42   ;;  %865 = vperm.xlu1 %7387, %v744_v13  }
 0x241   : > { %862 = vperm.xlu0 %7389, %v743_v43   ;;  %v781_v43 = vlaneseq }
 0x242   : > { %v7359_v60 = vpop.permute.xlu2 %7358 }
 0x243   : > { %v7361_v17 = vunpack.i.h.bf16 %v7359_v60  ;;  %v7360_v0 = vunpack.i.l.bf16 %v7359_v60 }
 0x245   : > { %v1268_v8 = vsel %vm305_vm0, %v7360_v0, %v7361_v17  ;;  %v762_v17 = vld [vmem:[%s7890_s8 + $0x168] sm:$0xff]  ;;  %v761_v0 = vld [vmem:[%s7890_s8 + $0x160] sm:$0xff] }
 0x246   : > { %v1277_v21 = vsel %vm1271_vm9, %v1268_v8, %v7942_v52  ;;  %v763_v8 = vld [vmem:[%s7890_s8 + $0x170] sm:$0xff] }
 0x247   : > { %v1286_v32 = vsel %vm1280_vm10, %v1277_v21, 1.0  ;;  %v765_v21 = vld [vmem:[%s7890_s8 + $0x180] sm:$0xff] }
 0x248   : > { %868 = vperm.xlu2 %7388, %v745_v46   ;;  %874 = vperm.xlu1 %7387, %v747_v47  }
 0x249   : > { %871 = vperm.xlu0 %7389, %v746_v48  }
 0x24a   : > { %v7369_v6 = vpop.permute.xlu2 %7368 }
 0x24b   : > { %v7371_v27 = vunpack.i.h.bf16 %v7369_v6  ;;  %v7370_v19 = vunpack.i.l.bf16 %v7369_v6 }
 0x24d   : > { %v1266_v34 = vsel %vm305_vm0, %v7370_v19, %v7371_v27 }
 0x24e   : > { %v1275_v42 = vsel %vm1271_vm9, %v1266_v34, %v7938_v49 }
 0x24f   : > { %v1284_v48 = vsel %vm1280_vm10, %v1275_v42, 1.0  ;;  %v774_v42 = vld [vmem:[%s7890_s8 + $0x1c8] sm:$0xff] }
 0x250   : > { %877 = vperm.xlu2 %7388, %v748_v15   ;;  %883 = vperm.xlu1 %7387, %v750_v53  }
 0x251   : > { %880 = vperm.xlu0 %7389, %v749_v55  }
 0x252   : > { %v7384_v53 = vpop.permute.xlu2 %7383 }
 0x258   : > { %886 = vperm.xlu2 %7388, %v751_v61   ;;  %892 = vperm.xlu1 %7387, %v753_v62   ;;  %v7984_v62 = vand.u32 127, %v781_v43 }
 0x259   : > { %889 = vperm.xlu0 %7389, %v752_v63   ;;  %v760_v63 = vld [vmem:[%s7890_s8 + $0x158] sm:$0xff] }
 0x25a   : > { %v7354_v1 = vpop.permute.xlu1 %7353  ;;  %v791_v27 = vpop.permute.xlu2 %790 }
 0x25b   : > { %v7356_v2 = vunpack.i.h.bf16 %v7354_v1  ;;  %v7355_v14 = vunpack.i.l.bf16 %v7354_v1  ;;  %v7349_v54 = vpop.permute.xlu0 %7348  ;;  %vm977_vm12 = vcmp.eq.s32.totalorder %v791_v27, %v7984_v62 }
 0x25c   : > { %v7351_v5 = vunpack.i.h.bf16 %v7349_v54  ;;  %v7350_v33 = vunpack.i.l.bf16 %v7349_v54 }
 0x25d   : > { %v1269_v9 = vsel %vm305_vm0, %v7355_v14, %v7356_v2  ;;  %v7386_v2 = vunpack.i.h.bf16 %v7384_v53  ;;  %v7385_v14 = vunpack.i.l.bf16 %v7384_v53 }
 0x25e   : > { %v1270_v51 = vsel %vm305_vm0, %v7350_v33, %v7351_v5  ;;  %v1278_v11 = vsel %vm1271_vm9, %v1269_v9, %v7949_v16  ;;  %v7587_v9 = vmov 0.0  }
 0x25f   : > { %v1279_v28 = vsel %vm1271_vm9, %v1270_v51, %v7947_v59  ;;  %v1287_v18 = vsel %vm1280_vm10, %v1278_v11, 1.0  ;;  %v764_v11 = vld [vmem:[%s7890_s8 + $0x178] sm:$0xff] }
 0x260   : > { %895 = vperm.xlu2 %7388, %v754_v7   ;;  %901 = vperm.xlu1 %7387, %v756_v36   ;;  %v1288_v20 = vsel %vm1280_vm10, %v1279_v28, 1.0  ;;  %v1263_v7 = vsel %vm305_vm0, %v7385_v14, %v7386_v2  ;;  %v717_v28 = vld [vmem:[%s7890_s8] sm:$0xff] }
 0x261   : > { %898 = vperm.xlu0 %7389, %v755_v10   ;;  %1489 = vmatpush.msrb.mxu2 %v1288_v20 }
 0x262   : > { %7324 = vmatpush.msra.mxu3 %v1288_v20  ;;  %v7374_v22 = vpop.permute.xlu1 %7373  ;;  %v6992_v20 = vsel %vm977_vm12, 1.0, %v7587_v9 }
 0x263   : > { %v7376_v23 = vunpack.i.h.bf16 %v7374_v22  ;;  %v7375_v24 = vunpack.i.l.bf16 %v7374_v22  ;;  %v7364_v25 = vpop.permute.xlu0 %7363  ;;  %1490 = vmatpush.msrb.mxu2 %v1287_v18  ;;  %v767_v22 = vld [vmem:[%s7890_s8 + $0x190] sm:$0xff] }
 0x264   : > { %v7366_v26 = vunpack.i.h.bf16 %v7364_v25  ;;  %v7365_v30 = vunpack.i.l.bf16 %v7364_v25  ;;  %7325 = vmatpush.msra.mxu3 %v1287_v18  ;;  %v766_v18 = vld [vmem:[%s7890_s8 + $0x188] sm:$0xff] }
 0x265   : > { %1491 = vmatpush.msrb.mxu2 %v1286_v32  ;;  %v1265_v40 = vsel %vm305_vm0, %v7375_v24, %v7376_v23 }
 0x266   : > { %7326 = vmatpush.msra.mxu3 %v1286_v32  ;;  %v1267_v39 = vsel %vm305_vm0, %v7365_v30, %v7366_v26  ;;  %v1274_v46 = vsel %vm1271_vm9, %v1265_v40, %v7933_v45  ;;  %v768_v26 = vld [vmem:[%s7890_s8 + $0x198] sm:$0xff]  ;;  %v770_v30 = vld [vmem:[%s7890_s8 + $0x1a8] sm:$0xff]  ;;  %v769_v32 = vld [vmem:[%s7890_s8 + $0x1a0] sm:$0xff]  ;;  %v800_v40 = vpop.permute.xlu2 %799 }
 0x267   : > { %v1276_v12 = vsel %vm1271_vm9, %v1267_v39, %v7940_v50  ;;  %v1283_v61 = vsel %vm1280_vm10, %v1274_v46, 1.0  ;;  %v772_v39 = vld [vmem:[%s7890_s8 + $0x1b8] sm:$0xff]  ;;  %vm980_vm15 = vcmp.eq.s32.totalorder %v800_v40, %v7984_v62  ;;  %v775_v46 = vld [vmem:[%s7890_s8 + $0x1d0] sm:$0xff] }
 0x268   : > { %904 = vperm.xlu2 %7388, %v757_v35   ;;  %910 = vperm.xlu1 %7387, %v759_v37   ;;  %v1285_v13 = vsel %vm1280_vm10, %v1276_v12, 1.0  ;;  %v771_v35 = vld [vmem:[%s7890_s8 + $0x1b0] sm:$0xff]  ;;  %v773_v37 = vld [vmem:[%s7890_s8 + $0x1c0] sm:$0xff]  ;;  %v6995_v43 = vsel %vm980_vm15, 1.0, %v7587_v9 }
 0x269   : > { %907 = vperm.xlu0 %7389, %v758_v38   ;;  %1492 = vmatpush.msrb.mxu2 %v1285_v13 }
 0x26a   : > { %7327 = vmatpush.msra.mxu3 %v1285_v13  ;;  %v788_v47 = vpop.permute.xlu1 %787  ;;  %v776_v13 = vld [vmem:[%s7890_s8 + $0x1d8] sm:$0xff] }
 0x26b   : > { %v7379_v15 = vpop.permute.xlu0 %7378  ;;  %1493 = vmatpush.msrb.mxu2 %v1284_v48  ;;  %vm976_vm11 = vcmp.eq.s32.totalorder %v788_v47, %v7984_v62 }
 0x26c   : > { %v7381_v55 = vunpack.i.h.bf16 %v7379_v15  ;;  %v7380_v60 = vunpack.i.l.bf16 %v7379_v15  ;;  %7328 = vmatpush.msra.mxu3 %v1284_v48  ;;  %v6991_v10 = vsel %vm976_vm11, 1.0, %v7587_v9  ;;  %v777_v48 = vld [vmem:[%s7890_s8 + $0x1e0] sm:$0xff]  ;;  %v779_v15 = vld [vmem:[%s7890_s8 + $0x1f0] sm:$0xff] }
 0x26d   : > { %1494 = vmatpush.msrb.mxu2 %v1283_v61 }
 0x26e   : > { %7329 = vmatpush.msra.mxu3 %v1283_v61  ;;  %v1264_v1 = vsel %vm305_vm0, %v7380_v60, %v7381_v55  ;;  %v778_v55 = vld [vmem:[%s7890_s8 + $0x1e8] sm:$0xff]  ;;  %v806_v60 = vpop.permute.xlu2 %805 }
 0x26f   : > { %v1273_v54 = vsel %vm1271_vm9, %v1264_v1, %v7931_v44  ;;  %vm982_vm2 = vcmp.eq.s32.totalorder %v806_v60, %v7984_v62 }
 0x270   : > { %913 = vperm.xlu2 %7388, %v760_v63   ;;  %919 = vperm.xlu1 %7387, %v762_v17   ;;  %v1282_v5 = vsel %vm1280_vm10, %v1273_v54, 1.0  ;;  %v780_v63 = vld [vmem:[%s7890_s8 + $0x1f8] sm:$0xff]  ;;  %v6997_v17 = vsel %vm982_vm2, 1.0, %v7587_v9 }
 0x271   : > { %916 = vperm.xlu0 %7389, %v761_v0   ;;  %1495 = vmatpush.msrb.mxu2 %v1282_v5 }
 0x272   : > { %7330 = vmatpush.msra.mxu3 %v1282_v5  ;;  %v797_v33 = vpop.permute.xlu1 %796 }
 0x273   : > { %v7994_v6 = vpop.permute.xlu0 %1239  ;;  %vm979_vm14 = vcmp.eq.s32.totalorder %v797_v33, %v7984_v62 }
 0x274   : > { %v1272_v36 = vsel %vm1271_vm9, %v1263_v7, %v7994_v6  ;;  %v6994_v38 = vsel %vm979_vm14, 1.0, %v7587_v9 }
 0x275   : > { %v1281_v51 = vsel %vm1280_vm10, %v1272_v36, 1.0 }
 0x276   : > { %1496 = vmatpush.msrb.mxu2 %v1281_v51  ;;  %7331 = vmatpush.msra.mxu3 %v1281_v51  ;;  %v815_v5 = vpop.permute.xlu2 %814 }
 0x277   : > { %7055 = vmatmul.msk.f32.vlgmr.msra.gmra.mxu3 %vm1271_vm9, %v6991_v10  ;;  %vm985_vm5 = vcmp.eq.s32.totalorder %v815_v5, %v7984_v62 }
 0x278   : > { %922 = vperm.xlu2 %7388, %v763_v8   ;;  %784 = vperm.xlu1 %7387, %v717_v28   ;;  %v7000_v7 = vsel %vm985_vm5, 1.0, %v7587_v9  ;;  %v7403_v28 = vld [vmem:[%s7656_s10 + $0x5] ss:$0 sm:$0xff] }
 0x279   : > { %925 = vperm.xlu0 %7389, %v764_v11  }
 0x27a   : > { %v803_v19 = vpop.permute.xlu1 %802 }
 0x27b   : > { %v794_v23 = vpop.permute.xlu0 %793  ;;  %vm981_vm1 = vcmp.eq.s32.totalorder %v803_v19, %v7984_v62 }
 0x27c   : > { %vm978_vm13 = vcmp.eq.s32.totalorder %v794_v23, %v7984_v62  ;;  %v6996_v53 = vsel %vm981_vm1, 1.0, %v7587_v9 }
 0x27d   : > { %v6993_v25 = vsel %vm978_vm13, 1.0, %v7587_v9 }
 0x27e   : > { %v824_v27 = vpop.permute.xlu2 %823 }
 0x27f   : > { %7056 = vmatmul.msk.f32.gmra.mxu3 %vm1271_vm9, %v6992_v20  ;;  %vm988_vm8 = vcmp.eq.s32.totalorder %v824_v27, %v7984_v62 }
 0x280   : > { %928 = vperm.xlu2 %7388, %v765_v21   ;;  %934 = vperm.xlu1 %7387, %v767_v22   ;;  %v7003_v20 = vsel %vm988_vm8, 1.0, %v7587_v9  ;;  %v7588_v22 = vmov 96  }
 0x281   : > { %931 = vperm.xlu0 %7389, %v766_v18  }
 0x282   : > { %v812_v24 = vpop.permute.xlu1 %811 }
 0x283   : > { %v809_v0 = vpop.permute.xlu0 %808  ;;  %vm984_vm4 = vcmp.eq.s32.totalorder %v812_v24, %v7984_v62 }
 0x284   : > { %vm983_vm3 = vcmp.eq.s32.totalorder %v809_v0, %v7984_v62  ;;  %v6999_v54 = vsel %vm984_vm4, 1.0, %v7587_v9 }
 0x285   : > { %v6998_v2 = vsel %vm983_vm3, 1.0, %v7587_v9 }
 0x287   : > { %7057 = vmatmul.msk.f32.gmra.mxu3 %vm1271_vm9, %v6993_v25 }
 0x288   : > { %937 = vperm.xlu2 %7388, %v768_v26   ;;  %943 = vperm.xlu1 %7387, %v770_v30   ;;  %v833_v26 = vpop.permute.xlu2 %832 }
 0x289   : > { %940 = vperm.xlu0 %7389, %v769_v32   ;;  %vm991_vm12 = vcmp.eq.s32.totalorder %v833_v26, %v7984_v62 }
 0x28a   : > { %v821_v34 = vpop.permute.xlu1 %820 }
 0x28b   : > { %v818_v36 = vpop.permute.xlu0 %817  ;;  %vm987_vm7 = vcmp.eq.s32.totalorder %v821_v34, %v7984_v62  ;;  %v7006_v34 = vsel %vm991_vm12, 1.0, %v7587_v9 }
 0x28c   : > { %vm986_vm6 = vcmp.eq.s32.totalorder %v818_v36, %v7984_v62  ;;  %v7002_v11 = vsel %vm987_vm7, 1.0, %v7587_v9 }
 0x28d   : > { %v7001_v51 = vsel %vm986_vm6, 1.0, %v7587_v9 }
 0x28f   : > { %7058 = vmatmul.msk.f32.gmra.mxu3 %vm1271_vm9, %v6994_v38 }
 0x290   : > { %946 = vperm.xlu2 %7388, %v771_v35   ;;  %952 = vperm.xlu1 %7387, %v773_v37   ;;  %v842_v40 = vpop.permute.xlu2 %841 }
 0x291   : > { %949 = vperm.xlu0 %7389, %v772_v39   ;;  %vm994_vm1 = vcmp.eq.s32.totalorder %v842_v40, %v7984_v62 }
 0x292   : > { %v8023_v12 = vpop.permute.xlu1 %829 }
 0x293   : > { %v827_v21 = vpop.permute.xlu0 %826  ;;  %vm990_vm11 = vcmp.eq.s32.totalorder %v8023_v12, %v7984_v62 }
 0x294   : > { %vm989_vm10 = vcmp.eq.s32.totalorder %v827_v21, %v7984_v62  ;;  %v7005_v25 = vsel %vm990_vm11, 1.0, %v7587_v9 }
 0x295   : > { %v7004_v23 = vsel %vm989_vm10, 1.0, %v7587_v9 }
 0x297   : > { %7059 = vmatmul.msk.f32.gmra.mxu3 %vm1271_vm9, %v6995_v43 }
 0x298   : > { %955 = vperm.xlu2 %7388, %v774_v42   ;;  %961 = vperm.xlu1 %7387, %v776_v13   ;;  %v7009_v42 = vsel %vm994_vm1, 1.0, %v7587_v9 }
 0x299   : > { %958 = vperm.xlu0 %7389, %v775_v46  }
 0x29a   : > { %v8031_v47 = vpop.permute.xlu1 %838 }
 0x29b   : > { %v836_v35 = vpop.permute.xlu0 %835  ;;  %vm993_vm15 = vcmp.eq.s32.totalorder %v8031_v47, %v7984_v62 }
 0x29c   : > { %vm992_vm14 = vcmp.eq.s32.totalorder %v836_v35, %v7984_v62  ;;  %v7008_v39 = vsel %vm993_vm15, 1.0, %v7587_v9 }
 0x29d   : > { %v7007_v37 = vsel %vm992_vm14, 1.0, %v7587_v9 }
 0x29f   : > { %7060 = vmatmul.msk.f32.gmra.mxu3 %vm1271_vm9, %v6996_v53 }
 0x2a0   : > { %964 = vperm.xlu2 %7388, %v777_v48   ;;  %970 = vperm.xlu1 %7387, %v779_v15   ;;  %v851_v15 = vpop.permute.xlu2 %850 }
 0x2a1   : > { %967 = vperm.xlu0 %7389, %v778_v55   ;;  %vm997_vm4 = vcmp.eq.s32.totalorder %v851_v15, %v7984_v62 }
 0x2a2   : > { %v8039_v61 = vpop.permute.xlu1 %847  ;;  %v7012_v55 = vsel %vm997_vm4, 1.0, %v7587_v9 }
 0x2a3   : > { %v845_v13 = vpop.permute.xlu0 %844  ;;  %vm996_vm3 = vcmp.eq.s32.totalorder %v8039_v61, %v7984_v62 }
 0x2a4   : > { %vm995_vm2 = vcmp.eq.s32.totalorder %v845_v13, %v7984_v62  ;;  %v7011_v48 = vsel %vm996_vm3, 1.0, %v7587_v9 }
 0x2a5   : > { %v7010_v46 = vsel %vm995_vm2, 1.0, %v7587_v9 }
 0x2a7   : > { %7061 = vmatmul.msk.f32.gmra.mxu3 %vm1271_vm9, %v6997_v17 }
 0x2a8   : > { %973 = vperm.xlu2 %7388, %v780_v63   ;;  %2141 = vrot.lane.b32.xlu1 %v7403_v28, %s7584_s26 }
 0x2a9   : > { %7391 = vset.pattern.permute.xlu1 %v7588_v22  ;;  %7390 = vset.pattern.permute.xlu0 %v7588_v22 }
 0x2aa   : > { %v8045_v1 = vpop.permute.xlu1 %856 }
 0x2ab   : > { %v854_v60 = vpop.permute.xlu0 %853  ;;  %vm999_vm6 = vcmp.eq.s32.totalorder %v8045_v1, %v7984_v62 }
 0x2ac   : > { %vm998_vm5 = vcmp.eq.s32.totalorder %v854_v60, %v7984_v62  ;;  %v7014_v0 = vsel %vm999_vm6, 1.0, %v7587_v9 }
 0x2ad   : > { %v7013_v61 = vsel %vm998_vm5, 1.0, %v7587_v9 }
 0x2af   : > { %7062 = vmatmul.msk.f32.gmra.mxu3 %vm1271_vm9, %v6998_v2  ;;  %v860_v2 = vpop.permute.xlu2 %859 }
 0x2b0   : > { %7392 = vset.pattern.permute.xlu2 %v7588_v22  ;;  %vm1000_vm7 = vcmp.eq.s32.totalorder %v860_v2, %v7984_v62 }
 0x2b1   : > { %v7015_v5 = vsel %vm1000_vm7, 1.0, %v7587_v9 }
 0x2b2   : > { %v8050_v14 = vpop.permute.xlu1 %865 }
 0x2b3   : > { %vm1002_vm10 = vcmp.eq.s32.totalorder %v8050_v14, %v7984_v62 }
 0x2b4   : > { %v7017_v28 = vsel %vm1002_vm10, 1.0, %v7587_v9 }
 0x2b7   : > { %7063 = vmatmul.msk.f32.gmra.mxu3 %vm1271_vm9, %v6999_v54 }
 0x2ba   : > { %v8055_v33 = vpop.permute.xlu1 %874 }
 0x2bf   : > { %7064 = vmatmul.msk.f32.gmra.mxu3 %vm1271_vm9, %v7000_v7  ;;  %v863_v7 = vpop.permute.xlu0 %862 }
 0x2c0   : > { %vm1001_vm8 = vcmp.eq.s32.totalorder %v863_v7, %v7984_v62 }
 0x2c1   : > { %v7016_v1 = vsel %vm1001_vm8, 1.0, %v7587_v9 }
 0x2c2   : > { %v8060_v10 = vpop.permute.xlu1 %883 }
 0x2c3   : > { %vm1008_vm1 = vcmp.eq.s32.totalorder %v8060_v10, %v7984_v62 }
 0x2c4   : > { %v7023_v40 = vsel %vm1008_vm1, 1.0, %v7587_v9 }
 0x2c7   : > { %7065 = vmatmul.msk.f32.gmra.mxu3 %vm1271_vm9, %v7001_v51  ;;  %v872_v21 = vpop.permute.xlu0 %871 }
 0x2c8   : > { %vm1004_vm12 = vcmp.eq.s32.totalorder %v872_v21, %v7984_v62 }
 0x2c9   : > { %v7019_v14 = vsel %vm1004_vm12, 1.0, %v7587_v9 }
 0x2ca   : > { %v8065_v8 = vpop.permute.xlu1 %892 }
 0x2cb   : > { %vm1011_vm4 = vcmp.eq.s32.totalorder %v8065_v8, %v7984_v62 }
 0x2cc   : > { %v7026_v60 = vsel %vm1011_vm4, 1.0, %v7587_v9 }
 0x2cf   : > { %7066 = vmatmul.msk.f32.gmra.mxu3 %vm1271_vm9, %v7002_v11  ;;  %v869_v11 = vpop.permute.xlu2 %868 }
 0x2d0   : > { %vm1003_vm11 = vcmp.eq.s32.totalorder %v869_v11, %v7984_v62 }
 0x2d2   : > { %v8072_v19 = vpop.permute.xlu1 %901 }
 0x2d3   : > { %vm1014_vm7 = vcmp.eq.s32.totalorder %v8072_v19, %v7984_v62 }
 0x2d7   : > { %7067 = vmatmul.msk.f32.gmra.mxu3 %vm1271_vm9, %v7003_v20  ;;  %v7018_v20 = vsel %vm1003_vm11, 1.0, %v7587_v9  ;;  %v878_v26 = vpop.permute.xlu2 %877 }
 0x2d8   : > { %vm1006_vm14 = vcmp.eq.s32.totalorder %v878_v26, %v7984_v62 }
 0x2da   : > { %v8077_v18 = vpop.permute.xlu1 %910 }
 0x2db   : > { %vm1017_vm11 = vcmp.eq.s32.totalorder %v8077_v18, %v7984_v62 }
 0x2df   : > { %7068 = vmatmul.msk.f32.gmra.mxu3 %vm1271_vm9, %v7004_v23 }
 0x2e2   : > { %v8082_v24 = vpop.permute.xlu1 %919 }
 0x2e7   : > { %7069 = vmatmul.msk.f32.gmra.mxu3 %vm1271_vm9, %v7005_v25 }
 0x2ea   : > { %v785_v30 = vpop.permute.xlu1 %784 }
 0x2eb   : > { %vm975_vm13 = vcmp.eq.s32.totalorder %v785_v30, %v7984_v62 }
 0x2ec   : > { %v6990_v32 = vsel %vm975_vm13, 1.0, %v7587_v9  ;;  %vm1005_vm13 = vcmp.eq.s32.totalorder %v8055_v33, %v7984_v62 }
 0x2ed   : > { %7054 = vmatmul.msk.f32.vlgmr.msrb.gmra.mxu2 %vm1271_vm9, %v6990_v32  ;;  %v7020_v25 = vsel %vm1005_vm13, 1.0, %v7587_v9  ;;  %v7021_v32 = vsel %vm1006_vm14, 1.0, %v7587_v9  ;;  %vm1020_vm14 = vcmp.eq.s32.totalorder %v8082_v24, %v7984_v62 }
 0x2ef   : > { %7070 = vmatmul.msk.f32.gmra.mxu3 %vm1271_vm9, %v7006_v34  ;;  %v881_v34 = vpop.permute.xlu0 %880 }
 0x2f0   : > { %vm1007_vm15 = vcmp.eq.s32.totalorder %v881_v34, %v7984_v62 }
 0x2f1   : > { %v7022_v33 = vsel %vm1007_vm15, 1.0, %v7587_v9 }
 0x2f7   : > { %7071 = vmatmul.msk.f32.gmra.mxu3 %vm1271_vm9, %v7007_v37 }
 0x2fa   : > { %v8097_v38 = vpop.f32.mrf.mxu3 }
 0x2fb   : > { %13655 = vst [vmem:[#allocation10_spill] sm:$0xff] %v8097_v38  ;;  %1761 = vperm.xlu1 %7391, %v8097_v38  }
 0x2ff   : > { %7072 = vmatmul.msk.f32.gmra.mxu3 %vm1271_vm9, %v7008_v39 }
 0x302   : > { %v8104_v12 = vpop.f32.mrf.mxu3 }
 0x303   : > { %13656 = vst [vmem:[#allocation11_spill] sm:$0xff] %v8104_v12  ;;  %1766 = vperm.xlu2 %7392, %v8104_v12  }
 0x307   : > { %7073 = vmatmul.msk.f32.gmra.mxu3 %vm1271_vm9, %v7009_v42  ;;  %v887_v42 = vpop.permute.xlu2 %886 }
 0x308   : > { %vm1009_vm2 = vcmp.eq.s32.totalorder %v887_v42, %v7984_v62 }
 0x30a   : > { %v8110_v43 = vpop.f32.mrf.mxu3 }
 0x30b   : > { %13657 = vst [vmem:[#allocation12_spill] sm:$0xff] %v8110_v43  ;;  %1771 = vperm.xlu2 %7392, %v8110_v43  }
 0x30f   : > { %7074 = vmatmul.msk.f32.gmra.mxu3 %vm1271_vm9, %v7010_v46  ;;  %v7024_v46 = vsel %vm1009_vm2, 1.0, %v7587_v9 }
 0x312   : > { %v8116_v47 = vpop.f32.mrf.mxu3 }
 0x313   : > { %13658 = vst [vmem:[#allocation13_spill] sm:$0xff] %v8116_v47 }
 0x317   : > { %7075 = vmatmul.msk.f32.gmra.mxu3 %vm1271_vm9, %v7011_v48  ;;  %v890_v48 = vpop.permute.xlu0 %889 }
 0x318   : > { %vm1010_vm3 = vcmp.eq.s32.totalorder %v890_v48, %v7984_v62 }
 0x319   : > { %v7025_v15 = vsel %vm1010_vm3, 1.0, %v7587_v9 }
 0x31a   : > { %v8122_v53 = vpop.f32.mrf.mxu3 }
 0x31b   : > { %13659 = vst [vmem:[#allocation14_spill] sm:$0xff] %v8122_v53  ;;  %1781 = vperm.xlu1 %7391, %v8122_v53  }
 0x31f   : > { %7076 = vmatmul.msk.f32.gmra.mxu3 %vm1271_vm9, %v7012_v55 }
 0x322   : > { %v8128_v63 = vpop.f32.mrf.mxu3 }
 0x323   : > { %13660 = vst [vmem:[#allocation15_spill] sm:$0xff] %v8128_v63  ;;  %1786 = vperm.xlu2 %7392, %v8128_v63  }
 0x327   : > { %7077 = vmatmul.msk.f32.gmra.mxu3 %vm1271_vm9, %v7013_v61  ;;  %v896_v61 = vpop.permute.xlu2 %895 }
 0x328   : > { %vm1012_vm5 = vcmp.eq.s32.totalorder %v896_v61, %v7984_v62 }
 0x329   : > { %v7027_v2 = vsel %vm1012_vm5, 1.0, %v7587_v9 }
 0x32a   : > { %v8134_v17 = vpop.f32.mrf.mxu3 }
 0x32b   : > { %13661 = vst [vmem:[#allocation16_spill] sm:$0xff] %v8134_v17 }
 0x32f   : > { %7078 = vmatmul.msk.f32.gmra.mxu3 %vm1271_vm9, %v7014_v0  ;;  %v905_v11 = vpop.permute.xlu2 %904 }
 0x330   : > { %vm1015_vm8 = vcmp.eq.s32.totalorder %v905_v11, %v7984_v62 }
 0x331   : > { %v7030_v21 = vsel %vm1015_vm8, 1.0, %v7587_v9 }
 0x332   : > { %v8140_v54 = vpop.f32.mrf.mxu3 }
 0x333   : > { %13662 = vst [vmem:[#allocation17_spill] sm:$0xff] %v8140_v54  ;;  %1796 = vperm.xlu1 %7391, %v8140_v54  }
 0x337   : > { %7079 = vmatmul.msk.f32.gmra.mxu3 %vm1271_vm9, %v7015_v5  ;;  %v899_v5 = vpop.permute.xlu0 %898  ;;  %v914_v34 = vpop.permute.xlu2 %913 }
 0x338   : > { %vm1013_vm6 = vcmp.eq.s32.totalorder %v899_v5, %v7984_v62  ;;  %vm1018_vm12 = vcmp.eq.s32.totalorder %v914_v34, %v7984_v62  ;;  %v935_v34 = vpop.permute.xlu1 %934 }
 0x339   : > { %v7028_v7 = vsel %vm1013_vm6, 1.0, %v7587_v9  ;;  %vm1025_vm4 = vcmp.eq.s32.totalorder %v935_v34, %v7984_v62 }
 0x33a   : > { %v8146_v36 = vpop.f32.mrf.mxu3 }
 0x33b   : > { %13663 = vst [vmem:[#allocation18_spill] sm:$0xff] %v8146_v36  ;;  %1801 = vperm.xlu2 %7392, %v8146_v36  }
 0x33f   : > { %7080 = vmatmul.msk.f32.gmra.mxu3 %vm1271_vm9, %v7016_v1 }
 0x342   : > { %v8152_v51 = vpop.f32.mrf.mxu3 }
 0x343   : > { %13664 = vst [vmem:[#allocation19_spill] sm:$0xff] %v8152_v51 }
 0x347   : > { %7081 = vmatmul.msk.f32.gmra.mxu3 %vm1271_vm9, %v7017_v28  ;;  %v7029_v28 = vsel %vm1014_vm7, 1.0, %v7587_v9 }
 0x34a   : > { %v8158_v27 = vpop.f32.mrf.mxu3 }
 0x34b   : > { %13665 = vst [vmem:[#allocation20_spill] sm:$0xff] %v8158_v27  ;;  %1811 = vperm.xlu1 %7391, %v8158_v27  }
 0x34f   : > { %7082 = vmatmul.msk.f32.gmra.mxu3 %vm1271_vm9, %v7018_v20 }
 0x352   : > { %v8164_v22 = vpop.f32.mrf.mxu3 }
 0x353   : > { %13666 = vst [vmem:[#allocation21_spill] sm:$0xff] %v8164_v22  ;;  %1816 = vperm.xlu2 %7392, %v8164_v22  }
 0x357   : > { %7083 = vmatmul.msk.f32.gmra.mxu3 %vm1271_vm9, %v7019_v14  ;;  %v908_v14 = vpop.permute.xlu0 %907 }
 0x358   : > { %vm1016_vm10 = vcmp.eq.s32.totalorder %v908_v14, %v7984_v62 }
 0x359   : > { %v7031_v19 = vsel %vm1016_vm10, 1.0, %v7587_v9 }
 0x35a   : > { %v8170_v23 = vpop.f32.mrf.mxu3 }
 0x35b   : > { %13667 = vst [vmem:[#allocation22_spill] sm:$0xff] %v8170_v23 }
 0x35f   : > { %7084 = vmatmul.msk.f32.gmra.mxu3 %vm1271_vm9, %v7020_v25  ;;  %v917_v42 = vpop.permute.xlu0 %916 }
 0x360   : > { %vm1019_vm13 = vcmp.eq.s32.totalorder %v917_v42, %v7984_v62  ;;  %v7040_v42 = vsel %vm1025_vm4, 1.0, %v7587_v9 }
 0x361   : > { %v7034_v18 = vsel %vm1019_vm13, 1.0, %v7587_v9 }
 0x362   : > { %v8176_v30 = vpop.f32.mrf.mxu3 }
 0x363   : > { %13668 = vst [vmem:[#allocation23_spill] sm:$0xff] %v8176_v30  ;;  %1826 = vperm.xlu1 %7391, %v8176_v30  }
 0x367   : > { %7085 = vmatmul.msk.f32.gmra.mxu3 %vm1271_vm9, %v7021_v32  ;;  %v7032_v32 = vsel %vm1017_vm11, 1.0, %v7587_v9  ;;  %v926_v5 = vpop.permute.xlu0 %925 }
 0x368   : > { %vm1022_vm1 = vcmp.eq.s32.totalorder %v926_v5, %v7984_v62 }
 0x369   : > { %v7037_v24 = vsel %vm1022_vm1, 1.0, %v7587_v9 }
 0x36a   : > { %v8182_v35 = vpop.f32.mrf.mxu3 }
 0x36b   : > { %13669 = vst [vmem:[#allocation24_spill] sm:$0xff] %v8182_v35  ;;  %1831 = vperm.xlu2 %7392, %v8182_v35  }
 0x36f   : > { %7086 = vmatmul.msk.f32.gmra.mxu3 %vm1271_vm9, %v7022_v33  ;;  %v932_v14 = vpop.permute.xlu0 %931 }
 0x370   : > { %v8188_v37 = vpop.f32.mrf.mxu2  ;;  %vm1024_vm3 = vcmp.eq.s32.totalorder %v932_v14, %v7984_v62 }
 0x371   : > { %13670 = vst [vmem:[#allocation25_spill] sm:$0xff] %v8188_v37  ;;  %1756 = vperm.xlu0 %7390, %v8188_v37  }
 0x372   : > { %v8191_v39 = vpop.f32.mrf.mxu3 }
 0x373   : > { %13671 = vst [vmem:[#allocation26_spill] sm:$0xff] %v8191_v39 }
 0x377   : > { %7087 = vmatmul.msk.f32.gmra.mxu3 %vm1271_vm9, %v7023_v40  ;;  %v7033_v40 = vsel %vm1018_vm12, 1.0, %v7587_v9 }
 0x379   : > { %1776 = vperm.xlu0 %7390, %v8116_v47  }
 0x37a   : > { %v8198_v13 = vpop.f32.mrf.mxu3 }
 0x37b   : > { %13672 = vst [vmem:[#allocation27_spill] sm:$0xff] %v8198_v13  ;;  %1841 = vperm.xlu1 %7391, %v8198_v13  }
 0x37f   : > { %7088 = vmatmul.msk.f32.gmra.mxu3 %vm1271_vm9, %v7024_v46 }
 0x381   : > { %1791 = vperm.xlu0 %7390, %v8134_v17  }
 0x382   : > { %v8205_v10 = vpop.f32.mrf.mxu3 }
 0x383   : > { %13673 = vst [vmem:[#allocation28_spill] sm:$0xff] %v8205_v10  ;;  %1846 = vperm.xlu2 %7392, %v8205_v10  }
 0x387   : > { %7089 = vmatmul.msk.f32.gmra.mxu3 %vm1271_vm9, %v7025_v15  ;;  %v7035_v15 = vsel %vm1020_vm14, 1.0, %v7587_v9 }
 0x389   : > { %1806 = vperm.xlu0 %7390, %v8152_v51  }
 0x38a   : > { %v8212_v55 = vpop.f32.mrf.mxu3 }
 0x38b   : > { %13674 = vst [vmem:[#allocation29_spill] sm:$0xff] %v8212_v55 }
 0x38f   : > { %7090 = vmatmul.msk.f32.gmra.mxu3 %vm1271_vm9, %v7026_v60  ;;  %v923_v60 = vpop.permute.xlu2 %922 }
 0x390   : > { %vm1021_vm15 = vcmp.eq.s32.totalorder %v923_v60, %v7984_v62 }
 0x391   : > { %1821 = vperm.xlu0 %7390, %v8170_v23  }
 0x392   : > { %v8219_v0 = vpop.f32.mrf.mxu3 }
 0x393   : > { %13675 = vst [vmem:[#allocation30_spill] sm:$0xff] %v8219_v0  ;;  %1856 = vperm.xlu1 %7391, %v8219_v0  }
 0x397   : > { %7091 = vmatmul.msk.f32.gmra.mxu3 %vm1271_vm9, %v7027_v2  ;;  %v7036_v2 = vsel %vm1021_vm15, 1.0, %v7587_v9 }
 0x399   : > { %1836 = vperm.xlu0 %7390, %v8191_v39  }
 0x39a   : > { %v8226_v8 = vpop.f32.mrf.mxu3 }
 0x39b   : > { %13676 = vst [vmem:[#allocation31_spill] sm:$0xff] %v8226_v8  ;;  %1861 = vperm.xlu2 %7392, %v8226_v8  }
 0x39f   : > { %7092 = vmatmul.msk.f32.gmra.mxu3 %vm1271_vm9, %v7028_v7 }
 0x3a1   : > { %1851 = vperm.xlu0 %7390, %v8212_v55  }
 0x3a2   : > { %v8233_v1 = vpop.f32.mrf.mxu3 }
 0x3a3   : > { %13677 = vst [vmem:[#allocation32_spill] sm:$0xff] %v8233_v1 }
 0x3a7   : > { %7093 = vmatmul.msk.f32.gmra.mxu3 %vm1271_vm9, %v7029_v28  ;;  %v929_v28 = vpop.permute.xlu2 %928 }
 0x3a8   : > { %vm1023_vm2 = vcmp.eq.s32.totalorder %v929_v28, %v7984_v62  ;;  %v944_v28 = vpop.permute.xlu1 %943 }
 0x3a9   : > { %1866 = vperm.xlu0 %7390, %v8233_v1   ;;  %vm1028_vm7 = vcmp.eq.s32.totalorder %v944_v28, %v7984_v62 }
 0x3aa   : > { %v8240_v20 = vpop.f32.mrf.mxu3  ;;  %v7043_v14 = vsel %vm1028_vm7, 1.0, %v7587_v9 }
 0x3ab   : > { %13678 = vst [vmem:[#allocation33_spill] sm:$0xff] %v8240_v20  ;;  %1871 = vperm.xlu1 %7391, %v8240_v20  }
 0x3af   : > { %7094 = vmatmul.msk.f32.gmra.mxu3 %vm1271_vm9, %v7030_v21  ;;  %v7038_v21 = vsel %vm1023_vm2, 1.0, %v7587_v9 }
 0x3b2   : > { %v8246_v25 = vpop.f32.mrf.mxu3 }
 0x3b3   : > { %13679 = vst [vmem:[#allocation34_spill] sm:$0xff] %v8246_v25  ;;  %1876 = vperm.xlu2 %7392, %v8246_v25  }
 0x3b7   : > { %7095 = vmatmul.msk.f32.gmra.mxu3 %vm1271_vm9, %v7031_v19 }
 0x3ba   : > { %v8252_v26 = vpop.f32.mrf.mxu3 }
 0x3bb   : > { %13680 = vst [vmem:[#allocation35_spill] sm:$0xff] %v8252_v26  ;;  %1881 = vperm.xlu0 %7390, %v8252_v26  }
 0x3bf   : > { %7096 = vmatmul.msk.f32.gmra.mxu3 %vm1271_vm9, %v7032_v32  ;;  %v7039_v32 = vsel %vm1024_vm3, 1.0, %v7587_v9 }
 0x3c2   : > { %v8259_v33 = vpop.f32.mrf.mxu3 }
 0x3c3   : > { %13681 = vst [vmem:[#allocation36_spill] sm:$0xff] %v8259_v33  ;;  %1886 = vperm.xlu1 %7391, %v8259_v33  }
 0x3c7   : > { %7097 = vmatmul.msk.f32.gmra.mxu3 %vm1271_vm9, %v7033_v40 }
 0x3ca   : > { %v8265_v46 = vpop.f32.mrf.mxu3 }
 0x3cb   : > { %13682 = vst [vmem:[#allocation37_spill] sm:$0xff] %v8265_v46  ;;  %1891 = vperm.xlu2 %7392, %v8265_v46  }
 0x3cf   : > { %7098 = vmatmul.msk.f32.gmra.mxu3 %vm1271_vm9, %v7034_v18  ;;  %v938_v18 = vpop.permute.xlu2 %937 }
 0x3d0   : > { %vm1026_vm5 = vcmp.eq.s32.totalorder %v938_v18, %v7984_v62 }
 0x3d1   : > { %v7041_v60 = vsel %vm1026_vm5, 1.0, %v7587_v9 }
 0x3d2   : > { %v8271_v48 = vpop.f32.mrf.mxu3 }
 0x3d3   : > { %13683 = vst [vmem:[#allocation38_spill] sm:$0xff] %v8271_v48  ;;  %1896 = vperm.xlu0 %7390, %v8271_v48  }
 0x3d7   : > { %7099 = vmatmul.msk.f32.gmra.mxu3 %vm1271_vm9, %v7035_v15 }
 0x3da   : > { %v8278_v61 = vpop.f32.mrf.mxu3 }
 0x3db   : > { %13684 = vst [vmem:[#allocation39_spill] sm:$0xff] %v8278_v61  ;;  %1901 = vperm.xlu1 %7391, %v8278_v61  }
 0x3df   : > { %7100 = vmatmul.msk.f32.gmra.mxu3 %vm1271_vm9, %v7036_v2  ;;  %v941_v2 = vpop.permute.xlu0 %940 }
 0x3e0   : > { %vm1027_vm6 = vcmp.eq.s32.totalorder %v941_v2, %v7984_v62 }
 0x3e2   : > { %v8284_v7 = vpop.f32.mrf.mxu3 }
 0x3e3   : > { %13685 = vst [vmem:[#allocation40_spill] sm:$0xff] %v8284_v7  ;;  %1906 = vperm.xlu2 %7392, %v8284_v7  }
 0x3e7   : > { %7101 = vmatmul.msk.f32.gmra.mxu3 %vm1271_vm9, %v7037_v24  ;;  %v7042_v24 = vsel %vm1027_vm6, 1.0, %v7587_v9  ;;  %v950_v18 = vpop.permute.xlu0 %949 }
 0x3e8   : > { %vm1030_vm10 = vcmp.eq.s32.totalorder %v950_v18, %v7984_v62 }
 0x3e9   : > { %v7045_v2 = vsel %vm1030_vm10, 1.0, %v7587_v9 }
 0x3ea   : > { %v8290_v11 = vpop.f32.mrf.mxu3 }
 0x3eb   : > { %13686 = vst [vmem:[#allocation41_spill] sm:$0xff] %v8290_v11  ;;  %1911 = vperm.xlu0 %7390, %v8290_v11  }
 0x3ef   : > { %7102 = vmatmul.msk.f32.gmra.mxu3 %vm1271_vm9, %v7038_v21 }
 0x3f2   : > { %v8296_v19 = vpop.f32.mrf.mxu3 }
 0x3f3   : > { %13687 = vst [vmem:[#allocation42_spill] sm:$0xff] %v8296_v19  ;;  %1916 = vperm.xlu1 %7391, %v8296_v19  }
 0x3f7   : > { %7103 = vmatmul.msk.f32.gmra.mxu3 %vm1271_vm9, %v7039_v32  ;;  %v947_v32 = vpop.permute.xlu2 %946 }
 0x3f8   : > { %vm1029_vm8 = vcmp.eq.s32.totalorder %v947_v32, %v7984_v62 }
 0x3fa   : > { %v8302_v40 = vpop.f32.mrf.mxu3 }
 0x3fb   : > { %13688 = vst [vmem:[#allocation43_spill] sm:$0xff] %v8302_v40  ;;  %1921 = vperm.xlu2 %7392, %v8302_v40  }
 0x3ff   : > { %7104 = vmatmul.msk.f32.gmra.mxu3 %vm1271_vm9, %v7040_v42  ;;  %v7044_v42 = vsel %vm1029_vm8, 1.0, %v7587_v9  ;;  %v956_v32 = vpop.permute.xlu2 %955 }
 0x400   : > { %vm1032_vm12 = vcmp.eq.s32.totalorder %v956_v32, %v7984_v62 }
 0x401   : > { %v7047_v18 = vsel %vm1032_vm12, 1.0, %v7587_v9 }
 0x402   : > { %v8308_v15 = vpop.f32.mrf.mxu3 }
 0x403   : > { %13689 = vst [vmem:[#allocation44_spill] sm:$0xff] %v8308_v15  ;;  %1926 = vperm.xlu0 %7390, %v8308_v15  }
 0x407   : > { %7105 = vmatmul.msk.f32.gmra.mxu3 %vm1271_vm9, %v7041_v60 }
 0x40a   : > { %v8314_v5 = vpop.f32.mrf.mxu3 }
 0x40b   : > { %13690 = vst [vmem:[#allocation45_spill] sm:$0xff] %v8314_v5  ;;  %1931 = vperm.xlu1 %7391, %v8314_v5  }
 0x40f   : > { %7106 = vmatmul.msk.f32.gmra.mxu3 %vm1271_vm9, %v7042_v24  ;;  %v953_v24 = vpop.permute.xlu1 %952 }
 0x410   : > { %vm1031_vm11 = vcmp.eq.s32.totalorder %v953_v24, %v7984_v62 }
 0x412   : > { %v8320_v21 = vpop.f32.mrf.mxu3 }
 0x413   : > { %13691 = vst [vmem:[#allocation46_spill] sm:$0xff] %v8320_v21  ;;  %1936 = vperm.xlu2 %7392, %v8320_v21  }
 0x417   : > { %7107 = vmatmul.msk.f32.gmra.mxu3 %vm1271_vm9, %v7043_v14  ;;  %v7046_v14 = vsel %vm1031_vm11, 1.0, %v7587_v9  ;;  %vm6362_vm11 = vcmask 523520  }
 0x41a   : > { %v8326_v34 = vpop.f32.mrf.mxu3 }
 0x41b   : > { %13692 = vst [vmem:[#allocation47_spill] sm:$0xff] %v8326_v34  ;;  %1941 = vperm.xlu0 %7390, %v8326_v34  }
 0x41f   : > { %7108 = vmatmul.msk.f32.gmra.mxu3 %vm1271_vm9, %v7044_v42 }
 0x422   : > { %v8332_v60 = vpop.f32.mrf.mxu3 }
 0x423   : > { %13693 = vst [vmem:[#allocation48_spill] sm:$0xff] %v8332_v60  ;;  %1946 = vperm.xlu1 %7391, %v8332_v60  }
 0x427   : > { %7109 = vmatmul.msk.f32.gmra.mxu3 %vm1271_vm9, %v7045_v2  ;;  %v959_v2 = vpop.permute.xlu0 %958 }
 0x428   : > { %vm1033_vm13 = vcmp.eq.s32.totalorder %v959_v2, %v7984_v62 }
 0x429   : > { %v7048_v24 = vsel %vm1033_vm13, 1.0, %v7587_v9 }
 0x42a   : > { %v8338_v28 = vpop.f32.mrf.mxu3 }
 0x42b   : > { %13694 = vst [vmem:[#allocation49_spill] sm:$0xff] %v8338_v28  ;;  %1951 = vperm.xlu2 %7392, %v8338_v28  }
 0x42f   : > { %7110 = vmatmul.msk.f32.gmra.mxu3 %vm1271_vm9, %v7046_v14  ;;  %v962_v14 = vpop.permute.xlu1 %961 }
 0x430   : > { %vm1034_vm14 = vcmp.eq.s32.totalorder %v962_v14, %v7984_v62 }
 0x431   : > { %v7049_v32 = vsel %vm1034_vm14, 1.0, %v7587_v9 }
 0x432   : > { %v8344_v42 = vpop.f32.mrf.mxu3 }
 0x433   : > { %13695 = vst [vmem:[#allocation50_spill] sm:$0xff] %v8344_v42  ;;  %1956 = vperm.xlu0 %7390, %v8344_v42  }
 0x437   : > { %7111 = vmatmul.msk.f32.gmra.mxu3 %vm1271_vm9, %v7047_v18  ;;  %v965_v18 = vpop.permute.xlu2 %964 }
 0x438   : > { %vm1035_vm15 = vcmp.eq.s32.totalorder %v965_v18, %v7984_v62 }
 0x439   : > { %v7050_v2 = vsel %vm1035_vm15, 1.0, %v7587_v9 }
 0x43a   : > { %v8350_v56 = vpop.f32.mrf.mxu3 }
 0x43b   : > { %13696 = vst [vmem:[#allocation51_spill] sm:$0xff] %v8350_v56  ;;  %1961 = vperm.xlu1 %7391, %v8350_v56  }
 0x43f   : > { %7112 = vmatmul.msk.f32.gmra.mxu3 %vm1271_vm9, %v7048_v24  ;;  %v968_v24 = vpop.permute.xlu0 %967 }
 0x440   : > { %vm1036_vm1 = vcmp.eq.s32.totalorder %v968_v24, %v7984_v62 }
 0x441   : > { %v7051_v14 = vsel %vm1036_vm1, 1.0, %v7587_v9 }
 0x442   : > { %v8356_v58 = vpop.f32.mrf.mxu3 }
 0x443   : > { %13697 = vst [vmem:[#allocation52_spill] sm:$0xff] %v8356_v58  ;;  %1966 = vperm.xlu2 %7392, %v8356_v58  }
 0x447   : > { %7113 = vmatmul.msk.f32.gmra.mxu3 %vm1271_vm9, %v7049_v32  ;;  %v971_v32 = vpop.permute.xlu1 %970  ;;  %v8408_v29 = vpop.permute.xlu0 %1756 }
 0x448   : > { %vm1037_vm2 = vcmp.eq.s32.totalorder %v971_v32, %v7984_v62  ;;  %13709 = vst [vmem:[#allocation64_spill] sm:$0xff] %v8408_v29 }
 0x449   : > { %v7052_v18 = vsel %vm1037_vm2, 1.0, %v7587_v9 }
 0x44a   : > { %v8362_v57 = vpop.f32.mrf.mxu3 }
 0x44b   : > { %13698 = vst [vmem:[#allocation53_spill] sm:$0xff] %v8362_v57  ;;  %1971 = vperm.xlu0 %7390, %v8362_v57  }
 0x44f   : > { %7114 = vmatmul.msk.f32.gmra.mxu3 %vm1271_vm9, %v7050_v2  ;;  %v974_v2 = vpop.permute.xlu2 %973 }
 0x450   : > { %vm1038_vm3 = vcmp.eq.s32.totalorder %v974_v2, %v7984_v62  ;;  %v8403_v2 = vpop.permute.xlu1 %2141 }
 0x451   : > { %v7053_v24 = vsel %vm1038_vm3, 1.0, %v7587_v9 }
 0x452   : > { %v8368_v4 = vpop.f32.mrf.mxu3 }
 0x453   : > { %13699 = vst [vmem:[#allocation54_spill] sm:$0xff] %v8368_v4  ;;  %1976 = vperm.xlu1 %7391, %v8368_v4  }
 0x457   : > { %7115 = vmatmul.msk.f32.gmra.mxu3 %vm1271_vm9, %v7051_v14 }
 0x45a   : > { %v8374_v3 = vpop.f32.mrf.mxu3 }
 0x45b   : > { %13700 = vst [vmem:[#allocation55_spill] sm:$0xff] %v8374_v3  ;;  %1981 = vperm.xlu2 %7392, %v8374_v3  }
 0x45f   : > { %7116 = vmatmul.msk.f32.gmra.mxu3 %vm1271_vm9, %v7052_v18 }
 0x462   : > { %v8380_v41 = vpop.f32.mrf.mxu3 }
 0x463   : > { %13701 = vst [vmem:[#allocation56_spill] sm:$0xff] %v8380_v41  ;;  %1986 = vperm.xlu0 %7390, %v8380_v41   ;;  %v1692_v41 = vsub.f32 %v8104_v12, %v7933_v45 }
 0x467   : > { %7117 = vmatmul.msk.f32.gmra.mxu3 %vm1271_vm9, %v7053_v24  ;;  %v8406_v24 = vpop.permute.xlu2 %1766  ;;  %vm2208_vm9 = vcmask 785920  }
 0x468   : > { %13708 = vst [vmem:[#allocation63_spill] sm:$0xff] %v8406_v24 }
 0x46a   : > { %v8386_v14 = vpop.f32.mrf.mxu3 }
 0x46b   : > { %13702 = vst [vmem:[#allocation57_spill] sm:$0xff] %v8386_v14  ;;  %1991 = vperm.xlu1 %7391, %v8386_v14  }
 0x472   : > { %v8389_v32 = vpop.f32.mrf.mxu3 }
 0x473   : > { %13703 = vst [vmem:[#allocation58_spill] sm:$0xff] %v8389_v32  ;;  %1996 = vperm.xlu2 %7392, %v8389_v32  }
 0x47a   : > { %v8392_v18 = vpop.f32.mrf.mxu3 }
 0x47b   : > { %13704 = vst [vmem:[#allocation59_spill] sm:$0xff] %v8392_v18  ;;  %2001 = vperm.xlu0 %7390, %v8392_v18   ;;  %v1690_v18 = vsub.f32 %v8188_v37, %v7994_v6  ;;  %v2076_v37 = vmul.f32 %v8406_v24, %v1692_v41  ;;  %v1694_v41 = vsub.f32 %v8116_v47, %v7940_v50 }
 0x47d   : > { %v2074_v14 = vmul.f32 %v8408_v29, %v1690_v18  ;;  %v1693_v18 = vsub.f32 %v8110_v43, %v7938_v49 }
 0x47f   : > { %v8424_v3 = vadd.f32 %v8403_v2, %v2074_v14 }
 0x481   : > { %13712 = vst [vmem:[#allocation67_spill] sm:$0xff] %v8424_v3  ;;  %v2343_v14 = vmul.f32 %v8424_v3, %v8424_v3 }
 0x482   : > { %v8395_v31 = vpop.f32.mrf.mxu3 }
 0x483   : > { %13705 = vst [vmem:[#allocation60_spill] sm:$0xff] %v8395_v31  ;;  %2006 = vperm.xlu1 %7391, %v8395_v31   ;;  %v8414_v31 = vpop.permute.xlu1 %1761  ;;  %v2407_v12 = vsel %vm2208_vm9, %v2343_v14, 0.0 }
 0x484   : > { %13711 = vst [vmem:[#allocation66_spill] sm:$0xff] %v8414_v31 }
 0x48a   : > { %v8398_v62 = vpop.f32.mrf.mxu3 }
 0x48b   : > { %13706 = vst [vmem:[#allocation61_spill] sm:$0xff] %v8398_v62  ;;  %2011 = vperm.xlu2 %7392, %v8398_v62   ;;  %v1691_v62 = vsub.f32 %v8097_v38, %v7931_v44  ;;  %v8434_v38 = vpop.permute.xlu0 %1776  ;;  %v8455_v47 = vpop.permute.xlu1 %1781 }
 0x48c   : > { %13716 = vst [vmem:[#allocation71_spill] sm:$0xff] %v8434_v38  ;;  %v2078_v29 = vmul.f32 %v8434_v38, %v1694_v41 }
 0x48d   : > { %13718 = vst [vmem:[#allocation73_spill] sm:$0xff] %v8455_v47 }
 0x48e   : > { %v8466_v41 = vadd.f32 %v8403_v2, %v2078_v29 }
 0x492   : > { %v8401_v9 = vpop.f32.mrf.mxu3 }
 0x493   : > { %13707 = vst [vmem:[#allocation62_spill] sm:$0xff] %v8401_v9  ;;  %2016 = vperm.xlu0 %7390, %v8401_v9   ;;  %v2075_v9 = vmul.f32 %v8414_v31, %v1691_v62  ;;  %v8444_v62 = vadd.f32 %v8403_v2, %v2076_v37  ;;  %v2209_v31 = vsel %vm2208_vm9, %v8424_v3, 0.0  ;;  %v1695_v37 = vsub.f32 %v8122_v53, %v7942_v52  ;;  %v8478_v53 = vpop.permute.xlu0 %1791  ;;  %v8500_v42 = vpop.permute.xlu1 %1796 }
 0x494   : > { %13721 = vst [vmem:[#allocation76_spill] sm:$0xff] %v8478_v53 }
 0x495   : > { %v8428_v4 = vadd.f32 %v8403_v2, %v2075_v9  ;;  %13717 = vst [vmem:[#allocation72_spill] sm:$0xff] %v8444_v62  ;;  %v2345_v3 = vmul.f32 %v8444_v62, %v8444_v62 }
 0x496   : > { %13723 = vst [vmem:[#allocation78_spill] sm:$0xff] %v8500_v42 }
 0x497   : > { %13713 = vst [vmem:[#allocation68_spill] sm:$0xff] %v8428_v4  ;;  %v2344_v24 = vmul.f32 %v8428_v4, %v8428_v4  ;;  %v2210_v43 = vsel %vm2208_vm9, %v8428_v4, 0.0  ;;  %v2079_v4 = vmul.f32 %v8455_v47, %v1695_v37  ;;  %v1697_v37 = vsub.f32 %v8134_v17, %v7947_v59 }
 0x49a   : > { %v8412_v32 = vpop.f32.mrf.mxu3 }
 0x49b   : > { %13710 = vst [vmem:[#allocation65_spill] sm:$0xff] %v8412_v32  ;;  %2021 = vperm.xlu1 %7391, %v8412_v32   ;;  %v8432_v32 = vpop.permute.xlu2 %1771 }
 0x49c   : > { %13715 = vst [vmem:[#allocation70_spill] sm:$0xff] %v8432_v32  ;;  %v2077_v9 = vmul.f32 %v8432_v32, %v1693_v18  ;;  %v2408_v32 = vsel %vm2208_vm9, %v2344_v24, 0.0  ;;  %v1696_v24 = vsub.f32 %v8128_v63, %v7949_v16 }
 0x49d   : > { %v2409_v14 = vadd.f32 %v2408_v32, %v2407_v12  ;;  %v2410_v12 = vsel %vm2208_vm9, %v2345_v3, 0.0  ;;  %v2347_v32 = vmul.f32 %v8466_v41, %v8466_v41  ;;  %v2081_v3 = vmul.f32 %v8478_v53, %v1697_v37  ;;  %v8520_v37 = vpop.permute.xlu0 %1806 }
 0x49e   : > { %v8460_v18 = vadd.f32 %v8403_v2, %v2077_v9  ;;  %13726 = vst [vmem:[#allocation81_spill] sm:$0xff] %v8520_v37 }
 0x49f   : > { %v2414_v56 = vsel %vm2208_vm9, %v2347_v32, 0.0 }
 0x4a0   : > { %v2346_v29 = vmul.f32 %v8460_v18, %v8460_v18  ;;  %v2214_v47 = vsel %vm2208_vm9, %v8460_v18, 0.0 }
 0x4a2   : > { %v8430_v57 = vpop.f32.mrf.mxu3  ;;  %v2412_v58 = vsel %vm2208_vm9, %v2346_v29, 0.0 }
 0x4a3   : > { %13714 = vst [vmem:[#allocation69_spill] sm:$0xff] %v8430_v57  ;;  %2026 = vperm.xlu2 %7392, %v8430_v57   ;;  %v2211_v57 = vadd.f32 %v2210_v43, %v2209_v31  ;;  %v2212_v31 = vsel %vm2208_vm9, %v8444_v62, 0.0  ;;  %v8474_v43 = vpop.permute.xlu2 %1786  ;;  %v2411_v62 = vadd.f32 %v2410_v12, %v2409_v14 }
 0x4a4   : > { %13720 = vst [vmem:[#allocation75_spill] sm:$0xff] %v8474_v43  ;;  %v2080_v63 = vmul.f32 %v8474_v43, %v1696_v24 }
 0x4a5   : > { %v2213_v9 = vadd.f32 %v2212_v31, %v2211_v57  ;;  %v8491_v57 = vadd.f32 %v8403_v2, %v2079_v4  ;;  %v2216_v31 = vsel %vm2208_vm9, %v8466_v41, 0.0  ;;  %v2413_v14 = vadd.f32 %v2412_v58, %v2411_v62 }
 0x4a6   : > { %v8504_v4 = vadd.f32 %v8403_v2, %v2080_v63  ;;  %v1699_v63 = vsub.f32 %v8146_v36, %v7931_v44 }
 0x4a7   : > { %v2348_v24 = vmul.f32 %v8491_v57, %v8491_v57  ;;  %v2415_v29 = vadd.f32 %v2414_v56, %v2413_v14  ;;  %v2218_v32 = vsel %vm2208_vm9, %v8491_v57, 0.0  ;;  %v1700_v14 = vsub.f32 %v8152_v51, %v7933_v45 }
 0x4a8   : > { %13724 = vst [vmem:[#allocation79_spill] sm:$0xff] %v8504_v4 }
 0x4aa   : > { %v8468_v38 = vpop.f32.mrf.mxu3 }
 0x4ab   : > { %13719 = vst [vmem:[#allocation74_spill] sm:$0xff] %v8468_v38  ;;  %2031 = vperm.xlu0 %7390, %v8468_v38   ;;  %v2215_v38 = vadd.f32 %v2214_v47, %v2213_v9  ;;  %v1698_v47 = vsub.f32 %v8140_v54, %v7994_v6  ;;  %v8511_v9 = vadd.f32 %v8403_v2, %v2081_v3  ;;  %v2416_v3 = vsel %vm2208_vm9, %v2348_v24, 0.0 }
 0x4ac   : > { %v2417_v53 = vadd.f32 %v2416_v3, %v2415_v29  ;;  %v2084_v24 = vmul.f32 %v8520_v37, %v1700_v14  ;;  %v8543_v29 = vpop.permute.xlu1 %1811  ;;  %v1701_v14 = vsub.f32 %v8158_v27, %v7938_v49 }
 0x4ad   : > { %v2217_v12 = vadd.f32 %v2216_v31, %v2215_v38  ;;  %v2082_v58 = vmul.f32 %v8500_v42, %v1698_v47  ;;  %v8516_v38 = vpop.permute.xlu2 %1801  ;;  %v2349_v31 = vmul.f32 %v8504_v4, %v8504_v4  ;;  %v2350_v56 = vmul.f32 %v8511_v9, %v8511_v9  ;;  %13729 = vst [vmem:[#allocation84_spill] sm:$0xff] %v8543_v29 }
 0x4ae   : > { %13725 = vst [vmem:[#allocation80_spill] sm:$0xff] %v8516_v38  ;;  %v2220_v47 = vsel %vm2208_vm9, %v8504_v4, 0.0  ;;  %v2083_v43 = vmul.f32 %v8516_v38, %v1699_v63 }
 0x4af   : > { %v2219_v62 = vadd.f32 %v2218_v32, %v2217_v12  ;;  %v8533_v12 = vadd.f32 %v8403_v2, %v2082_v58  ;;  %v2222_v32 = vsel %vm2208_vm9, %v8511_v9, 0.0  ;;  %v2418_v51 = vsel %vm2208_vm9, %v2349_v31, 0.0 }
 0x4b0   : > { %v2420_v54 = vsel %vm2208_vm9, %v2350_v56, 0.0  ;;  %v2419_v63 = vadd.f32 %v2418_v51, %v2417_v53  ;;  %v8546_v58 = vadd.f32 %v8403_v2, %v2083_v43  ;;  %v2085_v56 = vmul.f32 %v8543_v29, %v1701_v14  ;;  %v8562_v43 = vpop.permute.xlu0 %1821 }
 0x4b1   : > { %13727 = vst [vmem:[#allocation82_spill] sm:$0xff] %v8533_v12  ;;  %v2221_v36 = vadd.f32 %v2220_v47, %v2219_v62  ;;  %v2351_v38 = vmul.f32 %v8533_v12, %v8533_v12  ;;  %v8553_v62 = vadd.f32 %v8403_v2, %v2084_v24  ;;  %v2224_v31 = vsel %vm2208_vm9, %v8533_v12, 0.0 }
 0x4b2   : > { %v8498_v17 = vpop.f32.mrf.mxu3  ;;  %13730 = vst [vmem:[#allocation85_spill] sm:$0xff] %v8546_v58  ;;  %v2421_v47 = vadd.f32 %v2420_v54, %v2419_v63  ;;  %v1703_v63 = vsub.f32 %v8170_v23, %v7942_v52  ;;  %v2226_v29 = vsel %vm2208_vm9, %v8546_v58, 0.0 }
 0x4b3   : > { %13722 = vst [vmem:[#allocation77_spill] sm:$0xff] %v8498_v17  ;;  %2036 = vperm.xlu1 %7391, %v8498_v17   ;;  %v2223_v3 = vadd.f32 %v2222_v32, %v2221_v36  ;;  %v1702_v36 = vsub.f32 %v8164_v22, %v7940_v50  ;;  %v2352_v32 = vmul.f32 %v8546_v58, %v8546_v58  ;;  %v2422_v24 = vsel %vm2208_vm9, %v2351_v38, 0.0 }
 0x4b4   : > { %13732 = vst [vmem:[#allocation87_spill] sm:$0xff] %v8562_v43  ;;  %v2353_v54 = vmul.f32 %v8553_v62, %v8553_v62  ;;  %v2423_v37 = vadd.f32 %v2422_v24, %v2421_v47  ;;  %v2228_v38 = vsel %vm2208_vm9, %v8553_v62, 0.0  ;;  %v2087_v22 = vmul.f32 %v8562_v43, %v1703_v63  ;;  %v8585_v12 = vpop.permute.xlu1 %1826 }
 0x4b5   : > { %v8558_v53 = vpop.permute.xlu2 %1816  ;;  %v2225_v51 = vadd.f32 %v2224_v31, %v2223_v3  ;;  %v8578_v31 = vadd.f32 %v8403_v2, %v2085_v56  ;;  %v2424_v23 = vsel %vm2208_vm9, %v2352_v32, 0.0  ;;  %13735 = vst [vmem:[#allocation90_spill] sm:$0xff] %v8585_v12 }
 0x4b6   : > { %13731 = vst [vmem:[#allocation86_spill] sm:$0xff] %v8558_v53  ;;  %v2086_v3 = vmul.f32 %v8558_v53, %v1702_v36  ;;  %v2426_v4 = vsel %vm2208_vm9, %v2353_v54, 0.0  ;;  %v2425_v47 = vadd.f32 %v2424_v23, %v2423_v37  ;;  %v1704_v36 = vsub.f32 %v8176_v30, %v7949_v16 }
 0x4b7   : > { %13734 = vst [vmem:[#allocation89_spill] sm:$0xff] %v8578_v31  ;;  %v2227_v27 = vadd.f32 %v2226_v29, %v2225_v51  ;;  %v2354_v56 = vmul.f32 %v8578_v31, %v8578_v31  ;;  %v8595_v63 = vadd.f32 %v8403_v2, %v2087_v22  ;;  %v2230_v51 = vsel %vm2208_vm9, %v8578_v31, 0.0 }
 0x4b8   : > { %v8588_v58 = vadd.f32 %v8403_v2, %v2086_v3  ;;  %v2427_v29 = vadd.f32 %v2426_v4, %v2425_v47  ;;  %v2088_v32 = vmul.f32 %v8585_v12, %v1704_v36  ;;  %v1705_v37 = vsub.f32 %v8182_v35, %v7947_v59  ;;  %v8606_v3 = vpop.permute.xlu0 %1836 }
 0x4b9   : > { %v2229_v24 = vadd.f32 %v2228_v38, %v2227_v27  ;;  %13739 = vst [vmem:[#allocation94_spill] sm:$0xff] %v8606_v3  ;;  %v2428_v4 = vsel %vm2208_vm9, %v2354_v56, 0.0  ;;  %v2356_v38 = vmul.f32 %v8595_v63, %v8595_v63  ;;  %v1706_v47 = vsub.f32 %v8191_v39, %v7994_v6 }
 0x4ba   : > { %v8538_v42 = vpop.f32.mrf.mxu3  ;;  %13736 = vst [vmem:[#allocation91_spill] sm:$0xff] %v8588_v58  ;;  %v2355_v22 = vmul.f32 %v8588_v58, %v8588_v58  ;;  %v2232_v36 = vsel %vm2208_vm9, %v8588_v58, 0.0  ;;  %v2429_v12 = vadd.f32 %v2428_v4, %v2427_v29  ;;  %v2234_v43 = vsel %vm2208_vm9, %v8595_v63, 0.0 }
 0x4bb   : > { %13728 = vst [vmem:[#allocation83_spill] sm:$0xff] %v8538_v42  ;;  %2041 = vperm.xlu2 %7392, %v8538_v42   ;;  %v2231_v54 = vadd.f32 %v2230_v51, %v2229_v24  ;;  %v8620_v51 = vadd.f32 %v8403_v2, %v2088_v32  ;;  %v2090_v56 = vmul.f32 %v8606_v3, %v1706_v47  ;;  %v2432_v30 = vsel %vm2208_vm9, %v2356_v38, 0.0 }
 0x4bc   : > { %v2430_v35 = vsel %vm2208_vm9, %v2355_v22, 0.0  ;;  %v8627_v39 = vpop.permute.xlu1 %1841 }
 0x4bd   : > { %v8602_v27 = vpop.permute.xlu2 %1831  ;;  %v2233_v53 = vadd.f32 %v2232_v36, %v2231_v54  ;;  %13740 = vst [vmem:[#allocation95_spill] sm:$0xff] %v8627_v39  ;;  %v2431_v31 = vadd.f32 %v2430_v35, %v2429_v12  ;;  %v2357_v32 = vmul.f32 %v8620_v51, %v8620_v51  ;;  %v8637_v4 = vadd.f32 %v8403_v2, %v2090_v56 }
 0x4be   : > { %13738 = vst [vmem:[#allocation93_spill] sm:$0xff] %v8602_v27  ;;  %v2089_v24 = vmul.f32 %v8602_v27, %v1705_v37  ;;  %v1707_v37 = vsub.f32 %v8198_v13, %v7931_v44  ;;  %v2236_v35 = vsel %vm2208_vm9, %v8620_v51, 0.0 }
 0x4bf   : > { %v2235_v58 = vadd.f32 %v2234_v43, %v2233_v53  ;;  %v2433_v22 = vadd.f32 %v2432_v30, %v2431_v31  ;;  %v1708_v43 = vsub.f32 %v8205_v10, %v7933_v45  ;;  %v2434_v30 = vsel %vm2208_vm9, %v2357_v32, 0.0 }
 0x4c0   : > { %v8630_v29 = vadd.f32 %v8403_v2, %v2089_v24  ;;  %v2091_v12 = vmul.f32 %v8627_v39, %v1707_v37  ;;  %v8649_v47 = vpop.permute.xlu0 %1851  ;;  %v2359_v31 = vmul.f32 %v8637_v4, %v8637_v4  ;;  %v1709_v24 = vsub.f32 %v8212_v55, %v7938_v49 }
 0x4c1   : > { %v2237_v38 = vadd.f32 %v2236_v35, %v2235_v58  ;;  %13744 = vst [vmem:[#allocation99_spill] sm:$0xff] %v8649_v47  ;;  %v2435_v37 = vadd.f32 %v2434_v30, %v2433_v22  ;;  %v2240_v35 = vsel %vm2208_vm9, %v8637_v4, 0.0 }
 0x4c2   : > { %v8571_v14 = vpop.f32.mrf.mxu3  ;;  %13741 = vst [vmem:[#allocation96_spill] sm:$0xff] %v8630_v29  ;;  %v2358_v36 = vmul.f32 %v8630_v29, %v8630_v29  ;;  %v2238_v56 = vsel %vm2208_vm9, %v8630_v29, 0.0  ;;  %v8662_v58 = vadd.f32 %v8403_v2, %v2091_v12  ;;  %v2093_v32 = vmul.f32 %v8649_v47, %v1709_v24 }
 0x4c3   : > { %13733 = vst [vmem:[#allocation88_spill] sm:$0xff] %v8571_v14  ;;  %2046 = vperm.xlu0 %7390, %v8571_v14   ;;  %v2239_v39 = vadd.f32 %v2238_v56, %v2237_v38  ;;  %v2438_v10 = vsel %vm2208_vm9, %v2359_v31, 0.0  ;;  %v1710_v38 = vsub.f32 %v8219_v0, %v7940_v50 }
 0x4c4   : > { %v2436_v3 = vsel %vm2208_vm9, %v2358_v36, 0.0  ;;  %v8671_v29 = vpop.permute.xlu1 %1856  ;;  %v8682_v36 = vadd.f32 %v8403_v2, %v2093_v32 }
 0x4c5   : > { %v8645_v53 = vpop.permute.xlu2 %1846  ;;  %v2437_v13 = vadd.f32 %v2436_v3, %v2435_v37  ;;  %13746 = vst [vmem:[#allocation101_spill] sm:$0xff] %v8671_v29  ;;  %v2241_v22 = vadd.f32 %v2240_v35, %v2239_v39  ;;  %v2242_v3 = vsel %vm2208_vm9, %v8662_v58, 0.0  ;;  %v2094_v39 = vmul.f32 %v8671_v29, %v1710_v38 }
 0x4c6   : > { %13743 = vst [vmem:[#allocation98_spill] sm:$0xff] %v8645_v53  ;;  %v2092_v27 = vmul.f32 %v8645_v53, %v1708_v43  ;;  %v2360_v43 = vmul.f32 %v8662_v58, %v8662_v58 }
 0x4c7   : > { %13748 = vst [vmem:[#allocation103_spill] sm:$0xff] %v8682_v36  ;;  %v2439_v30 = vadd.f32 %v2438_v10, %v2437_v13  ;;  %v2243_v24 = vadd.f32 %v2242_v3, %v2241_v22  ;;  %v2362_v13 = vmul.f32 %v8682_v36, %v8682_v36  ;;  %v1712_v10 = vsub.f32 %v8233_v1, %v7949_v16 }
 0x4c8   : > { %v8675_v12 = vadd.f32 %v8403_v2, %v2092_v27  ;;  %v1711_v27 = vsub.f32 %v8226_v8, %v7942_v52  ;;  %v8691_v56 = vpop.permute.xlu0 %1866  ;;  %v2440_v35 = vsel %vm2208_vm9, %v2360_v43, 0.0  ;;  %v8704_v22 = vadd.f32 %v8403_v2, %v2094_v39 }
 0x4c9   : > { %13750 = vst [vmem:[#allocation105_spill] sm:$0xff] %v8691_v56  ;;  %v2441_v38 = vadd.f32 %v2440_v35, %v2439_v30  ;;  %v2246_v3 = vsel %vm2208_vm9, %v8682_v36, 0.0  ;;  %v2096_v43 = vmul.f32 %v8691_v56, %v1712_v10  ;;  %v2444_v30 = vsel %vm2208_vm9, %v2362_v13, 0.0 }
 0x4ca   : > { %v8600_v23 = vpop.f32.mrf.mxu3  ;;  %13747 = vst [vmem:[#allocation102_spill] sm:$0xff] %v8675_v12  ;;  %v2361_v37 = vmul.f32 %v8675_v12, %v8675_v12  ;;  %v2244_v32 = vsel %vm2208_vm9, %v8675_v12, 0.0  ;;  %v1713_v39 = vsub.f32 %v8240_v20, %v7947_v59  ;;  %v2363_v10 = vmul.f32 %v8704_v22, %v8704_v22 }
 0x4cb   : > { %13737 = vst [vmem:[#allocation92_spill] sm:$0xff] %v8600_v23  ;;  %2051 = vperm.xlu1 %7391, %v8600_v23   ;;  %v2245_v53 = vadd.f32 %v2244_v32, %v2243_v24  ;;  %v8724_v24 = vadd.f32 %v8403_v2, %v2096_v43  ;;  %v2248_v13 = vsel %vm2208_vm9, %v8704_v22, 0.0 }
 0x4cc   : > { %13751 = vst [vmem:[#allocation106_spill] sm:$0xff] %v8704_v22  ;;  %v8711_v8 = vpop.permute.xlu1 %1871  ;;  %v2442_v1 = vsel %vm2208_vm9, %v2361_v37, 0.0  ;;  %v2446_v43 = vsel %vm2208_vm9, %v2363_v10, 0.0 }
 0x4cd   : > { %v8687_v31 = vpop.permute.xlu2 %1861  ;;  %13753 = vst [vmem:[#allocation108_spill] sm:$0xff] %v8711_v8  ;;  %v2443_v35 = vadd.f32 %v2442_v1, %v2441_v38  ;;  %v2097_v32 = vmul.f32 %v8711_v8, %v1713_v39  ;;  %v1714_v1 = vsub.f32 %v8246_v25, %v7994_v6  ;;  %v2252_v25 = vsel %vm2208_vm9, %v8724_v24, 0.0 }
 0x4ce   : > { %13749 = vst [vmem:[#allocation104_spill] sm:$0xff] %v8687_v31  ;;  %v2095_v29 = vmul.f32 %v8687_v31, %v1711_v27  ;;  %v2247_v27 = vadd.f32 %v2246_v3, %v2245_v53 }
 0x4cf   : > { %13755 = vst [vmem:[#allocation110_spill] sm:$0xff] %v8724_v24  ;;  %v2445_v37 = vadd.f32 %v2444_v30, %v2443_v35  ;;  %v2365_v30 = vmul.f32 %v8724_v24, %v8724_v24  ;;  %v8743_v39 = vadd.f32 %v8403_v2, %v2097_v32 }
 0x4d0   : > { %v8719_v31 = vadd.f32 %v8403_v2, %v2095_v29  ;;  %v2249_v53 = vadd.f32 %v2248_v13, %v2247_v27  ;;  %v1715_v29 = vsub.f32 %v8252_v26, %v7931_v44  ;;  %v8735_v38 = vpop.permute.xlu0 %1881  ;;  %v1716_v13 = vsub.f32 %v8259_v33, %v7933_v45 }
 0x4d1   : > { %13757 = vst [vmem:[#allocation112_spill] sm:$0xff] %v8735_v38  ;;  %v2447_v8 = vadd.f32 %v2446_v43, %v2445_v37  ;;  %v2450_v43 = vsel %vm2208_vm9, %v2365_v30, 0.0  ;;  %v2366_v33 = vmul.f32 %v8743_v39, %v8743_v39 }
 0x4d2   : > { %v8639_v54 = vpop.f32.mrf.mxu3  ;;  %13754 = vst [vmem:[#allocation109_spill] sm:$0xff] %v8719_v31  ;;  %v2364_v3 = vmul.f32 %v8719_v31, %v8719_v31  ;;  %v2250_v26 = vsel %vm2208_vm9, %v8719_v31, 0.0  ;;  %v2099_v32 = vmul.f32 %v8735_v38, %v1715_v29  ;;  %v2254_v29 = vsel %vm2208_vm9, %v8743_v39, 0.0 }
 0x4d3   : > { %13742 = vst [vmem:[#allocation97_spill] sm:$0xff] %v8639_v54  ;;  %2056 = vperm.xlu2 %7392, %v8639_v54   ;;  %v2251_v20 = vadd.f32 %v2250_v26, %v2249_v53 }
 0x4d4   : > { %13758 = vst [vmem:[#allocation113_spill] sm:$0xff] %v8743_v39  ;;  %v8747_v27 = vpop.permute.xlu1 %1886  ;;  %v2448_v37 = vsel %vm2208_vm9, %v2364_v3, 0.0  ;;  %v8771_v26 = vadd.f32 %v8403_v2, %v2099_v32  ;;  %v1717_v3 = vsub.f32 %v8265_v46, %v7938_v49 }
 0x4d5   : > { %v8727_v56 = vpop.permute.xlu2 %1876  ;;  %13760 = vst [vmem:[#allocation115_spill] sm:$0xff] %v8747_v27  ;;  %v2100_v0 = vmul.f32 %v8747_v27, %v1716_v13  ;;  %v2253_v22 = vadd.f32 %v2252_v25, %v2251_v20  ;;  %v2449_v36 = vadd.f32 %v2448_v37, %v2447_v8  ;;  %v2452_v8 = vsel %vm2208_vm9, %v2366_v33, 0.0  ;;  %v7404_v27 = vld [vmem:[%s7656_s10 + $0x6] ss:$0 sm:$0xff] }
 0x4d6   : > { %13756 = vst [vmem:[#allocation111_spill] sm:$0xff] %v8727_v56  ;;  %v2098_v10 = vmul.f32 %v8727_v56, %v1714_v1  ;;  %v1718_v25 = vsub.f32 %v8271_v48, %v7940_v50  ;;  %v2368_v37 = vmul.f32 %v8771_v26, %v8771_v26 }
 0x4d7   : > { %v2451_v53 = vadd.f32 %v2450_v43, %v2449_v36  ;;  %v8779_v20 = vadd.f32 %v8403_v2, %v2100_v0  ;;  %v2255_v13 = vadd.f32 %v2254_v29, %v2253_v22  ;;  %v1719_v0 = vsub.f32 %v8278_v61, %v7942_v52 }
 0x4d8   : > { %v8766_v1 = vadd.f32 %v8403_v2, %v2098_v10  ;;  %v8775_v30 = vpop.permute.xlu0 %1896  ;;  %v2258_v29 = vsel %vm2208_vm9, %v8771_v26, 0.0  ;;  %v2456_v56 = vsel %vm2208_vm9, %v2368_v37, 0.0  ;;  %v1721_v37 = vsub.f32 %v8290_v11, %v7947_v59 }
 0x4d9   : > { %13762 = vst [vmem:[#allocation117_spill] sm:$0xff] %v8775_v30  ;;  %v2102_v33 = vmul.f32 %v8775_v30, %v1718_v25  ;;  %v2453_v43 = vadd.f32 %v2452_v8, %v2451_v53  ;;  %v7405_v53 = vld [vmem:[%s7656_s10 + $0x7] ss:$0 sm:$0xff]  ;;  %v2260_v61 = vsel %vm2208_vm9, %v8779_v20, 0.0 }
 0x4da   : > { %v8669_v55 = vpop.f32.mrf.mxu3  ;;  %v2367_v36 = vmul.f32 %v8766_v1, %v8766_v1  ;;  %v2256_v22 = vsel %vm2208_vm9, %v8766_v1, 0.0 }
 0x4db   : > { %13745 = vst [vmem:[#allocation100_spill] sm:$0xff] %v8669_v55  ;;  %2061 = vperm.xlu0 %7390, %v8669_v55   ;;  %v2257_v25 = vadd.f32 %v2256_v22, %v2255_v13  ;;  %v8813_v48 = vadd.f32 %v8403_v2, %v2102_v33 }
 0x4dc   : > { %v8784_v32 = vpop.permute.xlu1 %1901  ;;  %v2454_v8 = vsel %vm2208_vm9, %v2367_v36, 0.0 }
 0x4dd   : > { %v8763_v31 = vpop.permute.xlu2 %1891  ;;  %13763 = vst [vmem:[#allocation118_spill] sm:$0xff] %v8784_v32 }
 0x4de   : > { %13761 = vst [vmem:[#allocation116_spill] sm:$0xff] %v8763_v31  ;;  %v2101_v10 = vmul.f32 %v8763_v31, %v1717_v3  ;;  %v2369_v3 = vmul.f32 %v8779_v20, %v8779_v20  ;;  %v2103_v31 = vmul.f32 %v8784_v32, %v1719_v0  ;;  %v2259_v0 = vadd.f32 %v2258_v29, %v2257_v25 }
 0x4df   : > { %v2455_v32 = vadd.f32 %v2454_v8, %v2453_v43 }
 0x4e0   : > { %v8802_v38 = vadd.f32 %v8403_v2, %v2101_v10  ;;  %v8815_v10 = vpop.permute.xlu0 %1911  ;;  %v2458_v13 = vsel %vm2208_vm9, %v2369_v3, 0.0  ;;  %v8822_v36 = vadd.f32 %v8403_v2, %v2103_v31  ;;  %v2261_v43 = vadd.f32 %v2260_v61, %v2259_v0 }
 0x4e1   : > { %13765 = vst [vmem:[#allocation120_spill] sm:$0xff] %v8815_v10  ;;  %v2457_v22 = vadd.f32 %v2456_v56, %v2455_v32  ;;  %v2371_v3 = vmul.f32 %v8813_v48, %v8813_v48  ;;  %v1722_v31 = vsub.f32 %v8296_v19, %v7994_v6  ;;  %v2264_v56 = vsel %vm2208_vm9, %v8813_v48, 0.0 }
 0x4e2   : > { %v8709_v47 = vpop.f32.mrf.mxu3  ;;  %v2370_v33 = vmul.f32 %v8802_v38, %v8802_v38  ;;  %v2262_v11 = vsel %vm2208_vm9, %v8802_v38, 0.0  ;;  %v2372_v61 = vmul.f32 %v8822_v36, %v8822_v36 }
 0x4e3   : > { %13752 = vst [vmem:[#allocation107_spill] sm:$0xff] %v8709_v47  ;;  %2066 = vperm.xlu1 %7391, %v8709_v47   ;;  %2686 = vrot.lane.b32.xlu0 %v7404_v27, %s7584_s26  ;;  %v1720_v27 = vsub.f32 %v8284_v7, %v7949_v16  ;;  %v2459_v8 = vadd.f32 %v2458_v13, %v2457_v22  ;;  %v2462_v13 = vsel %vm2208_vm9, %v2371_v3, 0.0  ;;  %v2266_v22 = vsel %vm2208_vm9, %v8822_v36, 0.0 }
 0x4e4   : > { %v8828_v29 = vpop.permute.xlu1 %1916  ;;  %v2460_v0 = vsel %vm2208_vm9, %v2370_v33, 0.0 }
 0x4e5   : > { %v8804_v30 = vpop.permute.xlu2 %1906  ;;  %13766 = vst [vmem:[#allocation121_spill] sm:$0xff] %v8828_v29  ;;  %v2106_v32 = vmul.f32 %v8828_v29, %v1722_v31  ;;  %v2461_v7 = vadd.f32 %v2460_v0, %v2459_v8  ;;  %v1723_v31 = vsub.f32 %v8302_v40, %v7931_v44 }
 0x4e6   : > { %13764 = vst [vmem:[#allocation119_spill] sm:$0xff] %v8804_v30  ;;  %v2104_v25 = vmul.f32 %v8804_v30, %v1720_v27  ;;  %v2263_v27 = vadd.f32 %v2262_v11, %v2261_v43  ;;  %v2464_v11 = vsel %vm2208_vm9, %v2372_v61, 0.0 }
 0x4e7   : > { %v8861_v43 = vadd.f32 %v8403_v2, %v2106_v32  ;;  %v2463_v3 = vadd.f32 %v2462_v13, %v2461_v7  ;;  %v1725_v32 = vsub.f32 %v8314_v5, %v7938_v49 }
 0x4e8   : > { %v2265_v19 = vadd.f32 %v2264_v56, %v2263_v27  ;;  %v8857_v33 = vpop.permute.xlu0 %1926 }
 0x4e9   : > { %13768 = vst [vmem:[#allocation123_spill] sm:$0xff] %v8857_v33  ;;  %v2465_v0 = vadd.f32 %v2464_v11, %v2463_v3  ;;  %v2375_v27 = vmul.f32 %v8861_v43, %v8861_v43  ;;  %v2272_v3 = vsel %vm2208_vm9, %v8861_v43, 0.0 }
 0x4ea   : > { %v8745_v35 = vpop.f32.mrf.mxu3  ;;  %v2267_v29 = vadd.f32 %v2266_v22, %v2265_v19 }
 0x4eb   : > { %13759 = vst [vmem:[#allocation114_spill] sm:$0xff] %v8745_v35  ;;  %2071 = vperm.xlu2 %7392, %v8745_v35   ;;  %2756 = vrot.lane.b32.xlu1 %v7405_v53, %s7584_s26  ;;  %v2105_v53 = vmul.f32 %v8815_v10, %v1721_v37  ;;  %v8847_v37 = vadd.f32 %v8403_v2, %v2104_v25 }
 0x4ec   : > { %v1724_v25 = vsub.f32 %v8308_v15, %v7933_v45  ;;  %v8866_v46 = vpop.permute.xlu1 %1931 }
 0x4ed   : > { %v8844_v30 = vpop.permute.xlu2 %1921  ;;  %v8853_v10 = vadd.f32 %v8403_v2, %v2105_v53  ;;  %13769 = vst [vmem:[#allocation124_spill] sm:$0xff] %v8866_v46  ;;  %v2373_v8 = vmul.f32 %v8847_v37, %v8847_v37  ;;  %v2268_v7 = vsel %vm2208_vm9, %v8847_v37, 0.0  ;;  %v2109_v13 = vmul.f32 %v8866_v46, %v1725_v32 }
 0x4ee   : > { %13767 = vst [vmem:[#allocation122_spill] sm:$0xff] %v8844_v30  ;;  %v2107_v53 = vmul.f32 %v8844_v30, %v1723_v31  ;;  %v2108_v61 = vmul.f32 %v8857_v33, %v1724_v25  ;;  %v2269_v31 = vadd.f32 %v2268_v7, %v2267_v29  ;;  %v1726_v29 = vsub.f32 %v8320_v21, %v7940_v50 }
 0x4ef   : > { %v2374_v56 = vmul.f32 %v8853_v10, %v8853_v10  ;;  %v2270_v19 = vsel %vm2208_vm9, %v8853_v10, 0.0  ;;  %v2466_v33 = vsel %vm2208_vm9, %v2373_v8, 0.0  ;;  %v8900_v32 = vadd.f32 %v8403_v2, %v2109_v13 }
 0x4f0   : > { %v8883_v22 = vadd.f32 %v8403_v2, %v2107_v53  ;;  %v8892_v30 = vadd.f32 %v8403_v2, %v2108_v61  ;;  %v2271_v5 = vadd.f32 %v2270_v19, %v2269_v31  ;;  %v2467_v15 = vadd.f32 %v2466_v33, %v2465_v0  ;;  %v8894_v40 = vpop.permute.xlu0 %1941 }
 0x4f1   : > { %v2468_v11 = vsel %vm2208_vm9, %v2374_v56, 0.0  ;;  %13771 = vst [vmem:[#allocation126_spill] sm:$0xff] %v8894_v40  ;;  %v2470_v53 = vsel %vm2208_vm9, %v2375_v27, 0.0  ;;  %v1727_v8 = vsub.f32 %v8326_v34, %v7942_v52  ;;  %v1728_v13 = vsub.f32 %v8332_v60, %v7949_v16 }
 0x4f2   : > { %v2376_v56 = vmul.f32 %v8883_v22, %v8883_v22  ;;  %v2469_v61 = vadd.f32 %v2468_v11, %v2467_v15  ;;  %v2273_v7 = vadd.f32 %v2272_v3, %v2271_v5  ;;  %v2377_v0 = vmul.f32 %v8892_v30, %v8892_v30 }
 0x4f3   : > { %v2111_v27 = vmul.f32 %v8894_v40, %v1727_v8  ;;  %v2274_v46 = vsel %vm2208_vm9, %v8883_v22, 0.0  ;;  %v2276_v15 = vsel %vm2208_vm9, %v8892_v30, 0.0  ;;  %v2378_v5 = vmul.f32 %v8900_v32, %v8900_v32 }
 0x4f4   : > { %v8906_v19 = vpop.permute.xlu1 %1946  ;;  %v2471_v31 = vadd.f32 %v2470_v53, %v2469_v61  ;;  %v2472_v3 = vsel %vm2208_vm9, %v2376_v56, 0.0  ;;  %v2474_v53 = vsel %vm2208_vm9, %v2377_v0, 0.0  ;;  %v2278_v61 = vsel %vm2208_vm9, %v8900_v32, 0.0 }
 0x4f5   : > { %v8885_v25 = vpop.permute.xlu2 %1936  ;;  %13772 = vst [vmem:[#allocation127_spill] sm:$0xff] %v8906_v19  ;;  %v2112_v11 = vmul.f32 %v8906_v19, %v1728_v13  ;;  %v8931_v40 = vadd.f32 %v8403_v2, %v2111_v27  ;;  %v1729_v13 = vsub.f32 %v8338_v28, %v7947_v59 }
 0x4f6   : > { %13770 = vst [vmem:[#allocation125_spill] sm:$0xff] %v8885_v25  ;;  %v2110_v33 = vmul.f32 %v8885_v25, %v1726_v29  ;;  %v2275_v29 = vadd.f32 %v2274_v46, %v2273_v7  ;;  %v2473_v34 = vadd.f32 %v2472_v3, %v2471_v31  ;;  %v2476_v46 = vsel %vm2208_vm9, %v2378_v5, 0.0 }
 0x4f7   : > { %v8939_v7 = vadd.f32 %v8403_v2, %v2112_v11  ;;  %v13778_v11 = vld [vmem:[#allocation51_spill] sm:$0xff] }
 0x4f8   : > { %v8925_v8 = vadd.f32 %v8403_v2, %v2110_v33  ;;  %v2277_v60 = vadd.f32 %v2276_v15, %v2275_v29  ;;  %v8935_v56 = vpop.permute.xlu0 %1956  ;;  %v13776_v33 = vld [vmem:[#allocation50_spill] sm:$0xff]  ;;  %v2475_v19 = vadd.f32 %v2474_v53, %v2473_v34  ;;  %v2380_v15 = vmul.f32 %v8931_v40, %v8931_v40 }
 0x4f9   : > { %13774 = vst [vmem:[#allocation129_spill] sm:$0xff] %v8935_v56  ;;  %v1730_v0 = vsub.f32 %v13776_v33, %v7994_v6  ;;  %v1731_v3 = vsub.f32 %v13778_v11, %v7931_v44  ;;  %v2381_v53 = vmul.f32 %v8939_v7, %v8939_v7 }
 0x4fa   : > { %13775 = vst [vmem:[#allocation130_spill] sm:$0xff] %v8939_v7  ;;  %v2279_v21 = vadd.f32 %v2278_v61, %v2277_v60  ;;  %v2379_v31 = vmul.f32 %v8925_v8, %v8925_v8  ;;  %v2477_v29 = vadd.f32 %v2476_v46, %v2475_v19  ;;  %v2280_v34 = vsel %vm2208_vm9, %v8925_v8, 0.0 }
 0x4fb   : > { %v2114_v5 = vmul.f32 %v8935_v56, %v1730_v0  ;;  %v2282_v60 = vsel %vm2208_vm9, %v8931_v40, 0.0  ;;  %v2480_v19 = vsel %vm2208_vm9, %v2380_v15, 0.0  ;;  %v2284_v46 = vsel %vm2208_vm9, %v8939_v7, 0.0 }
 0x4fc   : > { %v8944_v39 = vpop.permute.xlu1 %1961  ;;  %v2478_v56 = vsel %vm2208_vm9, %v2379_v31, 0.0  ;;  %v13785_v31 = vld [vmem:[#allocation53_spill] sm:$0xff] }
 0x4fd   : > { %v8922_v25 = vpop.permute.xlu2 %1951  ;;  %13777 = vst [vmem:[#allocation131_spill] sm:$0xff] %v8944_v39  ;;  %v2115_v61 = vmul.f32 %v8944_v39, %v1731_v3  ;;  %v8970_v11 = vadd.f32 %v8403_v2, %v2114_v5  ;;  %v2479_v28 = vadd.f32 %v2478_v56, %v2477_v29  ;;  %v1733_v15 = vsub.f32 %v13785_v31, %v7938_v49 }
 0x4fe   : > { %13773 = vst [vmem:[#allocation128_spill] sm:$0xff] %v8922_v25  ;;  %v2113_v27 = vmul.f32 %v8922_v25, %v1729_v13  ;;  %v2281_v25 = vadd.f32 %v2280_v34, %v2279_v21  ;;  %v13783_v21 = vld [vmem:[#allocation52_spill] sm:$0xff] }
 0x4ff   : > { %13781 = vst [vmem:[#allocation134_spill] sm:$0xff] %v8970_v11  ;;  %v1732_v3 = vsub.f32 %v13783_v21, %v7933_v45  ;;  %v8978_v34 = vadd.f32 %v8403_v2, %v2115_v61  ;;  %v2481_v5 = vadd.f32 %v2480_v19, %v2479_v28  ;;  %v2383_v29 = vmul.f32 %v8970_v11, %v8970_v11 }
 0x500   : > { %v8961_v13 = vadd.f32 %v8403_v2, %v2113_v27  ;;  %v2283_v33 = vadd.f32 %v2282_v60, %v2281_v25  ;;  %v8972_v24 = vpop.permute.xlu0 %1971  ;;  %v2482_v27 = vsel %vm2208_vm9, %v2381_v53, 0.0  ;;  %v13787_v53 = vld [vmem:[#allocation54_spill] sm:$0xff]  ;;  %v2288_v28 = vsel %vm2208_vm9, %v8970_v11, 0.0 }
 0x501   : > { %13782 = vst [vmem:[#allocation135_spill] sm:$0xff] %v8972_v24  ;;  %v2117_v60 = vmul.f32 %v8972_v24, %v1733_v15  ;;  %v1734_v61 = vsub.f32 %v13787_v53, %v7940_v50  ;;  %v2483_v21 = vadd.f32 %v2482_v27, %v2481_v5  ;;  %v2486_v27 = vsel %vm2208_vm9, %v2383_v29, 0.0 }
 0x502   : > { %13779 = vst [vmem:[#allocation132_spill] sm:$0xff] %v8961_v13  ;;  %v2382_v39 = vmul.f32 %v8961_v13, %v8961_v13  ;;  %v2285_v12 = vadd.f32 %v2284_v46, %v2283_v33  ;;  %v2286_v31 = vsel %vm2208_vm9, %v8961_v13, 0.0  ;;  %v2384_v33 = vmul.f32 %v8978_v34, %v8978_v34 }
 0x503   : > { %13784 = vst [vmem:[#allocation136_spill] sm:$0xff] %v8978_v34  ;;  %v2290_v5 = vsel %vm2208_vm9, %v8978_v34, 0.0  ;;  %v9009_v24 = vadd.f32 %v8403_v2, %v2117_v60 }
 0x504   : > { %v8984_v25 = vpop.permute.xlu1 %1976  ;;  %v2484_v46 = vsel %vm2208_vm9, %v2382_v39, 0.0 }
 0x505   : > { %v8963_v0 = vpop.permute.xlu2 %1966  ;;  %13786 = vst [vmem:[#allocation137_spill] sm:$0xff] %v8984_v25  ;;  %v2118_v19 = vmul.f32 %v8984_v25, %v1734_v61  ;;  %v2485_v11 = vadd.f32 %v2484_v46, %v2483_v21  ;;  %v13791_v61 = vld [vmem:[#allocation55_spill] sm:$0xff] }
 0x506   : > { %13780 = vst [vmem:[#allocation133_spill] sm:$0xff] %v8963_v0  ;;  %v2116_v56 = vmul.f32 %v8963_v0, %v1732_v3  ;;  %v2287_v3 = vadd.f32 %v2286_v31, %v2285_v12  ;;  %v1735_v25 = vsub.f32 %v13791_v61, %v7942_v52  ;;  %v2488_v12 = vsel %vm2208_vm9, %v2384_v33, 0.0 }
 0x507   : > { %13790 = vst [vmem:[#allocation140_spill] sm:$0xff] %v9009_v24  ;;  %v9017_v31 = vadd.f32 %v8403_v2, %v2118_v19  ;;  %v2487_v13 = vadd.f32 %v2486_v27, %v2485_v11  ;;  %v13796_v19 = vld [vmem:[#allocation57_spill] sm:$0xff] }
 0x508   : > { %v9003_v15 = vadd.f32 %v8403_v2, %v2116_v56  ;;  %v2289_v53 = vadd.f32 %v2288_v28, %v2287_v3  ;;  %v9013_v39 = vpop.permute.xlu0 %1986  ;;  %v13794_v56 = vld [vmem:[#allocation56_spill] sm:$0xff]  ;;  %v2386_v28 = vmul.f32 %v9009_v24, %v9009_v24  ;;  %v1737_v46 = vsub.f32 %v13796_v19, %v7947_v59 }
 0x509   : > { %13792 = vst [vmem:[#allocation141_spill] sm:$0xff] %v9013_v39  ;;  %v1736_v29 = vsub.f32 %v13794_v56, %v7949_v16  ;;  %v2489_v3 = vadd.f32 %v2488_v12, %v2487_v13  ;;  %v2296_v12 = vsel %vm2208_vm9, %v9017_v31, 0.0 }
 0x50a   : > { %13789 = vst [vmem:[#allocation139_spill] sm:$0xff] %v9003_v15  ;;  %v2291_v34 = vadd.f32 %v2290_v5, %v2289_v53  ;;  %v2385_v21 = vmul.f32 %v9003_v15, %v9003_v15  ;;  %v2292_v11 = vsel %vm2208_vm9, %v9003_v15, 0.0  ;;  %v2387_v53 = vmul.f32 %v9017_v31, %v9017_v31 }
 0x50b   : > { %13793 = vst [vmem:[#allocation142_spill] sm:$0xff] %v9017_v31  ;;  %v2120_v33 = vmul.f32 %v9013_v39, %v1736_v29  ;;  %v2492_v13 = vsel %vm2208_vm9, %v2386_v28, 0.0 }
 0x50c   : > { %v9022_v7 = vpop.permute.xlu1 %1991  ;;  %v2490_v39 = vsel %vm2208_vm9, %v2385_v21, 0.0  ;;  %v13803_v21 = vld [vmem:[#allocation59_spill] sm:$0xff] }
 0x50d   : > { %v9000_v0 = vpop.permute.xlu2 %1981  ;;  %13795 = vst [vmem:[#allocation143_spill] sm:$0xff] %v9022_v7  ;;  %v2121_v27 = vmul.f32 %v9022_v7, %v1737_v46  ;;  %v9048_v19 = vadd.f32 %v8403_v2, %v2120_v33  ;;  %v2491_v61 = vadd.f32 %v2490_v39, %v2489_v3  ;;  %v1739_v28 = vsub.f32 %v13803_v21, %v7931_v44 }
 0x50e   : > { %13788 = vst [vmem:[#allocation138_spill] sm:$0xff] %v9000_v0  ;;  %v2119_v60 = vmul.f32 %v9000_v0, %v1735_v25  ;;  %v2294_v25 = vsel %vm2208_vm9, %v9009_v24, 0.0  ;;  %v2293_v0 = vadd.f32 %v2292_v11, %v2291_v34  ;;  %v13801_v34 = vld [vmem:[#allocation58_spill] sm:$0xff] }
 0x50f   : > { %13799 = vst [vmem:[#allocation146_spill] sm:$0xff] %v9048_v19  ;;  %v1738_v46 = vsub.f32 %v13801_v34, %v7994_v6  ;;  %v9056_v11 = vadd.f32 %v8403_v2, %v2121_v27  ;;  %v2493_v33 = vadd.f32 %v2492_v13, %v2491_v61  ;;  %v2389_v3 = vmul.f32 %v9048_v19, %v9048_v19 }
 0x510   : > { %v9039_v5 = vadd.f32 %v8403_v2, %v2119_v60  ;;  %v2295_v56 = vadd.f32 %v2294_v25, %v2293_v0  ;;  %v9050_v24 = vpop.permute.xlu0 %2001  ;;  %v2494_v60 = vsel %vm2208_vm9, %v2387_v53, 0.0  ;;  %v13805_v53 = vld [vmem:[#allocation60_spill] sm:$0xff]  ;;  %v2300_v61 = vsel %vm2208_vm9, %v9048_v19, 0.0 }
 0x511   : > { %13800 = vst [vmem:[#allocation147_spill] sm:$0xff] %v9050_v24  ;;  %v2123_v25 = vmul.f32 %v9050_v24, %v1739_v28  ;;  %v1740_v27 = vsub.f32 %v13805_v53, %v7933_v45  ;;  %v2495_v34 = vadd.f32 %v2494_v60, %v2493_v33  ;;  %v2498_v60 = vsel %vm2208_vm9, %v2389_v3, 0.0 }
 0x512   : > { %13797 = vst [vmem:[#allocation144_spill] sm:$0xff] %v9039_v5  ;;  %v2388_v7 = vmul.f32 %v9039_v5, %v9039_v5  ;;  %v2297_v31 = vadd.f32 %v2296_v12, %v2295_v56  ;;  %v2298_v21 = vsel %vm2208_vm9, %v9039_v5, 0.0  ;;  %v2390_v56 = vmul.f32 %v9056_v11, %v9056_v11 }
 0x513   : > { %13802 = vst [vmem:[#allocation148_spill] sm:$0xff] %v9056_v11  ;;  %v2302_v33 = vsel %vm2208_vm9, %v9056_v11, 0.0  ;;  %v9087_v24 = vadd.f32 %v8403_v2, %v2123_v25 }
 0x514   : > { %v9062_v0 = vpop.permute.xlu1 %2006  ;;  %v2496_v12 = vsel %vm2208_vm9, %v2388_v7, 0.0 }
 0x515   : > { %v9041_v29 = vpop.permute.xlu2 %1996  ;;  %13804 = vst [vmem:[#allocation149_spill] sm:$0xff] %v9062_v0  ;;  %v2124_v13 = vmul.f32 %v9062_v0, %v1740_v27  ;;  %v2497_v19 = vadd.f32 %v2496_v12, %v2495_v34  ;;  %v13808_v27 = vld [vmem:[#allocation61_spill] sm:$0xff] }
 0x516   : > { %13798 = vst [vmem:[#allocation145_spill] sm:$0xff] %v9041_v29  ;;  %v2122_v39 = vmul.f32 %v9041_v29, %v1738_v46  ;;  %v2299_v46 = vadd.f32 %v2298_v21, %v2297_v31  ;;  %v1741_v0 = vsub.f32 %v13808_v27, %v7938_v49  ;;  %v2500_v31 = vsel %vm2208_vm9, %v2390_v56, 0.0 }
 0x517   : > { %13807 = vst [vmem:[#allocation151_spill] sm:$0xff] %v9087_v24  ;;  %v9095_v21 = vadd.f32 %v8403_v2, %v2124_v13  ;;  %v2499_v5 = vadd.f32 %v2498_v60, %v2497_v19  ;;  %v13813_v13 = vld [vmem:[#allocation65_spill] sm:$0xff] }
 0x518   : > { %v9081_v28 = vadd.f32 %v8403_v2, %v2122_v39  ;;  %v2301_v53 = vadd.f32 %v2300_v61, %v2299_v46  ;;  %v9091_v7 = vpop.permute.xlu0 %2016  ;;  %v13811_v39 = vld [vmem:[#allocation62_spill] sm:$0xff]  ;;  %v2392_v61 = vmul.f32 %v9087_v24, %v9087_v24  ;;  %v1743_v12 = vsub.f32 %v13813_v13, %v7942_v52 }
 0x519   : > { %13809 = vst [vmem:[#allocation152_spill] sm:$0xff] %v9091_v7  ;;  %v1742_v3 = vsub.f32 %v13811_v39, %v7940_v50  ;;  %v2501_v46 = vadd.f32 %v2500_v31, %v2499_v5  ;;  %v2308_v31 = vsel %vm2208_vm9, %v9095_v21, 0.0 }
 0x51a   : > { %13810 = vst [vmem:[#allocation153_spill] sm:$0xff] %v9095_v21  ;;  %v2303_v11 = vadd.f32 %v2302_v33, %v2301_v53  ;;  %v2391_v34 = vmul.f32 %v9081_v28, %v9081_v28  ;;  %v2304_v19 = vsel %vm2208_vm9, %v9081_v28, 0.0  ;;  %v2393_v53 = vmul.f32 %v9095_v21, %v9095_v21 }
 0x51b   : > { %v2126_v56 = vmul.f32 %v9091_v7, %v1742_v3  ;;  %v2504_v5 = vsel %vm2208_vm9, %v2392_v61, 0.0 }
 0x51c   : > { %v9100_v15 = vpop.permute.xlu1 %2021  ;;  %v2502_v7 = vsel %vm2208_vm9, %v2391_v34, 0.0  ;;  %v13817_v34 = vld [vmem:[#allocation74_spill] sm:$0xff] }
 0x51d   : > { %v9078_v29 = vpop.permute.xlu2 %2011  ;;  %13812 = vst [vmem:[#allocation154_spill] sm:$0xff] %v9100_v15  ;;  %v2127_v60 = vmul.f32 %v9100_v15, %v1743_v12  ;;  %v9126_v13 = vadd.f32 %v8403_v2, %v2126_v56  ;;  %v2503_v27 = vadd.f32 %v2502_v7, %v2501_v46  ;;  %v1745_v61 = vsub.f32 %v13817_v34, %v7947_v59 }
 0x51e   : > { %13806 = vst [vmem:[#allocation150_spill] sm:$0xff] %v9078_v29  ;;  %v2125_v25 = vmul.f32 %v9078_v29, %v1741_v0  ;;  %v2306_v0 = vsel %vm2208_vm9, %v9087_v24, 0.0  ;;  %v2305_v29 = vadd.f32 %v2304_v19, %v2303_v11  ;;  %v13816_v11 = vld [vmem:[#allocation69_spill] sm:$0xff] }
 0x51f   : > { %v1744_v12 = vsub.f32 %v13816_v11, %v7949_v16  ;;  %v9134_v19 = vadd.f32 %v8403_v2, %v2127_v60  ;;  %v2505_v56 = vadd.f32 %v2504_v5, %v2503_v27  ;;  %v2395_v46 = vmul.f32 %v9126_v13, %v9126_v13 }
 0x520   : > { %v9117_v33 = vadd.f32 %v8403_v2, %v2125_v25  ;;  %v2307_v39 = vadd.f32 %v2306_v0, %v2305_v29  ;;  %v9128_v24 = vpop.permute.xlu0 %2031  ;;  %v2506_v25 = vsel %vm2208_vm9, %v2393_v53, 0.0  ;;  %v1746_v53 = vsub.f32 %v8498_v17, %v7994_v6 }
 0x521   : > { %13815 = vst [vmem:[#allocation156_spill] sm:$0xff] %v9128_v24  ;;  %v2129_v0 = vmul.f32 %v9128_v24, %v1745_v61  ;;  %v2507_v60 = vadd.f32 %v2506_v25, %v2505_v56  ;;  %v2312_v27 = vsel %vm2208_vm9, %v9126_v13, 0.0  ;;  %v2510_v6 = vsel %vm2208_vm9, %v2395_v46, 0.0 }
 0x522   : > { %v2394_v15 = vmul.f32 %v9117_v33, %v9117_v33  ;;  %v2309_v21 = vadd.f32 %v2308_v31, %v2307_v39  ;;  %v2310_v34 = vsel %vm2208_vm9, %v9117_v33, 0.0  ;;  %v2396_v39 = vmul.f32 %v9134_v19, %v9134_v19 }
 0x523   : > { %v2314_v25 = vsel %vm2208_vm9, %v9134_v19, 0.0  ;;  %v9165_v56 = vadd.f32 %v8403_v2, %v2129_v0 }
 0x524   : > { %v2508_v31 = vsel %vm2208_vm9, %v2394_v15, 0.0 }
 0x525   : > { %v9119_v3 = vpop.permute.xlu2 %2026  ;;  %v9140_v29 = vpop.permute.xlu1 %2036  ;;  %v2509_v17 = vadd.f32 %v2508_v31, %v2507_v60 }
 0x526   : > { %13814 = vst [vmem:[#allocation155_spill] sm:$0xff] %v9119_v3  ;;  %v2128_v7 = vmul.f32 %v9119_v3, %v1744_v12  ;;  %v2130_v5 = vmul.f32 %v9140_v29, %v1746_v53  ;;  %v2311_v12 = vadd.f32 %v2310_v34, %v2309_v21  ;;  %v1747_v53 = vsub.f32 %v8538_v42, %v7931_v44 }
 0x527   : > { %13818 = vst [vmem:[#allocation157_spill] sm:$0xff] %v9140_v29  ;;  %v2512_v21 = vsel %vm2208_vm9, %v2396_v39, 0.0  ;;  %v2511_v46 = vadd.f32 %v2510_v6, %v2509_v17  ;;  %v2398_v44 = vmul.f32 %v9165_v56, %v9165_v56  ;;  %v1749_v39 = vsub.f32 %v8600_v23, %v7938_v49 }
 0x528   : > { %v9159_v61 = vadd.f32 %v8403_v2, %v2128_v7  ;;  %v2313_v24 = vadd.f32 %v2312_v27, %v2311_v12  ;;  %v9173_v34 = vadd.f32 %v8403_v2, %v2130_v5  ;;  %v1748_v7 = vsub.f32 %v8571_v14, %v7933_v45 }
 0x529   : > { %v2513_v5 = vadd.f32 %v2512_v21, %v2511_v46  ;;  %v2318_v17 = vsel %vm2208_vm9, %v9165_v56, 0.0 }
 0x52a   : > { %v2315_v29 = vadd.f32 %v2314_v25, %v2313_v24  ;;  %v2397_v60 = vmul.f32 %v9159_v61, %v9159_v61  ;;  %v2316_v45 = vsel %vm2208_vm9, %v9159_v61, 0.0  ;;  %v2399_v24 = vmul.f32 %v9173_v34, %v9173_v34 }
 0x52b   : > { %v2320_v21 = vsel %vm2208_vm9, %v9173_v34, 0.0 }
 0x52c   : > { %v2317_v6 = vadd.f32 %v2316_v45, %v2315_v29  ;;  %v2514_v49 = vsel %vm2208_vm9, %v2397_v60, 0.0 }
 0x52d   : > { %v9156_v3 = vpop.permute.xlu2 %2041 }
 0x52e   : > { %13819 = vst [vmem:[#allocation158_spill] sm:$0xff] %v9156_v3  ;;  %v2131_v0 = vmul.f32 %v9156_v3, %v1747_v53  ;;  %v2516_v53 = vsel %vm2208_vm9, %v2398_v44, 0.0  ;;  %v2319_v46 = vadd.f32 %v2318_v17, %v2317_v6 }
 0x530   : > { %v9195_v12 = vadd.f32 %v8403_v2, %v2131_v0  ;;  %v1750_v0 = vsub.f32 %v8639_v54, %v7940_v50  ;;  %v2321_v45 = vadd.f32 %v2320_v21, %v2319_v46 }
 0x532   : > { %v2400_v60 = vmul.f32 %v9195_v12, %v9195_v12  ;;  %v2322_v50 = vsel %vm2208_vm9, %v9195_v12, 0.0 }
 0x535   : > { %v9169_v15 = vpop.permute.xlu0 %2046  ;;  %v9197_v25 = vpop.permute.xlu2 %2056 }
 0x536   : > { %13820 = vst [vmem:[#allocation159_spill] sm:$0xff] %v9169_v15  ;;  %v2132_v27 = vmul.f32 %v9169_v15, %v1748_v7  ;;  %v2515_v15 = vadd.f32 %v2514_v49, %v2513_v5  ;;  %v1751_v5 = vsub.f32 %v8669_v55, %v7942_v52  ;;  %v2520_v49 = vsel %vm2208_vm9, %v2400_v60, 0.0 }
 0x537   : > { %13822 = vst [vmem:[#allocation161_spill] sm:$0xff] %v9197_v25  ;;  %v1753_v52 = vsub.f32 %v8745_v35, %v7947_v59 }
 0x538   : > { %v9204_v7 = vadd.f32 %v8403_v2, %v2132_v27  ;;  %v2517_v44 = vadd.f32 %v2516_v53, %v2515_v15  ;;  %v2323_v53 = vadd.f32 %v2322_v50, %v2321_v45 }
 0x53a   : > { %v2401_v27 = vmul.f32 %v9204_v7, %v9204_v7 }
 0x53d   : > { %v9178_v11 = vpop.permute.xlu1 %2051 }
 0x53e   : > { %13821 = vst [vmem:[#allocation160_spill] sm:$0xff] %v9178_v11  ;;  %v2133_v31 = vmul.f32 %v9178_v11, %v1749_v39  ;;  %v2518_v39 = vsel %vm2208_vm9, %v2399_v24, 0.0  ;;  %v2134_v11 = vmul.f32 %v9197_v25, %v1750_v0 }
 0x53f   : > { %v2519_v17 = vadd.f32 %v2518_v39, %v2517_v44  ;;  %v2522_v39 = vsel %vm2208_vm9, %v2401_v27, 0.0  ;;  %v1752_v27 = vsub.f32 %v8709_v47, %v7949_v16 }
 0x540   : > { %v9210_v29 = vadd.f32 %v8403_v2, %v2133_v31  ;;  %v2324_v31 = vsel %vm2208_vm9, %v9204_v7, 0.0  ;;  %v9234_v46 = vadd.f32 %v8403_v2, %v2134_v11 }
 0x542   : > { %v2402_v15 = vmul.f32 %v9210_v29, %v9210_v29  ;;  %v2326_v0 = vsel %vm2208_vm9, %v9210_v29, 0.0  ;;  %v2403_v59 = vmul.f32 %v9234_v46, %v9234_v46 }
 0x544   : > { %v2524_v60 = vsel %vm2208_vm9, %v2402_v15, 0.0 }
 0x545   : > { %v9229_v21 = vpop.permute.xlu2 %2071 }
 0x546   : > { %13824 = vst [vmem:[#allocation163_spill] sm:$0xff] %v9229_v21  ;;  %v2137_v45 = vmul.f32 %v9229_v21, %v1753_v52 }
 0x54d   : > { %v9219_v24 = vpop.permute.xlu0 %2061 }
 0x54e   : > { %13823 = vst [vmem:[#allocation162_spill] sm:$0xff] %v9219_v24  ;;  %v2135_v6 = vmul.f32 %v9219_v24, %v1751_v5  ;;  %v2325_v5 = vadd.f32 %v2324_v31, %v2323_v53  ;;  %v2521_v24 = vadd.f32 %v2520_v49, %v2519_v17  ;;  %v2328_v17 = vsel %vm2208_vm9, %v9234_v46, 0.0 }
 0x54f   : > { %v9255_v31 = vadd.f32 %v8403_v2, %v2137_v45  ;;  %v2526_v53 = vsel %vm2208_vm9, %v2403_v59, 0.0 }
 0x550   : > { %v9240_v44 = vadd.f32 %v8403_v2, %v2135_v6  ;;  %v2523_v50 = vadd.f32 %v2522_v39, %v2521_v24  ;;  %v2327_v25 = vadd.f32 %v2326_v0, %v2325_v5 }
 0x551   : > { %v2406_v5 = vmul.f32 %v9255_v31, %v9255_v31  ;;  %v2334_v59 = vsel %vm2208_vm9, %v9255_v31, 0.0 }
 0x552   : > { %v2404_v11 = vmul.f32 %v9240_v44, %v9240_v44  ;;  %v2525_v3 = vadd.f32 %v2524_v60, %v2523_v50  ;;  %v2330_v24 = vsel %vm2208_vm9, %v9240_v44, 0.0  ;;  %v2329_v49 = vadd.f32 %v2328_v17, %v2327_v25 }
 0x554   : > { %v2528_v52 = vsel %vm2208_vm9, %v2404_v11, 0.0  ;;  %v2331_v39 = vadd.f32 %v2330_v24, %v2329_v49  ;;  %v2527_v0 = vadd.f32 %v2526_v53, %v2525_v3  ;;  %v2532_v3 = vsel %vm2208_vm9, %v2406_v5, 0.0 }
 0x555   : > { %v9250_v6 = vpop.permute.xlu1 %2066 }
 0x556   : > { %13825 = vst [vmem:[#allocation164_spill] sm:$0xff] %v9250_v6  ;;  %v2136_v15 = vmul.f32 %v9250_v6, %v1752_v27  ;;  %v2529_v50 = vadd.f32 %v2528_v52, %v2527_v0 }
 0x558   : > { %v9263_v16 = vadd.f32 %v8403_v2, %v2136_v15 }
 0x55a   : > { %v2332_v60 = vsel %vm2208_vm9, %v9263_v16, 0.0  ;;  %v2405_v45 = vmul.f32 %v9263_v16, %v9263_v16 }
 0x55b   : > { %v2333_v25 = vadd.f32 %v2332_v60, %v2331_v39 }
 0x55c   : > { %v2530_v11 = vsel %vm2208_vm9, %v2405_v45, 0.0 }
 0x55d   : > { %v2335_v2 = vadd.f32 %v2334_v59, %v2333_v25  ;;  %v2531_v27 = vadd.f32 %v2530_v11, %v2529_v50 }
 0x55f   : > { %v2336_v17 = vrot.slane %v2335_v2, 4  ;;  %v2533_v24 = vadd.f32 %v2532_v3, %v2531_v27 }
 0x561   : > { %v2337_v15 = vadd.f32 %v2336_v17, %v2335_v2  ;;  %v2534_v49 = vrot.slane %v2533_v24, 4 }
 0x563   : > { %v2338_v53 = vrot.slane %v2337_v15, 2  ;;  %v2535_v21 = vadd.f32 %v2534_v49, %v2533_v24  ;;  %v13826_v24 = vld [vmem:[#allocation67_spill] sm:$0xff]  ;;  %v13827_v49 = vld [vmem:[#allocation68_spill] sm:$0xff] }
 0x565   : > { %v2339_v6 = vadd.f32 %v2338_v53, %v2337_v15  ;;  %v2536_v35 = vrot.slane %v2535_v21, 2 }
 0x567   : > { %v2340_v47 = vrot.slane %v2339_v6, 1  ;;  %v2537_v52 = vadd.f32 %v2536_v35, %v2535_v21 }
 0x569   : > { %v2341_v39 = vadd.f32 %v2340_v47, %v2339_v6  ;;  %v2538_v0 = vrot.slane %v2537_v52, 1 }
 0x56b   : > { %v9275_v60 = vmul.f32 0.001953125, %v2341_v39  ;;  %v2539_v55 = vadd.f32 %v2538_v0, %v2537_v52  ;;  %v13828_v52 = vld [vmem:[#allocation72_spill] sm:$0xff] }
 0x56d   : > { %v2540_v45 = vmul.f32 0.001953125, %v2539_v55  ;;  %v2541_v50 = vmul.f32 %v9275_v60, %v9275_v60  ;;  %v2544_v15 = vsub.f32 %v13826_v24, %v9275_v60  ;;  %v2545_v53 = vsub.f32 %v13827_v49, %v9275_v60 }
 0x56e   : > { %v2546_v39 = vsub.f32 %v13828_v52, %v9275_v60 }
 0x56f   : > { %v2542_v25 = vsub.f32 %v2540_v45, %v2541_v50  ;;  %v2549_v45 = vsub.f32 %v8491_v57, %v9275_v60  ;;  %v9297_v50 = vpop.permute.xlu0 %2686 }
 0x571   : > { %v2543_v59 = vmax.f32 %v2542_v25, 0.0  ;;  %v2548_v25 = vsub.f32 %v8466_v41, %v9275_v60 }
 0x573   : > { %v2608_v11 = vadd.f32 1e-05, %v2543_v59 }
 0x575   : > { %7414 = vrsqrt.f32 %v2608_v11  ;;  %vm2615_vm5 = vweird.f32 %v2608_v11 }
 0x57b   : > { %v7415_v2 = vpop.eup %7414 }
 0x57c   : > { %v2610_v27 = vmul.f32 %v7415_v2, %v2608_v11  ;;  %vm2616_vm4 = vweird.f32 %v7415_v2 }
 0x57d   : > { %vm2617_vm6 = vmor %vm2615_vm5, %vm2616_vm4 }
 0x57e   : > { %v2611_v3 = vmul.f32 %v7415_v2, %v2610_v27 }
 0x580   : > { %v2612_v21 = vmul.f32 0.5, %v2611_v3  ;;  %v2547_v3 = vsub.f32 %v8460_v18, %v9275_v60 }
 0x582   : > { %v2613_v6 = vsub.f32 1.5, %v2612_v21  ;;  %v9306_v21 = vpop.permute.xlu1 %2756 }
 0x584   : > { %v2614_v17 = vmul.f32 %v7415_v2, %v2613_v6 }
 0x586   : > { %v9293_v0 = vsel %vm2617_vm6, %v7415_v2, %v2614_v17 }
 0x587   : > { %v2621_v59 = vmul.f32 %v9293_v0, %v2546_v39  ;;  %v2620_v11 = vmul.f32 %v9293_v0, %v2545_v53  ;;  %v2619_v27 = vmul.f32 %v9293_v0, %v2544_v15  ;;  %v2624_v2 = vmul.f32 %v9293_v0, %v2549_v45 }
 0x588   : > { %v2623_v41 = vmul.f32 %v9293_v0, %v2548_v25  ;;  %v2622_v24 = vmul.f32 %v9293_v0, %v2547_v3  ;;  %v2551_v25 = vsub.f32 %v8511_v9, %v9275_v60 }
 0x589   : > { %v2691_v57 = vmul.f32 %v9297_v50, %v2621_v59  ;;  %v2690_v6 = vmul.f32 %v9297_v50, %v2620_v11  ;;  %v2689_v17 = vmul.f32 %v9297_v50, %v2619_v27  ;;  %v2694_v53 = vmul.f32 %v9297_v50, %v2624_v2  ;;  %v13829_v27 = vld [vmem:[#allocation82_spill] sm:$0xff] }
 0x58a   : > { %v2693_v59 = vmul.f32 %v9297_v50, %v2623_v41  ;;  %v2692_v11 = vmul.f32 %v9297_v50, %v2622_v24  ;;  %v2552_v3 = vsub.f32 %v13829_v27, %v9275_v60  ;;  %v2626_v9 = vmul.f32 %v9293_v0, %v2551_v25 }
 0x58b   : > { %v2761_v49 = vadd.f32 %v9306_v21, %v2691_v57  ;;  %v2760_v15 = vadd.f32 %v9306_v21, %v2690_v6  ;;  %v2759_v18 = vadd.f32 %v9306_v21, %v2689_v17  ;;  %v13830_v57 = vld [vmem:[#allocation79_spill] sm:$0xff]  ;;  %v2764_v6 = vadd.f32 %v9306_v21, %v2694_v53 }
 0x58c   : > { %v2550_v2 = vsub.f32 %v13830_v57, %v9275_v60  ;;  %v2763_v17 = vadd.f32 %v9306_v21, %v2693_v59  ;;  %v2627_v41 = vmul.f32 %v9293_v0, %v2552_v3  ;;  %v2762_v24 = vadd.f32 %v9306_v21, %v2692_v11  ;;  %v13831_v59 = vld [vmem:[#allocation89_spill] sm:$0xff] }
 0x58d   : > { %v2825_v52 = vmax.f32 %v2761_v49, 0.0  ;;  %v2824_v39 = vmax.f32 %v2760_v15, 0.0  ;;  %v2823_v45 = vmax.f32 %v2759_v18, 0.0  ;;  %v2828_v15 = vmax.f32 %v2764_v6, 0.0  ;;  %v13832_v11 = vld [vmem:[#allocation85_spill] sm:$0xff] }
 0x58e   : > { %v2625_v49 = vmul.f32 %v9293_v0, %v2550_v2  ;;  %v2827_v18 = vmax.f32 %v2763_v17, 0.0  ;;  %v2826_v27 = vmax.f32 %v2762_v24, 0.0  ;;  %v2554_v53 = vsub.f32 %v8553_v62, %v9275_v60  ;;  %v13833_v17 = vld [vmem:[#allocation91_spill] sm:$0xff] }
 0x58f   : > { %2959 = vrot.lane.b32.xlu1 %v2825_v52, %s7584_s26  ;;  %2957 = vrot.lane.b32.xlu0 %v2824_v39, %s7584_s26  ;;  %v2697_v52 = vmul.f32 %v9297_v50, %v2627_v41  ;;  %v2696_v39 = vmul.f32 %v9297_v50, %v2626_v9  ;;  %v2555_v3 = vsub.f32 %v13831_v59, %v9275_v60 }
 0x590   : > { %2955 = vrot.lane.b32.xlu2 %v2823_v45, %s7584_s26  ;;  %v2695_v45 = vmul.f32 %v9297_v50, %v2625_v49  ;;  %v2553_v25 = vsub.f32 %v13832_v11, %v9275_v60  ;;  %v2629_v62 = vmul.f32 %v9293_v0, %v2554_v53  ;;  %v2556_v41 = vsub.f32 %v13833_v17, %v9275_v60 }
 0x591   : > { %v2767_v57 = vadd.f32 %v9306_v21, %v2697_v52  ;;  %v2766_v2 = vadd.f32 %v9306_v21, %v2696_v39  ;;  %v2630_v6 = vmul.f32 %v9293_v0, %v2555_v3  ;;  %v2557_v9 = vsub.f32 %v8595_v63, %v9275_v60 }
 0x592   : > { %v2765_v24 = vadd.f32 %v9306_v21, %v2695_v45  ;;  %v2628_v49 = vmul.f32 %v9293_v0, %v2553_v25  ;;  %v2569_v52 = vsub.f32 %v8771_v26, %v9275_v60  ;;  %v2570_v39 = vsub.f32 %v8779_v20, %v9275_v60 }
 0x593   : > { %v2572_v63 = vsub.f32 %v8813_v48, %v9275_v60  ;;  %v2573_v45 = vsub.f32 %v8822_v36, %v9275_v60  ;;  %v2831_v53 = vmax.f32 %v2767_v57, 0.0  ;;  %v2700_v59 = vmul.f32 %v9297_v50, %v2630_v6 }
 0x594   : > { %v2699_v26 = vmul.f32 %v9297_v50, %v2629_v62  ;;  %v2576_v20 = vsub.f32 %v8861_v43, %v9275_v60  ;;  %v2829_v3 = vmax.f32 %v2765_v24, 0.0  ;;  %v9385_v36 = vmul.f32 %v9293_v0, %v2569_v52 }
 0x595   : > { %v9392_v43 = vmul.f32 %v9293_v0, %v2573_v45  ;;  %v9395_v25 = vmul.f32 %v9293_v0, %v2572_v63  ;;  %v2770_v6 = vadd.f32 %v9306_v21, %v2700_v59  ;;  %v2632_v17 = vmul.f32 %v9293_v0, %v2557_v9 }
 0x596   : > { %v2769_v62 = vadd.f32 %v9306_v21, %v2699_v26  ;;  %v2574_v63 = vsub.f32 %v8847_v37, %v9275_v60  ;;  %v2577_v9 = vsub.f32 %v8883_v22, %v9275_v60  ;;  %v2578_v45 = vsub.f32 %v8892_v30, %v9275_v60  ;;  %v13836_v30 = vld [vmem:[#allocation136_spill] sm:$0xff] }
 0x597   : > { %2965 = vrot.lane.b32.xlu1 %v2828_v15, %s7584_s26  ;;  %2963 = vrot.lane.b32.xlu0 %v2827_v18, %s7584_s26  ;;  %v2558_v15 = vsub.f32 %v8620_v51, %v9275_v60  ;;  %v2568_v18 = vsub.f32 %v8766_v1, %v9275_v60  ;;  %v2575_v51 = vsub.f32 %v8853_v10, %v9275_v60  ;;  %v2830_v1 = vmax.f32 %v2766_v2, 0.0 }
 0x598   : > { %2961 = vrot.lane.b32.xlu2 %v2826_v27, %s7584_s26  ;;  %v2571_v27 = vsub.f32 %v8802_v38, %v9275_v60  ;;  %v2698_v38 = vmul.f32 %v9297_v50, %v2628_v49  ;;  %v9382_v10 = vmul.f32 %v9293_v0, %v2570_v39  ;;  %v9401_v2 = vmul.f32 %v9293_v0, %v2576_v20  ;;  %v13834_v49 = vld [vmem:[#allocation96_spill] sm:$0xff] }
 0x599   : > { %v2633_v48 = vmul.f32 %v9293_v0, %v2558_v15  ;;  %v9388_v11 = vmul.f32 %v9293_v0, %v2568_v18  ;;  %v9407_v24 = vmul.f32 %v9293_v0, %v2575_v51  ;;  %v2559_v15 = vsub.f32 %v13834_v49, %v9275_v60 }
 0x59a   : > { %v9398_v57 = vmul.f32 %v9293_v0, %v2571_v27  ;;  %v2560_v18 = vsub.f32 %v8637_v4, %v9275_v60  ;;  %v2768_v52 = vadd.f32 %v9306_v21, %v2698_v38  ;;  %v2631_v39 = vmul.f32 %v9293_v0, %v2556_v41 }
 0x59b   : > { %v2561_v27 = vsub.f32 %v8662_v58, %v9275_v60  ;;  %v2579_v51 = vsub.f32 %v8900_v32, %v9275_v60  ;;  %v2580_v4 = vsub.f32 %v8925_v8, %v9275_v60  ;;  %v2581_v41 = vsub.f32 %v8931_v40, %v9275_v60  ;;  %v13835_v58 = vld [vmem:[#allocation130_spill] sm:$0xff] }
 0x59c   : > { %v2833_v37 = vmax.f32 %v2769_v62, 0.0  ;;  %v2703_v59 = vmul.f32 %v9297_v50, %v2633_v48  ;;  %v2702_v22 = vmul.f32 %v9297_v50, %v2632_v17  ;;  %v2585_v26 = vsub.f32 %v13836_v30, %v9275_v60  ;;  %v13842_v30 = vld [vmem:[#allocation139_spill] sm:$0xff] }
 0x59d   : > { %v2832_v20 = vmax.f32 %v2768_v52, 0.0  ;;  %v2701_v32 = vmul.f32 %v9297_v50, %v2631_v39  ;;  %v2636_v8 = vmul.f32 %v9293_v0, %v2561_v27  ;;  %v9440_v40 = vmul.f32 %v9293_v0, %v2574_v63  ;;  %v13837_v63 = vld [vmem:[#allocation102_spill] sm:$0xff] }
 0x59e   : > { %v9446_v38 = vmul.f32 %v9293_v0, %v2578_v45  ;;  %v9450_v48 = vmul.f32 %v9293_v0, %v2577_v9  ;;  %v9456_v62 = vmul.f32 %v9293_v0, %v2581_v41  ;;  %v9459_v17 = vmul.f32 %v9293_v0, %v2580_v4  ;;  %v13838_v4 = vld [vmem:[#allocation103_spill] sm:$0xff] }
 0x59f   : > { %2971 = vrot.lane.b32.xlu1 %v2831_v53, %s7584_s26  ;;  %2969 = vrot.lane.b32.xlu0 %v2830_v1, %s7584_s26  ;;  %v2582_v53 = vsub.f32 %v13835_v58, %v9275_v60  ;;  %v2834_v1 = vmax.f32 %v2770_v6, 0.0  ;;  %v2773_v49 = vadd.f32 %v9306_v21, %v2703_v59  ;;  %v2772_v52 = vadd.f32 %v9306_v21, %v2702_v22  ;;  %v13841_v59 = vld [vmem:[#allocation134_spill] sm:$0xff] }
 0x5a0   : > { %2967 = vrot.lane.b32.xlu2 %v2829_v3, %s7584_s26  ;;  %v9443_v3 = vmul.f32 %v9293_v0, %v2579_v51  ;;  %v2635_v39 = vmul.f32 %v9293_v0, %v2560_v18  ;;  %v9465_v27 = vmul.f32 %v9293_v0, %v2585_v26  ;;  %v2562_v9 = vsub.f32 %v13837_v63, %v9275_v60  ;;  %v13840_v18 = vld [vmem:[#allocation132_spill] sm:$0xff] }
 0x5a1   : > { %v9453_v6 = vmul.f32 %v9293_v0, %v2582_v53  ;;  %v2771_v45 = vadd.f32 %v9306_v21, %v2701_v32  ;;  %v2706_v51 = vmul.f32 %v9297_v50, %v2636_v8  ;;  %v2634_v41 = vmul.f32 %v9293_v0, %v2559_v15  ;;  %v13839_v53 = vld [vmem:[#allocation106_spill] sm:$0xff]  ;;  %v13845_v63 = vld [vmem:[#allocation144_spill] sm:$0xff] }
 0x5a2   : > { %v2563_v58 = vsub.f32 %v13838_v4, %v9275_v60  ;;  %v2584_v22 = vsub.f32 %v13841_v59, %v9275_v60  ;;  %v2586_v26 = vsub.f32 %v13842_v30, %v9275_v60  ;;  %v13844_v15 = vld [vmem:[#allocation142_spill] sm:$0xff]  ;;  %v2589_v4 = vsub.f32 %v13845_v63, %v9275_v60  ;;  %v13847_v59 = vld [vmem:[#allocation148_spill] sm:$0xff] }
 0x5a3   : > { %v2588_v8 = vsub.f32 %v13844_v15, %v9275_v60  ;;  %v2837_v35 = vmax.f32 %v2773_v49, 0.0  ;;  %v2705_v5 = vmul.f32 %v9297_v50, %v2635_v39  ;;  %v2591_v47 = vsub.f32 %v13847_v59, %v9275_v60  ;;  %v13852_v59 = vld [vmem:[#allocation153_spill] sm:$0xff] }
 0x5a4   : > { %v2835_v30 = vmax.f32 %v2771_v45, 0.0  ;;  %v2776_v54 = vadd.f32 %v9306_v21, %v2706_v51  ;;  %v9498_v15 = vmul.f32 %v9293_v0, %v2584_v22  ;;  %v9511_v45 = vmul.f32 %v9293_v0, %v2586_v26  ;;  %v13849_v26 = vld [vmem:[#allocation110_spill] sm:$0xff] }
 0x5a5   : > { %v2638_v22 = vmul.f32 %v9293_v0, %v2563_v58  ;;  %v13851_v58 = vld [vmem:[#allocation151_spill] sm:$0xff] }
 0x5a7   : > { %2977 = vrot.lane.b32.xlu1 %v2834_v1, %s7584_s26  ;;  %2975 = vrot.lane.b32.xlu0 %v2833_v37, %s7584_s26  ;;  %v2564_v1 = vsub.f32 %v13839_v53, %v9275_v60  ;;  %v2583_v37 = vsub.f32 %v13840_v18, %v9275_v60  ;;  %v13846_v53 = vld [vmem:[#allocation146_spill] sm:$0xff]  ;;  %v2836_v18 = vmax.f32 %v2772_v52, 0.0  ;;  %v9504_v52 = vmul.f32 %v9293_v0, %v2588_v8 }
 0x5a8   : > { %2973 = vrot.lane.b32.xlu2 %v2832_v20, %s7584_s26  ;;  %v13843_v20 = vld [vmem:[#allocation140_spill] sm:$0xff]  ;;  %v2590_v55 = vsub.f32 %v13846_v53, %v9275_v60  ;;  %v9523_v8 = vmul.f32 %v9293_v0, %v2589_v4  ;;  %v2566_v53 = vsub.f32 %v13849_v26, %v9275_v60  ;;  %v2593_v4 = vsub.f32 %v13851_v58, %v9275_v60 }
 0x5a9   : > { %v2587_v32 = vsub.f32 %v13843_v20, %v9275_v60  ;;  %v2704_v20 = vmul.f32 %v9297_v50, %v2634_v41  ;;  %v9501_v49 = vmul.f32 %v9293_v0, %v2583_v37  ;;  %v2775_v41 = vadd.f32 %v9306_v21, %v2705_v5 }
 0x5aa   : > { %v9517_v51 = vmul.f32 %v9293_v0, %v2590_v55  ;;  %v2639_v37 = vmul.f32 %v9293_v0, %v2564_v1  ;;  %v2637_v55 = vmul.f32 %v9293_v0, %v2562_v9  ;;  %v2592_v1 = vsub.f32 %v9081_v28, %v9275_v60 }
 0x5ab   : > { %v9508_v39 = vmul.f32 %v9293_v0, %v2587_v32  ;;  %v13848_v32 = vld [vmem:[#allocation109_spill] sm:$0xff]  ;;  %v2597_v9 = vsub.f32 %v9134_v19, %v9275_v60  ;;  %v2599_v26 = vsub.f32 %v9165_v56, %v9275_v60  ;;  %v2839_v28 = vmax.f32 %v2775_v41, 0.0 }
 0x5ac   : > { %v2565_v63 = vsub.f32 %v13848_v32, %v9275_v60  ;;  %v2595_v32 = vsub.f32 %v9117_v33, %v9275_v60  ;;  %v2709_v23 = vmul.f32 %v9297_v50, %v2639_v37  ;;  %v2708_v58 = vmul.f32 %v9297_v50, %v2638_v22 }
 0x5ad   : > { %v2707_v33 = vmul.f32 %v9297_v50, %v2637_v55  ;;  %v9562_v56 = vmul.f32 %v9293_v0, %v2592_v1 }
 0x5ae   : > { %v9572_v37 = vmul.f32 %v9293_v0, %v2595_v32  ;;  %v2778_v55 = vadd.f32 %v9306_v21, %v2708_v58  ;;  %v2602_v32 = vsub.f32 %v9204_v7, %v9275_v60  ;;  %v13853_v7 = vsub.f32 %v9210_v29, %v9275_v60 }
 0x5af   : > { %2983 = vrot.lane.b32.xlu1 %v2837_v35, %s7584_s26  ;;  %2981 = vrot.lane.b32.xlu0 %v2836_v18, %s7584_s26  ;;  %v9514_v35 = vmul.f32 %v9293_v0, %v2591_v47  ;;  %v2774_v47 = vadd.f32 %v9306_v21, %v2704_v20  ;;  %v13850_v18 = vld [vmem:[#allocation113_spill] sm:$0xff]  ;;  %v2596_v20 = vsub.f32 %v9126_v13, %v9275_v60 }
 0x5b0   : > { %2979 = vrot.lane.b32.xlu2 %v2835_v30, %s7584_s26  ;;  %v2567_v5 = vsub.f32 %v13850_v18, %v9275_v60  ;;  %v2594_v30 = vsub.f32 %v13852_v59, %v9275_v60  ;;  %v2840_v18 = vmax.f32 %v2776_v54, 0.0  ;;  %v2600_v59 = vsub.f32 %v9173_v34, %v9275_v60 }
 0x5b1   : > { %v2838_v14 = vmax.f32 %v2774_v47, 0.0  ;;  %v9559_v54 = vmul.f32 %v9293_v0, %v2593_v4  ;;  %v9566_v34 = vmul.f32 %v9293_v0, %v2597_v9  ;;  %v9569_v41 = vmul.f32 %v9293_v0, %v2596_v20 }
 0x5b2   : > { %v2642_v13 = vmul.f32 %v9293_v0, %v2567_v5  ;;  %v9556_v19 = vmul.f32 %v9293_v0, %v2594_v30  ;;  %v9575_v22 = vmul.f32 %v9293_v0, %v2600_v59  ;;  %v2779_v47 = vadd.f32 %v9306_v21, %v2709_v23  ;;  %v2889_v59 = vld [vmem:[%s13361_s3 + $0x70] sm:$0xff] }
 0x5b3   : > { %v2641_v5 = vmul.f32 %v9293_v0, %v2566_v53  ;;  %v2777_v1 = vadd.f32 %v9306_v21, %v2707_v33  ;;  %v2640_v4 = vmul.f32 %v9293_v0, %v2565_v63  ;;  %v2598_v30 = vsub.f32 %v9159_v61, %v9275_v60 }
 0x5b4   : > { %v2843_v20 = vmax.f32 %v2779_v47, 0.0  ;;  %v2842_v9 = vmax.f32 %v2778_v55, 0.0  ;;  %v2712_v23 = vmul.f32 %v9297_v50, %v2642_v13  ;;  %v2601_v53 = vsub.f32 %v9195_v12, %v9275_v60 }
 0x5b5   : > { %v2710_v63 = vmul.f32 %v9297_v50, %v2640_v4  ;;  %v9599_v61 = vmul.f32 %v9293_v0, %v2598_v30  ;;  %v9605_v58 = vmul.f32 %v9293_v0, %v13853_v7  ;;  %v9608_v12 = vmul.f32 %v9293_v0, %v2602_v32 }
 0x5b6   : > { %v9618_v33 = vmul.f32 %v9293_v0, %v2601_v53  ;;  %v13854_v29 = vsub.f32 %v9263_v16, %v9275_v60  ;;  %v13855_v47 = vsub.f32 %v9240_v44, %v9275_v60  ;;  %v13856_v16 = vsub.f32 %v9255_v31, %v9275_v60  ;;  %v2888_v44 = vld [vmem:[%s13361_s3 + $0x68] sm:$0xff] }
 0x5b7   : > { %2989 = vrot.lane.b32.xlu1 %v2840_v18, %s7584_s26  ;;  %2987 = vrot.lane.b32.xlu0 %v2839_v28, %s7584_s26  ;;  %v2711_v18 = vmul.f32 %v9297_v50, %v2641_v5  ;;  %v2841_v28 = vmax.f32 %v2777_v1, 0.0  ;;  %v2782_v1 = vadd.f32 %v9306_v21, %v2712_v23  ;;  %v2780_v32 = vadd.f32 %v9306_v21, %v2710_v63 }
 0x5b8   : > { %2985 = vrot.lane.b32.xlu2 %v2838_v14, %s7584_s26  ;;  %v9581_v14 = vmul.f32 %v9293_v0, %v2599_v26  ;;  %v2604_v26 = vsub.f32 %v9234_v46, %v9275_v60  ;;  %v2890_v46 = vld [vmem:[%s13361_s3 + $0x78] sm:$0xff]  ;;  %v9624_v13 = vmul.f32 %v9293_v0, %v13854_v29  ;;  %v9630_v55 = vmul.f32 %v9293_v0, %v13855_v47 }
 0x5b9   : > { %v2781_v4 = vadd.f32 %v9306_v21, %v2711_v18  ;;  %3223 = vmatpush.msra.mxu2 %v2890_v46  ;;  %v9641_v30 = vmul.f32 %v9293_v0, %v13856_v16  ;;  %v2715_v23 = vmul.f32 %v9297_v50, %v9382_v10  ;;  %v2714_v18 = vmul.f32 %v9297_v50, %v9385_v36 }
 0x5ba   : > { %v9633_v5 = vmul.f32 %v9293_v0, %v2604_v26  ;;  %v2844_v31 = vmax.f32 %v2780_v32, 0.0  ;;  %v2713_v60 = vmul.f32 %v9297_v50, %v9388_v11  ;;  %v2887_v0 = vld [vmem:[%s13361_s3 + $0x60] sm:$0xff]  ;;  %v2718_v11 = vmul.f32 %v9297_v50, %v9392_v43 }
 0x5bb   : > { %3224 = vmatpush.msra.mxu2 %v2889_v59  ;;  %v2785_v10 = vadd.f32 %v9306_v21, %v2715_v23  ;;  %v2784_v53 = vadd.f32 %v9306_v21, %v2714_v18  ;;  %v2717_v63 = vmul.f32 %v9297_v50, %v9395_v25  ;;  %v2716_v46 = vmul.f32 %v9297_v50, %v9398_v57 }
 0x5bc   : > { %v2783_v36 = vadd.f32 %v9306_v21, %v2713_v60  ;;  %v2788_v59 = vadd.f32 %v9306_v21, %v2718_v11  ;;  %v2721_v25 = vmul.f32 %v9297_v50, %v9401_v2  ;;  %v2720_v57 = vmul.f32 %v9297_v50, %v9407_v24 }
 0x5bd   : > { %3225 = vmatpush.msra.mxu2 %v2888_v44  ;;  %v2849_v26 = vmax.f32 %v2785_v10, 0.0  ;;  %v2787_v29 = vadd.f32 %v9306_v21, %v2717_v63  ;;  %v2786_v47 = vadd.f32 %v9306_v21, %v2716_v46  ;;  %v2719_v16 = vmul.f32 %v9297_v50, %v9440_v40 }
 0x5be   : > { %v2847_v7 = vmax.f32 %v2783_v36, 0.0  ;;  %v2852_v43 = vmax.f32 %v2788_v59, 0.0  ;;  %v2791_v32 = vadd.f32 %v9306_v21, %v2721_v25  ;;  %v2790_v44 = vadd.f32 %v9306_v21, %v2720_v57 }
 0x5bf   : > { %2995 = vrot.lane.b32.xlu1 %v2843_v20, %s7584_s26  ;;  %2993 = vrot.lane.b32.xlu0 %v2842_v9, %s7584_s26  ;;  %v2846_v20 = vmax.f32 %v2782_v1, 0.0  ;;  %v2845_v9 = vmax.f32 %v2781_v4, 0.0  ;;  %v2851_v1 = vmax.f32 %v2787_v29, 0.0  ;;  %v2850_v4 = vmax.f32 %v2786_v47, 0.0 }
 0x5c0   : > { %2991 = vrot.lane.b32.xlu2 %v2841_v28, %s7584_s26  ;;  %3226 = vmatpush.msra.mxu2 %v2887_v0  ;;  %v2848_v28 = vmax.f32 %v2784_v53, 0.0  ;;  %v2855_v2 = vmax.f32 %v2791_v32, 0.0  ;;  %v2724_v24 = vmul.f32 %v9297_v50, %v9443_v3  ;;  %v2723_v40 = vmul.f32 %v9297_v50, %v9446_v38 }
 0x5c1   : > { %v2722_v18 = vmul.f32 %v9297_v50, %v9450_v48  ;;  %v2727_v38 = vmul.f32 %v9297_v50, %v9453_v6  ;;  %v2726_v48 = vmul.f32 %v9297_v50, %v9456_v62  ;;  %v2725_v36 = vmul.f32 %v9297_v50, %v9459_v17 }
 0x5c2   : > { %v2793_v60 = vadd.f32 %v9306_v21, %v2723_v40  ;;  %v2730_v17 = vmul.f32 %v9297_v50, %v9465_v27  ;;  %v2728_v59 = vmul.f32 %v9297_v50, %v9501_v49  ;;  %v2732_v49 = vmul.f32 %v9297_v50, %v9508_v39 }
 0x5c3   : > { %v2792_v0 = vadd.f32 %v9306_v21, %v2722_v18  ;;  %v2795_v6 = vadd.f32 %v9306_v21, %v2725_v36  ;;  %v2731_v57 = vmul.f32 %v9297_v50, %v9511_v45  ;;  %v2736_v39 = vmul.f32 %v9297_v50, %v9514_v35 }
 0x5c4   : > { %v2857_v10 = vmax.f32 %v2793_v60, 0.0  ;;  %v2800_v29 = vadd.f32 %v9306_v21, %v2730_v17  ;;  %v2735_v45 = vmul.f32 %v9297_v50, %v9517_v51  ;;  %v2738_v18 = vmul.f32 %v9297_v50, %v9559_v54 }
 0x5c5   : > { %v2856_v53 = vmax.f32 %v2792_v0, 0.0  ;;  %v2859_v46 = vmax.f32 %v2795_v6, 0.0  ;;  %v2801_v32 = vadd.f32 %v9306_v21, %v2731_v57  ;;  %v2737_v60 = vmul.f32 %v9297_v50, %v9562_v56 }
 0x5c6   : > { %v2864_v27 = vmax.f32 %v2800_v29, 0.0  ;;  %v2805_v40 = vadd.f32 %v9306_v21, %v2735_v45  ;;  %v2742_v56 = vmul.f32 %v9297_v50, %v9566_v34  ;;  %v2740_v36 = vmul.f32 %v9297_v50, %v9572_v37 }
 0x5c7   : > { %3001 = vrot.lane.b32.xlu1 %v2846_v20, %s7584_s26  ;;  %2999 = vrot.lane.b32.xlu0 %v2845_v9, %s7584_s26  ;;  %v2789_v20 = vadd.f32 %v9306_v21, %v2719_v16  ;;  %v2854_v9 = vmax.f32 %v2790_v44, 0.0  ;;  %v2802_v16 = vadd.f32 %v9306_v21, %v2732_v49  ;;  %v2745_v37 = vmul.f32 %v9297_v50, %v9575_v22 }
 0x5c8   : > { %2997 = vrot.lane.b32.xlu2 %v2844_v31, %s7584_s26  ;;  %v2794_v31 = vadd.f32 %v9306_v21, %v2724_v24  ;;  %v2806_v24 = vadd.f32 %v9306_v21, %v2736_v39  ;;  %v2810_v34 = vadd.f32 %v9306_v21, %v2740_v36  ;;  %v2743_v17 = vmul.f32 %v9297_v50, %v9599_v61 }
 0x5c9   : > { %v2853_v23 = vmax.f32 %v2789_v20, 0.0  ;;  %v2866_v44 = vmax.f32 %v2802_v16, 0.0  ;;  %v2865_v20 = vmax.f32 %v2801_v32, 0.0  ;;  %v2748_v61 = vmul.f32 %v9297_v50, %v9605_v58 }
 0x5ca   : > { %v2858_v3 = vmax.f32 %v2794_v31, 0.0  ;;  %v2870_v51 = vmax.f32 %v2806_v24, 0.0  ;;  %v2813_v22 = vadd.f32 %v9306_v21, %v2743_v17  ;;  %v2751_v57 = vmul.f32 %v9297_v50, %v9624_v13  ;;  %v3936_v24 = vld [vmem:[%s13361_s3 + $0x90] sm:$0xff]  ;;  %v13862_v17 = vld [vmem:[#allocation11_spill] sm:$0xff] }
 0x5cb   : > { %v2749_v32 = vmul.f32 %v9297_v50, %v9633_v5  ;;  %v2752_v5 = vmul.f32 %v9297_v50, %v9641_v30 }
 0x5cd   : > { %v2819_v13 = vadd.f32 %v9306_v21, %v2749_v32  ;;  %v13868_v32 = vld [vmem:[#allocation14_spill] sm:$0xff] }
 0x5cf   : > { %3007 = vrot.lane.b32.xlu1 %v2849_v26, %s7584_s26  ;;  %3005 = vrot.lane.b32.xlu0 %v2848_v28, %s7584_s26  ;;  %v2797_v26 = vadd.f32 %v9306_v21, %v2727_v38  ;;  %v2796_v28 = vadd.f32 %v9306_v21, %v2726_v48  ;;  %v2741_v48 = vmul.f32 %v9297_v50, %v9569_v41 }
 0x5d0   : > { %3003 = vrot.lane.b32.xlu2 %v2847_v7, %s7584_s26  ;;  %v2729_v7 = vmul.f32 %v9297_v50, %v9498_v15  ;;  %v2733_v15 = vmul.f32 %v9297_v50, %v9504_v52 }
 0x5d1   : > { %v2861_v62 = vmax.f32 %v2797_v26, 0.0  ;;  %v2860_v63 = vmax.f32 %v2796_v28, 0.0  ;;  %v2812_v28 = vadd.f32 %v9306_v21, %v2742_v56 }
 0x5d2   : > { %v2799_v47 = vadd.f32 %v9306_v21, %v2729_v7 }
 0x5d3   : > { %v2876_v41 = vmax.f32 %v2812_v28, 0.0  ;;  %v13859_v28 = vld [vmem:[#allocation9_spill] sm:$0xff] }
 0x5d7   : > { %3013 = vrot.lane.b32.xlu1 %v2852_v43, %s7584_s26  ;;  %3011 = vrot.lane.b32.xlu0 %v2851_v1, %s7584_s26  ;;  %v2798_v43 = vadd.f32 %v9306_v21, %v2728_v59  ;;  %v2863_v1 = vmax.f32 %v2799_v47, 0.0  ;;  %v2747_v47 = vmul.f32 %v9297_v50, %v9608_v12  ;;  %v3937_v12 = vld [vmem:[%s13361_s3 + $0x98] sm:$0xff] }
 0x5d8   : > { %3009 = vrot.lane.b32.xlu2 %v2850_v4, %s7584_s26  ;;  %v2803_v4 = vadd.f32 %v9306_v21, %v2733_v15  ;;  %v2818_v15 = vadd.f32 %v9306_v21, %v2748_v61  ;;  %4142 = vmatpush.msrb.mxu0 %v3937_v12  ;;  %v13864_v61 = vld [vmem:[#allocation12_spill] sm:$0xff] }
 0x5d9   : > { %v2862_v25 = vmax.f32 %v2798_v43, 0.0  ;;  %v2877_v43 = vmax.f32 %v2813_v22, 0.0  ;;  %v2817_v49 = vadd.f32 %v9306_v21, %v2747_v47 }
 0x5da   : > { %v2867_v52 = vmax.f32 %v2803_v4, 0.0  ;;  %v2750_v4 = vmul.f32 %v9297_v50, %v9630_v55  ;;  %4143 = vmatpush.msrb.mxu0 %v3936_v24 }
 0x5dc   : > { %v2820_v39 = vadd.f32 %v9306_v21, %v2750_v4 }
 0x5de   : > { %v2884_v45 = vmax.f32 %v2820_v39, 0.0 }
 0x5df   : > { %3019 = vrot.lane.b32.xlu1 %v2855_v2, %s7584_s26  ;;  %3017 = vrot.lane.b32.xlu0 %v2854_v9, %s7584_s26  ;;  %v2734_v2 = vmul.f32 %v9297_v50, %v9523_v8  ;;  %v2739_v8 = vmul.f32 %v9297_v50, %v9556_v19  ;;  %v2807_v19 = vadd.f32 %v9306_v21, %v2737_v60  ;;  %v9841_v60 = vld [vmem:[%s7656_s10 + $0x8] ss:$0 sm:$0xff] }
 0x5e0   : > { %3015 = vrot.lane.b32.xlu2 %v2853_v23, %s7584_s26  ;;  %v2869_v23 = vmax.f32 %v2805_v40, 0.0 }
 0x5e1   : > { %v2804_v35 = vadd.f32 %v9306_v21, %v2734_v2 }
 0x5e3   : > { %v2868_v31 = vmax.f32 %v2804_v35, 0.0  ;;  %v3935_v35 = vld [vmem:[%s13361_s3 + $0x88] sm:$0xff] }
 0x5e4   : > { %4144 = vmatpush.msrb.mxu0 %v3935_v35 }
 0x5e7   : > { %3025 = vrot.lane.b32.xlu1 %v2858_v3, %s7584_s26  ;;  %3023 = vrot.lane.b32.xlu0 %v2857_v10, %s7584_s26  ;;  %v2809_v3 = vadd.f32 %v9306_v21, %v2739_v8  ;;  %v2808_v10 = vadd.f32 %v9306_v21, %v2738_v18 }
 0x5e8   : > { %3021 = vrot.lane.b32.xlu2 %v2856_v53, %s7584_s26  ;;  %v2871_v53 = vmax.f32 %v2807_v19, 0.0  ;;  %v13858_v19 = vld [vmem:[#allocation25_spill] sm:$0xff] }
 0x5e9   : > { %v2873_v54 = vmax.f32 %v2809_v3, 0.0  ;;  %v2872_v38 = vmax.f32 %v2808_v10, 0.0  ;;  %v13857_v10 = vld [vmem:[#allocation8_spill] sm:$0xff] }
 0x5ea   : > { %v2956_v11 = vpop.permute.xlu2 %2955 }
 0x5eb   : > { %7118 = vmatmul.msk.f32.vlgmr.msra.gmra.mxu2 %vm305_vm0, %v2956_v11  ;;  %v2811_v11 = vadd.f32 %v9306_v21, %v2741_v48 }
 0x5ed   : > { %v2875_v6 = vmax.f32 %v2811_v11, 0.0  ;;  %v13860_v11 = vld [vmem:[#allocation10_spill] sm:$0xff] }
 0x5ef   : > { %3031 = vrot.lane.b32.xlu1 %v2861_v62, %s7584_s26  ;;  %3029 = vrot.lane.b32.xlu0 %v2860_v63, %s7584_s26  ;;  %v2744_v62 = vmul.f32 %v9297_v50, %v9581_v14  ;;  %v2874_v63 = vmax.f32 %v2810_v34, 0.0  ;;  %v3487_v34 = vsub.f32 %v13860_v11, %v13859_v28 }
 0x5f0   : > { %3027 = vrot.lane.b32.xlu2 %v2859_v46, %s7584_s26  ;;  %v2815_v46 = vadd.f32 %v9306_v21, %v2745_v37 }
 0x5f1   : > { %v2814_v59 = vadd.f32 %v9306_v21, %v2744_v62 }
 0x5f2   : > { %v2962_v26 = vpop.permute.xlu2 %2961  ;;  %v2879_v14 = vmax.f32 %v2815_v46, 0.0 }
 0x5f3   : > { %v2878_v29 = vmax.f32 %v2814_v59, 0.0 }
 0x5f7   : > { %3037 = vrot.lane.b32.xlu1 %v2864_v27, %s7584_s26  ;;  %3035 = vrot.lane.b32.xlu0 %v2863_v1, %s7584_s26  ;;  %v2746_v27 = vmul.f32 %v9297_v50, %v9618_v33  ;;  %v2882_v33 = vmax.f32 %v2818_v15, 0.0 }
 0x5f8   : > { %3033 = vrot.lane.b32.xlu2 %v2862_v25, %s7584_s26  ;;  %v2881_v25 = vmax.f32 %v2817_v49, 0.0  ;;  %v13865_v49 = vld [vmem:[#allocation7_spill] sm:$0xff] }
 0x5f9   : > { %v2816_v58 = vadd.f32 %v9306_v21, %v2746_v27 }
 0x5fb   : > { %v2880_v16 = vmax.f32 %v2816_v58, 0.0  ;;  %v13866_v58 = vld [vmem:[#allocation13_spill] sm:$0xff] }
 0x5fc   : > { %v3490_v12 = vsub.f32 %v13866_v58, %v13865_v49 }
 0x5ff   : > { %3043 = vrot.lane.b32.xlu1 %v2867_v52, %s7584_s26  ;;  %3041 = vrot.lane.b32.xlu0 %v2866_v44, %s7584_s26  ;;  %v2968_v52 = vpop.permute.xlu2 %2967  ;;  %v2821_v44 = vadd.f32 %v9306_v21, %v2751_v57 }
 0x600   : > { %3039 = vrot.lane.b32.xlu2 %v2865_v20, %s7584_s26  ;;  %v2883_v20 = vmax.f32 %v2819_v13, 0.0 }
 0x601   : > { %v2958_v9 = vpop.permute.xlu0 %2957  ;;  %v2960_v0 = vpop.permute.xlu1 %2959  ;;  %v2885_v55 = vmax.f32 %v2821_v44, 0.0 }
 0x602   : > { %7119 = vmatmul.msk.f32.gmra.mxu2 %vm305_vm0, %v2958_v9  ;;  %v2822_v9 = vadd.f32 %v9306_v21, %v2752_v5 }
 0x604   : > { %v2886_v40 = vmax.f32 %v2822_v9, 0.0 }
 0x607   : > { %3049 = vrot.lane.b32.xlu1 %v2870_v51, %s7584_s26  ;;  %3047 = vrot.lane.b32.xlu0 %v2869_v23, %s7584_s26  ;;  %v2974_v30 = vpop.permute.xlu2 %2973  ;;  %v3934_v23 = vld [vmem:[%s13361_s3 + $0x80] sm:$0xff] }
 0x608   : > { %3045 = vrot.lane.b32.xlu2 %v2868_v31, %s7584_s26  ;;  %4145 = vmatpush.msrb.mxu0 %v3934_v23 }
 0x609   : > { %v2964_v7 = vpop.permute.xlu0 %2963  ;;  %v2966_v1 = vpop.permute.xlu1 %2965 }
 0x60a   : > { %7120 = vmatmul.msk.f32.gmra.mxu2 %vm305_vm0, %v2960_v0 }
 0x60f   : > { %3055 = vrot.lane.b32.xlu1 %v2873_v54, %s7584_s26  ;;  %3053 = vrot.lane.b32.xlu0 %v2872_v38, %s7584_s26  ;;  %v2980_v8 = vpop.permute.xlu2 %2979  ;;  %v3486_v54 = vsub.f32 %v13858_v19, %v13857_v10 }
 0x610   : > { %3051 = vrot.lane.b32.xlu2 %v2871_v53, %s7584_s26 }
 0x611   : > { %v2970_v2 = vpop.permute.xlu0 %2969  ;;  %v2972_v50 = vpop.permute.xlu1 %2971 }
 0x612   : > { %7121 = vmatmul.msk.f32.gmra.mxu2 %vm305_vm0, %v2962_v26 }
 0x617   : > { %3061 = vrot.lane.b32.xlu1 %v2876_v41, %s7584_s26  ;;  %3059 = vrot.lane.b32.xlu0 %v2875_v6, %s7584_s26  ;;  %v2986_v38 = vpop.permute.xlu2 %2985 }
 0x618   : > { %3057 = vrot.lane.b32.xlu2 %v2874_v63, %s7584_s26  ;;  %v13861_v63 = vld [vmem:[#allocation6_spill] sm:$0xff] }
 0x619   : > { %v2976_v21 = vpop.permute.xlu0 %2975  ;;  %v2978_v51 = vpop.permute.xlu1 %2977 }
 0x61a   : > { %7122 = vmatmul.msk.f32.gmra.mxu2 %vm305_vm0, %v2964_v7  ;;  %v3488_v7 = vsub.f32 %v13862_v17, %v13861_v63 }
 0x61f   : > { %3067 = vrot.lane.b32.xlu1 %v2879_v14, %s7584_s26  ;;  %3065 = vrot.lane.b32.xlu0 %v2878_v29, %s7584_s26  ;;  %v2992_v6 = vpop.permute.xlu2 %2991  ;;  %v13863_v29 = vld [vmem:[#allocation5_spill] sm:$0xff] }
 0x620   : > { %3063 = vrot.lane.b32.xlu2 %v2877_v43, %s7584_s26  ;;  %v3489_v47 = vsub.f32 %v13864_v61, %v13863_v29 }
 0x621   : > { %v2982_v18 = vpop.permute.xlu0 %2981  ;;  %v2984_v31 = vpop.permute.xlu1 %2983 }
 0x622   : > { %7123 = vmatmul.msk.f32.gmra.mxu2 %vm305_vm0, %v2966_v1 }
 0x627   : > { %3073 = vrot.lane.b32.xlu1 %v2882_v33, %s7584_s26  ;;  %3071 = vrot.lane.b32.xlu0 %v2881_v25, %s7584_s26  ;;  %v2998_v25 = vpop.permute.xlu2 %2997 }
 0x628   : > { %3069 = vrot.lane.b32.xlu2 %v2880_v16, %s7584_s26  ;;  %v13867_v16 = vld [vmem:[#allocation3_spill] sm:$0xff] }
 0x629   : > { %v2988_v48 = vpop.permute.xlu0 %2987  ;;  %v2990_v53 = vpop.permute.xlu1 %2989 }
 0x62a   : > { %7124 = vmatmul.msk.f32.gmra.mxu2 %vm305_vm0, %v2968_v52  ;;  %v3491_v52 = vsub.f32 %v13868_v32, %v13867_v16 }
 0x62f   : > { %3079 = vrot.lane.b32.xlu1 %v2885_v55, %s7584_s26  ;;  %3077 = vrot.lane.b32.xlu0 %v2884_v45, %s7584_s26  ;;  %v13869_v45 = vld [vmem:[#allocation4_spill] sm:$0xff] }
 0x630   : > { %3075 = vrot.lane.b32.xlu2 %v2883_v20, %s7584_s26  ;;  %v13870_v20 = vld [vmem:[#allocation15_spill] sm:$0xff] }
 0x631   : > { %v2994_v59 = vpop.permute.xlu0 %2993  ;;  %v2996_v27 = vpop.permute.xlu1 %2995  ;;  %v3492_v5 = vsub.f32 %v13870_v20, %v13869_v45 }
 0x632   : > { %7125 = vmatmul.msk.f32.gmra.mxu2 %vm305_vm0, %v2970_v2 }
 0x638   : > { %3081 = vrot.lane.b32.xlu2 %v2886_v40, %s7584_s26  ;;  %s7589_s26 = smov 32  }
 0x639   : > { %v3000_v39 = vpop.permute.xlu0 %2999  ;;  %v3002_v9 = vpop.permute.xlu1 %3001 }
 0x63a   : > { %7126 = vmatmul.msk.f32.gmra.mxu2 %vm305_vm0, %v2972_v50  ;;  %v13871_v50 = vld [vmem:[#allocation2_spill] sm:$0xff] }
 0x642   : > { %7127 = vmatmul.msk.f32.gmra.mxu2 %vm305_vm0, %v2974_v30  ;;  %v13872_v30 = vld [vmem:[#allocation16_spill] sm:$0xff] }
 0x643   : > { %v3493_v35 = vsub.f32 %v13872_v30, %v13871_v50 }
 0x64a   : > { %7128 = vmatmul.msk.f32.gmra.mxu2 %vm305_vm0, %v2976_v21 }
 0x652   : > { %7129 = vmatmul.msk.f32.gmra.mxu2 %vm305_vm0, %v2978_v51  ;;  %v3004_v51 = vpop.permute.xlu2 %3003 }
 0x65a   : > { %7130 = vmatmul.msk.f32.gmra.mxu2 %vm305_vm0, %v2980_v8 }
 0x662   : > { %7131 = vmatmul.msk.f32.gmra.mxu2 %vm305_vm0, %v2982_v18  ;;  %v13873_v18 = vld [vmem:[#allocation17_spill] sm:$0xff] }
 0x66a   : > { %7132 = vmatmul.msk.f32.gmra.mxu2 %vm305_vm0, %v2984_v31  ;;  %v3494_v31 = vsub.f32 %v13873_v18, %v13857_v10 }
 0x66e   : > { %v3228_v0 = vpop.f32.mrf.mxu2 }
 0x66f   : > { %v3422_v3 = vadd.f32 %v9841_v60, %v3228_v0 }
 0x671   : > { %v3550_v56 = vadd.f32 %v3486_v54, %v3422_v3  ;;  %3678 = vrot.lane.b32.xlu0 %v3422_v3, %s7589_s26  ;;  %v3006_v3 = vpop.permute.xlu0 %3005 }
 0x672   : > { %7133 = vmatmul.msk.f32.gmra.mxu2 %vm305_vm0, %v2986_v38 }
 0x673   : > { %7182 = vmatmul.msk.f32.vlgmr.msrb.gmra.mxu0 %vm305_vm0, %v3550_v56  ;;  %v13874_v56 = vld [vmem:[#allocation18_spill] sm:$0xff] }
 0x67a   : > { %7134 = vmatmul.msk.f32.gmra.mxu2 %vm305_vm0, %v2988_v48  ;;  %v3495_v48 = vsub.f32 %v13874_v56, %v13859_v28 }
 0x682   : > { %7135 = vmatmul.msk.f32.gmra.mxu2 %vm305_vm0, %v2990_v53 }
 0x685   : > { %v3231_v36 = vpop.f32.mrf.mxu2 }
 0x686   : > { %v3423_v26 = vadd.f32 %v9841_v60, %v3231_v36  ;;  %v3008_v36 = vpop.permute.xlu1 %3007 }
 0x688   : > { %v3551_v41 = vadd.f32 %v3487_v34, %v3423_v26  ;;  %3680 = vrot.lane.b32.xlu1 %v3423_v26, %s7589_s26 }
 0x68a   : > { %7136 = vmatmul.msk.f32.gmra.mxu2 %vm305_vm0, %v2992_v6  ;;  %7183 = vmatmul.msk.f32.gmra.mxu0 %vm305_vm0, %v3551_v41  ;;  %v13875_v41 = vld [vmem:[#allocation19_spill] sm:$0xff] }
 0x68b   : > { %v3496_v6 = vsub.f32 %v13875_v41, %v13861_v63 }
 0x68d   : > { %v3234_v37 = vpop.f32.mrf.mxu2 }
 0x68e   : > { %v3424_v62 = vadd.f32 %v9841_v60, %v3234_v37 }
 0x690   : > { %v3552_v46 = vadd.f32 %v3488_v7, %v3424_v62  ;;  %3682 = vrot.lane.b32.xlu2 %v3424_v62, %s7589_s26  ;;  %v3010_v62 = vpop.permute.xlu2 %3009 }
 0x692   : > { %7137 = vmatmul.msk.f32.gmra.mxu2 %vm305_vm0, %v2994_v59  ;;  %7184 = vmatmul.msk.f32.gmra.mxu0 %vm305_vm0, %v3552_v46  ;;  %v13876_v59 = vld [vmem:[#allocation20_spill] sm:$0xff] }
 0x695   : > { %v3237_v22 = vpop.f32.mrf.mxu2 }
 0x696   : > { %v3425_v14 = vadd.f32 %v9841_v60, %v3237_v22  ;;  %v3497_v22 = vsub.f32 %v13876_v59, %v13863_v29 }
 0x698   : > { %v3553_v43 = vadd.f32 %v3489_v47, %v3425_v14  ;;  %3684 = vrot.lane.b32.xlu0 %v3425_v14, %s7589_s26  ;;  %v3012_v47 = vpop.permute.xlu0 %3011 }
 0x69a   : > { %7138 = vmatmul.msk.f32.gmra.mxu2 %vm305_vm0, %v2996_v27  ;;  %7185 = vmatmul.msk.f32.gmra.mxu0 %vm305_vm0, %v3553_v43 }
 0x69d   : > { %v3240_v1 = vpop.f32.mrf.mxu2 }
 0x69e   : > { %v3426_v15 = vadd.f32 %v9841_v60, %v3240_v1  ;;  %v13877_v1 = vld [vmem:[#allocation21_spill] sm:$0xff] }
 0x6a0   : > { %v3554_v33 = vadd.f32 %v3490_v12, %v3426_v15  ;;  %3686 = vrot.lane.b32.xlu1 %v3426_v15, %s7589_s26  ;;  %v3498_v15 = vsub.f32 %v13877_v1, %v13865_v49 }
 0x6a2   : > { %7139 = vmatmul.msk.f32.gmra.mxu2 %vm305_vm0, %v2998_v25  ;;  %7186 = vmatmul.msk.f32.gmra.mxu0 %vm305_vm0, %v3554_v33  ;;  %v3014_v33 = vpop.permute.xlu1 %3013 }
 0x6a5   : > { %v3243_v57 = vpop.f32.mrf.mxu2 }
 0x6a6   : > { %v3427_v4 = vadd.f32 %v9841_v60, %v3243_v57 }
 0x6a8   : > { %v3555_v44 = vadd.f32 %v3491_v52, %v3427_v4  ;;  %3688 = vrot.lane.b32.xlu2 %v3427_v4, %s7589_s26  ;;  %v13878_v4 = vld [vmem:[#allocation22_spill] sm:$0xff] }
 0x6a9   : > { %v3499_v52 = vsub.f32 %v13878_v4, %v13867_v16 }
 0x6aa   : > { %7140 = vmatmul.msk.f32.gmra.mxu2 %vm305_vm0, %v3000_v39  ;;  %7187 = vmatmul.msk.f32.gmra.mxu0 %vm305_vm0, %v3555_v44  ;;  %v3016_v39 = vpop.permute.xlu2 %3015 }
 0x6ad   : > { %v3246_v13 = vpop.f32.mrf.mxu2 }
 0x6ae   : > { %v3428_v55 = vadd.f32 %v9841_v60, %v3246_v13 }
 0x6b0   : > { %v3556_v2 = vadd.f32 %v3492_v5, %v3428_v55  ;;  %3690 = vrot.lane.b32.xlu0 %v3428_v55, %s7589_s26  ;;  %v13879_v5 = vld [vmem:[#allocation23_spill] sm:$0xff] }
 0x6b2   : > { %7141 = vmatmul.msk.f32.gmra.mxu2 %vm305_vm0, %v3002_v9  ;;  %7188 = vmatmul.msk.f32.gmra.mxu0 %vm305_vm0, %v3556_v2  ;;  %v3500_v2 = vsub.f32 %v13879_v5, %v13869_v45 }
 0x6b5   : > { %v3249_v24 = vpop.f32.mrf.mxu2 }
 0x6b6   : > { %v3429_v40 = vadd.f32 %v9841_v60, %v3249_v24  ;;  %v3018_v24 = vpop.permute.xlu0 %3017 }
 0x6b8   : > { %v3557_v21 = vadd.f32 %v3493_v35, %v3429_v40  ;;  %3692 = vrot.lane.b32.xlu1 %v3429_v40, %s7589_s26 }
 0x6ba   : > { %7142 = vmatmul.msk.f32.gmra.mxu2 %vm305_vm0, %v3004_v51  ;;  %7189 = vmatmul.msk.f32.gmra.mxu0 %vm305_vm0, %v3557_v21  ;;  %v13880_v21 = vld [vmem:[#allocation24_spill] sm:$0xff] }
 0x6bb   : > { %v3501_v51 = vsub.f32 %v13880_v21, %v13871_v50 }
 0x6bd   : > { %v3252_v23 = vpop.f32.mrf.mxu2 }
 0x6be   : > { %v3430_v8 = vadd.f32 %v9841_v60, %v3252_v23 }
 0x6c0   : > { %v3558_v0 = vadd.f32 %v3494_v31, %v3430_v8  ;;  %3694 = vrot.lane.b32.xlu2 %v3430_v8, %s7589_s26  ;;  %v3020_v8 = vpop.permute.xlu1 %3019 }
 0x6c2   : > { %7143 = vmatmul.msk.f32.gmra.mxu2 %vm305_vm0, %v3006_v3  ;;  %7190 = vmatmul.msk.f32.gmra.mxu0 %vm305_vm0, %v3558_v0  ;;  %v13881_v3 = vld [vmem:[#allocation26_spill] sm:$0xff] }
 0x6c5   : > { %v3255_v54 = vpop.f32.mrf.mxu2 }
 0x6c6   : > { %v3431_v38 = vadd.f32 %v9841_v60, %v3255_v54  ;;  %v3502_v54 = vsub.f32 %v13881_v3, %v13857_v10 }
 0x6c8   : > { %v3559_v53 = vadd.f32 %v3495_v48, %v3431_v38  ;;  %3696 = vrot.lane.b32.xlu0 %v3431_v38, %s7589_s26 }
 0x6ca   : > { %7144 = vmatmul.msk.f32.gmra.mxu2 %vm305_vm0, %v3008_v36  ;;  %7191 = vmatmul.msk.f32.gmra.mxu0 %vm305_vm0, %v3559_v53  ;;  %v3022_v53 = vpop.permute.xlu2 %3021 }
 0x6cd   : > { %v3258_v26 = vpop.f32.mrf.mxu2 }
 0x6ce   : > { %v3432_v34 = vadd.f32 %v9841_v60, %v3258_v26 }
 0x6d0   : > { %v3560_v37 = vadd.f32 %v3496_v6, %v3432_v34  ;;  %3698 = vrot.lane.b32.xlu1 %v3432_v34, %s7589_s26  ;;  %v13882_v34 = vld [vmem:[#allocation27_spill] sm:$0xff] }
 0x6d1   : > { %v3503_v6 = vsub.f32 %v13882_v34, %v13859_v28 }
 0x6d2   : > { %7145 = vmatmul.msk.f32.gmra.mxu2 %vm305_vm0, %v3010_v62  ;;  %7192 = vmatmul.msk.f32.gmra.mxu0 %vm305_vm0, %v3560_v37 }
 0x6d5   : > { %v3261_v7 = vpop.f32.mrf.mxu2 }
 0x6d6   : > { %v3433_v46 = vadd.f32 %v9841_v60, %v3261_v7  ;;  %v3024_v7 = vpop.permute.xlu0 %3023 }
 0x6d8   : > { %v3561_v14 = vadd.f32 %v3497_v22, %v3433_v46  ;;  %3700 = vrot.lane.b32.xlu2 %v3433_v46, %s7589_s26 }
 0x6da   : > { %7146 = vmatmul.msk.f32.gmra.mxu2 %vm305_vm0, %v3012_v47  ;;  %7193 = vmatmul.msk.f32.gmra.mxu0 %vm305_vm0, %v3561_v14  ;;  %v13883_v14 = vld [vmem:[#allocation28_spill] sm:$0xff] }
 0x6db   : > { %v3504_v47 = vsub.f32 %v13883_v14, %v13861_v63 }
 0x6dd   : > { %v3264_v43 = vpop.f32.mrf.mxu2 }
 0x6de   : > { %v3434_v27 = vadd.f32 %v9841_v60, %v3264_v43 }
 0x6e0   : > { %v3562_v12 = vadd.f32 %v3498_v15, %v3434_v27  ;;  %3702 = vrot.lane.b32.xlu1 %v3434_v27, %s7589_s26  ;;  %v3026_v15 = vpop.permute.xlu1 %3025 }
 0x6e2   : > { %7147 = vmatmul.msk.f32.gmra.mxu2 %vm305_vm0, %v3014_v33  ;;  %7194 = vmatmul.msk.f32.gmra.mxu0 %vm305_vm0, %v3562_v12 }
 0x6e5   : > { %v3267_v25 = vpop.f32.mrf.mxu2 }
 0x6e6   : > { %v3435_v57 = vadd.f32 %v9841_v60, %v3267_v25  ;;  %v13884_v25 = vld [vmem:[#allocation29_spill] sm:$0xff] }
 0x6e8   : > { %v3563_v44 = vadd.f32 %v3499_v52, %v3435_v57  ;;  %3704 = vrot.lane.b32.xlu2 %v3435_v57, %s7589_s26  ;;  %v3505_v57 = vsub.f32 %v13884_v25, %v13863_v29 }
 0x6ea   : > { %7148 = vmatmul.msk.f32.gmra.mxu2 %vm305_vm0, %v3016_v39  ;;  %7195 = vmatmul.msk.f32.gmra.mxu0 %vm305_vm0, %v3563_v44  ;;  %v3028_v39 = vpop.permute.xlu2 %3027 }
 0x6ed   : > { %v3270_v13 = vpop.f32.mrf.mxu2 }
 0x6ee   : > { %v3436_v55 = vadd.f32 %v9841_v60, %v3270_v13 }
 0x6f0   : > { %v3564_v9 = vadd.f32 %v3500_v2, %v3436_v55  ;;  %3706 = vrot.lane.b32.xlu2 %v3436_v55, %s7589_s26  ;;  %v9944_v38 = vpop.f32.mrf.mxu0  ;;  %v13885_v2 = vld [vmem:[#allocation30_spill] sm:$0xff] }
 0x6f2   : > { %7149 = vmatmul.msk.f32.gmra.mxu2 %vm305_vm0, %v3018_v24  ;;  %7196 = vmatmul.msk.f32.gmra.mxu0 %vm305_vm0, %v3564_v9  ;;  %v3506_v9 = vsub.f32 %v13885_v2, %v13865_v49 }
 0x6f5   : > { %v3273_v40 = vpop.f32.mrf.mxu2 }
 0x6f6   : > { %v3437_v35 = vadd.f32 %v9841_v60, %v3273_v40 }
 0x6f8   : > { %v3565_v23 = vadd.f32 %v3501_v51, %v3437_v35  ;;  %3708 = vrot.lane.b32.xlu1 %v3437_v35, %s7589_s26  ;;  %v3030_v35 = vpop.permute.xlu0 %3029 }
 0x6fa   : > { %7150 = vmatmul.msk.f32.gmra.mxu2 %vm305_vm0, %v3020_v8  ;;  %7197 = vmatmul.msk.f32.gmra.mxu0 %vm305_vm0, %v3565_v23  ;;  %v13886_v8 = vld [vmem:[#allocation31_spill] sm:$0xff] }
 0x6fd   : > { %v3276_v31 = vpop.f32.mrf.mxu2 }
 0x6fe   : > { %v3438_v0 = vadd.f32 %v9841_v60, %v3276_v31  ;;  %v3507_v31 = vsub.f32 %v13886_v8, %v13867_v16 }
 0x700   : > { %v3566_v48 = vadd.f32 %v3502_v54, %v3438_v0  ;;  %3710 = vrot.lane.b32.xlu2 %v3438_v0, %s7589_s26 }
 0x702   : > { %7151 = vmatmul.msk.f32.gmra.mxu2 %vm305_vm0, %v3022_v53  ;;  %7198 = vmatmul.msk.f32.gmra.mxu0 %vm305_vm0, %v3566_v48  ;;  %v3032_v48 = vpop.permute.xlu1 %3031 }
 0x705   : > { %v3279_v36 = vpop.f32.mrf.mxu2 }
 0x706   : > { %v3439_v26 = vadd.f32 %v9841_v60, %v3279_v36 }
 0x707   : > { %v9952_v37 = vpop.f32.mrf.mxu0 }
 0x708   : > { %v3567_v62 = vadd.f32 %v3503_v6, %v3439_v26  ;;  %3712 = vrot.lane.b32.xlu0 %v3439_v26, %s7589_s26  ;;  %v13887_v26 = vld [vmem:[#allocation32_spill] sm:$0xff] }
 0x709   : > { %v3508_v6 = vsub.f32 %v13887_v26, %v13869_v45 }
 0x70a   : > { %7152 = vmatmul.msk.f32.gmra.mxu2 %vm305_vm0, %v3024_v7  ;;  %7199 = vmatmul.msk.f32.gmra.mxu0 %vm305_vm0, %v3567_v62 }
 0x70d   : > { %v3282_v46 = vpop.f32.mrf.mxu2 }
 0x70e   : > { %v3440_v22 = vadd.f32 %v9841_v60, %v3282_v46  ;;  %v3034_v46 = vpop.permute.xlu2 %3033 }
 0x70f   : > { %v9960_v43 = vpop.f32.mrf.mxu0 }
 0x710   : > { %v3568_v27 = vadd.f32 %v3504_v47, %v3440_v22  ;;  %3714 = vrot.lane.b32.xlu0 %v3440_v22, %s7589_s26 }
 0x712   : > { %7153 = vmatmul.msk.f32.gmra.mxu2 %vm305_vm0, %v3026_v15  ;;  %7200 = vmatmul.msk.f32.gmra.mxu0 %vm305_vm0, %v3568_v27  ;;  %v13888_v27 = vld [vmem:[#allocation33_spill] sm:$0xff] }
 0x713   : > { %v3509_v15 = vsub.f32 %v13888_v27, %v13871_v50 }
 0x715   : > { %v3285_v12 = vpop.f32.mrf.mxu2 }
 0x716   : > { %v3441_v33 = vadd.f32 %v9841_v60, %v3285_v12 }
 0x717   : > { %v9968_v52 = vpop.f32.mrf.mxu0 }
 0x718   : > { %v3569_v44 = vadd.f32 %v3505_v57, %v3441_v33  ;;  %3716 = vrot.lane.b32.xlu2 %v3441_v33, %s7589_s26  ;;  %v3036_v57 = vpop.permute.xlu0 %3035 }
 0x71a   : > { %7154 = vmatmul.msk.f32.gmra.mxu2 %vm305_vm0, %v3028_v39  ;;  %7201 = vmatmul.msk.f32.gmra.mxu0 %vm305_vm0, %v3569_v44 }
 0x71d   : > { %v3288_v13 = vpop.f32.mrf.mxu2 }
 0x71e   : > { %v3442_v55 = vadd.f32 %v9841_v60, %v3288_v13  ;;  %v13889_v13 = vld [vmem:[#allocation34_spill] sm:$0xff] }
 0x71f   : > { %v9976_v24 = vpop.f32.mrf.mxu0 }
 0x720   : > { %v3570_v40 = vadd.f32 %v3506_v9, %v3442_v55  ;;  %3718 = vrot.lane.b32.xlu0 %v3442_v55, %s7589_s26  ;;  %v3510_v55 = vsub.f32 %v13889_v13, %v13857_v10 }
 0x722   : > { %7155 = vmatmul.msk.f32.gmra.mxu2 %vm305_vm0, %v3030_v35  ;;  %7202 = vmatmul.msk.f32.gmra.mxu0 %vm305_vm0, %v3570_v40  ;;  %v3038_v35 = vpop.permute.xlu1 %3037 }
 0x725   : > { %v3291_v51 = vpop.f32.mrf.mxu2 }
 0x726   : > { %v3443_v23 = vadd.f32 %v9841_v60, %v3291_v51 }
 0x727   : > { %v9984_v0 = vpop.f32.mrf.mxu0 }
 0x728   : > { %v3571_v54 = vadd.f32 %v3507_v31, %v3443_v23  ;;  %3720 = vrot.lane.b32.xlu0 %v3443_v23, %s7589_s26  ;;  %v13890_v31 = vld [vmem:[#allocation35_spill] sm:$0xff] }
 0x72a   : > { %7156 = vmatmul.msk.f32.gmra.mxu2 %vm305_vm0, %v3032_v48  ;;  %7203 = vmatmul.msk.f32.gmra.mxu0 %vm305_vm0, %v3571_v54  ;;  %v3511_v54 = vsub.f32 %v13890_v31, %v13859_v28 }
 0x72d   : > { %v3294_v53 = vpop.f32.mrf.mxu2 }
 0x72e   : > { %v3444_v36 = vadd.f32 %v9841_v60, %v3294_v53 }
 0x72f   : > { %v9992_v62 = vpop.f32.mrf.mxu0 }
 0x730   : > { %v3572_v7 = vadd.f32 %v3508_v6, %v3444_v36  ;;  %3722 = vrot.lane.b32.xlu2 %v3444_v36, %s7589_s26  ;;  %v3040_v36 = vpop.permute.xlu2 %3039 }
 0x732   : > { %7157 = vmatmul.msk.f32.gmra.mxu2 %vm305_vm0, %v3034_v46  ;;  %7204 = vmatmul.msk.f32.gmra.mxu0 %vm305_vm0, %v3572_v7  ;;  %v13891_v46 = vld [vmem:[#allocation36_spill] sm:$0xff] }
 0x735   : > { %v3297_v22 = vpop.f32.mrf.mxu2 }
 0x736   : > { %v3445_v47 = vadd.f32 %v9841_v60, %v3297_v22  ;;  %v3512_v22 = vsub.f32 %v13891_v46, %v13861_v63 }
 0x737   : > { %v10000_v12 = vpop.f32.mrf.mxu0 }
 0x738   : > { %v3573_v33 = vadd.f32 %v3509_v15, %v3445_v47  ;;  %3724 = vrot.lane.b32.xlu2 %v3445_v47, %s7589_s26 }
 0x73a   : > { %7158 = vmatmul.msk.f32.gmra.mxu2 %vm305_vm0, %v3036_v57  ;;  %7205 = vmatmul.msk.f32.gmra.mxu0 %vm305_vm0, %v3573_v33  ;;  %v3042_v33 = vpop.permute.xlu0 %3041 }
 0x73d   : > { %v3300_v44 = vpop.f32.mrf.mxu2 }
 0x73e   : > { %v3446_v39 = vadd.f32 %v9841_v60, %v3300_v44 }
 0x73f   : > { %v10008_v9 = vpop.f32.mrf.mxu0 }
 0x740   : > { %v3574_v40 = vadd.f32 %v3510_v55, %v3446_v39  ;;  %3726 = vrot.lane.b32.xlu1 %v3446_v39, %s7589_s26  ;;  %v13892_v39 = vld [vmem:[#allocation37_spill] sm:$0xff] }
 0x741   : > { %v3513_v55 = vsub.f32 %v13892_v39, %v13863_v29 }
 0x742   : > { %7159 = vmatmul.msk.f32.gmra.mxu2 %vm305_vm0, %v3038_v35  ;;  %7206 = vmatmul.msk.f32.gmra.mxu0 %vm305_vm0, %v3574_v40 }
 0x745   : > { %v3303_v51 = vpop.f32.mrf.mxu2 }
 0x746   : > { %v3447_v23 = vadd.f32 %v9841_v60, %v3303_v51  ;;  %v3044_v51 = vpop.permute.xlu1 %3043 }
 0x747   : > { %v10016_v48 = vpop.f32.mrf.mxu0 }
 0x748   : > { %v3575_v53 = vadd.f32 %v3511_v54, %v3447_v23  ;;  %3728 = vrot.lane.b32.xlu2 %v3447_v23, %s7589_s26 }
 0x74a   : > { %7160 = vmatmul.msk.f32.gmra.mxu2 %vm305_vm0, %v3040_v36  ;;  %7207 = vmatmul.msk.f32.gmra.mxu0 %vm305_vm0, %v3575_v53  ;;  %v13893_v53 = vld [vmem:[#allocation38_spill] sm:$0xff] }
 0x74b   : > { %v3514_v36 = vsub.f32 %v13893_v53, %v13865_v49 }
 0x74d   : > { %v3306_v6 = vpop.f32.mrf.mxu2 }
 0x74e   : > { %v3448_v7 = vadd.f32 %v9841_v60, %v3306_v6  ;;  %v3050_v21 = vpop.permute.xlu1 %3049 }
 0x74f   : > { %v10024_v47 = vpop.f32.mrf.mxu0 }
 0x750   : > { %v3576_v15 = vadd.f32 %v3512_v22, %v3448_v7  ;;  %3730 = vrot.lane.b32.xlu0 %v3448_v7, %s7589_s26  ;;  %v3046_v22 = vpop.permute.xlu2 %3045 }
 0x752   : > { %7161 = vmatmul.msk.f32.gmra.mxu2 %vm305_vm0, %v3042_v33  ;;  %7208 = vmatmul.msk.f32.gmra.mxu0 %vm305_vm0, %v3576_v15 }
 0x755   : > { %v3309_v57 = vpop.f32.mrf.mxu2 }
 0x756   : > { %v3449_v44 = vadd.f32 %v9841_v60, %v3309_v57  ;;  %v13894_v57 = vld [vmem:[#allocation39_spill] sm:$0xff]  ;;  %v3056_v26 = vpop.permute.xlu1 %3055 }
 0x757   : > { %v10032_v40 = vpop.f32.mrf.mxu0 }
 0x758   : > { %v3577_v35 = vadd.f32 %v3513_v55, %v3449_v44  ;;  %3732 = vrot.lane.b32.xlu1 %v3449_v44, %s7589_s26  ;;  %v3515_v44 = vsub.f32 %v13894_v57, %v13867_v16  ;;  %v3052_v30 = vpop.permute.xlu2 %3051 }
 0x75a   : > { %7162 = vmatmul.msk.f32.gmra.mxu2 %vm305_vm0, %v3044_v51  ;;  %7209 = vmatmul.msk.f32.gmra.mxu0 %vm305_vm0, %v3577_v35  ;;  %v3048_v51 = vpop.permute.xlu0 %3047 }
 0x75d   : > { %v3312_v23 = vpop.f32.mrf.mxu2 }
 0x75e   : > { %v3450_v54 = vadd.f32 %v9841_v60, %v3312_v23  ;;  %v3062_v53 = vpop.permute.xlu1 %3061 }
 0x75f   : > { %v10040_v6 = vpop.f32.mrf.mxu0 }
 0x760   : > { %v3578_v7 = vadd.f32 %v3514_v36, %v3450_v54  ;;  %3734 = vrot.lane.b32.xlu1 %v3450_v54, %s7589_s26  ;;  %v13895_v36 = vld [vmem:[#allocation40_spill] sm:$0xff]  ;;  %v3058_v57 = vpop.permute.xlu2 %3057 }
 0x762   : > { %7163 = vmatmul.msk.f32.gmra.mxu2 %vm305_vm0, %v3046_v22  ;;  %7210 = vmatmul.msk.f32.gmra.mxu0 %vm305_vm0, %v3578_v7  ;;  %v3516_v7 = vsub.f32 %v13895_v36, %v13869_v45 }
 0x765   : > { %v3315_v15 = vpop.f32.mrf.mxu2 }
 0x766   : > { %v3451_v33 = vadd.f32 %v9841_v60, %v3315_v15 }
 0x767   : > { %v10048_v55 = vpop.f32.mrf.mxu0 }
 0x768   : > { %v3579_v35 = vadd.f32 %v3515_v44, %v3451_v33  ;;  %3736 = vrot.lane.b32.xlu0 %v3451_v33, %s7589_s26 }
 0x76a   : > { %7164 = vmatmul.msk.f32.gmra.mxu2 %vm305_vm0, %v3048_v51  ;;  %7211 = vmatmul.msk.f32.gmra.mxu0 %vm305_vm0, %v3579_v35  ;;  %v13896_v35 = vld [vmem:[#allocation41_spill] sm:$0xff] }
 0x76b   : > { %v3517_v51 = vsub.f32 %v13896_v35, %v13871_v50  ;;  %v3054_v35 = vpop.permute.xlu0 %3053 }
 0x76d   : > { %v3318_v23 = vpop.f32.mrf.mxu2 }
 0x76e   : > { %v3452_v54 = vadd.f32 %v9841_v60, %v3318_v23 }
 0x76f   : > { %v10056_v22 = vpop.f32.mrf.mxu0 }
 0x770   : > { %v3580_v15 = vadd.f32 %v3516_v7, %v3452_v54  ;;  %3738 = vrot.lane.b32.xlu0 %v3452_v54, %s7589_s26  ;;  %v13897_v7 = vld [vmem:[#allocation42_spill] sm:$0xff] }
 0x772   : > { %7165 = vmatmul.msk.f32.gmra.mxu2 %vm305_vm0, %v3050_v21  ;;  %7212 = vmatmul.msk.f32.gmra.mxu0 %vm305_vm0, %v3580_v15  ;;  %v3518_v15 = vsub.f32 %v13897_v7, %v13857_v10 }
 0x773   : > { %v3060_v8 = vpop.permute.xlu0 %3059 }
 0x775   : > { %v3321_v33 = vpop.f32.mrf.mxu2 }
 0x776   : > { %v3453_v44 = vadd.f32 %v9841_v60, %v3321_v33 }
 0x777   : > { %v10064_v23 = vpop.f32.mrf.mxu0 }
 0x778   : > { %v3581_v27 = vadd.f32 %v3517_v51, %v3453_v44  ;;  %3740 = vrot.lane.b32.xlu2 %v3453_v44, %s7589_s26 }
 0x77a   : > { %7166 = vmatmul.msk.f32.gmra.mxu2 %vm305_vm0, %v3052_v30  ;;  %7213 = vmatmul.msk.f32.gmra.mxu0 %vm305_vm0, %v3581_v27  ;;  %v13898_v27 = vld [vmem:[#allocation43_spill] sm:$0xff] }
 0x77b   : > { %v3519_v51 = vsub.f32 %v13898_v27, %v13859_v28 }
 0x77d   : > { %v3324_v54 = vpop.f32.mrf.mxu2 }
 0x77e   : > { %v3454_v21 = vadd.f32 %v9841_v60, %v3324_v54 }
 0x77f   : > { %v10072_v33 = vpop.f32.mrf.mxu0 }
 0x780   : > { %v3582_v36 = vadd.f32 %v3518_v15, %v3454_v21  ;;  %3742 = vrot.lane.b32.xlu1 %v3454_v21, %s7589_s26 }
 0x782   : > { %7167 = vmatmul.msk.f32.gmra.mxu2 %vm305_vm0, %v3054_v35  ;;  %7214 = vmatmul.msk.f32.gmra.mxu0 %vm305_vm0, %v3582_v36  ;;  %v13899_v36 = vld [vmem:[#allocation44_spill] sm:$0xff] }
 0x783   : > { %v3520_v15 = vsub.f32 %v13899_v36, %v13861_v63 }
 0x785   : > { %v3327_v44 = vpop.f32.mrf.mxu2 }
 0x786   : > { %v3455_v30 = vadd.f32 %v9841_v60, %v3327_v44 }
 0x787   : > { %v10080_v54 = vpop.f32.mrf.mxu0 }
 0x788   : > { %v3583_v20 = vadd.f32 %v3519_v51, %v3455_v30  ;;  %3744 = vrot.lane.b32.xlu2 %v3455_v30, %s7589_s26 }
 0x78a   : > { %7168 = vmatmul.msk.f32.gmra.mxu2 %vm305_vm0, %v3056_v26  ;;  %7215 = vmatmul.msk.f32.gmra.mxu0 %vm305_vm0, %v3583_v20  ;;  %v13900_v20 = vld [vmem:[#allocation45_spill] sm:$0xff] }
 0x78b   : > { %v3521_v51 = vsub.f32 %v13900_v20, %v13863_v29 }
 0x78d   : > { %v3330_v21 = vpop.f32.mrf.mxu2 }
 0x78e   : > { %v3456_v35 = vadd.f32 %v9841_v60, %v3330_v21 }
 0x78f   : > { %v10088_v44 = vpop.f32.mrf.mxu0 }
 0x790   : > { %v3584_v5 = vadd.f32 %v3520_v15, %v3456_v35  ;;  %3746 = vrot.lane.b32.xlu2 %v3456_v35, %s7589_s26 }
 0x792   : > { %7169 = vmatmul.msk.f32.gmra.mxu2 %vm305_vm0, %v3058_v57  ;;  %7216 = vmatmul.msk.f32.gmra.mxu0 %vm305_vm0, %v3584_v5  ;;  %v13901_v5 = vld [vmem:[#allocation46_spill] sm:$0xff] }
 0x793   : > { %v3522_v15 = vsub.f32 %v13901_v5, %v13865_v49  ;;  %v3064_v5 = vpop.permute.xlu2 %3063 }
 0x795   : > { %v3333_v30 = vpop.f32.mrf.mxu2 }
 0x796   : > { %v3457_v26 = vadd.f32 %v9841_v60, %v3333_v30 }
 0x797   : > { %v10096_v21 = vpop.f32.mrf.mxu0 }
 0x798   : > { %v3585_v32 = vadd.f32 %v3521_v51, %v3457_v26  ;;  %3748 = vrot.lane.b32.xlu2 %v3457_v26, %s7589_s26 }
 0x79a   : > { %7170 = vmatmul.msk.f32.gmra.mxu2 %vm305_vm0, %v3060_v8  ;;  %7217 = vmatmul.msk.f32.gmra.mxu0 %vm305_vm0, %v3585_v32  ;;  %v13902_v32 = vld [vmem:[#allocation47_spill] sm:$0xff] }
 0x79b   : > { %v3523_v51 = vsub.f32 %v13902_v32, %v13867_v16  ;;  %v3066_v32 = vpop.permute.xlu0 %3065 }
 0x79d   : > { %v3336_v35 = vpop.f32.mrf.mxu2 }
 0x79e   : > { %v3458_v57 = vadd.f32 %v9841_v60, %v3336_v35 }
 0x79f   : > { %v10104_v30 = vpop.f32.mrf.mxu0 }
 0x7a0   : > { %v3586_v4 = vadd.f32 %v3522_v15, %v3458_v57  ;;  %3750 = vrot.lane.b32.xlu1 %v3458_v57, %s7589_s26 }
 0x7a2   : > { %7171 = vmatmul.msk.f32.gmra.mxu2 %vm305_vm0, %v3062_v53  ;;  %7218 = vmatmul.msk.f32.gmra.mxu0 %vm305_vm0, %v3586_v4  ;;  %v13903_v4 = vld [vmem:[#allocation48_spill] sm:$0xff] }
 0x7a3   : > { %v3524_v15 = vsub.f32 %v13903_v4, %v13869_v45  ;;  %v3068_v4 = vpop.permute.xlu1 %3067  ;;  %v3072_v59 = vpop.permute.xlu0 %3071 }
 0x7a5   : > { %v3339_v26 = vpop.f32.mrf.mxu2 }
 0x7a6   : > { %v3459_v8 = vadd.f32 %v9841_v60, %v3339_v26 }
 0x7a7   : > { %v10112_v35 = vpop.f32.mrf.mxu0 }
 0x7a8   : > { %v3587_v1 = vadd.f32 %v3523_v51, %v3459_v8  ;;  %3752 = vrot.lane.b32.xlu1 %v3459_v8, %s7589_s26 }
 0x7aa   : > { %7172 = vmatmul.msk.f32.gmra.mxu2 %vm305_vm0, %v3064_v5  ;;  %7219 = vmatmul.msk.f32.gmra.mxu0 %vm305_vm0, %v3587_v1  ;;  %v13904_v1 = vld [vmem:[#allocation49_spill] sm:$0xff] }
 0x7ab   : > { %v3525_v51 = vsub.f32 %v13904_v1, %v13871_v50  ;;  %v3070_v1 = vpop.permute.xlu2 %3069  ;;  %v3074_v36 = vpop.permute.xlu1 %3073 }
 0x7ad   : > { %v3342_v57 = vpop.f32.mrf.mxu2 }
 0x7ae   : > { %v3460_v53 = vadd.f32 %v9841_v60, %v3342_v57 }
 0x7af   : > { %v10120_v26 = vpop.f32.mrf.mxu0 }
 0x7b0   : > { %v3588_v20 = vadd.f32 %v3524_v15, %v3460_v53  ;;  %3754 = vrot.lane.b32.xlu0 %v3460_v53, %s7589_s26 }
 0x7b2   : > { %7173 = vmatmul.msk.f32.gmra.mxu2 %vm305_vm0, %v3066_v32  ;;  %7220 = vmatmul.msk.f32.gmra.mxu0 %vm305_vm0, %v3588_v20  ;;  %v13905_v20 = vld [vmem:[#allocation50_spill] sm:$0xff] }
 0x7b3   : > { %v3526_v15 = vsub.f32 %v13905_v20, %v13857_v10  ;;  %v3076_v58 = vpop.permute.xlu2 %3075 }
 0x7b5   : > { %v3345_v8 = vpop.f32.mrf.mxu2 }
 0x7b6   : > { %v3461_v5 = vadd.f32 %v9841_v60, %v3345_v8 }
 0x7b7   : > { %v10128_v57 = vpop.f32.mrf.mxu0 }
 0x7b8   : > { %v3589_v39 = vadd.f32 %v3525_v51, %v3461_v5  ;;  %3756 = vrot.lane.b32.xlu1 %v3461_v5, %s7589_s26 }
 0x7ba   : > { %7174 = vmatmul.msk.f32.gmra.mxu2 %vm305_vm0, %v3068_v4  ;;  %7221 = vmatmul.msk.f32.gmra.mxu0 %vm305_vm0, %v3589_v39  ;;  %v13906_v39 = vld [vmem:[#allocation51_spill] sm:$0xff] }
 0x7bb   : > { %v3527_v51 = vsub.f32 %v13906_v39, %v13859_v28 }
 0x7bd   : > { %v3348_v53 = vpop.f32.mrf.mxu2 }
 0x7be   : > { %v3462_v32 = vadd.f32 %v9841_v60, %v3348_v53 }
 0x7bf   : > { %v10136_v8 = vpop.f32.mrf.mxu0 }
 0x7c0   : > { %v3590_v25 = vadd.f32 %v3526_v15, %v3462_v32  ;;  %3758 = vrot.lane.b32.xlu0 %v3462_v32, %s7589_s26 }
 0x7c2   : > { %7175 = vmatmul.msk.f32.gmra.mxu2 %vm305_vm0, %v3070_v1  ;;  %7222 = vmatmul.msk.f32.gmra.mxu0 %vm305_vm0, %v3590_v25  ;;  %v13907_v25 = vld [vmem:[#allocation52_spill] sm:$0xff] }
 0x7c3   : > { %v3528_v15 = vsub.f32 %v13907_v25, %v13861_v63 }
 0x7c5   : > { %v3351_v5 = vpop.f32.mrf.mxu2 }
 0x7c6   : > { %v3463_v4 = vadd.f32 %v9841_v60, %v3351_v5 }
 0x7c7   : > { %v10144_v53 = vpop.f32.mrf.mxu0 }
 0x7c8   : > { %v3591_v61 = vadd.f32 %v3527_v51, %v3463_v4  ;;  %3760 = vrot.lane.b32.xlu1 %v3463_v4, %s7589_s26 }
 0x7ca   : > { %7176 = vmatmul.msk.f32.gmra.mxu2 %vm305_vm0, %v3072_v59  ;;  %7223 = vmatmul.msk.f32.gmra.mxu0 %vm305_vm0, %v3591_v61  ;;  %v13908_v61 = vld [vmem:[#allocation53_spill] sm:$0xff] }
 0x7cb   : > { %v3529_v51 = vsub.f32 %v13908_v61, %v13863_v29  ;;  %v3078_v61 = vpop.permute.xlu0 %3077 }
 0x7cd   : > { %v3354_v32 = vpop.f32.mrf.mxu2 }
 0x7ce   : > { %v3464_v1 = vadd.f32 %v9841_v60, %v3354_v32 }
 0x7cf   : > { %v10152_v5 = vpop.f32.mrf.mxu0 }
 0x7d0   : > { %v3592_v2 = vadd.f32 %v3528_v15, %v3464_v1  ;;  %3762 = vrot.lane.b32.xlu0 %v3464_v1, %s7589_s26 }
 0x7d2   : > { %7177 = vmatmul.msk.f32.gmra.mxu2 %vm305_vm0, %v3074_v36  ;;  %7224 = vmatmul.msk.f32.gmra.mxu0 %vm305_vm0, %v3592_v2  ;;  %v13909_v2 = vld [vmem:[#allocation54_spill] sm:$0xff] }
 0x7d3   : > { %v3530_v15 = vsub.f32 %v13909_v2, %v13865_v49  ;;  %v3080_v2 = vpop.permute.xlu1 %3079 }
 0x7d5   : > { %v3357_v4 = vpop.f32.mrf.mxu2 }
 0x7d6   : > { %v3465_v59 = vadd.f32 %v9841_v60, %v3357_v4 }
 0x7d7   : > { %v10160_v32 = vpop.f32.mrf.mxu0 }
 0x7d8   : > { %v3593_v17 = vadd.f32 %v3529_v51, %v3465_v59  ;;  %3764 = vrot.lane.b32.xlu2 %v3465_v59, %s7589_s26 }
 0x7da   : > { %7178 = vmatmul.msk.f32.gmra.mxu2 %vm305_vm0, %v3076_v58  ;;  %7225 = vmatmul.msk.f32.gmra.mxu0 %vm305_vm0, %v3593_v17  ;;  %v13910_v17 = vld [vmem:[#allocation55_spill] sm:$0xff] }
 0x7db   : > { %v3531_v51 = vsub.f32 %v13910_v17, %v13867_v16  ;;  %v3082_v17 = vpop.permute.xlu2 %3081 }
 0x7dd   : > { %v3360_v1 = vpop.f32.mrf.mxu2 }
 0x7de   : > { %v3466_v36 = vadd.f32 %v9841_v60, %v3360_v1 }
 0x7df   : > { %v10168_v4 = vpop.f32.mrf.mxu0 }
 0x7e0   : > { %v3594_v39 = vadd.f32 %v3530_v15, %v3466_v36  ;;  %3766 = vrot.lane.b32.xlu2 %v3466_v36, %s7589_s26 }
 0x7e2   : > { %7179 = vmatmul.msk.f32.gmra.mxu2 %vm305_vm0, %v3078_v61  ;;  %7226 = vmatmul.msk.f32.gmra.mxu0 %vm305_vm0, %v3594_v39  ;;  %v13911_v39 = vld [vmem:[#allocation56_spill] sm:$0xff] }
 0x7e3   : > { %v3532_v15 = vsub.f32 %v13911_v39, %v13869_v45 }
 0x7e5   : > { %v3363_v59 = vpop.f32.mrf.mxu2 }
 0x7e6   : > { %v3467_v58 = vadd.f32 %v9841_v60, %v3363_v59 }
 0x7e7   : > { %v10176_v1 = vpop.f32.mrf.mxu0 }
 0x7e8   : > { %v3595_v41 = vadd.f32 %v3531_v51, %v3467_v58  ;;  %3768 = vrot.lane.b32.xlu1 %v3467_v58, %s7589_s26 }
 0x7ea   : > { %7180 = vmatmul.msk.f32.gmra.mxu2 %vm305_vm0, %v3080_v2  ;;  %7227 = vmatmul.msk.f32.gmra.mxu0 %vm305_vm0, %v3595_v41  ;;  %v13912_v41 = vld [vmem:[#allocation57_spill] sm:$0xff] }
 0x7eb   : > { %v3533_v51 = vsub.f32 %v13912_v41, %v13871_v50 }
 0x7ed   : > { %v3366_v36 = vpop.f32.mrf.mxu2 }
 0x7ee   : > { %v3468_v61 = vadd.f32 %v9841_v60, %v3366_v36 }
 0x7ef   : > { %v10184_v59 = vpop.f32.mrf.mxu0 }
 0x7f0   : > { %v3596_v34 = vadd.f32 %v3532_v15, %v3468_v61  ;;  %3770 = vrot.lane.b32.xlu2 %v3468_v61, %s7589_s26 }
 0x7f2   : > { %7181 = vmatmul.msk.f32.gmra.mxu2 %vm305_vm0, %v3082_v17  ;;  %7228 = vmatmul.msk.f32.gmra.mxu0 %vm305_vm0, %v3596_v34  ;;  %v13913_v17 = vld [vmem:[#allocation58_spill] sm:$0xff] }
 0x7f3   : > { %v3534_v39 = vsub.f32 %v13913_v17, %v13857_v10 }
 0x7f5   : > { %v3369_v58 = vpop.f32.mrf.mxu2 }
 0x7f6   : > { %v3469_v2 = vadd.f32 %v9841_v60, %v3369_v58 }
 0x7f7   : > { %v10192_v36 = vpop.f32.mrf.mxu0 }
 0x7f8   : > { %v3597_v27 = vadd.f32 %v3533_v51, %v3469_v2  ;;  %3772 = vrot.lane.b32.xlu1 %v3469_v2, %s7589_s26  ;;  %v13914_v2 = vld [vmem:[#allocation59_spill] sm:$0xff] }
 0x7f9   : > { %v3535_v41 = vsub.f32 %v13914_v2, %v13859_v28 }
 0x7fa   : > { %7229 = vmatmul.msk.f32.gmra.mxu0 %vm305_vm0, %v3597_v27 }
 0x7fd   : > { %v3372_v15 = vpop.f32.mrf.mxu2 }
 0x7fe   : > { %v3470_v61 = vadd.f32 %v9841_v60, %v3372_v15 }
 0x7ff   : > { %v10199_v34 = vpop.f32.mrf.mxu0 }
 0x800   : > { %v3598_v25 = vadd.f32 %v3534_v39, %v3470_v61  ;;  %3774 = vrot.lane.b32.xlu1 %v3470_v61, %s7589_s26  ;;  %v13915_v61 = vld [vmem:[#allocation60_spill] sm:$0xff] }
 0x801   : > { %v3536_v17 = vsub.f32 %v13915_v61, %v13861_v63 }
 0x802   : > { %7230 = vmatmul.msk.f32.gmra.mxu0 %vm305_vm0, %v3598_v25 }
 0x805   : > { %v3375_v58 = vpop.f32.mrf.mxu2 }
 0x806   : > { %v3471_v51 = vadd.f32 %v9841_v60, %v3375_v58 }
 0x807   : > { %v10206_v27 = vpop.f32.mrf.mxu0 }
 0x808   : > { %v3599_v7 = vadd.f32 %v3535_v41, %v3471_v51  ;;  %3776 = vrot.lane.b32.xlu2 %v3471_v51, %s7589_s26  ;;  %v13916_v51 = vld [vmem:[#allocation61_spill] sm:$0xff] }
 0x809   : > { %v3537_v2 = vsub.f32 %v13916_v51, %v13863_v29 }
 0x80a   : > { %7231 = vmatmul.msk.f32.gmra.mxu0 %vm305_vm0, %v3599_v7 }
 0x80d   : > { %v3378_v15 = vpop.f32.mrf.mxu2 }
 0x80e   : > { %v3472_v39 = vadd.f32 %v9841_v60, %v3378_v15 }
 0x80f   : > { %v10213_v25 = vpop.f32.mrf.mxu0 }
 0x810   : > { %v3600_v31 = vadd.f32 %v3536_v17, %v3472_v39  ;;  %3778 = vrot.lane.b32.xlu0 %v3472_v39, %s7589_s26  ;;  %v13917_v39 = vld [vmem:[#allocation62_spill] sm:$0xff] }
 0x811   : > { %v3538_v61 = vsub.f32 %v13917_v39, %v13865_v49 }
 0x812   : > { %7232 = vmatmul.msk.f32.gmra.mxu0 %vm305_vm0, %v3600_v31 }
 0x815   : > { %v3381_v58 = vpop.f32.mrf.mxu2 }
 0x816   : > { %v3473_v41 = vadd.f32 %v9841_v60, %v3381_v58 }
 0x817   : > { %v10220_v7 = vpop.f32.mrf.mxu0 }
 0x818   : > { %v3601_v46 = vadd.f32 %v3537_v2, %v3473_v41  ;;  %3780 = vrot.lane.b32.xlu0 %v3473_v41, %s7589_s26  ;;  %v13918_v41 = vld [vmem:[#allocation65_spill] sm:$0xff] }
 0x819   : > { %v3539_v51 = vsub.f32 %v13918_v41, %v13867_v16 }
 0x81a   : > { %7233 = vmatmul.msk.f32.gmra.mxu0 %vm305_vm0, %v3601_v46 }
 0x81d   : > { %v3384_v15 = vpop.f32.mrf.mxu2 }
 0x81e   : > { %v3474_v17 = vadd.f32 %v9841_v60, %v3384_v15 }
 0x81f   : > { %v10227_v31 = vpop.f32.mrf.mxu0 }
 0x820   : > { %v3602_v13 = vadd.f32 %v3538_v61, %v3474_v17  ;;  %3782 = vrot.lane.b32.xlu2 %v3474_v17, %s7589_s26  ;;  %v13919_v17 = vld [vmem:[#allocation69_spill] sm:$0xff] }
 0x821   : > { %v3540_v39 = vsub.f32 %v13919_v17, %v13869_v45 }
 0x822   : > { %7234 = vmatmul.msk.f32.gmra.mxu0 %vm305_vm0, %v3602_v13 }
 0x825   : > { %v3387_v58 = vpop.f32.mrf.mxu2 }
 0x826   : > { %v3475_v2 = vadd.f32 %v9841_v60, %v3387_v58 }
 0x827   : > { %v10234_v46 = vpop.f32.mrf.mxu0 }
 0x828   : > { %v3603_v56 = vadd.f32 %v3539_v51, %v3475_v2  ;;  %3784 = vrot.lane.b32.xlu0 %v3475_v2, %s7589_s26  ;;  %v13920_v2 = vld [vmem:[#allocation74_spill] sm:$0xff] }
 0x829   : > { %v3541_v41 = vsub.f32 %v13920_v2, %v13871_v50 }
 0x82a   : > { %7235 = vmatmul.msk.f32.gmra.mxu0 %vm305_vm0, %v3603_v56 }
 0x82d   : > { %v3390_v15 = vpop.f32.mrf.mxu2 }
 0x82e   : > { %v3476_v61 = vadd.f32 %v9841_v60, %v3390_v15 }
 0x82f   : > { %v10241_v13 = vpop.f32.mrf.mxu0 }
 0x830   : > { %v3604_v14 = vadd.f32 %v3540_v39, %v3476_v61  ;;  %3786 = vrot.lane.b32.xlu2 %v3476_v61, %s7589_s26  ;;  %v13921_v61 = vld [vmem:[#allocation77_spill] sm:$0xff] }
 0x831   : > { %v3542_v17 = vsub.f32 %v13921_v61, %v13857_v10 }
 0x832   : > { %7236 = vmatmul.msk.f32.gmra.mxu0 %vm305_vm0, %v3604_v14 }
 0x835   : > { %v3393_v58 = vpop.f32.mrf.mxu2 }
 0x836   : > { %v3477_v51 = vadd.f32 %v9841_v60, %v3393_v58 }
 0x837   : > { %v10248_v56 = vpop.f32.mrf.mxu0 }
 0x838   : > { %v3605_v18 = vadd.f32 %v3541_v41, %v3477_v51  ;;  %3788 = vrot.lane.b32.xlu1 %v3477_v51, %s7589_s26  ;;  %v3543_v51 = vsub.f32 %v8538_v42, %v13859_v28 }
 0x83a   : > { %7237 = vmatmul.msk.f32.gmra.mxu0 %vm305_vm0, %v3605_v18 }
 0x83d   : > { %v3396_v15 = vpop.f32.mrf.mxu2 }
 0x83e   : > { %v3478_v39 = vadd.f32 %v9841_v60, %v3396_v15  ;;  %v13922_v15 = vld [vmem:[#allocation88_spill] sm:$0xff] }
 0x83f   : > { %v10255_v14 = vpop.f32.mrf.mxu0 }
 0x840   : > { %v3606_v19 = vadd.f32 %v3542_v17, %v3478_v39  ;;  %3790 = vrot.lane.b32.xlu1 %v3478_v39, %s7589_s26  ;;  %v3544_v39 = vsub.f32 %v13922_v15, %v13861_v63 }
 0x842   : > { %7238 = vmatmul.msk.f32.gmra.mxu0 %vm305_vm0, %v3606_v19 }
 0x845   : > { %v3399_v58 = vpop.f32.mrf.mxu2 }
 0x846   : > { %v3479_v41 = vadd.f32 %v9841_v60, %v3399_v58 }
 0x847   : > { %v10262_v18 = vpop.f32.mrf.mxu0 }
 0x848   : > { %v3607_v2 = vadd.f32 %v3543_v51, %v3479_v41  ;;  %3792 = vrot.lane.b32.xlu2 %v3479_v41, %s7589_s26  ;;  %v13923_v41 = vld [vmem:[#allocation92_spill] sm:$0xff] }
 0x84a   : > { %7239 = vmatmul.msk.f32.gmra.mxu0 %vm305_vm0, %v3607_v2  ;;  %v3545_v2 = vsub.f32 %v13923_v41, %v13863_v29 }
 0x84d   : > { %v3402_v10 = vpop.f32.mrf.mxu2 }
 0x84e   : > { %v3480_v17 = vadd.f32 %v9841_v60, %v3402_v10 }
 0x84f   : > { %v10269_v19 = vpop.f32.mrf.mxu0 }
 0x850   : > { %v3608_v61 = vadd.f32 %v3544_v39, %v3480_v17  ;;  %3794 = vrot.lane.b32.xlu1 %v3480_v17, %s7589_s26  ;;  %v13924_v17 = vld [vmem:[#allocation97_spill] sm:$0xff] }
 0x852   : > { %7240 = vmatmul.msk.f32.gmra.mxu0 %vm305_vm0, %v3608_v61  ;;  %v3546_v61 = vsub.f32 %v13924_v17, %v13865_v49 }
 0x855   : > { %v3405_v28 = vpop.f32.mrf.mxu2 }
 0x856   : > { %v3481_v58 = vadd.f32 %v9841_v60, %v3405_v28  ;;  %v7566_v28 = vld [vmem:[%s7656_s10 + $0x8] ss:$0 sm:$0xff] }
 0x857   : > { %v10276_v51 = vpop.f32.mrf.mxu0 }
 0x858   : > { %v3609_v10 = vadd.f32 %v3545_v2, %v3481_v58  ;;  %3796 = vrot.lane.b32.xlu0 %v3481_v58, %s7589_s26  ;;  %v13925_v58 = vld [vmem:[#allocation100_spill] sm:$0xff] }
 0x85a   : > { %7241 = vmatmul.msk.f32.gmra.mxu0 %vm305_vm0, %v3609_v10  ;;  %v3547_v10 = vsub.f32 %v13925_v58, %v13867_v16  ;;  %v10301_v16 = vld [vmem:[%s7656_s10 + $0x9] ss:$0 sm:$0xff] }
 0x85b   : > { %v10358_v3 = vadd.f32 %v10301_v16, %v9992_v62 }
 0x85d   : > { %v3408_v63 = vpop.f32.mrf.mxu2  ;;  %13934 = vst [vmem:[#allocation85_spill] sm:$0xff] %v10358_v3 }
 0x85e   : > { %v3482_v39 = vadd.f32 %v9841_v60, %v3408_v63 }
 0x85f   : > { %v10283_v15 = vpop.f32.mrf.mxu0 }
 0x860   : > { %v3610_v42 = vadd.f32 %v3546_v61, %v3482_v39  ;;  %3798 = vrot.lane.b32.xlu1 %v3482_v39, %s7589_s26  ;;  %v13926_v39 = vld [vmem:[#allocation107_spill] sm:$0xff] }
 0x861   : > { %v3548_v61 = vsub.f32 %v13926_v39, %v13869_v45  ;;  %v10311_v45 = vadd.f32 %v10301_v16, %v9944_v38 }
 0x862   : > { %7242 = vmatmul.msk.f32.gmra.mxu0 %vm305_vm0, %v3610_v42 }
 0x863   : > { %13929 = vst [vmem:[#allocation68_spill] sm:$0xff] %v10311_v45 }
 0x865   : > { %v3411_v29 = vpop.f32.mrf.mxu2 }
 0x866   : > { %v3483_v2 = vadd.f32 %v7566_v28, %v3411_v29 }
 0x867   : > { %v10290_v41 = vpop.f32.mrf.mxu0 }
 0x868   : > { %v3611_v60 = vadd.f32 %v3547_v10, %v3483_v2  ;;  %3800 = vrot.lane.b32.xlu0 %v3483_v2, %s7589_s26  ;;  %v10305_v2 = vadd.f32 %v10301_v16, %v9952_v37 }
 0x86a   : > { %7243 = vmatmul.msk.f32.gmra.mxu0 %vm305_vm0, %v3611_v60  ;;  %13927 = vst [vmem:[#allocation67_spill] sm:$0xff] %v10305_v2  ;;  %v13928_v60 = vld [vmem:[#allocation114_spill] sm:$0xff]  ;;  %v4540_v37 = vmul.f32 %v10305_v2, %v10305_v2  ;;  %v4406_v38 = vsel %vm305_vm0, %v10305_v2, 0.0 }
 0x86d   : > { %v3414_v49 = vpop.f32.mrf.mxu2 }
 0x86e   : > { %v3484_v63 = vadd.f32 %v7566_v28, %v3414_v49  ;;  %v3549_v49 = vsub.f32 %v13928_v60, %v13871_v50  ;;  %v4539_v50 = vmul.f32 %v10311_v45, %v10311_v45  ;;  %v10346_v60 = vadd.f32 %v10301_v16, %v9984_v0 }
 0x86f   : > { %v10296_v42 = vpop.f32.mrf.mxu0 }
 0x870   : > { %v3612_v17 = vadd.f32 %v3548_v61, %v3484_v63  ;;  %3802 = vrot.lane.b32.xlu2 %v3484_v63, %s7589_s26  ;;  %13933 = vst [vmem:[#allocation89_spill] sm:$0xff] %v10346_v60  ;;  %v4603_v58 = vsel %vm305_vm0, %v4539_v50, 0.0  ;;  %v4414_v62 = vsel %vm305_vm0, %v10346_v60, 0.0 }
 0x872   : > { %7244 = vmatmul.msk.f32.gmra.mxu0 %vm305_vm0, %v3612_v17  ;;  %v10317_v17 = vadd.f32 %v10301_v16, %v9960_v43 }
 0x874   : > { %13930 = vst [vmem:[#allocation72_spill] sm:$0xff] %v10317_v17  ;;  %v4541_v43 = vmul.f32 %v10317_v17, %v10317_v17 }
 0x875   : > { %v3417_v29 = vpop.f32.mrf.mxu2 }
 0x876   : > { %v3485_v10 = vadd.f32 %v7566_v28, %v3417_v29  ;;  %v10324_v28 = vadd.f32 %v10301_v16, %v9968_v52  ;;  %v10335_v29 = vadd.f32 %v10301_v16, %v9976_v24  ;;  %v4604_v52 = vsel %vm305_vm0, %v4540_v37, 0.0 }
 0x877   : > { %v10313_v61 = vpop.f32.mrf.mxu0  ;;  %v4606_v11 = vsel %vm305_vm0, %v4541_v43, 0.0  ;;  %v10367_v43 = vadd.f32 %v10301_v16, %v10000_v12 }
 0x878   : > { %v3613_v63 = vadd.f32 %v3549_v49, %v3485_v10  ;;  %3804 = vrot.lane.b32.xlu1 %v3485_v10, %s7589_s26  ;;  %13931 = vst [vmem:[#allocation82_spill] sm:$0xff] %v10324_v28  ;;  %v4405_v10 = vsel %vm305_vm0, %v10311_v45, 0.0  ;;  %v4408_v49 = vsel %vm305_vm0, %v10317_v17, 0.0  ;;  %v4410_v37 = vsel %vm305_vm0, %v10324_v28, 0.0 }
 0x879   : > { %13932 = vst [vmem:[#allocation79_spill] sm:$0xff] %v10335_v29  ;;  %v4407_v39 = vadd.f32 %v4406_v38, %v4405_v10  ;;  %v4543_v20 = vmul.f32 %v10335_v29, %v10335_v29  ;;  %v4605_v17 = vadd.f32 %v4604_v52, %v4603_v58  ;;  %v4412_v50 = vsel %vm305_vm0, %v10335_v29, 0.0 }
 0x87a   : > { %7245 = vmatmul.msk.f32.gmra.mxu0 %vm305_vm0, %v3613_v63  ;;  %v4542_v63 = vmul.f32 %v10324_v28, %v10324_v28  ;;  %v4544_v38 = vmul.f32 %v10346_v60, %v10346_v60  ;;  %13935 = vst [vmem:[#allocation91_spill] sm:$0xff] %v10367_v43  ;;  %v4545_v58 = vmul.f32 %v10358_v3, %v10358_v3 }
 0x87b   : > { %v4409_v0 = vadd.f32 %v4408_v49, %v4407_v39  ;;  %v4607_v10 = vadd.f32 %v4606_v11, %v4605_v17  ;;  %v4610_v45 = vsel %vm305_vm0, %v4543_v20, 0.0  ;;  %v10376_v39 = vadd.f32 %v10301_v16, %v10008_v9 }
 0x87c   : > { %v4608_v2 = vsel %vm305_vm0, %v4542_v63, 0.0  ;;  %v4612_v63 = vsel %vm305_vm0, %v4544_v38, 0.0  ;;  %v4416_v11 = vsel %vm305_vm0, %v10358_v3, 0.0  ;;  %v4546_v12 = vmul.f32 %v10367_v43, %v10367_v43 }
 0x87d   : > { %v4411_v28 = vadd.f32 %v4410_v37, %v4409_v0  ;;  %v4609_v52 = vadd.f32 %v4608_v2, %v4607_v10  ;;  %v10385_v20 = vadd.f32 %v10301_v16, %v10016_v48  ;;  %v4614_v9 = vsel %vm305_vm0, %v4545_v58, 0.0 }
 0x87e   : > { %v4418_v2 = vsel %vm305_vm0, %v10367_v43, 0.0  ;;  %v4616_v48 = vsel %vm305_vm0, %v4546_v12, 0.0  ;;  %v10405_v58 = vadd.f32 %v10301_v16, %v10032_v40 }
 0x87f   : > { %v10349_v24 = vpop.f32.mrf.mxu0  ;;  %v4413_v49 = vadd.f32 %v4412_v50, %v4411_v28  ;;  %v4611_v17 = vadd.f32 %v4610_v45, %v4609_v52  ;;  %v4547_v28 = vmul.f32 %v10376_v39, %v10376_v39  ;;  %v10396_v50 = vadd.f32 %v10301_v16, %v10024_v47 }
 0x880   : > { %v4420_v45 = vsel %vm305_vm0, %v10376_v39, 0.0  ;;  %v4422_v47 = vsel %vm305_vm0, %v10385_v20, 0.0 }
 0x881   : > { %v4415_v37 = vadd.f32 %v4414_v62, %v4413_v49  ;;  %v4613_v38 = vadd.f32 %v4612_v63, %v4611_v17  ;;  %v4548_v62 = vmul.f32 %v10385_v20, %v10385_v20  ;;  %v4618_v43 = vsel %vm305_vm0, %v4547_v28, 0.0 }
 0x882   : > { %v4549_v63 = vmul.f32 %v10396_v50, %v10396_v50  ;;  %v4424_v40 = vsel %vm305_vm0, %v10396_v50, 0.0 }
 0x883   : > { %v4417_v10 = vadd.f32 %v4416_v11, %v4415_v37  ;;  %v4615_v52 = vadd.f32 %v4614_v9, %v4613_v38  ;;  %v10414_v11 = vadd.f32 %v10301_v16, %v10040_v6  ;;  %v4620_v37 = vsel %vm305_vm0, %v4548_v62, 0.0 }
 0x884   : > { %v4550_v9 = vmul.f32 %v10405_v58, %v10405_v58  ;;  %v4622_v6 = vsel %vm305_vm0, %v4549_v63, 0.0  ;;  %v10434_v62 = vadd.f32 %v10301_v16, %v10056_v22  ;;  %v10443_v63 = vadd.f32 %v10301_v16, %v10064_v23 }
 0x885   : > { %v4419_v49 = vadd.f32 %v4418_v2, %v4417_v10  ;;  %v4617_v12 = vadd.f32 %v4616_v48, %v4615_v52  ;;  %v10423_v2 = vadd.f32 %v10301_v16, %v10048_v55  ;;  %v4426_v48 = vsel %vm305_vm0, %v10405_v58, 0.0 }
 0x886   : > { %v4624_v55 = vsel %vm305_vm0, %v4550_v9, 0.0  ;;  %v4432_v23 = vsel %vm305_vm0, %v10434_v62, 0.0 }
 0x887   : > { %v10387_v0 = vpop.f32.mrf.mxu0  ;;  %v4421_v17 = vadd.f32 %v4420_v45, %v4419_v49  ;;  %v4619_v28 = vadd.f32 %v4618_v43, %v4617_v12  ;;  %v4551_v45 = vmul.f32 %v10414_v11, %v10414_v11  ;;  %v4428_v43 = vsel %vm305_vm0, %v10414_v11, 0.0 }
 0x888   : > { %v4430_v22 = vsel %vm305_vm0, %v10423_v2, 0.0 }
 0x889   : > { %v4423_v38 = vadd.f32 %v4422_v47, %v4421_v17  ;;  %v4621_v52 = vadd.f32 %v4620_v37, %v4619_v28  ;;  %v4552_v47 = vmul.f32 %v10423_v2, %v10423_v2  ;;  %v4626_v3 = vsel %vm305_vm0, %v4551_v45, 0.0 }
 0x88a   : > { %v4553_v37 = vmul.f32 %v10434_v62, %v10434_v62 }
 0x88b   : > { %v4425_v49 = vadd.f32 %v4424_v40, %v4423_v38  ;;  %v4623_v12 = vadd.f32 %v4622_v6, %v4621_v52  ;;  %v10452_v40 = vadd.f32 %v10301_v16, %v10072_v33  ;;  %v4628_v38 = vsel %vm305_vm0, %v4552_v47, 0.0 }
 0x88c   : > { %v4554_v6 = vmul.f32 %v10443_v63, %v10443_v63  ;;  %v4630_v33 = vsel %vm305_vm0, %v4553_v37, 0.0  ;;  %v10472_v47 = vadd.f32 %v10301_v16, %v10088_v44  ;;  %v10481_v37 = vadd.f32 %v10301_v16, %v10096_v21 }
 0x88d   : > { %v4427_v17 = vadd.f32 %v4426_v48, %v4425_v49  ;;  %v4625_v9 = vadd.f32 %v4624_v55, %v4623_v12  ;;  %v10461_v48 = vadd.f32 %v10301_v16, %v10080_v54  ;;  %v4434_v55 = vsel %vm305_vm0, %v10443_v63, 0.0 }
 0x88e   : > { %v4632_v54 = vsel %vm305_vm0, %v4554_v6, 0.0  ;;  %v4440_v21 = vsel %vm305_vm0, %v10472_v47, 0.0 }
 0x88f   : > { %v10425_v10 = vpop.f32.mrf.mxu0  ;;  %v4429_v28 = vadd.f32 %v4428_v43, %v4427_v17  ;;  %v4627_v45 = vadd.f32 %v4626_v3, %v4625_v9  ;;  %v4555_v43 = vmul.f32 %v10452_v40, %v10452_v40  ;;  %v4436_v3 = vsel %vm305_vm0, %v10452_v40, 0.0 }
 0x890   : > { %v4438_v44 = vsel %vm305_vm0, %v10461_v48, 0.0 }
 0x891   : > { %v4431_v52 = vadd.f32 %v4430_v22, %v4429_v28  ;;  %v4629_v12 = vadd.f32 %v4628_v38, %v4627_v45  ;;  %v4556_v22 = vmul.f32 %v10461_v48, %v10461_v48  ;;  %v4634_v60 = vsel %vm305_vm0, %v4555_v43, 0.0 }
 0x892   : > { %v4557_v38 = vmul.f32 %v10472_v47, %v10472_v47 }
 0x893   : > { %v4433_v17 = vadd.f32 %v4432_v23, %v4431_v52  ;;  %v4631_v9 = vadd.f32 %v4630_v33, %v4629_v12  ;;  %v10490_v23 = vadd.f32 %v10301_v16, %v10104_v30  ;;  %v4636_v52 = vsel %vm305_vm0, %v4556_v22, 0.0 }
 0x894   : > { %v4558_v33 = vmul.f32 %v10481_v37, %v10481_v37  ;;  %v4638_v30 = vsel %vm305_vm0, %v4557_v38, 0.0  ;;  %v10510_v22 = vadd.f32 %v10301_v16, %v10120_v26  ;;  %v10519_v38 = vadd.f32 %v10301_v16, %v10128_v57 }
 0x895   : > { %v4435_v28 = vadd.f32 %v4434_v55, %v4433_v17  ;;  %v4633_v6 = vadd.f32 %v4632_v54, %v4631_v9  ;;  %v10499_v55 = vadd.f32 %v10301_v16, %v10112_v35  ;;  %v4442_v54 = vsel %vm305_vm0, %v10481_v37, 0.0 }
 0x896   : > { %v4640_v35 = vsel %vm305_vm0, %v4558_v33, 0.0  ;;  %13936 = vst [vmem:[#allocation96_spill] sm:$0xff] %v10519_v38  ;;  %v4448_v57 = vsel %vm305_vm0, %v10510_v22, 0.0 }
 0x897   : > { %v10463_v49 = vpop.f32.mrf.mxu0  ;;  %v4437_v45 = vadd.f32 %v4436_v3, %v4435_v28  ;;  %v4635_v43 = vadd.f32 %v4634_v60, %v4633_v6  ;;  %v4559_v3 = vmul.f32 %v10490_v23, %v10490_v23  ;;  %v4444_v60 = vsel %vm305_vm0, %v10490_v23, 0.0 }
 0x898   : > { %v4446_v26 = vsel %vm305_vm0, %v10499_v55, 0.0 }
 0x899   : > { %v4439_v12 = vadd.f32 %v4438_v44, %v4437_v45  ;;  %v4637_v9 = vadd.f32 %v4636_v52, %v4635_v43  ;;  %v4560_v44 = vmul.f32 %v10499_v55, %v10499_v55  ;;  %v4642_v29 = vsel %vm305_vm0, %v4559_v3, 0.0 }
 0x89a   : > { %v4561_v52 = vmul.f32 %v10510_v22, %v10510_v22 }
 0x89b   : > { %v4441_v28 = vadd.f32 %v4440_v21, %v4439_v12  ;;  %v4639_v6 = vadd.f32 %v4638_v30, %v4637_v9  ;;  %v10528_v21 = vadd.f32 %v10301_v16, %v10136_v8  ;;  %v4644_v12 = vsel %vm305_vm0, %v4560_v44, 0.0 }
 0x89c   : > { %v4562_v30 = vmul.f32 %v10519_v38, %v10519_v38  ;;  %v4646_v8 = vsel %vm305_vm0, %v4561_v52, 0.0  ;;  %v10548_v44 = vadd.f32 %v10301_v16, %v10152_v5  ;;  %v10557_v52 = vadd.f32 %v10301_v16, %v10160_v32 }
 0x89d   : > { %v4443_v45 = vadd.f32 %v4442_v54, %v4441_v28  ;;  %v4641_v33 = vadd.f32 %v4640_v35, %v4639_v6  ;;  %v10537_v54 = vadd.f32 %v10301_v16, %v10144_v53  ;;  %v4450_v35 = vsel %vm305_vm0, %v10519_v38, 0.0 }
 0x89e   : > { %v4648_v53 = vsel %vm305_vm0, %v4562_v30, 0.0  ;;  %13937 = vst [vmem:[#allocation130_spill] sm:$0xff] %v10557_v52  ;;  %v4456_v32 = vsel %vm305_vm0, %v10548_v44, 0.0 }
 0x89f   : > { %v10501_v17 = vpop.f32.mrf.mxu0  ;;  %v4445_v43 = vadd.f32 %v4444_v60, %v4443_v45  ;;  %v4643_v3 = vadd.f32 %v4642_v29, %v4641_v33  ;;  %v4563_v60 = vmul.f32 %v10528_v21, %v10528_v21  ;;  %v4452_v29 = vsel %vm305_vm0, %v10528_v21, 0.0 }
 0x8a0   : > { %v4454_v5 = vsel %vm305_vm0, %v10537_v54, 0.0 }
 0x8a1   : > { %v4447_v9 = vadd.f32 %v4446_v26, %v4445_v43  ;;  %v4645_v6 = vadd.f32 %v4644_v12, %v4643_v3  ;;  %v4564_v26 = vmul.f32 %v10537_v54, %v10537_v54  ;;  %v4650_v38 = vsel %vm305_vm0, %v4563_v60, 0.0 }
 0x8a2   : > { %v4565_v12 = vmul.f32 %v10548_v44, %v10548_v44 }
 0x8a3   : > { %v4449_v45 = vadd.f32 %v4448_v57, %v4447_v9  ;;  %v4647_v33 = vadd.f32 %v4646_v8, %v4645_v6  ;;  %v10566_v57 = vadd.f32 %v10301_v16, %v10168_v4  ;;  %v4652_v9 = vsel %vm305_vm0, %v4564_v26, 0.0 }
 0x8a4   : > { %v4566_v8 = vmul.f32 %v10557_v52, %v10557_v52  ;;  %v4654_v4 = vsel %vm305_vm0, %v4565_v12, 0.0  ;;  %v10586_v26 = vadd.f32 %v10301_v16, %v10184_v59  ;;  %v10595_v12 = vadd.f32 %v10301_v16, %v10192_v36 }
 0x8a5   : > { %v4451_v43 = vadd.f32 %v4450_v35, %v4449_v45  ;;  %v4649_v30 = vadd.f32 %v4648_v53, %v4647_v33  ;;  %v10575_v35 = vadd.f32 %v10301_v16, %v10176_v1  ;;  %v4458_v53 = vsel %vm305_vm0, %v10557_v52, 0.0 }
 0x8a6   : > { %v4656_v1 = vsel %vm305_vm0, %v4566_v8, 0.0  ;;  %13938 = vst [vmem:[#allocation136_spill] sm:$0xff] %v10595_v12  ;;  %v4464_v36 = vsel %vm305_vm0, %v10586_v26, 0.0 }
 0x8a7   : > { %v10539_v28 = vpop.f32.mrf.mxu0  ;;  %v4453_v3 = vadd.f32 %v4452_v29, %v4451_v43  ;;  %v4651_v60 = vadd.f32 %v4650_v38, %v4649_v30  ;;  %v4567_v29 = vmul.f32 %v10566_v57, %v10566_v57  ;;  %v4460_v38 = vsel %vm305_vm0, %v10566_v57, 0.0 }
 0x8a8   : > { %v4462_v59 = vsel %vm305_vm0, %v10575_v35, 0.0 }
 0x8a9   : > { %v4455_v6 = vadd.f32 %v4454_v5, %v4453_v3  ;;  %v4653_v33 = vadd.f32 %v4652_v9, %v4651_v60  ;;  %v4568_v5 = vmul.f32 %v10575_v35, %v10575_v35  ;;  %v4658_v52 = vsel %vm305_vm0, %v4567_v29, 0.0 }
 0x8aa   : > { %v4569_v9 = vmul.f32 %v10586_v26, %v10586_v26 }
 0x8ab   : > { %v4457_v43 = vadd.f32 %v4456_v32, %v4455_v6  ;;  %v4655_v30 = vadd.f32 %v4654_v4, %v4653_v33  ;;  %v10604_v32 = vadd.f32 %v10301_v16, %v10199_v34  ;;  %v4660_v6 = vsel %vm305_vm0, %v4568_v5, 0.0 }
 0x8ac   : > { %v4570_v4 = vmul.f32 %v10595_v12, %v10595_v12  ;;  %v4662_v34 = vsel %vm305_vm0, %v4569_v9, 0.0  ;;  %v10624_v5 = vadd.f32 %v10301_v16, %v10213_v25  ;;  %v10633_v9 = vadd.f32 %v10301_v16, %v10220_v7 }
 0x8ad   : > { %v4459_v3 = vadd.f32 %v4458_v53, %v4457_v43  ;;  %v4657_v8 = vadd.f32 %v4656_v1, %v4655_v30  ;;  %v10613_v53 = vadd.f32 %v10301_v16, %v10206_v27  ;;  %v4466_v1 = vsel %vm305_vm0, %v10595_v12, 0.0 }
 0x8ae   : > { %v4664_v27 = vsel %vm305_vm0, %v4570_v4, 0.0  ;;  %13939 = vst [vmem:[#allocation102_spill] sm:$0xff] %v10633_v9  ;;  %v4472_v7 = vsel %vm305_vm0, %v10624_v5, 0.0 }
 0x8af   : > { %v10577_v45 = vpop.f32.mrf.mxu0  ;;  %v4461_v60 = vadd.f32 %v4460_v38, %v4459_v3  ;;  %v4659_v29 = vadd.f32 %v4658_v52, %v4657_v8  ;;  %v4571_v38 = vmul.f32 %v10604_v32, %v10604_v32  ;;  %v4468_v52 = vsel %vm305_vm0, %v10604_v32, 0.0 }
 0x8b0   : > { %v4470_v25 = vsel %vm305_vm0, %v10613_v53, 0.0 }
 0x8b1   : > { %v4463_v33 = vadd.f32 %v4462_v59, %v4461_v60  ;;  %v4661_v30 = vadd.f32 %v4660_v6, %v4659_v29  ;;  %v4572_v59 = vmul.f32 %v10613_v53, %v10613_v53  ;;  %v4666_v12 = vsel %vm305_vm0, %v4571_v38, 0.0 }
 0x8b2   : > { %v4573_v6 = vmul.f32 %v10624_v5, %v10624_v5 }
 0x8b3   : > { %v4465_v3 = vadd.f32 %v4464_v36, %v4463_v33  ;;  %v4663_v8 = vadd.f32 %v4662_v34, %v4661_v30  ;;  %v10642_v36 = vadd.f32 %v10301_v16, %v10227_v31  ;;  %v4668_v33 = vsel %vm305_vm0, %v4572_v59, 0.0 }
 0x8b4   : > { %v4574_v34 = vmul.f32 %v10633_v9, %v10633_v9  ;;  %v4670_v31 = vsel %vm305_vm0, %v4573_v6, 0.0  ;;  %v10662_v59 = vadd.f32 %v10301_v16, %v10241_v13  ;;  %v10671_v6 = vadd.f32 %v10301_v16, %v10248_v56 }
 0x8b5   : > { %v4467_v60 = vadd.f32 %v4466_v1, %v4465_v3  ;;  %v4665_v4 = vadd.f32 %v4664_v27, %v4663_v8  ;;  %v10651_v1 = vadd.f32 %v10301_v16, %v10234_v46  ;;  %v4474_v27 = vsel %vm305_vm0, %v10633_v9, 0.0 }
 0x8b6   : > { %v4672_v46 = vsel %vm305_vm0, %v4574_v34, 0.0  ;;  %13941 = vst [vmem:[#allocation106_spill] sm:$0xff] %v10671_v6  ;;  %v4480_v56 = vsel %vm305_vm0, %v10662_v59, 0.0 }
 0x8b7   : > { %v10615_v43 = vpop.f32.mrf.mxu0  ;;  %v4469_v29 = vadd.f32 %v4468_v52, %v4467_v60  ;;  %13940 = vst [vmem:[#allocation103_spill] sm:$0xff] %v10651_v1  ;;  %v4667_v38 = vadd.f32 %v4666_v12, %v4665_v4  ;;  %v4575_v52 = vmul.f32 %v10642_v36, %v10642_v36  ;;  %v4476_v12 = vsel %vm305_vm0, %v10642_v36, 0.0 }
 0x8b8   : > { %v4478_v13 = vsel %vm305_vm0, %v10651_v1, 0.0 }
 0x8b9   : > { %v4471_v30 = vadd.f32 %v4470_v25, %v4469_v29  ;;  %v4669_v8 = vadd.f32 %v4668_v33, %v4667_v38  ;;  %v4576_v25 = vmul.f32 %v10651_v1, %v10651_v1  ;;  %v4674_v9 = vsel %vm305_vm0, %v4575_v52, 0.0 }
 0x8ba   : > { %v4577_v33 = vmul.f32 %v10662_v59, %v10662_v59 }
 0x8bb   : > { %v4473_v60 = vadd.f32 %v4472_v7, %v4471_v30  ;;  %v4671_v4 = vadd.f32 %v4670_v31, %v4669_v8  ;;  %v10680_v7 = vadd.f32 %v10301_v16, %v10255_v14  ;;  %v4676_v30 = vsel %vm305_vm0, %v4576_v25, 0.0 }
 0x8bc   : > { %v4578_v31 = vmul.f32 %v10671_v6, %v10671_v6  ;;  %v4678_v14 = vsel %vm305_vm0, %v4577_v33, 0.0  ;;  %v10700_v25 = vadd.f32 %v10301_v16, %v10269_v19  ;;  %v10709_v33 = vadd.f32 %v10301_v16, %v10276_v51  ;;  %v5078_v51 = vld [vmem:[%s13361_s3 + $0xb8] sm:$0xff] }
 0x8bd   : > { %v4475_v29 = vadd.f32 %v4474_v27, %v4473_v60  ;;  %v4673_v34 = vadd.f32 %v4672_v46, %v4671_v4  ;;  %v10689_v27 = vadd.f32 %v10301_v16, %v10262_v18  ;;  %v4482_v46 = vsel %vm305_vm0, %v10671_v6, 0.0  ;;  %5283 = vmatpush.msrb.mxu1 %v5078_v51 }
 0x8be   : > { %v4680_v18 = vsel %vm305_vm0, %v4578_v31, 0.0  ;;  %13942 = vst [vmem:[#allocation132_spill] sm:$0xff] %v10709_v33 }
 0x8bf   : > { %v10653_v3 = vpop.f32.mrf.mxu0  ;;  %v4477_v38 = vadd.f32 %v4476_v12, %v4475_v29  ;;  %v4675_v52 = vadd.f32 %v4674_v9, %v4673_v34  ;;  %v4579_v12 = vmul.f32 %v10680_v7, %v10680_v7  ;;  %v4484_v9 = vsel %vm305_vm0, %v10680_v7, 0.0 }
 0x8c0   : > { %v4486_v19 = vsel %vm305_vm0, %v10689_v27, 0.0 }
 0x8c1   : > { %v4479_v8 = vadd.f32 %v4478_v13, %v4477_v38  ;;  %v4677_v4 = vadd.f32 %v4676_v30, %v4675_v52  ;;  %v4580_v13 = vmul.f32 %v10689_v27, %v10689_v27  ;;  %v4682_v6 = vsel %vm305_vm0, %v4579_v12, 0.0 }
 0x8c2   : > { %v4581_v30 = vmul.f32 %v10700_v25, %v10700_v25  ;;  %v10730_v12 = vadd.f32 %v10301_v16, %v10290_v41 }
 0x8c3   : > { %v4481_v29 = vadd.f32 %v4480_v56, %v4479_v8  ;;  %v4679_v34 = vadd.f32 %v4678_v14, %v4677_v4  ;;  %v10718_v56 = vadd.f32 %v10301_v16, %v10283_v15  ;;  %v4684_v8 = vsel %vm305_vm0, %v4580_v13, 0.0 }
 0x8c4   : > { %v4488_v14 = vsel %vm305_vm0, %v10700_v25, 0.0 }
 0x8c5   : > { %v4483_v38 = vadd.f32 %v4482_v46, %v4481_v29  ;;  %v4681_v31 = vadd.f32 %v4680_v18, %v4679_v34  ;;  %v4582_v46 = vmul.f32 %v10709_v33, %v10709_v33  ;;  %v4686_v18 = vsel %vm305_vm0, %v4581_v30, 0.0 }
 0x8c6   : > { %v4583_v13 = vmul.f32 %v10718_v56, %v10718_v56  ;;  %v10741_v34 = vadd.f32 %v10301_v16, %v10296_v42  ;;  %v10750_v30 = vadd.f32 %v10301_v16, %v10313_v61  ;;  %v4494_v42 = vsel %vm305_vm0, %v10730_v12, 0.0 }
 0x8c7   : > { %v10691_v60 = vpop.f32.mrf.mxu0  ;;  %v4485_v52 = vadd.f32 %v4484_v9, %v4483_v38  ;;  %v4683_v15 = vadd.f32 %v4682_v6, %v4681_v31  ;;  %v4490_v9 = vsel %vm305_vm0, %v10709_v33, 0.0  ;;  %v4688_v51 = vsel %vm305_vm0, %v4582_v46, 0.0 }
 0x8c8   : > { %v4492_v6 = vsel %vm305_vm0, %v10718_v56, 0.0  ;;  %13943 = vst [vmem:[#allocation134_spill] sm:$0xff] %v10750_v30  ;;  %v4690_v33 = vsel %vm305_vm0, %v4583_v13, 0.0  ;;  %v4496_v61 = vsel %vm305_vm0, %v10741_v34, 0.0 }
 0x8c9   : > { %v4487_v4 = vadd.f32 %v4486_v19, %v4485_v52  ;;  %v4685_v38 = vadd.f32 %v4684_v8, %v4683_v15  ;;  %v4584_v19 = vmul.f32 %v10730_v12, %v10730_v12  ;;  %v4585_v8 = vmul.f32 %v10741_v34, %v10741_v34 }
 0x8cb   : > { %v4489_v41 = vadd.f32 %v4488_v14, %v4487_v4  ;;  %v4687_v31 = vadd.f32 %v4686_v18, %v4685_v38  ;;  %v10759_v14 = vadd.f32 %v10301_v16, %v10349_v24  ;;  %v4692_v4 = vsel %vm305_vm0, %v4584_v19, 0.0 }
 0x8cc   : > { %v4586_v18 = vmul.f32 %v10750_v30, %v10750_v30  ;;  %v4694_v24 = vsel %vm305_vm0, %v4585_v8, 0.0  ;;  %v10777_v19 = vadd.f32 %v10301_v16, %v10425_v10  ;;  %v10786_v8 = vadd.f32 %v10301_v16, %v10463_v49 }
 0x8cd   : > { %v4491_v52 = vadd.f32 %v4490_v9, %v4489_v41  ;;  %v4689_v46 = vadd.f32 %v4688_v51, %v4687_v31  ;;  %v10768_v9 = vadd.f32 %v10301_v16, %v10387_v0  ;;  %v4498_v51 = vsel %vm305_vm0, %v10750_v30, 0.0 }
 0x8ce   : > { %v4696_v0 = vsel %vm305_vm0, %v4586_v18, 0.0  ;;  %13944 = vst [vmem:[#allocation139_spill] sm:$0xff] %v10786_v8  ;;  %v4504_v49 = vsel %vm305_vm0, %v10777_v19, 0.0 }
 0x8cf   : > { %v10732_v29 = vpop.f32.mrf.mxu0  ;;  %v4493_v15 = vadd.f32 %v4492_v6, %v4491_v52  ;;  %v4691_v13 = vadd.f32 %v4690_v33, %v4689_v46  ;;  %v4587_v6 = vmul.f32 %v10759_v14, %v10759_v14  ;;  %v4500_v33 = vsel %vm305_vm0, %v10759_v14, 0.0 }
 0x8d0   : > { %v4502_v10 = vsel %vm305_vm0, %v10768_v9, 0.0 }
 0x8d1   : > { %v4495_v38 = vadd.f32 %v4494_v42, %v4493_v15  ;;  %v4693_v31 = vadd.f32 %v4692_v4, %v4691_v13  ;;  %v4588_v42 = vmul.f32 %v10768_v9, %v10768_v9  ;;  %v4698_v30 = vsel %vm305_vm0, %v4587_v6, 0.0 }
 0x8d2   : > { %v4589_v4 = vmul.f32 %v10777_v19, %v10777_v19 }
 0x8d3   : > { %v4497_v52 = vadd.f32 %v4496_v61, %v4495_v38  ;;  %v4695_v46 = vadd.f32 %v4694_v24, %v4693_v31  ;;  %v10795_v61 = vadd.f32 %v10301_v16, %v10501_v17  ;;  %v4700_v38 = vsel %vm305_vm0, %v4588_v42, 0.0 }
 0x8d4   : > { %v4590_v24 = vmul.f32 %v10786_v8, %v10786_v8  ;;  %v4702_v17 = vsel %vm305_vm0, %v4589_v4, 0.0  ;;  %v10813_v42 = vadd.f32 %v10301_v16, %v10577_v45  ;;  %v10822_v4 = vadd.f32 %v10301_v16, %v10615_v43 }
 0x8d5   : > { %v4499_v15 = vadd.f32 %v4498_v51, %v4497_v52  ;;  %v4697_v18 = vadd.f32 %v4696_v0, %v4695_v46  ;;  %v10804_v51 = vadd.f32 %v10301_v16, %v10539_v28  ;;  %v4506_v0 = vsel %vm305_vm0, %v10786_v8, 0.0 }
 0x8d6   : > { %13946 = vst [vmem:[#allocation142_spill] sm:$0xff] %v10813_v42  ;;  %v4704_v28 = vsel %vm305_vm0, %v4590_v24, 0.0  ;;  %v4512_v43 = vsel %vm305_vm0, %v10813_v42, 0.0 }
 0x8d7   : > { %v4324_v41 = vpop.f32.mrf.mxu0  ;;  %v4501_v13 = vadd.f32 %v4500_v33, %v4499_v15  ;;  %13945 = vst [vmem:[#allocation140_spill] sm:$0xff] %v10804_v51  ;;  %v4699_v6 = vadd.f32 %v4698_v30, %v4697_v18  ;;  %v4591_v33 = vmul.f32 %v10795_v61, %v10795_v61  ;;  %v4508_v30 = vsel %vm305_vm0, %v10795_v61, 0.0 }
 0x8d8   : > { %13947 = vst [vmem:[#allocation144_spill] sm:$0xff] %v10822_v4  ;;  %v4510_v45 = vsel %vm305_vm0, %v10804_v51, 0.0 }
 0x8d9   : > { %v4503_v31 = vadd.f32 %v4502_v10, %v4501_v13  ;;  %v4701_v46 = vadd.f32 %v4700_v38, %v4699_v6  ;;  %v4592_v10 = vmul.f32 %v10804_v51, %v10804_v51  ;;  %v4706_v8 = vsel %vm305_vm0, %v4591_v33, 0.0 }
 0x8da   : > { %v4593_v38 = vmul.f32 %v10813_v42, %v10813_v42 }
 0x8db   : > { %v4505_v15 = vadd.f32 %v4504_v49, %v4503_v31  ;;  %v4703_v18 = vadd.f32 %v4702_v17, %v4701_v46  ;;  %v10831_v49 = vadd.f32 %v10301_v16, %v10653_v3  ;;  %v4708_v31 = vsel %vm305_vm0, %v4592_v10, 0.0 }
 0x8dc   : > { %v4594_v17 = vmul.f32 %v10822_v4, %v10822_v4  ;;  %v4710_v3 = vsel %vm305_vm0, %v4593_v38, 0.0  ;;  %v10849_v10 = vadd.f32 %v10301_v16, %v10732_v29  ;;  %v10857_v38 = vadd.f32 %v10301_v16, %v4324_v41 }
 0x8dd   : > { %v4507_v13 = vadd.f32 %v4506_v0, %v4505_v15  ;;  %13948 = vst [vmem:[#allocation146_spill] sm:$0xff] %v10831_v49  ;;  %v4705_v24 = vadd.f32 %v4704_v28, %v4703_v18  ;;  %v10840_v0 = vadd.f32 %v10301_v16, %v10691_v60  ;;  %v4514_v28 = vsel %vm305_vm0, %v10822_v4, 0.0 }
 0x8de   : > { %13950 = vst [vmem:[#allocation109_spill] sm:$0xff] %v10849_v10  ;;  %v4712_v60 = vsel %vm305_vm0, %v4594_v17, 0.0  ;;  %v4520_v41 = vsel %vm305_vm0, %v10849_v10, 0.0 }
 0x8df   : > { %v4327_v52 = vpop.f32.mrf.mxu0  ;;  %v4509_v6 = vadd.f32 %v4508_v30, %v4507_v13  ;;  %13949 = vst [vmem:[#allocation148_spill] sm:$0xff] %v10840_v0  ;;  %v4707_v33 = vadd.f32 %v4706_v8, %v4705_v24  ;;  %v4595_v30 = vmul.f32 %v10831_v49, %v10831_v49  ;;  %v4516_v8 = vsel %vm305_vm0, %v10831_v49, 0.0 }
 0x8e0   : > { %13951 = vst [vmem:[#allocation110_spill] sm:$0xff] %v10857_v38  ;;  %v4518_v29 = vsel %vm305_vm0, %v10840_v0, 0.0 }
 0x8e1   : > { %v4511_v46 = vadd.f32 %v4510_v45, %v4509_v6  ;;  %v4709_v18 = vadd.f32 %v4708_v31, %v4707_v33  ;;  %v4596_v45 = vmul.f32 %v10840_v0, %v10840_v0  ;;  %v4714_v4 = vsel %vm305_vm0, %v4595_v30, 0.0 }
 0x8e2   : > { %v4597_v31 = vmul.f32 %v10849_v10, %v10849_v10 }
 0x8e3   : > { %v4513_v13 = vadd.f32 %v4512_v43, %v4511_v46  ;;  %v4711_v24 = vadd.f32 %v4710_v3, %v4709_v18  ;;  %v10865_v43 = vadd.f32 %v10301_v16, %v4327_v52  ;;  %v4716_v46 = vsel %vm305_vm0, %v4596_v45, 0.0 }
 0x8e4   : > { %v4598_v3 = vmul.f32 %v10857_v38, %v10857_v38  ;;  %v4718_v0 = vsel %vm305_vm0, %v4597_v31, 0.0  ;;  %v4522_v52 = vsel %vm305_vm0, %v10857_v38, 0.0 }
 0x8e5   : > { %v4515_v6 = vadd.f32 %v4514_v28, %v4513_v13  ;;  %13952 = vst [vmem:[#allocation113_spill] sm:$0xff] %v10865_v43  ;;  %v4713_v17 = vadd.f32 %v4712_v60, %v4711_v24  ;;  %v4599_v60 = vmul.f32 %v10865_v43, %v10865_v43 }
 0x8e7   : > { %v4330_v15 = vpop.f32.mrf.mxu0  ;;  %v4517_v33 = vadd.f32 %v4516_v8, %v4515_v6  ;;  %v4715_v30 = vadd.f32 %v4714_v4, %v4713_v17  ;;  %v4720_v6 = vsel %vm305_vm0, %v4598_v3, 0.0  ;;  %v4524_v4 = vsel %vm305_vm0, %v10865_v43, 0.0  ;;  %v13970_v43 = vld [vmem:[#allocation109_spill] sm:$0xff]  ;;  %v13971_v1 = vld [vmem:[#allocation110_spill] sm:$0xff] }
 0x8e8   : > { %v10873_v28 = vadd.f32 %v10301_v16, %v4330_v15  ;;  %v4722_v17 = vsel %vm305_vm0, %v4599_v60, 0.0 }
 0x8e9   : > { %v4519_v18 = vadd.f32 %v4518_v29, %v4517_v33  ;;  %v4717_v45 = vadd.f32 %v4716_v46, %v4715_v30 }
 0x8ea   : > { %13953 = vst [vmem:[#allocation151_spill] sm:$0xff] %v10873_v28  ;;  %v4600_v15 = vmul.f32 %v10873_v28, %v10873_v28  ;;  %v4526_v33 = vsel %vm305_vm0, %v10873_v28, 0.0  ;;  %v13969_v28 = vld [vmem:[#allocation148_spill] sm:$0xff] }
 0x8eb   : > { %v4521_v24 = vadd.f32 %v4520_v41, %v4519_v18  ;;  %v4719_v29 = vadd.f32 %v4718_v0, %v4717_v45 }
 0x8ec   : > { %v4724_v3 = vsel %vm305_vm0, %v4600_v15, 0.0 }
 0x8ed   : > { %v4523_v31 = vadd.f32 %v4522_v52, %v4521_v24  ;;  %v4721_v46 = vadd.f32 %v4720_v6, %v4719_v29 }
 0x8ef   : > { %v4333_v13 = vpop.f32.mrf.mxu0  ;;  %v4525_v41 = vadd.f32 %v4524_v4, %v4523_v31  ;;  %v4723_v18 = vadd.f32 %v4722_v17, %v4721_v46 }
 0x8f0   : > { %v10881_v8 = vadd.f32 %v10301_v16, %v4333_v13 }
 0x8f1   : > { %v4527_v38 = vadd.f32 %v4526_v33, %v4525_v41  ;;  %v4725_v60 = vadd.f32 %v4724_v3, %v4723_v18 }
 0x8f2   : > { %13954 = vst [vmem:[#allocation153_spill] sm:$0xff] %v10881_v8  ;;  %v4601_v13 = vmul.f32 %v10881_v8, %v10881_v8  ;;  %v4528_v30 = vsel %vm305_vm0, %v10881_v8, 0.0 }
 0x8f3   : > { %v4529_v45 = vadd.f32 %v4528_v30, %v4527_v38 }
 0x8f4   : > { %v4726_v0 = vsel %vm305_vm0, %v4601_v13, 0.0 }
 0x8f5   : > { %v4727_v4 = vadd.f32 %v4726_v0, %v4725_v60 }
 0x8f7   : > { %v4336_v10 = vpop.f32.mrf.mxu0 }
 0x8f8   : > { %v10898_v52 = vadd.f32 %v10301_v16, %v4336_v10 }
 0x8fa   : > { %v4530_v24 = vsel %vm305_vm0, %v10898_v52, 0.0  ;;  %v4602_v6 = vmul.f32 %v10898_v52, %v10898_v52 }
 0x8fb   : > { %v4531_v15 = vadd.f32 %v4530_v24, %v4529_v45 }
 0x8fc   : > { %v4728_v29 = vsel %vm305_vm0, %v4602_v6, 0.0 }
 0x8fd   : > { %v4532_v31 = vrot.slane %v4531_v15, 4  ;;  %v4729_v17 = vadd.f32 %v4728_v29, %v4727_v4  ;;  %v13955_v4 = vld [vmem:[#allocation68_spill] sm:$0xff]  ;;  %v13956_v29 = vld [vmem:[#allocation67_spill] sm:$0xff] }
 0x8ff   : > { %v4533_v33 = vadd.f32 %v4532_v31, %v4531_v15  ;;  %v4730_v46 = vrot.slane %v4729_v17, 4  ;;  %v13965_v15 = vld [vmem:[#allocation140_spill] sm:$0xff] }
 0x901   : > { %v4534_v13 = vrot.slane %v4533_v33, 2  ;;  %v4731_v41 = vadd.f32 %v4730_v46, %v4729_v17 }
 0x903   : > { %v4535_v16 = vadd.f32 %v4534_v13, %v4533_v33  ;;  %v4732_v10 = vrot.slane %v4731_v41, 2 }
 0x905   : > { %v4536_v3 = vrot.slane %v4535_v16, 1  ;;  %v4733_v38 = vadd.f32 %v4732_v10, %v4731_v41 }
 0x907   : > { %v4537_v30 = vadd.f32 %v4536_v3, %v4535_v16  ;;  %v4734_v18 = vrot.slane %v4733_v38, 1  ;;  %v13957_v16 = vld [vmem:[#allocation96_spill] sm:$0xff] }
 0x909   : > { %v10905_v49 = vmul.f32 0.001953125, %v4537_v30  ;;  %v4735_v42 = vadd.f32 %v4734_v18, %v4733_v38  ;;  %v5077_v30 = vld [vmem:[%s13361_s3 + $0xb0] sm:$0xff]  ;;  %v5076_v18 = vld [vmem:[%s13361_s3 + $0xa8] sm:$0xff]  ;;  %v13958_v38 = vld [vmem:[#allocation130_spill] sm:$0xff] }
 0x90a   : > { %5284 = vmatpush.msrb.mxu1 %v5077_v30 }
 0x90b   : > { %v4736_v51 = vmul.f32 0.001953125, %v4735_v42  ;;  %v4737_v0 = vmul.f32 %v10905_v49, %v10905_v49  ;;  %v4803_v60 = vsub.f32 %v10898_v52, %v10905_v49  ;;  %v13960_v42 = vld [vmem:[#allocation102_spill] sm:$0xff]  ;;  %v4778_v33 = vsub.f32 %v10662_v59, %v10905_v49 }
 0x90c   : > { %5285 = vmatpush.msrb.mxu1 %v5076_v18  ;;  %v4780_v30 = vsub.f32 %v10680_v7, %v10905_v49  ;;  %v4782_v18 = vsub.f32 %v10700_v25, %v10905_v49  ;;  %v4784_v17 = vsub.f32 %v10718_v56, %v10905_v49  ;;  %v4785_v59 = vsub.f32 %v10730_v12, %v10905_v49  ;;  %v11009_v7 = vld [vmem:[%s7656_s10 + $0xa] ss:$0 sm:$0xff] }
 0x90d   : > { %v4738_v45 = vsub.f32 %v4736_v51, %v4737_v0  ;;  %v5075_v0 = vld [vmem:[%s13361_s3 + $0xa0] sm:$0xff]  ;;  %v13959_v51 = vld [vmem:[#allocation136_spill] sm:$0xff]  ;;  %v4790_v56 = vsub.f32 %v10777_v19, %v10905_v49  ;;  %v4799_v52 = vsub.f32 %v13971_v1, %v10905_v49 }
 0x90e   : > { %5286 = vmatpush.msrb.mxu1 %v5075_v0  ;;  %v13967_v19 = vld [vmem:[#allocation144_spill] sm:$0xff] }
 0x90f   : > { %v4739_v24 = vmax.f32 %v4738_v45, 0.0 }
 0x911   : > { %v4804_v6 = vadd.f32 1e-05, %v4739_v24  ;;  %v13961_v24 = vld [vmem:[#allocation106_spill] sm:$0xff] }
 0x912   : > { %v4779_v10 = vsub.f32 %v13961_v24, %v10905_v49  ;;  %v4786_v24 = vsub.f32 %v10741_v34, %v10905_v49  ;;  %v13964_v34 = vld [vmem:[#allocation139_spill] sm:$0xff] }
 0x913   : > { %7416 = vrsqrt.f32 %v4804_v6  ;;  %vm4811_vm7 = vweird.f32 %v4804_v6  ;;  %v4791_v31 = vsub.f32 %v13964_v34, %v10905_v49 }
 0x919   : > { %v7417_v3 = vpop.eup %7416 }
 0x91a   : > { %v4806_v45 = vmul.f32 %v7417_v3, %v4804_v6  ;;  %vm4812_vm8 = vweird.f32 %v7417_v3  ;;  %v4792_v6 = vsub.f32 %v10795_v61, %v10905_v49  ;;  %v4797_v61 = vsub.f32 %v13969_v28, %v10905_v49 }
 0x91b   : > { %vm4813_vm10 = vmor %vm4811_vm7, %vm4812_vm8 }
 0x91c   : > { %v4807_v41 = vmul.f32 %v7417_v3, %v4806_v45  ;;  %v4781_v45 = vsub.f32 %v10689_v27, %v10905_v49  ;;  %v13963_v27 = vld [vmem:[#allocation134_spill] sm:$0xff] }
 0x91d   : > { %v4787_v25 = vsub.f32 %v13963_v27, %v10905_v49  ;;  %v4793_v27 = vsub.f32 %v13965_v15, %v10905_v49  ;;  %v4798_v15 = vsub.f32 %v13970_v43, %v10905_v49  ;;  %v13975_v43 = vsub.f32 %v10376_v39, %v10905_v49 }
 0x91e   : > { %v4808_v46 = vmul.f32 0.5, %v4807_v41  ;;  %v13962_v41 = vld [vmem:[#allocation132_spill] sm:$0xff] }
 0x91f   : > { %v4783_v0 = vsub.f32 %v13962_v41, %v10905_v49  ;;  %v4788_v41 = vsub.f32 %v10759_v14, %v10905_v49 }
 0x920   : > { %v4809_v13 = vsub.f32 1.5, %v4808_v46 }
 0x922   : > { %v4810_v46 = vmul.f32 %v7417_v3, %v4809_v13  ;;  %v4789_v13 = vsub.f32 %v10768_v9, %v10905_v49  ;;  %v13966_v9 = vld [vmem:[#allocation142_spill] sm:$0xff] }
 0x923   : > { %v4794_v8 = vsub.f32 %v13966_v9, %v10905_v49 }
 0x924   : > { %v11020_v12 = vsel %vm4813_vm10, %v7417_v3, %v4810_v46  ;;  %v4795_v3 = vsub.f32 %v13967_v19, %v10905_v49  ;;  %v13968_v46 = vld [vmem:[#allocation146_spill] sm:$0xff] }
 0x925   : > { %v4878_v14 = vmul.f32 %v11020_v12, %v4803_v60  ;;  %v4796_v34 = vsub.f32 %v13968_v46, %v10905_v49  ;;  %v13972_v60 = vsub.f32 %v13955_v4, %v10905_v49  ;;  %v13974_v46 = vsub.f32 %v13956_v29, %v10905_v49 }
 0x926   : > { %v11063_v1 = vmul.f32 %v11020_v12, %v13975_v43  ;;  %v13976_v4 = vsub.f32 %v10385_v20, %v10905_v49  ;;  %v13979_v43 = vsub.f32 %v10414_v11, %v10905_v49 }
 0x927   : > { %v11048_v9 = vmul.f32 %v11020_v12, %v13972_v60  ;;  %v11051_v19 = vmul.f32 %v11009_v7, %v4878_v14  ;;  %v11057_v28 = vmul.f32 %v11020_v12, %v13974_v46  ;;  %v13977_v14 = vsub.f32 %v10396_v50, %v10905_v49 }
 0x928   : > { %v11069_v60 = vmul.f32 %v11020_v12, %v13976_v4  ;;  %v13978_v46 = vsub.f32 %v10405_v58, %v10905_v49  ;;  %v11087_v20 = vmul.f32 %v11020_v12, %v13979_v43  ;;  %v13980_v4 = vsub.f32 %v10423_v2, %v10905_v49 }
 0x929   : > { %13973 = vst [vmem:[#allocation8_spill] sm:$0xff] %v11051_v19  ;;  %v11075_v29 = vmul.f32 %v11020_v12, %v13977_v14  ;;  %v13981_v14 = vsub.f32 %v10434_v62, %v10905_v49  ;;  %v13983_v43 = vsub.f32 %v10452_v40, %v10905_v49 }
 0x92a   : > { %v11081_v39 = vmul.f32 %v11020_v12, %v13978_v46  ;;  %v11093_v50 = vmul.f32 %v11020_v12, %v13980_v4  ;;  %v13982_v46 = vsub.f32 %v10443_v63, %v10905_v49  ;;  %v13984_v4 = vsub.f32 %v10461_v48, %v10905_v49 }
 0x92b   : > { %v11099_v58 = vmul.f32 %v11020_v12, %v13981_v14  ;;  %v11111_v2 = vmul.f32 %v11020_v12, %v13983_v43  ;;  %v13985_v14 = vsub.f32 %v10472_v47, %v10905_v49  ;;  %v13987_v43 = vsub.f32 %v10490_v23, %v10905_v49 }
 0x92c   : > { %v11105_v11 = vmul.f32 %v11020_v12, %v13982_v46  ;;  %v11117_v62 = vmul.f32 %v11020_v12, %v13984_v4  ;;  %v13986_v46 = vsub.f32 %v10481_v37, %v10905_v49  ;;  %v13988_v4 = vsub.f32 %v10499_v55, %v10905_v49 }
 0x92d   : > { %v11123_v63 = vmul.f32 %v11020_v12, %v13985_v14  ;;  %v11135_v48 = vmul.f32 %v11020_v12, %v13987_v43  ;;  %v13989_v14 = vsub.f32 %v10510_v22, %v10905_v49  ;;  %v13991_v43 = vsub.f32 %v10528_v21, %v10905_v49 }
 0x92e   : > { %v11129_v40 = vmul.f32 %v11020_v12, %v13986_v46  ;;  %v11141_v47 = vmul.f32 %v11020_v12, %v13988_v4  ;;  %v13990_v46 = vsub.f32 %v13957_v16, %v10905_v49  ;;  %v13992_v4 = vsub.f32 %v10537_v54, %v10905_v49 }
 0x92f   : > { %v11147_v37 = vmul.f32 %v11020_v12, %v13989_v14  ;;  %v11159_v55 = vmul.f32 %v11020_v12, %v13991_v43  ;;  %v13993_v14 = vsub.f32 %v10548_v44, %v10905_v49  ;;  %v13995_v43 = vsub.f32 %v10566_v57, %v10905_v49 }
 0x930   : > { %v11153_v23 = vmul.f32 %v11020_v12, %v13990_v46  ;;  %v11165_v22 = vmul.f32 %v11020_v12, %v13992_v4  ;;  %v13994_v46 = vsub.f32 %v13958_v38, %v10905_v49  ;;  %v13996_v4 = vsub.f32 %v10575_v35, %v10905_v49 }
 0x931   : > { %v11171_v16 = vmul.f32 %v11020_v12, %v13993_v14  ;;  %v11183_v54 = vmul.f32 %v11020_v12, %v13995_v43  ;;  %v13997_v14 = vsub.f32 %v10586_v26, %v10905_v49  ;;  %v13999_v43 = vsub.f32 %v10604_v32, %v10905_v49 }
 0x932   : > { %v11177_v21 = vmul.f32 %v11020_v12, %v13994_v46  ;;  %v11189_v44 = vmul.f32 %v11020_v12, %v13996_v4  ;;  %v13998_v46 = vsub.f32 %v13959_v51, %v10905_v49  ;;  %v14000_v4 = vsub.f32 %v10613_v53, %v10905_v49 }
 0x933   : > { %v11195_v38 = vmul.f32 %v11020_v12, %v13997_v14  ;;  %v11207_v35 = vmul.f32 %v11020_v12, %v13999_v43  ;;  %v14001_v14 = vsub.f32 %v10624_v5, %v10905_v49  ;;  %v14004_v43 = vsub.f32 %v10642_v36, %v10905_v49 }
 0x934   : > { %v11201_v57 = vmul.f32 %v11020_v12, %v13998_v46  ;;  %v11213_v26 = vmul.f32 %v11020_v12, %v14000_v4  ;;  %v14002_v46 = vsub.f32 %v13960_v42, %v10905_v49  ;;  %v14006_v4 = vld [vmem:[#allocation103_spill] sm:$0xff]  ;;  %v11243_v42 = vmul.f32 %v11020_v12, %v4779_v10 }
 0x935   : > { %v11219_v51 = vmul.f32 %v11020_v12, %v14001_v14  ;;  %v11231_v53 = vmul.f32 %v11020_v12, %v14004_v43  ;;  %v14007_v19 = vsub.f32 %v14006_v4, %v10905_v49  ;;  %v11240_v14 = vmul.f32 %v11020_v12, %v4778_v33 }
 0x936   : > { %v11225_v32 = vmul.f32 %v11020_v12, %v14002_v46  ;;  %14010 = vst [vmem:[#allocation3_spill] sm:$0xff] %v11243_v42  ;;  %v4855_v46 = vmul.f32 %v11020_v12, %v4780_v30  ;;  %v4857_v36 = vmul.f32 %v11020_v12, %v4782_v18  ;;  %v4858_v43 = vmul.f32 %v11020_v12, %v4783_v0  ;;  %v14011_v42 = vld [vmem:[#allocation113_spill] sm:$0xff] }
 0x937   : > { %14005 = vst [vmem:[#allocation6_spill] sm:$0xff] %v11231_v53  ;;  %v11237_v5 = vmul.f32 %v11020_v12, %v14007_v19  ;;  %v4859_v53 = vmul.f32 %v11020_v12, %v4784_v17  ;;  %v4860_v4 = vmul.f32 %v11020_v12, %v4785_v59  ;;  %v4861_v19 = vmul.f32 %v11020_v12, %v4786_v24 }
 0x938   : > { %14003 = vst [vmem:[#allocation9_spill] sm:$0xff] %v11225_v32  ;;  %v4856_v32 = vmul.f32 %v11020_v12, %v4781_v45  ;;  %v4862_v33 = vmul.f32 %v11020_v12, %v4787_v25  ;;  %v4864_v10 = vmul.f32 %v11020_v12, %v4789_v13  ;;  %v4865_v30 = vmul.f32 %v11020_v12, %v4790_v56 }
 0x939   : > { %14008 = vst [vmem:[#allocation5_spill] sm:$0xff] %v11237_v5  ;;  %v4866_v45 = vmul.f32 %v11020_v12, %v4791_v31  ;;  %v4867_v18 = vmul.f32 %v11020_v12, %v4792_v6  ;;  %v4868_v0 = vmul.f32 %v11020_v12, %v4793_v27  ;;  %v4869_v17 = vmul.f32 %v11020_v12, %v4794_v8  ;;  %v14013_v6 = vld [vmem:[#allocation151_spill] sm:$0xff]  ;;  %v14015_v5 = vld [vmem:[#allocation153_spill] sm:$0xff] }
 0x93a   : > { %14009 = vst [vmem:[#allocation7_spill] sm:$0xff] %v11240_v14  ;;  %v4863_v14 = vmul.f32 %v11020_v12, %v4788_v41  ;;  %v4870_v59 = vmul.f32 %v11020_v12, %v4795_v3  ;;  %v4871_v24 = vmul.f32 %v11020_v12, %v4796_v34  ;;  %v4872_v25 = vmul.f32 %v11020_v12, %v4797_v61 }
 0x93b   : > { %v4873_v41 = vmul.f32 %v11020_v12, %v4798_v15  ;;  %v4874_v13 = vmul.f32 %v11020_v12, %v4799_v52  ;;  %v14012_v56 = vsub.f32 %v14011_v42, %v10905_v49  ;;  %v14014_v27 = vsub.f32 %v14013_v6, %v10905_v49 }
 0x93c   : > { %v14016_v3 = vsub.f32 %v14015_v5, %v10905_v49  ;;  %v11278_v61 = vmul.f32 %v11009_v7, %v4855_v46  ;;  %v11281_v15 = vmul.f32 %v11009_v7, %v4856_v32  ;;  %v11284_v52 = vmul.f32 %v11009_v7, %v4857_v36 }
 0x93d   : > { %v4875_v31 = vmul.f32 %v11020_v12, %v14012_v56  ;;  %v4876_v8 = vmul.f32 %v11020_v12, %v14014_v27  ;;  %v11287_v42 = vmul.f32 %v11009_v7, %v4858_v43  ;;  %v11290_v56 = vmul.f32 %v11009_v7, %v4859_v53 }
 0x93e   : > { %v4877_v34 = vmul.f32 %v11020_v12, %v14016_v3  ;;  %v11293_v5 = vmul.f32 %v11009_v7, %v4860_v4  ;;  %v11296_v6 = vmul.f32 %v11009_v7, %v4861_v19  ;;  %v11299_v46 = vmul.f32 %v11009_v7, %v4862_v33 }
 0x93f   : > { %v11302_v32 = vmul.f32 %v11009_v7, %v4863_v14  ;;  %v11305_v36 = vmul.f32 %v11009_v7, %v4864_v10  ;;  %v11308_v43 = vmul.f32 %v11009_v7, %v4865_v30  ;;  %v11311_v53 = vmul.f32 %v11009_v7, %v4866_v45  ;;  %v11323_v14 = vld [vmem:[%s7656_s10 + $0xb] ss:$0 sm:$0xff] }
 0x940   : > { %v11314_v4 = vmul.f32 %v11009_v7, %v4867_v18  ;;  %v11317_v19 = vmul.f32 %v11009_v7, %v4868_v0  ;;  %v11320_v33 = vmul.f32 %v11009_v7, %v4869_v17  ;;  %v11326_v10 = vmul.f32 %v11009_v7, %v4870_v59 }
 0x941   : > { %v11329_v30 = vmul.f32 %v11009_v7, %v4871_v24  ;;  %v11332_v45 = vmul.f32 %v11009_v7, %v4872_v25  ;;  %v11335_v18 = vmul.f32 %v11009_v7, %v4873_v41  ;;  %v11338_v0 = vmul.f32 %v11009_v7, %v4874_v13  ;;  %v14019_v24 = vld [vmem:[#allocation72_spill] sm:$0xff] }
 0x942   : > { %v11341_v17 = vmul.f32 %v11009_v7, %v4875_v31  ;;  %v11344_v27 = vmul.f32 %v11009_v7, %v4876_v8  ;;  %v11347_v59 = vmul.f32 %v11009_v7, %v4877_v34  ;;  %v4742_v3 = vsub.f32 %v14019_v24, %v10905_v49 }
 0x943   : > { %v4881_v25 = vmul.f32 %v11009_v7, %v11048_v9  ;;  %v4882_v31 = vmul.f32 %v11009_v7, %v11057_v28  ;;  %v4889_v24 = vmul.f32 %v11009_v7, %v11063_v1  ;;  %v4890_v9 = vmul.f32 %v11009_v7, %v11069_v60 }
 0x944   : > { %14017 = vst [vmem:[#allocation4_spill] sm:$0xff] %v11341_v17  ;;  %v4817_v41 = vmul.f32 %v11020_v12, %v4742_v3  ;;  %v4891_v3 = vmul.f32 %v11009_v7, %v11075_v29  ;;  %v4893_v28 = vmul.f32 %v11009_v7, %v11087_v20  ;;  %v14021_v20 = vld [vmem:[#allocation79_spill] sm:$0xff] }
 0x945   : > { %14018 = vst [vmem:[#allocation2_spill] sm:$0xff] %v11347_v59  ;;  %v4947_v13 = vadd.f32 %v11323_v14, %v4881_v25  ;;  %v4948_v8 = vadd.f32 %v11323_v14, %v4882_v31  ;;  %v4892_v25 = vmul.f32 %v11009_v7, %v11081_v39  ;;  %v11376_v1 = vadd.f32 %v11323_v14, %v4890_v9 }
 0x946   : > { %v4883_v34 = vmul.f32 %v11009_v7, %v4817_v41  ;;  %v11373_v41 = vadd.f32 %v11323_v14, %v4889_v24  ;;  %v11379_v60 = vadd.f32 %v11323_v14, %v4891_v3  ;;  %v11385_v39 = vadd.f32 %v11323_v14, %v4893_v28 }
 0x947   : > { %v5011_v17 = vmax.f32 %v4947_v13, 0.0  ;;  %v11382_v29 = vadd.f32 %v11323_v14, %v4892_v25  ;;  %v4744_v31 = vsub.f32 %v14021_v20, %v10905_v49  ;;  %v5012_v59 = vmax.f32 %v4948_v8, 0.0 }
 0x948   : > { %v4949_v24 = vadd.f32 %v11323_v14, %v4883_v34  ;;  %v4894_v9 = vmul.f32 %v11009_v7, %v11093_v50  ;;  %v4895_v3 = vmul.f32 %v11009_v7, %v11099_v58  ;;  %v4896_v25 = vmul.f32 %v11009_v7, %v11105_v11 }
 0x949   : > { %7246 = vmatmul.msk.f32.vlgmr.msrb.gmra.mxu1 %vm305_vm0, %v5011_v17  ;;  %v14020_v17 = vld [vmem:[#allocation82_spill] sm:$0xff]  ;;  %v4897_v28 = vmul.f32 %v11009_v7, %v11111_v2  ;;  %v4898_v20 = vmul.f32 %v11009_v7, %v11117_v62  ;;  %v4899_v8 = vmul.f32 %v11009_v7, %v11123_v63  ;;  %v4900_v34 = vmul.f32 %v11009_v7, %v11129_v40 }
 0x94a   : > { %v4743_v13 = vsub.f32 %v14020_v17, %v10905_v49  ;;  %v4901_v50 = vmul.f32 %v11009_v7, %v11135_v48  ;;  %v11409_v58 = vadd.f32 %v11323_v14, %v4894_v9  ;;  %v11412_v11 = vadd.f32 %v11323_v14, %v4895_v3 }
 0x94b   : > { %v11415_v2 = vadd.f32 %v11323_v14, %v4896_v25  ;;  %v11418_v62 = vadd.f32 %v11323_v14, %v4897_v28  ;;  %v11421_v63 = vadd.f32 %v11323_v14, %v4898_v20  ;;  %v11424_v40 = vadd.f32 %v11323_v14, %v4899_v8 }
 0x94c   : > { %v4818_v17 = vmul.f32 %v11020_v12, %v4743_v13  ;;  %v11427_v48 = vadd.f32 %v11323_v14, %v4900_v34  ;;  %v4819_v13 = vmul.f32 %v11020_v12, %v4744_v31  ;;  %v5013_v9 = vmax.f32 %v4949_v24, 0.0 }
 0x94d   : > { %v4902_v25 = vmul.f32 %v11009_v7, %v11141_v47  ;;  %v4903_v28 = vmul.f32 %v11009_v7, %v11147_v37  ;;  %v4904_v20 = vmul.f32 %v11009_v7, %v11153_v23  ;;  %v4905_v8 = vmul.f32 %v11009_v7, %v11159_v55 }
 0x94e   : > { %v4884_v3 = vmul.f32 %v11009_v7, %v4818_v17  ;;  %v4906_v34 = vmul.f32 %v11009_v7, %v11165_v22  ;;  %v4907_v31 = vmul.f32 %v11009_v7, %v11171_v16  ;;  %v4908_v17 = vmul.f32 %v11009_v7, %v11177_v21 }
 0x94f   : > { %v4909_v47 = vmul.f32 %v11009_v7, %v11183_v54  ;;  %v11451_v37 = vadd.f32 %v11323_v14, %v4902_v25  ;;  %v11454_v23 = vadd.f32 %v11323_v14, %v4903_v28  ;;  %v11457_v55 = vadd.f32 %v11323_v14, %v4904_v20 }
 0x950   : > { %v11460_v22 = vadd.f32 %v11323_v14, %v4905_v8  ;;  %v11463_v16 = vadd.f32 %v11323_v14, %v4906_v34  ;;  %v11466_v21 = vadd.f32 %v11323_v14, %v4907_v31  ;;  %v11469_v54 = vadd.f32 %v11323_v14, %v4908_v17  ;;  %v14023_v17 = vld [vmem:[#allocation6_spill] sm:$0xff] }
 0x951   : > { %7247 = vmatmul.msk.f32.gmra.mxu1 %vm305_vm0, %v5012_v59  ;;  %v11430_v59 = vadd.f32 %v11323_v14, %v4901_v50  ;;  %v11472_v24 = vadd.f32 %v11323_v14, %v4909_v47  ;;  %v4950_v50 = vadd.f32 %v11323_v14, %v4884_v3  ;;  %v4885_v25 = vmul.f32 %v11009_v7, %v4819_v13  ;;  %v14022_v3 = vld [vmem:[#allocation9_spill] sm:$0xff] }
 0x952   : > { %v4910_v28 = vmul.f32 %v11009_v7, %v11189_v44  ;;  %v4911_v20 = vmul.f32 %v11009_v7, %v11195_v38  ;;  %v4912_v8 = vmul.f32 %v11009_v7, %v11201_v57  ;;  %v4913_v34 = vmul.f32 %v11009_v7, %v11207_v35 }
 0x953   : > { %v4914_v31 = vmul.f32 %v11009_v7, %v11213_v26  ;;  %v4916_v13 = vmul.f32 %v11009_v7, %v14022_v3  ;;  %v4917_v44 = vmul.f32 %v11009_v7, %v14023_v17  ;;  %v14027_v17 = vld [vmem:[#allocation89_spill] sm:$0xff] }
 0x954   : > { %v11494_v38 = vadd.f32 %v11323_v14, %v4910_v28  ;;  %v11497_v57 = vadd.f32 %v11323_v14, %v4911_v20  ;;  %v11500_v35 = vadd.f32 %v11323_v14, %v4912_v8  ;;  %v11503_v26 = vadd.f32 %v11323_v14, %v4913_v34  ;;  %v14028_v34 = vld [vmem:[#allocation5_spill] sm:$0xff] }
 0x955   : > { %v11512_v3 = vadd.f32 %v11323_v14, %v4916_v13  ;;  %v11515_v28 = vadd.f32 %v11323_v14, %v4917_v44  ;;  %v5014_v20 = vmax.f32 %v4950_v50, 0.0  ;;  %v4745_v8 = vsub.f32 %v14027_v17, %v10905_v49 }
 0x956   : > { %14024 = vst [vmem:[#allocation68_spill] sm:$0xff] %v11500_v35  ;;  %v4951_v35 = vadd.f32 %v11323_v14, %v4885_v25  ;;  %v11529_v44 = vadd.f32 %v11323_v14, %v11278_v61  ;;  %v11533_v50 = vadd.f32 %v11323_v14, %v11281_v15  ;;  %v11537_v25 = vadd.f32 %v11323_v14, %v11284_v52  ;;  %v14032_v52 = vld [vmem:[#allocation85_spill] sm:$0xff] }
 0x959   : > { %7248 = vmatmul.msk.f32.gmra.mxu1 %vm305_vm0, %v5013_v9  ;;  %v4915_v9 = vmul.f32 %v11009_v7, %v11219_v51  ;;  %v11506_v51 = vadd.f32 %v11323_v14, %v4914_v31  ;;  %v4918_v31 = vmul.f32 %v11009_v7, %v14028_v34  ;;  %v4746_v34 = vsub.f32 %v14032_v52, %v10905_v49 }
 0x95b   : > { %14025 = vst [vmem:[#allocation67_spill] sm:$0xff] %v11506_v51  ;;  %v11509_v47 = vadd.f32 %v11323_v14, %v4915_v9  ;;  %v14029_v51 = vld [vmem:[#allocation7_spill] sm:$0xff]  ;;  %v11549_v61 = vadd.f32 %v11323_v14, %v4918_v31  ;;  %v11573_v31 = vadd.f32 %v11323_v14, %v11302_v32  ;;  %v4821_v32 = vmul.f32 %v11020_v12, %v4746_v34 }
 0x95c   : > { %v4919_v9 = vmul.f32 %v11009_v7, %v14029_v51  ;;  %v11545_v51 = vadd.f32 %v11323_v14, %v11290_v56  ;;  %v11565_v56 = vadd.f32 %v11323_v14, %v11296_v6  ;;  %v11586_v6 = vadd.f32 %v11323_v14, %v11311_v53 }
 0x95d   : > { %14026 = vst [vmem:[#allocation96_spill] sm:$0xff] %v11509_v47  ;;  %v14030_v47 = vld [vmem:[#allocation3_spill] sm:$0xff]  ;;  %v11604_v53 = vadd.f32 %v11323_v14, %v11326_v10  ;;  %v14035_v10 = vld [vmem:[#allocation4_spill] sm:$0xff] }
 0x95e   : > { %v4920_v13 = vmul.f32 %v11009_v7, %v14030_v47  ;;  %v4820_v47 = vmul.f32 %v11020_v12, %v4745_v8  ;;  %v11552_v15 = vadd.f32 %v11323_v14, %v4919_v9  ;;  %v11569_v8 = vadd.f32 %v11323_v14, %v11299_v46 }
 0x95f   : > { %v11577_v9 = vadd.f32 %v11323_v14, %v11305_v36  ;;  %v11590_v46 = vadd.f32 %v11323_v14, %v11314_v4  ;;  %v11596_v36 = vadd.f32 %v11323_v14, %v11317_v19  ;;  %v11608_v4 = vadd.f32 %v11323_v14, %v11329_v30 }
 0x960   : > { %v11555_v17 = vadd.f32 %v11323_v14, %v4920_v13  ;;  %v11612_v13 = vadd.f32 %v11323_v14, %v11332_v45  ;;  %v11617_v19 = vadd.f32 %v11323_v14, %v11335_v18  ;;  %v11625_v52 = vadd.f32 %v11323_v14, %v14035_v10  ;;  %v14037_v45 = vld [vmem:[#allocation2_spill] sm:$0xff] }
 0x961   : > { %7249 = vmatmul.msk.f32.gmra.mxu1 %vm305_vm0, %v5014_v20  ;;  %v11541_v20 = vadd.f32 %v11323_v14, %v11287_v42  ;;  %v5015_v42 = vmax.f32 %v4951_v35, 0.0  ;;  %v4886_v35 = vmul.f32 %v11009_v7, %v4820_v47  ;;  %v11629_v30 = vadd.f32 %v11323_v14, %v11344_v27 }
 0x962   : > { %14033 = vst [vmem:[#allocation136_spill] sm:$0xff] %v11617_v19  ;;  %v11633_v34 = vadd.f32 %v11323_v14, %v14037_v45 }
 0x963   : > { %14031 = vst [vmem:[#allocation130_spill] sm:$0xff] %v11541_v20  ;;  %v11561_v20 = vadd.f32 %v11323_v14, %v11293_v5  ;;  %v11582_v5 = vadd.f32 %v11323_v14, %v11308_v43  ;;  %v11600_v43 = vadd.f32 %v11323_v14, %v11320_v33  ;;  %v4952_v47 = vadd.f32 %v11323_v14, %v4886_v35 }
 0x964   : > { %v11621_v33 = vadd.f32 %v11323_v14, %v11338_v0  ;;  %14036 = vst [vmem:[#allocation106_spill] sm:$0xff] %v11629_v30  ;;  %v4887_v0 = vmul.f32 %v11009_v7, %v4821_v32  ;;  %v5019_v32 = vmax.f32 %v11373_v41, 0.0  ;;  %v5024_v41 = vmax.f32 %v11409_v58, 0.0 }
 0x965   : > { %v5016_v35 = vmax.f32 %v4952_v47, 0.0  ;;  %v5028_v58 = vmax.f32 %v11421_v63, 0.0 }
 0x966   : > { %14034 = vst [vmem:[#allocation102_spill] sm:$0xff] %v11621_v33  ;;  %v14040_v33 = vld [vmem:[#allocation91_spill] sm:$0xff]  ;;  %v4953_v27 = vadd.f32 %v11323_v14, %v4887_v0  ;;  %v5034_v0 = vmax.f32 %v11457_v55, 0.0 }
 0x967   : > { %v4747_v19 = vsub.f32 %v14040_v33, %v10905_v49  ;;  %v5020_v49 = vmax.f32 %v11376_v1, 0.0  ;;  %v5025_v1 = vmax.f32 %v11412_v11, 0.0  ;;  %v5029_v11 = vmax.f32 %v11424_v40, 0.0 }
 0x968   : > { %v5017_v30 = vmax.f32 %v4953_v27, 0.0  ;;  %v5030_v33 = vmax.f32 %v11427_v48, 0.0  ;;  %v5036_v27 = vmax.f32 %v11463_v16, 0.0 }
 0x969   : > { %7250 = vmatmul.msk.f32.gmra.mxu1 %vm305_vm0, %v5015_v42  ;;  %v14038_v42 = vld [vmem:[#allocation8_spill] sm:$0xff]  ;;  %v4822_v10 = vmul.f32 %v11020_v12, %v4747_v19  ;;  %v5021_v12 = vmax.f32 %v11379_v60, 0.0  ;;  %v5026_v60 = vmax.f32 %v11415_v2, 0.0 }
 0x96a   : > { %v11637_v18 = vadd.f32 %v11323_v14, %v14038_v42 }
 0x96b   : > { %v4888_v45 = vmul.f32 %v11009_v7, %v4822_v10  ;;  %v5022_v7 = vmax.f32 %v11382_v29, 0.0  ;;  %v5027_v29 = vmax.f32 %v11418_v62, 0.0  ;;  %v5035_v10 = vmax.f32 %v11460_v22, 0.0 }
 0x96c   : > { %14039 = vst [vmem:[#allocation132_spill] sm:$0xff] %v11637_v18 }
 0x96d   : > { %v4954_v42 = vadd.f32 %v11323_v14, %v4888_v45  ;;  %v5023_v14 = vmax.f32 %v11385_v39, 0.0  ;;  %v5037_v45 = vmax.f32 %v11466_v21, 0.0 }
 0x96f   : > { %v5018_v18 = vmax.f32 %v4954_v42, 0.0  ;;  %v5038_v42 = vmax.f32 %v11469_v54, 0.0 }
 0x971   : > { %7251 = vmatmul.msk.f32.gmra.mxu1 %vm305_vm0, %v5016_v35  ;;  %v5033_v35 = vmax.f32 %v11454_v23, 0.0 }
 0x979   : > { %7252 = vmatmul.msk.f32.gmra.mxu1 %vm305_vm0, %v5017_v30  ;;  %v5031_v30 = vmax.f32 %v11430_v59, 0.0 }
 0x981   : > { %7253 = vmatmul.msk.f32.gmra.mxu1 %vm305_vm0, %v5018_v18  ;;  %v5032_v18 = vmax.f32 %v11451_v37, 0.0 }
 0x989   : > { %7254 = vmatmul.msk.f32.gmra.mxu1 %vm305_vm0, %v5019_v32  ;;  %v5039_v32 = vmax.f32 %v11472_v24, 0.0 }
 0x991   : > { %7255 = vmatmul.msk.f32.gmra.mxu1 %vm305_vm0, %v5020_v49  ;;  %v5040_v49 = vmax.f32 %v11494_v38, 0.0 }
 0x999   : > { %7256 = vmatmul.msk.f32.gmra.mxu1 %vm305_vm0, %v5021_v12  ;;  %v5041_v12 = vmax.f32 %v11497_v57, 0.0 }
 0x9a1   : > { %7257 = vmatmul.msk.f32.gmra.mxu1 %vm305_vm0, %v5022_v7  ;;  %v14041_v7 = vld [vmem:[#allocation68_spill] sm:$0xff] }
 0x9a9   : > { %7258 = vmatmul.msk.f32.gmra.mxu1 %vm305_vm0, %v5023_v14  ;;  %v5042_v14 = vmax.f32 %v14041_v7, 0.0  ;;  %v5055_v7 = vmax.f32 %v11545_v51, 0.0 }
 0x9b1   : > { %7259 = vmatmul.msk.f32.gmra.mxu1 %vm305_vm0, %v5024_v41  ;;  %v5043_v41 = vmax.f32 %v11503_v26, 0.0 }
 0x9b9   : > { %7260 = vmatmul.msk.f32.gmra.mxu1 %vm305_vm0, %v5025_v1  ;;  %v14042_v1 = vld [vmem:[#allocation67_spill] sm:$0xff] }
 0x9c1   : > { %7261 = vmatmul.msk.f32.gmra.mxu1 %vm305_vm0, %v5026_v60  ;;  %v5044_v60 = vmax.f32 %v14042_v1, 0.0 }
 0x9c6   : > { %v11665_v47 = vpop.f32.mrf.mxu1 }
 0x9c9   : > { %7262 = vmatmul.msk.f32.gmra.mxu1 %vm305_vm0, %v5027_v29  ;;  %v14043_v29 = vld [vmem:[#allocation96_spill] sm:$0xff] }
 0x9ce   : > { %v11669_v39 = vpop.f32.mrf.mxu1 }
 0x9d1   : > { %7263 = vmatmul.msk.f32.gmra.mxu1 %vm305_vm0, %v5028_v58  ;;  %v5045_v58 = vmax.f32 %v14043_v29, 0.0  ;;  %v5059_v29 = vmax.f32 %v11573_v31, 0.0 }
 0x9d6   : > { %v11673_v19 = vpop.f32.mrf.mxu1 }
 0x9d9   : > { %7264 = vmatmul.msk.f32.gmra.mxu1 %vm305_vm0, %v5029_v11 }
 0x9de   : > { %v11677_v2 = vpop.f32.mrf.mxu1 }
 0x9e1   : > { %7265 = vmatmul.msk.f32.gmra.mxu1 %vm305_vm0, %v5030_v33  ;;  %v5046_v33 = vmax.f32 %v11512_v3, 0.0 }
 0x9e6   : > { %v11681_v62 = vpop.f32.mrf.mxu1 }
 0x9e9   : > { %7266 = vmatmul.msk.f32.gmra.mxu1 %vm305_vm0, %v5031_v30  ;;  %v5047_v30 = vmax.f32 %v11515_v28, 0.0 }
 0x9ee   : > { %v11685_v63 = vpop.f32.mrf.mxu1 }
 0x9f1   : > { %7267 = vmatmul.msk.f32.gmra.mxu1 %vm305_vm0, %v5032_v18 }
 0x9f6   : > { %v11689_v40 = vpop.f32.mrf.mxu1 }
 0x9f9   : > { %7268 = vmatmul.msk.f32.gmra.mxu1 %vm305_vm0, %v5033_v35  ;;  %v5048_v35 = vmax.f32 %v11549_v61, 0.0 }
 0x9fe   : > { %v11693_v48 = vpop.f32.mrf.mxu1 }
 0xa01   : > { %7269 = vmatmul.msk.f32.gmra.mxu1 %vm305_vm0, %v5034_v0 }
 0xa06   : > { %v11697_v59 = vpop.f32.mrf.mxu1 }
 0xa09   : > { %7270 = vmatmul.msk.f32.gmra.mxu1 %vm305_vm0, %v5035_v10  ;;  %v5049_v10 = vmax.f32 %v11552_v15, 0.0 }
 0xa0e   : > { %v11701_v37 = vpop.f32.mrf.mxu1 }
 0xa11   : > { %7271 = vmatmul.msk.f32.gmra.mxu1 %vm305_vm0, %v5036_v27  ;;  %v5050_v27 = vmax.f32 %v11555_v17, 0.0 }
 0xa16   : > { %v11705_v23 = vpop.f32.mrf.mxu1 }
 0xa19   : > { %7272 = vmatmul.msk.f32.gmra.mxu1 %vm305_vm0, %v5037_v45  ;;  %v5051_v45 = vmax.f32 %v11529_v44, 0.0 }
 0xa1e   : > { %v11709_v55 = vpop.f32.mrf.mxu1 }
 0xa21   : > { %7273 = vmatmul.msk.f32.gmra.mxu1 %vm305_vm0, %v5038_v42  ;;  %v5052_v42 = vmax.f32 %v11533_v50, 0.0 }
 0xa26   : > { %v11713_v22 = vpop.f32.mrf.mxu1 }
 0xa29   : > { %7274 = vmatmul.msk.f32.gmra.mxu1 %vm305_vm0, %v5039_v32  ;;  %v5053_v32 = vmax.f32 %v11537_v25, 0.0 }
 0xa2e   : > { %v11717_v16 = vpop.f32.mrf.mxu1 }
 0xa31   : > { %7275 = vmatmul.msk.f32.gmra.mxu1 %vm305_vm0, %v5040_v49  ;;  %v14044_v49 = vld [vmem:[#allocation130_spill] sm:$0xff] }
 0xa36   : > { %v11721_v21 = vpop.f32.mrf.mxu1 }
 0xa39   : > { %7276 = vmatmul.msk.f32.gmra.mxu1 %vm305_vm0, %v5041_v12  ;;  %v5054_v12 = vmax.f32 %v14044_v49, 0.0  ;;  %v14045_v49 = vld [vmem:[#allocation136_spill] sm:$0xff] }
 0xa3e   : > { %v11725_v54 = vpop.f32.mrf.mxu1 }
 0xa41   : > { %7277 = vmatmul.msk.f32.gmra.mxu1 %vm305_vm0, %v5042_v14  ;;  %v5056_v14 = vmax.f32 %v11561_v20, 0.0 }
 0xa46   : > { %v11729_v24 = vpop.f32.mrf.mxu1 }
 0xa49   : > { %7278 = vmatmul.msk.f32.gmra.mxu1 %vm305_vm0, %v5043_v41  ;;  %v5057_v41 = vmax.f32 %v11565_v56, 0.0 }
 0xa4e   : > { %v11733_v38 = vpop.f32.mrf.mxu1 }
 0xa51   : > { %7279 = vmatmul.msk.f32.gmra.mxu1 %vm305_vm0, %v5044_v60  ;;  %v5058_v60 = vmax.f32 %v11569_v8, 0.0 }
 0xa56   : > { %v11737_v57 = vpop.f32.mrf.mxu1 }
 0xa59   : > { %7280 = vmatmul.msk.f32.gmra.mxu1 %vm305_vm0, %v5045_v58  ;;  %v5060_v58 = vmax.f32 %v11577_v9, 0.0 }
 0xa5e   : > { %v11741_v11 = vpop.f32.mrf.mxu1 }
 0xa61   : > { %7281 = vmatmul.msk.f32.gmra.mxu1 %vm305_vm0, %v5046_v33  ;;  %v5061_v33 = vmax.f32 %v11582_v5, 0.0 }
 0xa66   : > { %v11745_v26 = vpop.f32.mrf.mxu1 }
 0xa69   : > { %7282 = vmatmul.msk.f32.gmra.mxu1 %vm305_vm0, %v5047_v30  ;;  %v5062_v30 = vmax.f32 %v11586_v6, 0.0 }
 0xa6e   : > { %v11749_v18 = vpop.f32.mrf.mxu1 }
 0xa71   : > { %7283 = vmatmul.msk.f32.gmra.mxu1 %vm305_vm0, %v5048_v35  ;;  %v5063_v35 = vmax.f32 %v11590_v46, 0.0 }
 0xa76   : > { %v11753_v0 = vpop.f32.mrf.mxu1 }
 0xa79   : > { %7284 = vmatmul.msk.f32.gmra.mxu1 %vm305_vm0, %v5049_v10  ;;  %v5064_v10 = vmax.f32 %v11596_v36, 0.0 }
 0xa7e   : > { %v11757_v3 = vpop.f32.mrf.mxu1 }
 0xa81   : > { %7285 = vmatmul.msk.f32.gmra.mxu1 %vm305_vm0, %v5050_v27  ;;  %v5065_v27 = vmax.f32 %v11600_v43, 0.0 }
 0xa86   : > { %v11761_v28 = vpop.f32.mrf.mxu1 }
 0xa89   : > { %7286 = vmatmul.msk.f32.gmra.mxu1 %vm305_vm0, %v5051_v45  ;;  %v5066_v45 = vmax.f32 %v11604_v53, 0.0 }
 0xa8e   : > { %v11765_v61 = vpop.f32.mrf.mxu1 }
 0xa91   : > { %7287 = vmatmul.msk.f32.gmra.mxu1 %vm305_vm0, %v5052_v42  ;;  %v5067_v42 = vmax.f32 %v11608_v4, 0.0  ;;  %v5071_v4 = vmax.f32 %v11625_v52, 0.0  ;;  %v14050_v52 = vld [vmem:[#allocation132_spill] sm:$0xff] }
 0xa96   : > { %v11769_v15 = vpop.f32.mrf.mxu1 }
 0xa99   : > { %7288 = vmatmul.msk.f32.gmra.mxu1 %vm305_vm0, %v5053_v32  ;;  %v5068_v32 = vmax.f32 %v11612_v13, 0.0 }
 0xa9e   : > { %v11773_v17 = vpop.f32.mrf.mxu1 }
 0xaa1   : > { %7289 = vmatmul.msk.f32.gmra.mxu1 %vm305_vm0, %v5054_v12  ;;  %v5069_v12 = vmax.f32 %v14045_v49, 0.0 }
 0xaa6   : > { %v11777_v44 = vpop.f32.mrf.mxu1 }
 0xaa9   : > { %7290 = vmatmul.msk.f32.gmra.mxu1 %vm305_vm0, %v5055_v7  ;;  %v14046_v7 = vld [vmem:[#allocation102_spill] sm:$0xff] }
 0xaae   : > { %v11781_v50 = vpop.f32.mrf.mxu1 }
 0xab1   : > { %7291 = vmatmul.msk.f32.gmra.mxu1 %vm305_vm0, %v5056_v14  ;;  %v5070_v14 = vmax.f32 %v14046_v7, 0.0 }
 0xab6   : > { %v11785_v25 = vpop.f32.mrf.mxu1 }
 0xab9   : > { %7292 = vmatmul.msk.f32.gmra.mxu1 %vm305_vm0, %v5057_v41 }
 0xabe   : > { %v11789_v1 = vpop.f32.mrf.mxu1 }
 0xac1   : > { %7293 = vmatmul.msk.f32.gmra.mxu1 %vm305_vm0, %v5058_v60  ;;  %v14047_v60 = vld [vmem:[#allocation106_spill] sm:$0xff] }
 0xac6   : > { %v11793_v51 = vpop.f32.mrf.mxu1 }
 0xac9   : > { %7294 = vmatmul.msk.f32.gmra.mxu1 %vm305_vm0, %v5059_v29  ;;  %v5072_v29 = vmax.f32 %v14047_v60, 0.0 }
 0xace   : > { %v11797_v20 = vpop.f32.mrf.mxu1 }
 0xad1   : > { %7295 = vmatmul.msk.f32.gmra.mxu1 %vm305_vm0, %v5060_v58  ;;  %v11842_v58 = vpop.permute.xlu2 %3682 }
 0xad2   : > { %14048 = vst [vmem:[#allocation134_spill] sm:$0xff] %v11842_v58 }
 0xad6   : > { %v5390_v56 = vpop.f32.mrf.mxu1 }
 0xad9   : > { %7296 = vmatmul.msk.f32.gmra.mxu1 %vm305_vm0, %v5061_v33 }
 0xade   : > { %v11803_v8 = vpop.f32.mrf.mxu1 }
 0xae1   : > { %7297 = vmatmul.msk.f32.gmra.mxu1 %vm305_vm0, %v5062_v30  ;;  %v5073_v30 = vmax.f32 %v11633_v34, 0.0 }
 0xae6   : > { %v11807_v31 = vpop.f32.mrf.mxu1 }
 0xae9   : > { %7298 = vmatmul.msk.f32.gmra.mxu1 %vm305_vm0, %v5063_v35  ;;  %v11848_v35 = vpop.permute.xlu2 %3688 }
 0xaea   : > { %14049 = vst [vmem:[#allocation139_spill] sm:$0xff] %v11848_v35 }
 0xaee   : > { %v11811_v9 = vpop.f32.mrf.mxu1 }
 0xaf1   : > { %7299 = vmatmul.msk.f32.gmra.mxu1 %vm305_vm0, %v5064_v10 }
 0xaf6   : > { %v11815_v5 = vpop.f32.mrf.mxu1 }
 0xaf9   : > { %7300 = vmatmul.msk.f32.gmra.mxu1 %vm305_vm0, %v5065_v27  ;;  %v5074_v27 = vmax.f32 %v14050_v52, 0.0 }
 0xafe   : > { %v11819_v6 = vpop.f32.mrf.mxu1 }
 0xb01   : > { %7301 = vmatmul.msk.f32.gmra.mxu1 %vm305_vm0, %v5066_v45  ;;  %v11854_v45 = vpop.permute.xlu2 %3694 }
 0xb02   : > { %14051 = vst [vmem:[#allocation140_spill] sm:$0xff] %v11854_v45 }
 0xb06   : > { %v11823_v46 = vpop.f32.mrf.mxu1 }
 0xb09   : > { %7302 = vmatmul.msk.f32.gmra.mxu1 %vm305_vm0, %v5067_v42  ;;  %v11862_v49 = vpop.permute.xlu2 %3700 }
 0xb0a   : > { %14052 = vst [vmem:[#allocation142_spill] sm:$0xff] %v11862_v49 }
 0xb0e   : > { %v11827_v36 = vpop.f32.mrf.mxu1 }
 0xb11   : > { %7303 = vmatmul.msk.f32.gmra.mxu1 %vm305_vm0, %v5068_v32  ;;  %v11860_v32 = vld [vmem:[%s7656_s10 + $0xc] ss:$0 sm:$0xff]  ;;  %v11893_v52 = vpop.permute.xlu2 %3704 }
 0xb12   : > { %v11866_v34 = vadd.f32 %v11860_v32, %v11705_v23  ;;  %v11874_v7 = vadd.f32 %v11860_v32, %v11737_v57  ;;  %14054 = vst [vmem:[#allocation146_spill] sm:$0xff] %v11893_v52 }
 0xb16   : > { %v5414_v43 = vpop.f32.mrf.mxu1 }
 0xb17   : > { %v11902_v35 = vadd.f32 %v11860_v32, %v5414_v43  ;;  %v11918_v43 = vadd.f32 %v11860_v32, %v11773_v17 }
 0xb19   : > { %7304 = vmatmul.msk.f32.gmra.mxu1 %vm305_vm0, %v5069_v12  ;;  %v11870_v12 = vadd.f32 %v11860_v32, %v11673_v19  ;;  %v5579_v19 = vsel %vm305_vm0, %v11874_v7, -inf }
 0xb1b   : > { %v5576_v23 = vsel %vm305_vm0, %v11870_v12, -inf }
 0xb1e   : > { %v5417_v53 = vpop.f32.mrf.mxu1 }
 0xb21   : > { %7305 = vmatmul.msk.f32.gmra.mxu1 %vm305_vm0, %v5070_v14  ;;  %v5577_v14 = vsel %vm305_vm0, %v11866_v34, -inf }
 0xb22   : > { %v5578_v57 = vmax.f32 %v5576_v23, %v5577_v14  ;;  %v11910_v14 = vadd.f32 %v11860_v32, %v11741_v11 }
 0xb24   : > { %v5580_v49 = vmax.f32 %v5578_v57, %v5579_v19  ;;  %14056 = vst [vmem:[#allocation109_spill] sm:$0xff] %v11910_v14  ;;  %v5585_v19 = vsel %vm305_vm0, %v11902_v35, -inf  ;;  %v5594_v58 = vsel %vm305_vm0, %v11910_v14, -inf  ;;  %v11942_v14 = vadd.f32 %v11860_v32, %v5417_v53 }
 0xb26   : > { %v11835_v41 = vpop.f32.mrf.mxu1 }
 0xb29   : > { %7306 = vmatmul.msk.f32.gmra.mxu1 %vm305_vm0, %v5071_v4  ;;  %v11880_v4 = vadd.f32 %v11860_v32, %v11769_v15  ;;  %v11897_v15 = vadd.f32 %v11860_v32, %v11709_v55 }
 0xb2b   : > { %14055 = vst [vmem:[#allocation148_spill] sm:$0xff] %v11897_v15  ;;  %v5592_v52 = vsel %vm305_vm0, %v11897_v15, -inf }
 0xb2e   : > { %v11839_v13 = vpop.f32.mrf.mxu1 }
 0xb31   : > { %7307 = vmatmul.msk.f32.gmra.mxu1 %vm305_vm0, %v5072_v29  ;;  %v11889_v29 = vadd.f32 %v11860_v32, %v5390_v56  ;;  %v11906_v56 = vadd.f32 %v11860_v32, %v11677_v2 }
 0xb33   : > { %v5583_v23 = vsel %vm305_vm0, %v11889_v29, -inf  ;;  %v5591_v11 = vsel %vm305_vm0, %v11906_v56, -inf }
 0xb34   : > { %v5593_v17 = vmax.f32 %v5591_v11, %v5592_v52  ;;  %v11948_v52 = vpop.permute.xlu2 %3706 }
 0xb35   : > { %14059 = vst [vmem:[#allocation113_spill] sm:$0xff] %v11948_v52 }
 0xb36   : > { %v11845_v33 = vpop.f32.mrf.mxu1  ;;  %v5595_v15 = vmax.f32 %v5593_v17, %v5594_v58  ;;  %v11964_v58 = vadd.f32 %v11860_v32, %v11777_v44 }
 0xb39   : > { %7308 = vmatmul.msk.f32.gmra.mxu1 %vm305_vm0, %v5073_v30  ;;  %v11891_v30 = vpop.permute.xlu1 %3680 }
 0xb3a   : > { %14053 = vst [vmem:[#allocation144_spill] sm:$0xff] %v11891_v30 }
 0xb3e   : > { %v11851_v10 = vpop.f32.mrf.mxu1 }
 0xb41   : > { %7309 = vmatmul.msk.f32.gmra.mxu1 %vm305_vm0, %v5074_v27  ;;  %v5581_v27 = vsel %vm305_vm0, %v11880_v4, -inf  ;;  %v11933_v30 = vpop.permute.xlu1 %3686 }
 0xb42   : > { %v5582_v55 = vmax.f32 %v5580_v49, %v5581_v27  ;;  %v11928_v49 = vadd.f32 %v11860_v32, %v11803_v8  ;;  %14057 = vst [vmem:[#allocation110_spill] sm:$0xff] %v11933_v30 }
 0xb44   : > { %v5584_v2 = vmax.f32 %v5582_v55, %v5583_v23  ;;  %v11937_v23 = vadd.f32 %v11860_v32, %v11713_v22  ;;  %v5596_v55 = vsel %vm305_vm0, %v11918_v43, -inf  ;;  %v11956_v22 = vadd.f32 %v11860_v32, %v11745_v26 }
 0xb45   : > { %v5598_v53 = vsel %vm305_vm0, %v11928_v49, -inf }
 0xb46   : > { %v11857_v42 = vpop.f32.mrf.mxu1  ;;  %v5586_v45 = vmax.f32 %v5584_v2, %v5585_v19  ;;  %14058 = vst [vmem:[#allocation103_spill] sm:$0xff] %v11937_v23  ;;  %v11952_v19 = vadd.f32 %v11860_v32, %v11681_v62  ;;  %v5597_v2 = vmax.f32 %v5595_v15, %v5596_v55  ;;  %v5607_v11 = vsel %vm305_vm0, %v11937_v23, -inf }
 0xb47   : > { %14060 = vst [vmem:[#allocation151_spill] sm:$0xff] %v11956_v22  ;;  %v11974_v15 = vadd.f32 %v11860_v32, %v11807_v31 }
 0xb48   : > { %v5599_v62 = vmax.f32 %v5597_v2, %v5598_v53  ;;  %v5606_v26 = vsel %vm305_vm0, %v11952_v19, -inf  ;;  %v11983_v53 = vadd.f32 %v11860_v32, %v11717_v16  ;;  %v5611_v2 = vsel %vm305_vm0, %v11964_v58, -inf }
 0xb49   : > { %v5608_v44 = vmax.f32 %v5606_v26, %v5607_v11  ;;  %v11979_v30 = vpop.permute.xlu1 %3692  ;;  %v11995_v11 = vpop.permute.xlu2 %3710  ;;  %v12003_v16 = vadd.f32 %v11860_v32, %v11749_v18 }
 0xb4a   : > { %14061 = vst [vmem:[#allocation153_spill] sm:$0xff] %v11979_v30  ;;  %v5622_v26 = vsel %vm305_vm0, %v11983_v53, -inf }
 0xb4b   : > { %14062 = vst [vmem:[#allocation72_spill] sm:$0xff] %v11995_v11 }
 0xb4c   : > { %14063 = vst [vmem:[#allocation82_spill] sm:$0xff] %v12003_v16 }
 0xb4e   : > { %v11882_v60 = vpop.f32.mrf.mxu1 }
 0xb51   : > { %v12026_v11 = vpop.permute.xlu1 %3698 }
 0xb52   : > { %14064 = vst [vmem:[#allocation79_spill] sm:$0xff] %v12026_v11 }
 0xb56   : > { %v5438_v57 = vpop.f32.mrf.mxu1 }
 0xb57   : > { %v11931_v27 = vadd.f32 %v11860_v32, %v5438_v57 }
 0xb59   : > { %v5587_v8 = vsel %vm305_vm0, %v11931_v27, -inf }
 0xb5a   : > { %v11946_v57 = vmax.f32 %v5586_v45, %v5587_v8  ;;  %v5600_v45 = vsel %vm305_vm0, %v11942_v14, -inf  ;;  %v5609_v8 = vsel %vm305_vm0, %v11956_v22, -inf  ;;  %v11989_v22 = vadd.f32 %v11860_v32, %v11835_v41 }
 0xb5b   : > { %v5601_v52 = vmax.f32 %v5599_v62, %v5600_v45  ;;  %v11999_v45 = vadd.f32 %v11860_v32, %v11685_v63  ;;  %v5613_v41 = vsel %vm305_vm0, %v11974_v15, -inf }
 0xb5d   : > { %v5621_v18 = vsel %vm305_vm0, %v11999_v45, -inf }
 0xb5e   : > { %v5441_v17 = vpop.f32.mrf.mxu1 }
 0xb5f   : > { %v11977_v55 = vadd.f32 %v11860_v32, %v5441_v17  ;;  %v5610_v17 = vmax.f32 %v5608_v44, %v5609_v8  ;;  %v5615_v8 = vsel %vm305_vm0, %v11989_v22, -inf }
 0xb61   : > { %v5602_v31 = vsel %vm305_vm0, %v11977_v55, -inf  ;;  %v5612_v62 = vmax.f32 %v5610_v17, %v5611_v2  ;;  %v12021_v2 = vadd.f32 %v11860_v32, %v11811_v9 }
 0xb62   : > { %v11993_v23 = vmax.f32 %v5601_v52, %v5602_v31  ;;  %v12011_v52 = vadd.f32 %v11860_v32, %v11781_v50  ;;  %v5624_v31 = vsel %vm305_vm0, %v12003_v16, -inf  ;;  %v5623_v50 = vmax.f32 %v5621_v18, %v5622_v26 }
 0xb63   : > { %v5614_v63 = vmax.f32 %v5612_v62, %v5613_v41  ;;  %v12030_v41 = vadd.f32 %v11860_v32, %v11721_v21  ;;  %v12036_v16 = vadd.f32 %v11860_v32, %v11839_v13  ;;  %v12048_v21 = vadd.f32 %v11860_v32, %v11689_v40 }
 0xb64   : > { %v5626_v62 = vsel %vm305_vm0, %v12011_v52, -inf  ;;  %v5625_v26 = vmax.f32 %v5623_v50, %v5624_v31  ;;  %v12052_v18 = vadd.f32 %v11860_v32, %v11753_v0  ;;  %v5628_v13 = vsel %vm305_vm0, %v12021_v2, -inf }
 0xb65   : > { %v5616_v30 = vmax.f32 %v5614_v63, %v5615_v8  ;;  %14065 = vst [vmem:[#allocation9_spill] sm:$0xff] %v12030_v41  ;;  %v12044_v63 = vpop.permute.xlu2 %3716  ;;  %v5630_v31 = vsel %vm305_vm0, %v12036_v16, -inf  ;;  %v5636_v0 = vsel %vm305_vm0, %v12048_v21, -inf }
 0xb66   : > { %v5444_v44 = vpop.f32.mrf.mxu1  ;;  %14067 = vst [vmem:[#allocation89_spill] sm:$0xff] %v12044_v63  ;;  %v5627_v11 = vmax.f32 %v5625_v26, %v5626_v62  ;;  %v12070_v62 = vadd.f32 %v11860_v32, %v11815_v5 }
 0xb67   : > { %v12024_v17 = vadd.f32 %v11860_v32, %v5444_v44  ;;  %v12040_v44 = vpop.permute.xlu0 %3678  ;;  %14068 = vst [vmem:[#allocation5_spill] sm:$0xff] %v12052_v18 }
 0xb68   : > { %14066 = vst [vmem:[#allocation6_spill] sm:$0xff] %v12040_v44  ;;  %v5637_v44 = vsel %vm305_vm0, %v12030_v41, -inf  ;;  %v5629_v40 = vmax.f32 %v5627_v11, %v5628_v13  ;;  %v12075_v41 = vpop.permute.xlu1 %3702  ;;  %v12079_v11 = vadd.f32 %v11860_v32, %v11725_v54 }
 0xb69   : > { %v5617_v9 = vsel %vm305_vm0, %v12024_v17, -inf  ;;  %14069 = vst [vmem:[#allocation7_spill] sm:$0xff] %v12075_v41 }
 0xb6a   : > { %v12042_v8 = vmax.f32 %v5616_v30, %v5617_v9  ;;  %v12060_v30 = vadd.f32 %v11860_v32, %v11785_v25  ;;  %v5639_v9 = vsel %vm305_vm0, %v12052_v18, -inf  ;;  %v5638_v25 = vmax.f32 %v5636_v0, %v5637_v44  ;;  %14070 = vst [vmem:[#allocation3_spill] sm:$0xff] %v12079_v11 }
 0xb6b   : > { %v5631_v63 = vmax.f32 %v5629_v40, %v5630_v31  ;;  %v12085_v18 = vadd.f32 %v11860_v32, %v11845_v33  ;;  %v12093_v44 = vadd.f32 %v11860_v32, %v11693_v48  ;;  %v12101_v0 = vadd.f32 %v11860_v32, %v11757_v3 }
 0xb6c   : > { %v5641_v13 = vsel %vm305_vm0, %v12060_v30, -inf  ;;  %v5640_v31 = vmax.f32 %v5638_v25, %v5639_v9  ;;  %v5643_v33 = vsel %vm305_vm0, %v12070_v62, -inf  ;;  %v12109_v48 = vadd.f32 %v11860_v32, %v11789_v1 }
 0xb6d   : > { %14071 = vst [vmem:[#allocation85_spill] sm:$0xff] %v12085_v18  ;;  %v12097_v54 = vpop.permute.xlu2 %3722  ;;  %v5651_v9 = vsel %vm305_vm0, %v12093_v44, -inf }
 0xb6e   : > { %v5447_v50 = vpop.f32.mrf.mxu1  ;;  %14073 = vst [vmem:[#allocation2_spill] sm:$0xff] %v12093_v44  ;;  %v5642_v41 = vmax.f32 %v5640_v31, %v5641_v13  ;;  %v5654_v13 = vsel %vm305_vm0, %v12101_v0, -inf  ;;  %v12123_v31 = vadd.f32 %v11860_v32, %v11819_v6  ;;  %v12142_v6 = vadd.f32 %v11860_v32, %v11851_v10 }
 0xb6f   : > { %v12073_v26 = vadd.f32 %v11860_v32, %v5447_v50  ;;  %v12089_v50 = vpop.permute.xlu0 %3684  ;;  %14074 = vst [vmem:[#allocation8_spill] sm:$0xff] %v12097_v54  ;;  %v12130_v54 = vadd.f32 %v11860_v32, %v11665_v47 }
 0xb70   : > { %14072 = vst [vmem:[#allocation4_spill] sm:$0xff] %v12089_v50  ;;  %v5652_v50 = vsel %vm305_vm0, %v12079_v11, -inf  ;;  %v5644_v25 = vmax.f32 %v5642_v41, %v5643_v33  ;;  %v12132_v11 = vpop.permute.xlu1 %3708 }
 0xb71   : > { %v5632_v5 = vsel %vm305_vm0, %v12073_v26, -inf  ;;  %14075 = vst [vmem:[#allocation91_spill] sm:$0xff] %v12101_v0  ;;  %v5653_v41 = vmax.f32 %v5651_v9, %v5652_v50  ;;  %v5656_v0 = vsel %vm305_vm0, %v12109_v48, -inf }
 0xb72   : > { %v12095_v40 = vmax.f32 %v5631_v63, %v5632_v5  ;;  %14076 = vst [vmem:[#allocation68_spill] sm:$0xff] %v12109_v48  ;;  %v5645_v63 = vsel %vm305_vm0, %v12085_v18, -inf  ;;  %v12117_v5 = vadd.f32 %v11860_v32, %v11697_v59  ;;  %v12136_v59 = vadd.f32 %v11860_v32, %v11729_v24 }
 0xb73   : > { %14077 = vst [vmem:[#allocation67_spill] sm:$0xff] %v12123_v31  ;;  %v5646_v33 = vmax.f32 %v5644_v25, %v5645_v63  ;;  %v5655_v50 = vmax.f32 %v5653_v41, %v5654_v13  ;;  %v12154_v24 = vadd.f32 %v11860_v32, %v11761_v28  ;;  %v5658_v25 = vsel %vm305_vm0, %v12123_v31, -inf }
 0xb74   : > { %14079 = vst [vmem:[#allocation130_spill] sm:$0xff] %v12132_v11  ;;  %v5547_v9 = vsel %vm305_vm0, %v12117_v5, -inf  ;;  %v5546_v48 = vsel %vm305_vm0, %v12130_v54, -inf  ;;  %v5549_v13 = vsel %vm305_vm0, %v12136_v59, -inf  ;;  %v12166_v41 = vadd.f32 %v11860_v32, %v11793_v51 }
 0xb75   : > { %14080 = vst [vmem:[#allocation136_spill] sm:$0xff] %v12142_v6  ;;  %v5657_v10 = vmax.f32 %v5655_v50, %v5656_v0  ;;  %v12158_v11 = vpop.permute.xlu2 %3724  ;;  %v5660_v28 = vsel %vm305_vm0, %v12142_v6, -inf  ;;  %v12183_v51 = vadd.f32 %v11860_v32, %v11669_v39  ;;  %v12226_v6 = vadd.f32 %v11860_v32, %v11827_v36 }
 0xb76   : > { %v5450_v3 = vpop.f32.mrf.mxu1  ;;  %14082 = vst [vmem:[#allocation106_spill] sm:$0xff] %v12158_v11  ;;  %v5551_v11 = vsel %vm305_vm0, %v12154_v24, -inf  ;;  %v12240_v36 = vadd.f32 %v11860_v32, %v11882_v60 }
 0xb77   : > { %v12126_v1 = vadd.f32 %v11860_v32, %v5450_v3  ;;  %v12146_v47 = vpop.permute.xlu0 %3690  ;;  %v5659_v0 = vmax.f32 %v5657_v10, %v5658_v25  ;;  %v5553_v10 = vsel %vm305_vm0, %v12166_v41, -inf }
 0xb78   : > { %14081 = vst [vmem:[#allocation102_spill] sm:$0xff] %v12146_v47  ;;  %v5522_v47 = vadd.f32 %v11860_v32, %v11823_v46  ;;  %v12189_v25 = vpop.permute.xlu1 %3726  ;;  %v12195_v46 = vadd.f32 %v11860_v32, %v11857_v42  ;;  %v5561_v42 = vsel %vm305_vm0, %v12183_v51, -inf }
 0xb79   : > { %14078 = vst [vmem:[#allocation96_spill] sm:$0xff] %v12126_v1  ;;  %v5647_v3 = vsel %vm305_vm0, %v12126_v1, -inf }
 0xb7a   : > { %v12148_v63 = vmax.f32 %v5646_v33, %v5647_v3  ;;  %v5548_v33 = vmax.f32 %v5546_v48, %v5547_v9  ;;  %v12172_v3 = vadd.f32 %v11860_v32, %v11701_v37  ;;  %v12187_v37 = vadd.f32 %v11860_v32, %v11733_v38  ;;  %14084 = vst [vmem:[#allocation165_spill] sm:$0xff] %v12189_v25 }
 0xb7b   : > { %v5661_v9 = vmax.f32 %v5659_v0, %v5660_v28  ;;  %v12205_v28 = vadd.f32 %v11860_v32, %v11765_v61  ;;  %v5555_v0 = vsel %vm305_vm0, %v5522_v47, -inf  ;;  %v5557_v61 = vsel %vm305_vm0, %v12195_v46, -inf }
 0xb7c   : > { %v5550_v48 = vmax.f32 %v5548_v33, %v5549_v13  ;;  %v5562_v13 = vsel %vm305_vm0, %v12172_v3, -inf  ;;  %v5564_v25 = vsel %vm305_vm0, %v12187_v37, -inf }
 0xb7e   : > { %v5453_v50 = vpop.f32.mrf.mxu1  ;;  %v5552_v38 = vmax.f32 %v5550_v48, %v5551_v11  ;;  %v12218_v11 = vpop.permute.xlu2 %3728  ;;  %v5563_v48 = vmax.f32 %v5561_v42, %v5562_v13 }
 0xb7f   : > { %v12179_v31 = vadd.f32 %v11860_v32, %v5453_v50  ;;  %v12199_v39 = vpop.permute.xlu0 %3696  ;;  %14087 = vst [vmem:[#allocation168_spill] sm:$0xff] %v12218_v11 }
 0xb80   : > { %14085 = vst [vmem:[#allocation166_spill] sm:$0xff] %v12199_v39  ;;  %v12216_v39 = vadd.f32 %v11860_v32, %v11797_v20  ;;  %v6652_v20 = vld [vmem:[%s13361_s3 + $0x58] sm:$0xff]  ;;  %v12236_v11 = vpop.permute.xlu1 %3732 }
 0xb81   : > { %14083 = vst [vmem:[#allocation132_spill] sm:$0xff] %v12179_v31  ;;  %v5662_v50 = vsel %vm305_vm0, %v12179_v31, -inf  ;;  %v5554_v31 = vmax.f32 %v5552_v38, %v5553_v10  ;;  %v5565_v10 = vmax.f32 %v5563_v48, %v5564_v25  ;;  %6705 = vmatpush.msrb.mxu3 %v6652_v20 }
 0xb82   : > { %v12207_v33 = vmax.f32 %v5661_v9, %v5662_v50  ;;  %v5566_v9 = vsel %vm305_vm0, %v12205_v28, -inf  ;;  %v5568_v13 = vsel %vm305_vm0, %v12216_v39, -inf  ;;  %14088 = vst [vmem:[#allocation169_spill] sm:$0xff] %v12236_v11 }
 0xb83   : > { %v5556_v50 = vmax.f32 %v5554_v31, %v5555_v0  ;;  %v5567_v31 = vmax.f32 %v5565_v10, %v5566_v9  ;;  %v5570_v0 = vsel %vm305_vm0, %v12226_v6, -inf }
 0xb84   : > { %14086 = vst [vmem:[#allocation167_spill] sm:$0xff] %v12207_v33 }
 0xb85   : > { %v5558_v42 = vmax.f32 %v5556_v50, %v5557_v61  ;;  %v5569_v33 = vmax.f32 %v5567_v31, %v5568_v13 }
 0xb86   : > { %v5456_v44 = vpop.f32.mrf.mxu1  ;;  %v12258_v10 = vpop.permute.xlu2 %3740 }
 0xb87   : > { %v12229_v38 = vadd.f32 %v11860_v32, %v5456_v44  ;;  %v12244_v25 = vpop.permute.xlu0 %3712  ;;  %14090 = vst [vmem:[#allocation171_spill] sm:$0xff] %v12258_v10  ;;  %v5571_v20 = vmax.f32 %v5569_v33, %v5570_v0 }
 0xb88   : > { %14089 = vst [vmem:[#allocation170_spill] sm:$0xff] %v12244_v25  ;;  %v12267_v18 = vpop.permute.xlu1 %3734 }
 0xb89   : > { %v5559_v44 = vsel %vm305_vm0, %v12229_v38, -inf  ;;  %14091 = vst [vmem:[#allocation172_spill] sm:$0xff] %v12267_v18  ;;  %v14122_v18 = vld [vmem:[#allocation136_spill] sm:$0xff] }
 0xb8a   : > { %v12248_v48 = vmax.f32 %v5558_v42, %v5559_v44  ;;  %v5572_v42 = vsel %vm305_vm0, %v12240_v36, -inf }
 0xb8b   : > { %v5573_v1 = vmax.f32 %v5571_v20, %v5572_v42 }
 0xb8c   : > { %v5666_v61 = vsub.f32 %v12130_v54, %v12248_v48  ;;  %v5674_v9 = vsub.f32 %v12117_v5, %v12248_v48  ;;  %v5682_v60 = vsub.f32 %v12136_v59, %v12248_v48  ;;  %v5690_v50 = vsub.f32 %v12154_v24, %v12248_v48 }
 0xb8d   : > { %v5698_v13 = vsub.f32 %v12166_v41, %v12248_v48  ;;  %v5706_v54 = vsub.f32 %v5522_v47, %v12248_v48 }
 0xb8e   : > { %v5730_v31 = vmul.f32 1.442695, %v5666_v61  ;;  %v5746_v44 = vmul.f32 1.442695, %v5674_v9  ;;  %v5762_v5 = vmul.f32 1.442695, %v5682_v60  ;;  %v5459_v11 = vpop.f32.mrf.mxu1  ;;  %v12274_v9 = vpop.permute.xlu2 %3744 }
 0xb8f   : > { %v5778_v25 = vmul.f32 1.442695, %v5690_v50  ;;  %v5539_v59 = vadd.f32 %v11860_v32, %v5459_v11  ;;  %v5794_v24 = vmul.f32 1.442695, %v5698_v13  ;;  %v5810_v0 = vmul.f32 1.442695, %v5706_v54  ;;  %v12269_v47 = vpop.permute.xlu0 %3714 }
 0xb90   : > { %7418 = vpow2.f32 %v5730_v31 }
 0xb91   : > { %7420 = vpow2.f32 %v5746_v44  ;;  %v5574_v33 = vsel %vm305_vm0, %v5539_v59, -inf }
 0xb92   : > { %7422 = vpow2.f32 %v5762_v5  ;;  %v5575_v10 = vmax.f32 %v5573_v1, %v5574_v33 }
 0xb93   : > { %7424 = vpow2.f32 %v5778_v25 }
 0xb94   : > { %v5667_v41 = vsub.f32 %v12183_v51, %v5575_v10  ;;  %v5675_v61 = vsub.f32 %v12172_v3, %v5575_v10  ;;  %v5683_v11 = vsub.f32 %v12187_v37, %v5575_v10  ;;  %7426 = vpow2.f32 %v5794_v24 }
 0xb95   : > { %v5691_v60 = vsub.f32 %v12205_v28, %v5575_v10  ;;  %v5699_v50 = vsub.f32 %v12216_v39, %v5575_v10  ;;  %v5707_v1 = vsub.f32 %v12226_v6, %v5575_v10  ;;  %7428 = vpow2.f32 %v5810_v0 }
 0xb96   : > { %v7419_v20 = vpop.eup %7418  ;;  %v5715_v25 = vsub.f32 %v12240_v36, %v5575_v10  ;;  %v5732_v42 = vmul.f32 1.442695, %v5667_v41  ;;  %v5462_v13 = vpop.f32.mrf.mxu1  ;;  %v5723_v54 = vsub.f32 %v5539_v59, %v5575_v10  ;;  %v5748_v37 = vmul.f32 1.442695, %v5675_v61 }
 0xb97   : > { %v7421_v51 = vpop.eup %7420  ;;  %v5858_v3 = vsel %vm305_vm0, %v7419_v20, 0.0  ;;  %v5764_v31 = vmul.f32 1.442695, %v5683_v11  ;;  %6042 = vrot.lane.b32.xlu1 %v7419_v20, %s7589_s26  ;;  %v5780_v39 = vmul.f32 1.442695, %v5691_v60  ;;  %v5714_v10 = vsub.f32 %v12195_v46, %v12248_v48  ;;  %v12290_v41 = vpop.permute.xlu1 %3742 }
 0xb98   : > { %v7423_v44 = vpop.eup %7422  ;;  %v5859_v28 = vsel %vm305_vm0, %v7421_v51, 0.0  ;;  %7430 = vpow2.f32 %v5732_v42  ;;  %v5796_v6 = vmul.f32 1.442695, %v5699_v50  ;;  %6058 = vrot.lane.b32.xlu0 %v7421_v51, %s7589_s26  ;;  %v5812_v24 = vmul.f32 1.442695, %v5707_v1  ;;  %v12295_v1 = vpop.permute.xlu0 %3718 }
 0xb99   : > { %v7425_v5 = vpop.eup %7424  ;;  %v5860_v36 = vadd.f32 %v5859_v28, %v5858_v3  ;;  %7432 = vpow2.f32 %v5748_v37  ;;  %6074 = vrot.lane.b32.xlu2 %v7423_v44, %s7589_s26  ;;  %v5861_v59 = vsel %vm305_vm0, %v7423_v44, 0.0  ;;  %v5828_v33 = vmul.f32 1.442695, %v5715_v25  ;;  %14092 = vst [vmem:[#allocation173_spill] sm:$0xff] %v12295_v1 }
 0xb9a   : > { %7434 = vpow2.f32 %v5764_v31  ;;  %v12288_v0 = vpop.eup %7426  ;;  %v5844_v11 = vmul.f32 1.442695, %v5723_v54  ;;  %v12293_v60 = vadd.f32 %v11860_v32, %v5462_v13  ;;  %v5863_v20 = vsel %vm305_vm0, %v7425_v5, 0.0  ;;  %v12305_v54 = vpop.permute.xlu2 %3746 }
 0xb9b   : > { %v5862_v61 = vadd.f32 %v5861_v59, %v5860_v36  ;;  %7436 = vpow2.f32 %v5780_v39  ;;  %v7429_v50 = vpop.eup %7428  ;;  %v5722_v37 = vsub.f32 %v12229_v38, %v12248_v48  ;;  %v5826_v31 = vmul.f32 1.442695, %v5714_v10 }
 0xb9c   : > { %7438 = vpow2.f32 %v5796_v6  ;;  %v5589_v25 = vsel %vm305_vm0, %v12293_v60, -inf  ;;  %v5865_v39 = vsel %vm305_vm0, %v12288_v0, 0.0 }
 0xb9d   : > { %v5864_v46 = vadd.f32 %v5863_v20, %v5862_v61  ;;  %7440 = vpow2.f32 %v5812_v24  ;;  %v12303_v51 = vmax.f32 %v11946_v57, %v5589_v25  ;;  %v5842_v20 = vmul.f32 1.442695, %v5722_v37 }
 0xb9e   : > { %v12300_v42 = vpop.eup %7430  ;;  %7442 = vpow2.f32 %v5828_v33  ;;  %v5465_v3 = vpop.f32.mrf.mxu1 }
 0xb9f   : > { %v7433_v13 = vpop.eup %7432  ;;  %7444 = vpow2.f32 %v5844_v11  ;;  %v5873_v44 = vsel %vm305_vm0, %v12300_v42, 0.0  ;;  %v5668_v6 = vsub.f32 %v11870_v12, %v12303_v51  ;;  %v5676_v36 = vsub.f32 %v11866_v34, %v12303_v51  ;;  %v12340_v11 = vpop.permute.xlu1 %3750 }
 0xba0   : > { %v12311_v28 = vpop.eup %7434  ;;  %v5874_v57 = vsel %vm305_vm0, %v7433_v13, 0.0  ;;  %6090 = vrot.lane.b32.xlu0 %v7425_v5, %s7589_s26  ;;  %6060 = vrot.lane.b32.xlu1 %v7433_v13, %s7589_s26  ;;  %v5866_v48 = vadd.f32 %v5865_v39, %v5864_v46  ;;  %v5684_v10 = vsub.f32 %v11874_v7, %v12303_v51  ;;  %v12325_v59 = vadd.f32 %v11860_v32, %v5465_v3 }
 0xba1   : > { %v7437_v38 = vpop.eup %7436  ;;  %v5875_v24 = vadd.f32 %v5874_v57, %v5873_v44  ;;  %6122 = vrot.lane.b32.xlu2 %v7429_v50, %s7589_s26  ;;  %v5876_v34 = vsel %vm305_vm0, %v12311_v28, 0.0  ;;  %v5692_v12 = vsub.f32 %v11880_v4, %v12303_v51  ;;  %v5708_v5 = vsub.f32 %v11902_v35, %v12303_v51  ;;  %14093 = vst [vmem:[#allocation174_spill] sm:$0xff] %v12340_v11 }
 0xba2   : > { %v12328_v33 = vpop.eup %7438  ;;  %v5716_v61 = vsub.f32 %v11931_v27, %v12303_v51  ;;  %7446 = vpow2.f32 %v5826_v31  ;;  %v5700_v25 = vsub.f32 %v11889_v29, %v12303_v51  ;;  %v5867_v4 = vsel %vm305_vm0, %v7429_v50, 0.0 }
 0xba3   : > { %v12338_v7 = vpop.eup %7440  ;;  %v5877_v46 = vadd.f32 %v5876_v34, %v5875_v24  ;;  %v5878_v13 = vsel %vm305_vm0, %v7437_v38, 0.0  ;;  %v5734_v35 = vmul.f32 1.442695, %v5668_v6  ;;  %v5750_v44 = vmul.f32 1.442695, %v5676_v36  ;;  %v12354_v24 = vpop.permute.xlu0 %3720 }
 0xba4   : > { %v12344_v3 = vpop.eup %7442  ;;  %v5724_v57 = vsub.f32 %v12293_v60, %v12303_v51  ;;  %v5766_v31 = vmul.f32 1.442695, %v5684_v10  ;;  %v5604_v37 = vsel %vm305_vm0, %v12325_v59, -inf  ;;  %14094 = vst [vmem:[#allocation175_spill] sm:$0xff] %v12354_v24  ;;  %v5868_v29 = vadd.f32 %v5867_v4, %v5866_v48 }
 0xba5   : > { %v12348_v39 = vpop.eup %7444  ;;  %v5879_v27 = vadd.f32 %v5878_v13, %v5877_v46  ;;  %v5880_v50 = vsel %vm305_vm0, %v12328_v33, 0.0  ;;  %7448 = vpow2.f32 %v5734_v35  ;;  %v5782_v34 = vmul.f32 1.442695, %v5692_v12  ;;  %v12370_v13 = vpop.permute.xlu2 %3748 }
 0xba6   : > { %v5882_v36 = vsel %vm305_vm0, %v12338_v7, 0.0  ;;  %v5884_v46 = vsel %vm305_vm0, %v12344_v3, 0.0  ;;  %v5798_v60 = vmul.f32 1.442695, %v5700_v25  ;;  %v5886_v51 = vsel %vm305_vm0, %v12348_v39, 0.0  ;;  %v5468_v4 = vpop.f32.mrf.mxu1  ;;  %14095 = vst [vmem:[#allocation176_spill] sm:$0xff] %v12370_v13 }
 0xba7   : > { %v5881_v6 = vadd.f32 %v5880_v50, %v5879_v27  ;;  %7450 = vpow2.f32 %v5750_v44  ;;  %v5814_v10 = vmul.f32 1.442695, %v5708_v5  ;;  %v12365_v48 = vmax.f32 %v11993_v23, %v5604_v37  ;;  %v14096_v5 = vld [vmem:[#allocation148_spill] sm:$0xff] }
 0xba8   : > { %6106 = vrot.lane.b32.xlu0 %v12288_v0, %s7589_s26  ;;  %6092 = vrot.lane.b32.xlu1 %v7437_v38, %s7589_s26  ;;  %v7447_v12 = vpop.eup %7446  ;;  %7452 = vpow2.f32 %v5766_v31  ;;  %v5830_v25 = vmul.f32 1.442695, %v5716_v61  ;;  %v5846_v27 = vmul.f32 1.442695, %v5724_v57  ;;  %v14097_v0 = vld [vmem:[#allocation109_spill] sm:$0xff]  ;;  %v12383_v61 = vadd.f32 %v11860_v32, %v5468_v4 }
 0xba9   : > { %v5883_v35 = vadd.f32 %v5882_v36, %v5881_v6  ;;  %6044 = vrot.lane.b32.xlu2 %v12300_v42, %s7589_s26  ;;  %7454 = vpow2.f32 %v5782_v34  ;;  %v5669_v23 = vsub.f32 %v11906_v56, %v12365_v48  ;;  %v5677_v44 = vsub.f32 %v14096_v5, %v12365_v48  ;;  %v12393_v34 = vpop.permute.xlu1 %3752 }
 0xbaa   : > { %v5685_v38 = vsub.f32 %v14097_v0, %v12365_v48  ;;  %7456 = vpow2.f32 %v5798_v60  ;;  %v5693_v31 = vsub.f32 %v11918_v43, %v12365_v48  ;;  %v5701_v56 = vsub.f32 %v11928_v49, %v12365_v48  ;;  %14098 = vst [vmem:[#allocation148_spill] sm:$0xff] %v12393_v34 }
 0xbab   : > { %v5885_v37 = vadd.f32 %v5884_v46, %v5883_v35  ;;  %v12385_v57 = vpop.eup %7448  ;;  %7458 = vpow2.f32 %v5814_v10  ;;  %v5709_v42 = vsub.f32 %v11942_v14, %v12365_v48  ;;  %v5717_v50 = vsub.f32 %v11977_v55, %v12365_v48  ;;  %v12401_v60 = vpop.permute.xlu0 %3730 }
 0xbac   : > { %7460 = vpow2.f32 %v5830_v25  ;;  %v5888_v43 = vsel %vm305_vm0, %v12385_v57, 0.0  ;;  %v5736_v36 = vmul.f32 1.442695, %v5669_v23  ;;  %v5869_v49 = vsel %vm305_vm0, %v7447_v12, 0.0 }
 0xbad   : > { %v12395_v6 = vadd.f32 %v5886_v51, %v5885_v37  ;;  %v12399_v46 = vpop.eup %7450  ;;  %7462 = vpow2.f32 %v5842_v20  ;;  %v5752_v14 = vmul.f32 1.442695, %v5677_v44  ;;  %v5768_v10 = vmul.f32 1.442695, %v5685_v38 }
 0xbae   : > { %v7453_v4 = vpop.eup %7452  ;;  %7464 = vpow2.f32 %v5846_v27  ;;  %v5889_v55 = vsel %vm305_vm0, %v12399_v46, 0.0  ;;  %v5725_v51 = vsub.f32 %v12325_v59, %v12365_v48  ;;  %v5784_v35 = vmul.f32 1.442695, %v5693_v31  ;;  %v12415_v27 = vpop.permute.xlu2 %3764 }
 0xbaf   : > { %v7455_v25 = vpop.eup %7454  ;;  %v12408_v23 = vadd.f32 %v5869_v49, %v5868_v29  ;;  %v5890_v5 = vadd.f32 %v5889_v55, %v5888_v43  ;;  %7466 = vpow2.f32 %v5736_v36  ;;  %v5800_v0 = vmul.f32 1.442695, %v5701_v56  ;;  %14099 = vst [vmem:[#allocation109_spill] sm:$0xff] %v12415_v27  ;;  %v5471_v37 = vpop.f32.mrf.mxu1 }
 0xbb0   : > { %6138 = vrot.lane.b32.xlu0 %v7447_v12, %s7589_s26  ;;  %6108 = vrot.lane.b32.xlu1 %v12328_v33, %s7589_s26  ;;  %v12413_v20 = vpop.eup %7456  ;;  %v5891_v44 = vsel %vm305_vm0, %v7453_v4, 0.0  ;;  %7468 = vpow2.f32 %v5752_v14  ;;  %v5816_v59 = vmul.f32 1.442695, %v5709_v42  ;;  %v5619_v29 = vsel %vm305_vm0, %v12383_v61, -inf }
 0xbb1   : > { %6078 = vrot.lane.b32.xlu2 %v7453_v4, %s7589_s26  ;;  %v12421_v48 = vpop.eup %7458  ;;  %v5892_v38 = vadd.f32 %v5891_v44, %v5890_v5  ;;  %7470 = vpow2.f32 %v5768_v10  ;;  %v5832_v12 = vmul.f32 1.442695, %v5717_v50  ;;  %v12424_v33 = vmax.f32 %v12042_v8, %v5619_v29  ;;  %v12437_v10 = vpop.permute.xlu1 %3756  ;;  %v14101_v4 = vld [vmem:[#allocation103_spill] sm:$0xff] }
 0xbb2   : > { %v12426_v31 = vpop.eup %7460  ;;  %v5893_v56 = vsel %vm305_vm0, %v7455_v25, 0.0  ;;  %v5895_v42 = vsel %vm305_vm0, %v12413_v20, 0.0  ;;  %7472 = vpow2.f32 %v5784_v35  ;;  %v5848_v43 = vmul.f32 1.442695, %v5725_v51  ;;  %14100 = vst [vmem:[#allocation177_spill] sm:$0xff] %v12437_v10  ;;  %v14102_v35 = vld [vmem:[#allocation151_spill] sm:$0xff] }
 0xbb3   : > { %v7463_v36 = vpop.eup %7462  ;;  %v5894_v49 = vadd.f32 %v5893_v56, %v5892_v38  ;;  %v5897_v14 = vsel %vm305_vm0, %v12421_v48, 0.0  ;;  %7474 = vpow2.f32 %v5800_v0  ;;  %v5670_v8 = vsub.f32 %v11952_v19, %v12424_v33  ;;  %v12448_v0 = vpop.permute.xlu0 %3736 }
 0xbb4   : > { %v12435_v50 = vpop.eup %7464  ;;  %7476 = vpow2.f32 %v5816_v59  ;;  %v5678_v55 = vsub.f32 %v14101_v4, %v12424_v33  ;;  %v5686_v51 = vsub.f32 %v14102_v35, %v12424_v33  ;;  %v12444_v5 = vadd.f32 %v11860_v32, %v5471_v37  ;;  %14103 = vst [vmem:[#allocation103_spill] sm:$0xff] %v12448_v0 }
 0xbb5   : > { %v12446_v44 = vpop.eup %7466  ;;  %v5896_v29 = vadd.f32 %v5895_v42, %v5894_v49  ;;  %v5899_v19 = vsel %vm305_vm0, %v12426_v31, 0.0  ;;  %7478 = vpow2.f32 %v5832_v12  ;;  %v5694_v59 = vsub.f32 %v11964_v58, %v12424_v33 }
 0xbb6   : > { %v12454_v38 = vpop.eup %7468  ;;  %v5903_v56 = vsel %vm305_vm0, %v12446_v44, 0.0  ;;  %v5702_v37 = vsub.f32 %v11974_v15, %v12424_v33  ;;  %v5710_v4 = vsub.f32 %v11989_v22, %v12424_v33  ;;  %v5718_v42 = vsub.f32 %v12024_v17, %v12424_v33  ;;  %v12482_v11 = vpop.permute.xlu2 %3766 }
 0xbb7   : > { %v12464_v49 = vpop.eup %7470  ;;  %v5898_v12 = vadd.f32 %v5897_v14, %v5896_v29  ;;  %v5901_v58 = vsel %vm305_vm0, %v12435_v50, 0.0  ;;  %v5904_v35 = vsel %vm305_vm0, %v12454_v38, 0.0  ;;  %v5738_v10 = vmul.f32 1.442695, %v5670_v8  ;;  %14104 = vst [vmem:[#allocation151_spill] sm:$0xff] %v12482_v11 }
 0xbb8   : > { %6154 = vrot.lane.b32.xlu0 %v7463_v36, %s7589_s26  ;;  %6140 = vrot.lane.b32.xlu1 %v12344_v3, %s7589_s26  ;;  %v12473_v15 = vpop.eup %7472  ;;  %7480 = vpow2.f32 %v5848_v43  ;;  %v5905_v22 = vadd.f32 %v5904_v35, %v5903_v56  ;;  %v5754_v17 = vmul.f32 1.442695, %v5678_v55  ;;  %v5770_v34 = vmul.f32 1.442695, %v5686_v51 }
 0xbb9   : > { %6094 = vrot.lane.b32.xlu2 %v7455_v25, %s7589_s26  ;;  %v12476_v14 = vpop.eup %7474  ;;  %v5900_v29 = vadd.f32 %v5899_v19, %v5898_v12  ;;  %v5906_v0 = vsel %vm305_vm0, %v12464_v49, 0.0  ;;  %7482 = vpow2.f32 %v5738_v10  ;;  %v5786_v8 = vmul.f32 1.442695, %v5694_v59  ;;  %v12492_v59 = vpop.permute.xlu1 %3760 }
 0xbba   : > { %v12480_v24 = vpop.eup %7476  ;;  %v5907_v3 = vadd.f32 %v5906_v0, %v5905_v22  ;;  %v5726_v43 = vsub.f32 %v12383_v61, %v12424_v33  ;;  %7484 = vpow2.f32 %v5754_v17  ;;  %v5802_v55 = vmul.f32 1.442695, %v5702_v37 }
 0xbbb   : > { %v12486_v51 = vpop.eup %7478  ;;  %v12488_v25 = vadd.f32 %v5901_v58, %v5900_v29  ;;  %v5908_v19 = vsel %vm305_vm0, %v12473_v15, 0.0  ;;  %7486 = vpow2.f32 %v5770_v34  ;;  %v5818_v10 = vmul.f32 1.442695, %v5710_v4  ;;  %v5474_v29 = vpop.f32.mrf.mxu1 }
 0xbbc   : > { %v5909_v56 = vadd.f32 %v5908_v19, %v5907_v3  ;;  %7488 = vpow2.f32 %v5786_v8  ;;  %v5834_v12 = vmul.f32 1.442695, %v5718_v42  ;;  %v5871_v0 = vsel %vm305_vm0, %v7463_v36, 0.0  ;;  %v12507_v42 = vpop.permute.xlu0 %3738  ;;  %v14106_v19 = vld [vmem:[#allocation82_spill] sm:$0xff] }
 0xbbd   : > { %v5910_v61 = vsel %vm305_vm0, %v12476_v14, 0.0  ;;  %v5634_v33 = vsel %vm305_vm0, %v12444_v5, -inf  ;;  %v5872_v58 = vadd.f32 %v5871_v0, %v12408_v23  ;;  %7490 = vpow2.f32 %v5802_v55  ;;  %14105 = vst [vmem:[#allocation178_spill] sm:$0xff] %v12507_v42 }
 0xbbe   : > { %v12499_v37 = vpop.eup %7480  ;;  %v5911_v35 = vadd.f32 %v5910_v61, %v5909_v56  ;;  %v12503_v34 = vmax.f32 %v12095_v40, %v5634_v33  ;;  %v5912_v36 = vsel %vm305_vm0, %v12480_v24, 0.0  ;;  %v5914_v22 = vsel %vm305_vm0, %v12486_v51, 0.0 }
 0xbbf   : > { %v12505_v4 = vpop.eup %7482  ;;  %7492 = vpow2.f32 %v5818_v10  ;;  %v5850_v17 = vmul.f32 1.442695, %v5726_v43  ;;  %v12542_v61 = vadd.f32 %v11860_v32, %v5474_v29 }
 0xbc0   : > { %6076 = vrot.lane.b32.xlu0 %v12311_v28, %s7589_s26  ;;  %6156 = vrot.lane.b32.xlu1 %v12348_v39, %s7589_s26  ;;  %v12517_v40 = vpop.eup %7484  ;;  %v5913_v23 = vadd.f32 %v5912_v36, %v5911_v35  ;;  %7494 = vpow2.f32 %v5834_v12  ;;  %v5918_v8 = vsel %vm305_vm0, %v12505_v4, 0.0  ;;  %v5671_v3 = vsub.f32 %v11999_v45, %v12503_v34  ;;  %v12537_v45 = vpop.permute.xlu2 %3770 }
 0xbc1   : > { %6126 = vrot.lane.b32.xlu2 %v12421_v48, %s7589_s26  ;;  %v12525_v43 = vpop.eup %7486  ;;  %v5916_v28 = vsel %vm305_vm0, %v12499_v37, 0.0  ;;  %v5919_v39 = vsel %vm305_vm0, %v12517_v40, 0.0  ;;  %v5679_v55 = vsub.f32 %v11983_v53, %v12503_v34  ;;  %v5687_v10 = vsub.f32 %v14106_v19, %v12503_v34  ;;  %14107 = vst [vmem:[#allocation82_spill] sm:$0xff] %v12537_v45 }
 0xbc2   : > { %v12535_v56 = vpop.eup %7488  ;;  %v5915_v12 = vadd.f32 %v5914_v22, %v5913_v23  ;;  %v5920_v48 = vadd.f32 %v5919_v39, %v5918_v8  ;;  %v5695_v0 = vsub.f32 %v12011_v52, %v12503_v34  ;;  %v5921_v33 = vsel %vm305_vm0, %v12525_v43, 0.0  ;;  %v12554_v23 = vpop.permute.xlu1 %3768 }
 0xbc3   : > { %v5703_v53 = vsub.f32 %v12021_v2, %v12503_v34  ;;  %v5711_v35 = vsub.f32 %v12036_v16, %v12503_v34  ;;  %v5719_v36 = vsub.f32 %v12073_v26, %v12503_v34  ;;  %v12552_v22 = vpop.eup %7490  ;;  %14108 = vst [vmem:[#allocation179_spill] sm:$0xff] %v12554_v23  ;;  %7496 = vpow2.f32 %v5850_v17 }
 0xbc4   : > { %v12556_v52 = vadd.f32 %v5916_v28, %v5915_v12  ;;  %v5922_v32 = vadd.f32 %v5921_v33, %v5920_v48  ;;  %v5740_v29 = vmul.f32 1.442695, %v5671_v3  ;;  %7498 = vrcp.f32 %v5872_v58  ;;  %v12568_v28 = vpop.permute.xlu0 %3754 }
 0xbc5   : > { %v12558_v8 = vpop.eup %7492  ;;  %v5923_v2 = vsel %vm305_vm0, %v12535_v56, 0.0  ;;  %v5756_v39 = vmul.f32 1.442695, %v5679_v55  ;;  %v5772_v16 = vmul.f32 1.442695, %v5687_v10  ;;  %v5727_v45 = vsub.f32 %v12444_v5, %v12503_v34  ;;  %14109 = vst [vmem:[#allocation180_spill] sm:$0xff] %v12568_v28 }
 0xbc6   : > { %v12562_v19 = vpop.eup %7494  ;;  %v5924_v26 = vadd.f32 %v5923_v2, %v5922_v32  ;;  %v5788_v42 = vmul.f32 1.442695, %v5695_v0  ;;  %v5649_v17 = vsel %vm305_vm0, %v12542_v61, -inf  ;;  %v5925_v58 = vsel %vm305_vm0, %v12552_v22, 0.0  ;;  %v14110_v32 = vld [vmem:[#allocation9_spill] sm:$0xff] }
 0xbc7   : > { %7500 = vpow2.f32 %v5740_v29  ;;  %v5804_v3 = vmul.f32 1.442695, %v5703_v53  ;;  %v5820_v5 = vmul.f32 1.442695, %v5711_v35  ;;  %v5927_v34 = vsel %vm305_vm0, %v12558_v8, 0.0 }
 0xbc8   : > { %6124 = vrot.lane.b32.xlu0 %v12338_v7, %s7589_s26  ;;  %6062 = vrot.lane.b32.xlu1 %v12399_v46, %s7589_s26  ;;  %v5926_v55 = vadd.f32 %v5925_v58, %v5924_v26  ;;  %7502 = vpow2.f32 %v5756_v39  ;;  %v5929_v10 = vsel %vm305_vm0, %v12562_v19, 0.0  ;;  %v12583_v12 = vmax.f32 %v12148_v63, %v5649_v17  ;;  %v5477_v7 = vpop.f32.mrf.mxu1  ;;  %v12587_v46 = vpop.permute.xlu2 %3776  ;;  %v14111_v63 = vld [vmem:[#allocation5_spill] sm:$0xff] }
 0xbc9   : > { %6142 = vrot.lane.b32.xlu2 %v12426_v31, %s7589_s26  ;;  %7504 = vpow2.f32 %v5772_v16  ;;  %v12585_v48 = vpop.eup %7496  ;;  %v5836_v33 = vmul.f32 1.442695, %v5719_v36  ;;  %v5852_v31 = vmul.f32 1.442695, %v5727_v45  ;;  %v7567_v36 = vld [vmem:[%s7656_s10 + $0xc] ss:$0 sm:$0xff] }
 0xbca   : > { %v5928_v0 = vadd.f32 %v5927_v34, %v5926_v55  ;;  %7506 = vpow2.f32 %v5788_v42  ;;  %v7499_v53 = vpop.eup %7498  ;;  %v5672_v35 = vsub.f32 %v12048_v21, %v12583_v12  ;;  %v5680_v29 = vsub.f32 %v14110_v32, %v12583_v12  ;;  %v12595_v39 = vpop.permute.xlu1 %3772  ;;  %v14113_v58 = vld [vmem:[#allocation85_spill] sm:$0xff]  ;;  %v14114_v55 = vld [vmem:[#allocation96_spill] sm:$0xff] }
 0xbcb   : > { %7508 = vpow2.f32 %v5804_v3  ;;  %v5688_v2 = vsub.f32 %v14111_v63, %v12583_v12  ;;  %14112 = vst [vmem:[#allocation9_spill] sm:$0xff] %v12595_v39  ;;  %v5696_v42 = vsub.f32 %v12060_v30, %v12583_v12  ;;  %v12600_v45 = vadd.f32 %v7567_v36, %v5477_v7 }
 0xbcc   : > { %v5930_v16 = vadd.f32 %v5929_v10, %v5928_v0  ;;  %7510 = vpow2.f32 %v5820_v5  ;;  %v5931_v21 = vsel %vm305_vm0, %v12585_v48, 0.0  ;;  %v5704_v17 = vsub.f32 %v12070_v62, %v12583_v12  ;;  %v12620_v32 = vpop.permute.xlu0 %3758 }
 0xbcd   : > { %v12602_v26 = vpop.eup %7500  ;;  %v5712_v3 = vsub.f32 %v14113_v58, %v12583_v12  ;;  %v5720_v5 = vsub.f32 %v14114_v55, %v12583_v12  ;;  %7512 = vpow2.f32 %v5836_v33  ;;  %v5742_v7 = vmul.f32 1.442695, %v5672_v35 }
 0xbce   : > { %v12612_v34 = vpop.eup %7502  ;;  %v12614_v30 = vadd.f32 %v5931_v21, %v5930_v16  ;;  %v5933_v10 = vsel %vm305_vm0, %v12602_v26, 0.0  ;;  %v5758_v63 = vmul.f32 1.442695, %v5680_v29  ;;  %v5774_v36 = vmul.f32 1.442695, %v5688_v2 }
 0xbcf   : > { %v12618_v0 = vpop.eup %7504  ;;  %v5934_v62 = vsel %vm305_vm0, %v12612_v34, 0.0  ;;  %7514 = vpow2.f32 %v5852_v31  ;;  %v5790_v35 = vmul.f32 1.442695, %v5696_v42  ;;  %v5664_v21 = vsel %vm305_vm0, %v12600_v45, -inf }
 0xbd0   : > { %14115 = vst [vmem:[#allocation5_spill] sm:$0xff] %v12614_v30  ;;  %6110 = vrot.lane.b32.xlu1 %v12413_v20, %s7589_s26  ;;  %6046 = vrot.lane.b32.xlu0 %v12385_v57, %s7589_s26  ;;  %v12628_v33 = vpop.eup %7506  ;;  %v5935_v16 = vadd.f32 %v5934_v62, %v5933_v10  ;;  %v5936_v29 = vsel %vm305_vm0, %v12618_v0, 0.0  ;;  %7516 = vpow2.f32 %v5742_v7  ;;  %v12639_v2 = vpop.permute.xlu2 %3782  ;;  %v5728_v31 = vsub.f32 %v12542_v61, %v12583_v12 }
 0xbd1   : > { %6499 = vrot.lane.b32.xlu2 %v7499_v53, %s7589_s26  ;;  %v12633_v58 = vpop.eup %7508  ;;  %14116 = vst [vmem:[#allocation85_spill] sm:$0xff] %v12639_v2  ;;  %7518 = vpow2.f32 %v5758_v63  ;;  %v5806_v42 = vmul.f32 1.442695, %v5704_v17  ;;  %v5938_v55 = vsel %vm305_vm0, %v12628_v33, 0.0  ;;  %v14117_v53 = vld [vmem:[#allocation167_spill] sm:$0xff]  ;;  %v14118_v17 = vld [vmem:[#allocation2_spill] sm:$0xff] }
 0xbd2   : > { %v12637_v20 = vpop.eup %7510  ;;  %v5937_v57 = vadd.f32 %v5936_v29, %v5935_v16  ;;  %7520 = vpow2.f32 %v5774_v36  ;;  %v12646_v10 = vmax.f32 %v14117_v53, %v5664_v21  ;;  %v5940_v39 = vsel %vm305_vm0, %v12633_v58, 0.0  ;;  %v14119_v36 = vld [vmem:[#allocation3_spill] sm:$0xff]  ;;  %v12660_v53 = vpop.permute.xlu1 %3774 }
 0xbd3   : > { %v12648_v62 = vpop.eup %7512  ;;  %7522 = vpow2.f32 %v5790_v35  ;;  %v5822_v16 = vmul.f32 1.442695, %v5712_v3  ;;  %v5942_v61 = vsel %vm305_vm0, %v12637_v20, 0.0  ;;  %v5838_v12 = vmul.f32 1.442695, %v5720_v5  ;;  %v14120_v35 = vld [vmem:[#allocation91_spill] sm:$0xff] }
 0xbd4   : > { %v5939_v7 = vadd.f32 %v5938_v55, %v5937_v57  ;;  %v5673_v63 = vsub.f32 %v14118_v17, %v12646_v10  ;;  %v5681_v29 = vsub.f32 %v14119_v36, %v12646_v10  ;;  %7524 = vpow2.f32 %v5806_v42  ;;  %v12666_v23 = vpop.permute.xlu0 %3762  ;;  %v14121_v17 = vld [vmem:[#allocation68_spill] sm:$0xff] }
 0xbd5   : > { %v12658_v21 = vpop.eup %7514  ;;  %v5854_v55 = vmul.f32 1.442695, %v5728_v31  ;;  %v5689_v3 = vsub.f32 %v14120_v35, %v12646_v10  ;;  %v5944_v5 = vsel %vm305_vm0, %v12648_v62, 0.0  ;;  %v5697_v36 = vsub.f32 %v14121_v17, %v12646_v10  ;;  %v14124_v17 = vld [vmem:[#allocation67_spill] sm:$0xff] }
 0xbd6   : > { %v5941_v57 = vadd.f32 %v5940_v39, %v5939_v7  ;;  %v12664_v28 = vpop.eup %7516  ;;  %v5713_v11 = vsub.f32 %v14122_v18, %v12646_v10  ;;  %v14123_v39 = vld [vmem:[#allocation132_spill] sm:$0xff]  ;;  %7526 = vpow2.f32 %v5822_v16  ;;  %v5705_v27 = vsub.f32 %v14124_v17, %v12646_v10 }
 0xbd7   : > { %v5721_v42 = vsub.f32 %v14123_v39, %v12646_v10  ;;  %v12680_v31 = vpop.eup %7518  ;;  %v5948_v35 = vsel %vm305_vm0, %v12664_v28, 0.0  ;;  %7528 = vpow2.f32 %v5838_v12  ;;  %v5760_v39 = vmul.f32 1.442695, %v5681_v29 }
 0xbd8   : > { %6158 = vrot.lane.b32.xlu0 %v12435_v50, %s7589_s26  ;;  %6064 = vrot.lane.b32.xlu1 %v12454_v38, %s7589_s26  ;;  %v5943_v7 = vadd.f32 %v5942_v61, %v5941_v57  ;;  %v12688_v18 = vpop.eup %7520  ;;  %v5949_v50 = vsel %vm305_vm0, %v12680_v31, 0.0  ;;  %v5744_v38 = vmul.f32 1.442695, %v5673_v63  ;;  %v12694_v16 = vpop.permute.xlu2 %3786  ;;  %7530 = vpow2.f32 %v5854_v55 }
 0xbd9   : > { %6144 = vrot.lane.b32.xlu2 %v12486_v51, %s7589_s26  ;;  %v12692_v30 = vpop.eup %7522  ;;  %14125 = vst [vmem:[#allocation96_spill] sm:$0xff] %v12694_v16  ;;  %v5950_v57 = vadd.f32 %v5949_v50, %v5948_v35  ;;  %v5776_v13 = vmul.f32 1.442695, %v5689_v3  ;;  %v5946_v17 = vsel %vm305_vm0, %v12658_v21, 0.0  ;;  %v5951_v51 = vsel %vm305_vm0, %v12688_v18, 0.0  ;;  %v14143_v16 = vld [vmem:[#allocation78_spill] sm:$0xff] }
 0xbda   : > { %v5945_v61 = vadd.f32 %v5944_v5, %v5943_v7  ;;  %7532 = vpow2.f32 %v5744_v38  ;;  %v5792_v12 = vmul.f32 1.442695, %v5697_v36  ;;  %v12700_v2 = vpop.eup %7524  ;;  %v5808_v1 = vmul.f32 1.442695, %v5705_v27  ;;  %v12708_v5 = vpop.permute.xlu1 %3788 }
 0xbdb   : > { %v5952_v29 = vadd.f32 %v5951_v51, %v5950_v57  ;;  %7534 = vpow2.f32 %v5760_v39  ;;  %v5953_v55 = vsel %vm305_vm0, %v12692_v30, 0.0  ;;  %14126 = vst [vmem:[#allocation167_spill] sm:$0xff] %v12708_v5  ;;  %v5729_v35 = vsub.f32 %v12600_v45, %v12646_v10 }
 0xbdc   : > { %v12702_v63 = vadd.f32 %v5946_v17, %v5945_v61  ;;  %7536 = vpow2.f32 %v5776_v13  ;;  %v12706_v3 = vpop.eup %7526  ;;  %v5824_v36 = vmul.f32 1.442695, %v5713_v11  ;;  %v12714_v38 = vpop.permute.xlu0 %3778  ;;  %v5955_v27 = vsel %vm305_vm0, %v12700_v2, 0.0 }
 0xbdd   : > { %v5954_v7 = vadd.f32 %v5953_v55, %v5952_v29  ;;  %v12712_v50 = vpop.eup %7528  ;;  %7538 = vpow2.f32 %v5792_v12  ;;  %v5840_v45 = vmul.f32 1.442695, %v5721_v42  ;;  %v5957_v10 = vsel %vm305_vm0, %v12706_v3, 0.0 }
 0xbde   : > { %v12722_v13 = vpop.eup %7530  ;;  %7540 = vpow2.f32 %v5808_v1 }
 0xbdf   : > { %v5956_v39 = vadd.f32 %v5955_v27, %v5954_v7  ;;  %7542 = vpow2.f32 %v5824_v36  ;;  %v5961_v55 = vsel %vm305_vm0, %v12722_v13, 0.0 }
 0xbe0   : > { %6080 = vrot.lane.b32.xlu1 %v12464_v49, %s7589_s26  ;;  %6048 = vrot.lane.b32.xlu0 %v12446_v44, %s7589_s26  ;;  %v12726_v11 = vpop.eup %7532  ;;  %v12732_v57 = vpop.permute.xlu2 %3792  ;;  %v5856_v44 = vmul.f32 1.442695, %v5729_v35  ;;  %7544 = vpow2.f32 %v5840_v45 }
 0xbe1   : > { %6050 = vrot.lane.b32.xlu2 %v12505_v4, %s7589_s26  ;;  %v12730_v61 = vpop.eup %7534  ;;  %v5958_v49 = vadd.f32 %v5957_v10, %v5956_v39  ;;  %v5963_v17 = vsel %vm305_vm0, %v12726_v11, 0.0  ;;  %v5959_v4 = vsel %vm305_vm0, %v12712_v50, 0.0 }
 0xbe2   : > { %v12736_v1 = vpop.eup %7536  ;;  %v5964_v42 = vsel %vm305_vm0, %v12730_v61, 0.0  ;;  %7546 = vpow2.f32 %v5856_v44  ;;  %v12760_v10 = vpop.permute.xlu1 %3790  ;;  %v6651_v44 = vld [vmem:[%s13361_s3 + $0x50] sm:$0xff] }
 0xbe3   : > { %v5960_v51 = vadd.f32 %v5959_v4, %v5958_v49  ;;  %v5965_v12 = vadd.f32 %v5964_v42, %v5963_v17  ;;  %v12742_v29 = vpop.eup %7538  ;;  %v5966_v7 = vsel %vm305_vm0, %v12736_v1, 0.0  ;;  %6706 = vmatpush.msrb.mxu3 %v6651_v44  ;;  %7548 = vrcp.f32 %v12395_v6  ;;  %v14128_v44 = vld [vmem:[#allocation26_spill] sm:$0xff] }
 0xbe4   : > { %v12748_v35 = vpop.eup %7540  ;;  %v5968_v39 = vsel %vm305_vm0, %v12742_v29, 0.0  ;;  %v12767_v17 = vpop.permute.xlu0 %3780  ;;  %v14131_v6 = vld [vmem:[#allocation50_spill] sm:$0xff]  ;;  %7550 = vrcp.f32 %v12488_v25 }
 0xbe5   : > { %v12750_v36 = vadd.f32 %v5961_v55, %v5960_v51  ;;  %v5967_v27 = vadd.f32 %v5966_v7, %v5965_v12  ;;  %v12758_v45 = vpop.eup %7542  ;;  %7552 = vrcp.f32 %v12556_v52 }
 0xbe6   : > { %v12771_v4 = vpop.eup %7544  ;;  %v5972_v51 = vsel %vm305_vm0, %v12758_v45, 0.0 }
 0xbe7   : > { %v5969_v49 = vadd.f32 %v5968_v39, %v5967_v27  ;;  %v5974_v55 = vsel %vm305_vm0, %v12771_v4, 0.0  ;;  %7554 = vrcp.f32 %v12750_v36  ;;  %v14178_v36 = vld [vmem:[#allocation11_spill] sm:$0xff] }
 0xbe8   : > { %6112 = vrot.lane.b32.xlu1 %v12476_v14, %s7589_s26  ;;  %6096 = vrot.lane.b32.xlu0 %v12473_v15, %s7589_s26  ;;  %v5970_v14 = vsel %vm305_vm0, %v12748_v35, 0.0  ;;  %v12773_v15 = vpop.permute.xlu2 %3802  ;;  %v12777_v12 = vpop.eup %7546  ;;  %7556 = vrcp.f32 %v12702_v63  ;;  %v14186_v63 = vld [vmem:[#allocation63_spill] sm:$0xff] }
 0xbe9   : > { %6082 = vrot.lane.b32.xlu2 %v12525_v43, %s7589_s26  ;;  %14127 = vst [vmem:[#allocation2_spill] sm:$0xff] %v12773_v15  ;;  %v5971_v42 = vadd.f32 %v5970_v14, %v5969_v49  ;;  %v5976_v27 = vsel %vm305_vm0, %v12777_v12, 0.0  ;;  %v14129_v14 = vld [vmem:[#allocation72_spill] sm:$0xff] }
 0xbea   : > { %v12787_v39 = vpop.permute.xlu1 %3794 }
 0xbeb   : > { %v5973_v43 = vadd.f32 %v5972_v51, %v5971_v42  ;;  %v3886_v42 = vadd.f32 %v14129_v14, %v14128_v44  ;;  %v14134_v14 = vld [vmem:[#allocation144_spill] sm:$0xff] }
 0xbec   : > { %v12796_v51 = vpop.permute.xlu0 %3784 }
 0xbed   : > { %v5975_v7 = vadd.f32 %v5974_v55, %v5973_v43  ;;  %14130 = vst [vmem:[#allocation3_spill] sm:$0xff] %v12796_v51 }
 0xbef   : > { %v12790_v49 = vadd.f32 %v5976_v27, %v5975_v7 }
 0xbf0   : > { %6128 = vrot.lane.b32.xlu1 %v12480_v24, %s7589_s26  ;;  %6160 = vrot.lane.b32.xlu0 %v12499_v37, %s7589_s26  ;;  %v7549_v24 = vpop.eup %7548 }
 0xbf1   : > { %6146 = vrot.lane.b32.xlu2 %v12562_v19, %s7589_s26  ;;  %v3910_v19 = vadd.f32 %v12620_v32, %v14131_v6  ;;  %v14136_v6 = vld [vmem:[#allocation25_spill] sm:$0xff] }
 0xbf2   : > { %v12801_v37 = vpop.permute.xlu1 %3798 }
 0xbf3   : > { %v6075_v43 = vpop.permute.xlu2 %6074 }
 0xbf4   : > { %v6250_v55 = vmul.f32 %v6075_v43, %v3886_v42  ;;  %v12807_v7 = vpop.permute.xlu0 %3796 }
 0xbf8   : > { %6501 = vrot.lane.b32.xlu0 %v7549_v24, %s7589_s26  ;;  %6130 = vrot.lane.b32.xlu1 %v12558_v8, %s7589_s26 }
 0xbf9   : > { %6084 = vrot.lane.b32.xlu2 %v12618_v0, %s7589_s26  ;;  %v14133_v0 = vld [vmem:[#allocation10_spill] sm:$0xff] }
 0xbfa   : > { %v12815_v8 = vpop.permute.xlu1 %3804  ;;  %v3871_v42 = vadd.f32 %v14134_v14, %v14133_v0  ;;  %v14140_v0 = vld [vmem:[#allocation28_spill] sm:$0xff] }
 0xbfb   : > { %v6123_v27 = vpop.permute.xlu2 %6122  ;;  %14132 = vst [vmem:[#allocation91_spill] sm:$0xff] %v12815_v8  ;;  %v3888_v14 = vadd.f32 %v12269_v47, %v14140_v0  ;;  %v14144_v47 = vld [vmem:[#allocation18_spill] sm:$0xff]  ;;  %v14147_v0 = vld [vmem:[#allocation165_spill] sm:$0xff] }
 0xbfc   : > { %v12809_v44 = vmul.f32 %v6123_v27, %v3910_v19  ;;  %v12821_v32 = vpop.permute.xlu0 %3800  ;;  %v14137_v19 = vld [vmem:[#allocation6_spill] sm:$0xff] }
 0xbfd   : > { %14135 = vst [vmem:[#allocation68_spill] sm:$0xff] %v12821_v32  ;;  %v3870_v27 = vadd.f32 %v14137_v19, %v14136_v6  ;;  %v14141_v19 = vld [vmem:[#allocation64_spill] sm:$0xff] }
 0xc00   : > { %6162 = vrot.lane.b32.xlu1 %v12585_v48, %s7589_s26  ;;  %6066 = vrot.lane.b32.xlu0 %v12517_v40, %s7589_s26  ;;  %v14138_v40 = vld [vmem:[#allocation17_spill] sm:$0xff]  ;;  %v14139_v48 = vld [vmem:[#allocation140_spill] sm:$0xff] }
 0xc01   : > { %6100 = vrot.lane.b32.xlu2 %v12628_v33, %s7589_s26  ;;  %v3878_v8 = vadd.f32 %v14139_v48, %v14138_v40 }
 0xc03   : > { %v6045_v43 = vpop.permute.xlu2 %6044 }
 0xc04   : > { %v6235_v24 = vmul.f32 %v6045_v43, %v3871_v42 }
 0xc08   : > { %6098 = vrot.lane.b32.xlu0 %v12535_v56, %s7589_s26  ;;  %6068 = vrot.lane.b32.xlu1 %v12612_v34, %s7589_s26  ;;  %v14142_v34 = vld [vmem:[#allocation94_spill] sm:$0xff] }
 0xc09   : > { %6164 = vrot.lane.b32.xlu2 %v12658_v21, %s7589_s26  ;;  %v6043_v33 = vpop.permute.xlu1 %6042  ;;  %v6314_v15 = vmul.f32 %v6250_v55, %v14142_v34 }
 0xc0a   : > { %v6059_v42 = vpop.permute.xlu0 %6058  ;;  %v6234_v43 = vmul.f32 %v6043_v33, %v3870_v27  ;;  %v14146_v33 = vld [vmem:[#allocation34_spill] sm:$0xff] }
 0xc0b   : > { %v6242_v5 = vmul.f32 %v6059_v42, %v3878_v8  ;;  %v6079_v6 = vpop.permute.xlu2 %6078  ;;  %v14145_v8 = vld [vmem:[#allocation166_spill] sm:$0xff] }
 0xc0c   : > { %v6298_v32 = vmul.f32 %v6234_v43, %v14141_v19  ;;  %v12836_v56 = vmul.f32 %v6079_v6, %v3888_v14  ;;  %v3879_v27 = vadd.f32 %v14145_v8, %v14144_v47  ;;  %v3894_v14 = vadd.f32 %v14147_v0, %v14146_v33  ;;  %v7551_v47 = vpop.eup %7550 }
 0xc0d   : > { %v6306_v40 = vmul.f32 %v6242_v5, %v14143_v16  ;;  %v6366_v16 = vsel %vm6362_vm11, %v6314_v15, 0.0  ;;  %v14148_v5 = vld [vmem:[#allocation36_spill] sm:$0xff] }
 0xc0e   : > { %v6363_v48 = vsel %vm6362_vm11, %v6298_v32, 0.0  ;;  %v3896_v55 = vadd.f32 %v12401_v60, %v14148_v5  ;;  %v14155_v5 = vld [vmem:[#allocation52_spill] sm:$0xff] }
 0xc0f   : > { %v6364_v21 = vsel %vm6362_vm11, %v6306_v40, 0.0 }
 0xc10   : > { %v6365_v51 = vadd.f32 %v6364_v21, %v6363_v48  ;;  %6114 = vrot.lane.b32.xlu0 %v12552_v22, %s7589_s26  ;;  %6132 = vrot.lane.b32.xlu1 %v12637_v20, %s7589_s26  ;;  %v14149_v20 = vld [vmem:[#allocation66_spill] sm:$0xff]  ;;  %v14150_v48 = vld [vmem:[#allocation111_spill] sm:$0xff]  ;;  %v14151_v21 = vld [vmem:[#allocation80_spill] sm:$0xff] }
 0xc11   : > { %6102 = vrot.lane.b32.xlu2 %v12692_v30, %s7589_s26  ;;  %v6299_v43 = vmul.f32 %v6235_v24, %v14149_v20  ;;  %v14152_v24 = vld [vmem:[#allocation35_spill] sm:$0xff] }
 0xc12   : > { %v6091_v22 = vpop.permute.xlu0 %6090  ;;  %v6367_v32 = vadd.f32 %v6366_v16, %v6365_v51  ;;  %v6061_v42 = vpop.permute.xlu1 %6060 }
 0xc13   : > { %v6258_v6 = vmul.f32 %v6091_v22, %v3894_v14  ;;  %v6243_v19 = vmul.f32 %v6061_v42, %v3879_v27  ;;  %v6095_v34 = vpop.permute.xlu2 %6094  ;;  %v6378_v30 = vsel %vm6362_vm11, %v6299_v43, 0.0  ;;  %v14153_v27 = vld [vmem:[#allocation168_spill] sm:$0xff]  ;;  %v14154_v14 = vld [vmem:[#allocation42_spill] sm:$0xff] }
 0xc14   : > { %v12857_v40 = vmul.f32 %v6095_v34, %v3896_v55  ;;  %v3895_v0 = vadd.f32 %v14153_v27, %v14152_v24  ;;  %v3902_v16 = vadd.f32 %v12290_v41, %v14154_v14  ;;  %v3912_v55 = vadd.f32 %v12666_v23, %v14155_v5  ;;  %v14157_v34 = vld [vmem:[#allocation121_spill] sm:$0xff]  ;;  %v14158_v23 = vld [vmem:[#allocation43_spill] sm:$0xff] }
 0xc15   : > { %v6322_v25 = vmul.f32 %v6258_v6, %v14150_v48  ;;  %v6307_v15 = vmul.f32 %v6243_v19, %v14151_v21  ;;  %v14159_v21 = vld [vmem:[#allocation58_spill] sm:$0xff] }
 0xc17   : > { %v6368_v8 = vsel %vm6362_vm11, %v6322_v25, 0.0  ;;  %v6379_v60 = vsel %vm6362_vm11, %v6307_v15, 0.0  ;;  %v3918_v15 = vadd.f32 %v12660_v53, %v14159_v21 }
 0xc18   : > { %v6369_v51 = vadd.f32 %v6368_v8, %v6367_v32  ;;  %v12864_v33 = vadd.f32 %v6379_v60, %v6378_v30  ;;  %6503 = vrot.lane.b32.xlu0 %v7551_v47, %s7589_s26  ;;  %6070 = vrot.lane.b32.xlu1 %v12680_v31, %s7589_s26  ;;  %v14156_v31 = vld [vmem:[#allocation129_spill] sm:$0xff] }
 0xc19   : > { %6134 = vrot.lane.b32.xlu2 %v12706_v3, %s7589_s26  ;;  %v6338_v19 = vmul.f32 %v12809_v44, %v14156_v31  ;;  %v3903_v3 = vadd.f32 %v12274_v9, %v14158_v23  ;;  %v14160_v44 = vld [vmem:[#allocation60_spill] sm:$0xff]  ;;  %v14161_v9 = vld [vmem:[#allocation145_spill] sm:$0xff] }
 0xc1a   : > { %v6107_v22 = vpop.permute.xlu0 %6106  ;;  %v6093_v32 = vpop.permute.xlu1 %6092  ;;  %v3920_v30 = vadd.f32 %v12714_v38, %v14160_v44  ;;  %v14162_v38 = vld [vmem:[#allocation59_spill] sm:$0xff]  ;;  %v14164_v31 = vld [vmem:[#allocation157_spill] sm:$0xff]  ;;  %v14169_v44 = vld [vmem:[#allocation112_spill] sm:$0xff] }
 0xc1b   : > { %v6266_v42 = vmul.f32 %v6107_v22, %v3902_v16  ;;  %v6259_v20 = vmul.f32 %v6093_v32, %v3895_v0  ;;  %v6127_v43 = vpop.permute.xlu2 %6126  ;;  %v6372_v47 = vsel %vm6362_vm11, %v6338_v19, 0.0  ;;  %v3919_v14 = vadd.f32 %v12587_v46, %v14162_v38  ;;  %v14163_v16 = vld [vmem:[#allocation77_spill] sm:$0xff]  ;;  %v14165_v46 = vld [vmem:[#allocation27_spill] sm:$0xff] }
 0xc1c   : > { %v12877_v6 = vmul.f32 %v6127_v43, %v3912_v55  ;;  %v3926_v5 = vadd.f32 %v12760_v10, %v14163_v16  ;;  %v14166_v10 = vld [vmem:[#allocation170_spill] sm:$0xff] }
 0xc1d   : > { %v6330_v48 = vmul.f32 %v6266_v42, %v14157_v34  ;;  %v3887_v34 = vadd.f32 %v14166_v10, %v14165_v46  ;;  %v14180_v46 = vld [vmem:[#allocation44_spill] sm:$0xff] }
 0xc1e   : > { %v3904_v10 = vadd.f32 %v12305_v54, %v14180_v46  ;;  %v14185_v54 = vld [vmem:[#allocation147_spill] sm:$0xff]  ;;  %v14197_v46 = vld [vmem:[#allocation89_spill] sm:$0xff] }
 0xc1f   : > { %v6370_v41 = vsel %vm6362_vm11, %v6330_v48, 0.0 }
 0xc20   : > { %v6371_v25 = vadd.f32 %v6370_v41, %v6369_v51  ;;  %6052 = vrot.lane.b32.xlu0 %v12602_v26, %s7589_s26  ;;  %6086 = vrot.lane.b32.xlu1 %v12688_v18, %s7589_s26  ;;  %v14168_v41 = vld [vmem:[#allocation61_spill] sm:$0xff] }
 0xc21   : > { %6056 = vrot.lane.b32.xlu2 %v12726_v11, %s7589_s26 }
 0xc22   : > { %v6139_v8 = vpop.permute.xlu0 %6138  ;;  %v6109_v60 = vpop.permute.xlu1 %6108  ;;  %v6373_v26 = vadd.f32 %v6372_v47, %v6371_v25  ;;  %v3921_v25 = vadd.f32 %v12767_v17, %v14168_v41  ;;  %v14172_v17 = vld [vmem:[#allocation19_spill] sm:$0xff] }
 0xc23   : > { %v6282_v51 = vmul.f32 %v6139_v8, %v3918_v15  ;;  %v6267_v24 = vmul.f32 %v6109_v60, %v3903_v3  ;;  %v6143_v18 = vpop.permute.xlu2 %6142  ;;  %v14170_v8 = vld [vmem:[#allocation95_spill] sm:$0xff] }
 0xc24   : > { %v12896_v27 = vmul.f32 %v6143_v18, %v3920_v30  ;;  %v6323_v30 = vmul.f32 %v6259_v20, %v14169_v44  ;;  %v14173_v18 = vld [vmem:[#allocation79_spill] sm:$0xff] }
 0xc25   : > { %v6346_v0 = vmul.f32 %v6282_v51, %v14161_v9  ;;  %v3880_v9 = vadd.f32 %v14173_v18, %v14172_v17  ;;  %v14188_v17 = vld [vmem:[#allocation158_spill] sm:$0xff] }
 0xc27   : > { %v6374_v53 = vsel %vm6362_vm11, %v6346_v0, 0.0  ;;  %v14174_v0 = vld [vmem:[#allocation51_spill] sm:$0xff] }
 0xc28   : > { %6116 = vrot.lane.b32.xlu0 %v12633_v58, %s7589_s26  ;;  %6150 = vrot.lane.b32.xlu1 %v12712_v50, %s7589_s26  ;;  %v6375_v11 = vadd.f32 %v6374_v53, %v6373_v26  ;;  %v3911_v20 = vadd.f32 %v12492_v59, %v14174_v0  ;;  %v14176_v53 = vld [vmem:[#allocation110_spill] sm:$0xff] }
 0xc29   : > { %6104 = vrot.lane.b32.xlu2 %v12742_v29, %s7589_s26  ;;  %v14167_v29 = vld [vmem:[#allocation83_spill] sm:$0xff] }
 0xc2a   : > { %v6155_v55 = vpop.permute.xlu0 %6154  ;;  %v6141_v22 = vpop.permute.xlu1 %6140  ;;  %v3927_v48 = vadd.f32 %v12732_v57, %v14167_v29  ;;  %v14171_v57 = vld [vmem:[#allocation122_spill] sm:$0xff]  ;;  %v14182_v29 = vld [vmem:[#allocation173_spill] sm:$0xff] }
 0xc2b   : > { %v6290_v32 = vmul.f32 %v6155_v55, %v3926_v5  ;;  %v6283_v42 = vmul.f32 %v6141_v22, %v3919_v14  ;;  %v6500_v43 = vpop.permute.xlu2 %6499  ;;  %v6331_v26 = vmul.f32 %v6267_v24, %v14171_v57  ;;  %v6383_v24 = vsel %vm6362_vm11, %v6323_v30, 0.0  ;;  %v14177_v22 = vld [vmem:[#allocation131_spill] sm:$0xff]  ;;  %v14184_v30 = vld [vmem:[#allocation98_spill] sm:$0xff] }
 0xc2d   : > { %v6354_v58 = vmul.f32 %v6290_v32, %v14164_v31  ;;  %v6385_v14 = vsel %vm6362_vm11, %v6331_v26, 0.0 }
 0xc2f   : > { %v6376_v19 = vsel %vm6362_vm11, %v6354_v58, 0.0 }
 0xc30   : > { %v6377_v50 = vadd.f32 %v6376_v19, %v6375_v11  ;;  %6148 = vrot.lane.b32.xlu0 %v12648_v62, %s7589_s26  ;;  %6088 = vrot.lane.b32.xlu1 %v12736_v1, %s7589_s26  ;;  %v14179_v19 = vld [vmem:[#allocation134_spill] sm:$0xff] }
 0xc31   : > { %6152 = vrot.lane.b32.xlu2 %v12771_v4, %s7589_s26 }
 0xc32   : > { %v12924_v23 = vmul.f32 %v6500_v43, %v6377_v50  ;;  %v6077_v3 = vpop.permute.xlu0 %6076  ;;  %v6157_v21 = vpop.permute.xlu1 %6156  ;;  %v3872_v50 = vadd.f32 %v14179_v19, %v14178_v36  ;;  %v14195_v36 = vld [vmem:[#allocation4_spill] sm:$0xff] }
 0xc33   : > { %v6251_v62 = vmul.f32 %v6077_v3, %v3887_v34  ;;  %v6291_v15 = vmul.f32 %v6157_v21, %v3927_v48  ;;  %v6145_v47 = vpop.permute.xlu2 %6144  ;;  %v7553_v43 = vpop.eup %7552  ;;  %v14181_v34 = vld [vmem:[#allocation30_spill] sm:$0xff]  ;;  %v14183_v3 = vld [vmem:[#allocation81_spill] sm:$0xff] }
 0xc34   : > { %v12926_v1 = vmul.f32 %v6145_v47, %v3921_v25  ;;  %v7555_v31 = vpop.eup %7554  ;;  %v3890_v48 = vadd.f32 %v14182_v29, %v14181_v34 }
 0xc35   : > { %v6315_v60 = vmul.f32 %v6251_v62, %v14170_v8  ;;  %v6316_v8 = vmul.f32 %v12836_v56, %v14184_v30  ;;  %v7557_v26 = vpop.eup %7556  ;;  %v6355_v18 = vmul.f32 %v6291_v15, %v14188_v17  ;;  %v14189_v56 = vld [vmem:[#allocation20_spill] sm:$0xff]  ;;  %v14201_v30 = vld [vmem:[#allocation149_spill] sm:$0xff] }
 0xc37   : > { %v6381_v4 = vsel %vm6362_vm11, %v6315_v60, 0.0  ;;  %v6347_v60 = vmul.f32 %v6283_v42, %v14185_v54  ;;  %v14190_v42 = vld [vmem:[#allocation142_spill] sm:$0xff]  ;;  %v14202_v54 = vld [vmem:[#allocation99_spill] sm:$0xff] }
 0xc38   : > { %v6382_v51 = vadd.f32 %v6381_v4, %v12864_v33  ;;  %6054 = vrot.lane.b32.xlu0 %v12664_v28, %s7589_s26  ;;  %6120 = vrot.lane.b32.xlu1 %v12748_v35, %s7589_s26  ;;  %v14175_v33 = vld [vmem:[#allocation13_spill] sm:$0xff]  ;;  %v14187_v4 = vld [vmem:[#allocation115_spill] sm:$0xff] }
 0xc39   : > { %6168 = vrot.lane.b32.xlu2 %v12777_v12, %s7589_s26  ;;  %v3874_v11 = vadd.f32 %v14176_v53, %v14175_v33  ;;  %v14191_v33 = vld [vmem:[#allocation88_spill] sm:$0xff]  ;;  %v6389_v15 = vsel %vm6362_vm11, %v6347_v60, 0.0 }
 0xc3a   : > { %v6384_v28 = vadd.f32 %v6383_v24, %v6382_v51  ;;  %v6125_v35 = vpop.permute.xlu0 %6124  ;;  %v6063_v38 = vpop.permute.xlu1 %6062  ;;  %v6324_v51 = vmul.f32 %v12857_v40, %v14187_v4  ;;  %v3881_v24 = vadd.f32 %v14190_v42, %v14189_v56  ;;  %v3928_v53 = vadd.f32 %v12787_v39, %v14191_v33  ;;  %v14204_v4 = vld [vmem:[#allocation159_spill] sm:$0xff]  ;;  %v14207_v56 = vld [vmem:[#allocation45_spill] sm:$0xff]  ;;  %v14208_v42 = vld [vmem:[#allocation176_spill] sm:$0xff] }
 0xc3b   : > { %v6275_v16 = vmul.f32 %v6125_v35, %v3911_v20  ;;  %v6244_v5 = vmul.f32 %v6063_v38, %v3880_v9  ;;  %v6051_v59 = vpop.permute.xlu2 %6050  ;;  %v6396_v40 = vsel %vm6362_vm11, %v6316_v8, 0.0  ;;  %v14209_v33 = vld [vmem:[#allocation5_spill] sm:$0xff] }
 0xc3c   : > { %v6386_v55 = vadd.f32 %v6385_v14, %v6384_v28  ;;  %v12949_v52 = vmul.f32 %v6051_v59, %v3874_v11  ;;  %v14192_v11 = vld [vmem:[#allocation62_spill] sm:$0xff]  ;;  %v14193_v28 = vld [vmem:[#allocation85_spill] sm:$0xff]  ;;  %7558 = vrcp.f32 %v14209_v33 }
 0xc3d   : > { %v6339_v32 = vmul.f32 %v6275_v16, %v14177_v22  ;;  %v6308_v21 = vmul.f32 %v6244_v5, %v14183_v3  ;;  %v3922_v35 = vadd.f32 %v14193_v28, %v14192_v11  ;;  %v14200_v3 = vld [vmem:[#allocation84_spill] sm:$0xff]  ;;  %7560 = vrcp.f32 %v12790_v49  ;;  %v14216_v49 = vld [vmem:[#allocation54_spill] sm:$0xff] }
 0xc3f   : > { %v6387_v12 = vsel %vm6362_vm11, %v6339_v32, 0.0  ;;  %v6394_v9 = vsel %vm6362_vm11, %v6308_v21, 0.0  ;;  %v6391_v32 = vsel %vm6362_vm11, %v6355_v18, 0.0  ;;  %v14205_v18 = vld [vmem:[#allocation37_spill] sm:$0xff] }
 0xc40   : > { %v6388_v58 = vadd.f32 %v6387_v12, %v6386_v55  ;;  %6118 = vrot.lane.b32.xlu0 %v12700_v2, %s7589_s26  ;;  %6505 = vrot.lane.b32.xlu1 %v7553_v43, %s7589_s26 }
 0xc41   : > { %6511 = vrot.lane.b32.xlu2 %v7555_v31, %s7589_s26  ;;  %v14194_v31 = vld [vmem:[#allocation12_spill] sm:$0xff] }
 0xc42   : > { %v6111_v41 = vpop.permute.xlu1 %6110  ;;  %v6047_v25 = vpop.permute.xlu0 %6046  ;;  %v6390_v5 = vadd.f32 %v6389_v15, %v6388_v58  ;;  %v3873_v19 = vadd.f32 %v14195_v36, %v14194_v31  ;;  %v14212_v31 = vld [vmem:[#allocation53_spill] sm:$0xff] }
 0xc43   : > { %v6268_v2 = vmul.f32 %v6111_v41, %v3904_v10  ;;  %v6236_v62 = vmul.f32 %v6047_v25, %v3872_v50  ;;  %v6083_v47 = vpop.permute.xlu2 %6082  ;;  %v14196_v50 = vld [vmem:[#allocation29_spill] sm:$0xff]  ;;  %v14198_v10 = vld [vmem:[#allocation123_spill] sm:$0xff] }
 0xc44   : > { %v12965_v44 = vmul.f32 %v6083_v47, %v3890_v48  ;;  %v6392_v12 = vadd.f32 %v6391_v32, %v6390_v5  ;;  %v3889_v58 = vadd.f32 %v14197_v46, %v14196_v50  ;;  %v14199_v41 = vld [vmem:[#allocation133_spill] sm:$0xff]  ;;  %v14214_v50 = vld [vmem:[#allocation92_spill] sm:$0xff] }
 0xc45   : > { %v6300_v57 = vmul.f32 %v6236_v62, %v14186_v63  ;;  %v6332_v34 = vmul.f32 %v6268_v2, %v14198_v10  ;;  %v6340_v25 = vmul.f32 %v12877_v6, %v14199_v41  ;;  %v14203_v63 = vld [vmem:[#allocation70_spill] sm:$0xff]  ;;  %v14213_v36 = vld [vmem:[#allocation109_spill] sm:$0xff]  ;;  %v3929_v46 = vadd.f32 %v12807_v7, %v14214_v50  ;;  %v6650_v7 = vld [vmem:[%s13361_s3 + $0x48] sm:$0xff] }
 0xc46   : > { %6707 = vmatpush.msrb.mxu3 %v6650_v7  ;;  %v14230_v7 = vld [vmem:[#allocation125_spill] sm:$0xff] }
 0xc47   : > { %v6393_v0 = vsel %vm6362_vm11, %v6300_v57, 0.0  ;;  %v6400_v8 = vsel %vm6362_vm11, %v6332_v34, 0.0  ;;  %v6402_v2 = vsel %vm6362_vm11, %v6340_v25, 0.0  ;;  %v14215_v25 = vld [vmem:[#allocation135_spill] sm:$0xff] }
 0xc48   : > { %v6395_v20 = vadd.f32 %v6394_v9, %v6393_v0  ;;  %6166 = vrot.lane.b32.xlu0 %v12722_v13, %s7589_s26  ;;  %6509 = vrot.lane.b32.xlu1 %v7557_v26, %s7589_s26  ;;  %v6398_v13 = vsel %vm6362_vm11, %v6324_v51, 0.0  ;;  %v14206_v9 = vld [vmem:[#allocation169_spill] sm:$0xff] }
 0xc49   : > { %v3897_v0 = vadd.f32 %v14206_v9, %v14205_v18  ;;  %v14219_v9 = vld [vmem:[#allocation160_spill] sm:$0xff] }
 0xc4a   : > { %v6397_v38 = vadd.f32 %v6396_v40, %v6395_v20  ;;  %v6159_v14 = vpop.permute.xlu0 %6158  ;;  %v6065_v16 = vpop.permute.xlu1 %6064 }
 0xc4b   : > { %v6292_v59 = vmul.f32 %v6159_v14, %v3928_v53  ;;  %v6245_v55 = vmul.f32 %v6065_v16, %v3881_v24  ;;  %v6147_v22 = vpop.permute.xlu2 %6146  ;;  %v3905_v24 = vadd.f32 %v14208_v42, %v14207_v56  ;;  %v14221_v56 = vld [vmem:[#allocation7_spill] sm:$0xff] }
 0xc4c   : > { %v6399_v43 = vadd.f32 %v6398_v13, %v6397_v38  ;;  %v12989_v39 = vmul.f32 %v6147_v22, %v3922_v35  ;;  %v7559_v22 = vpop.eup %7558 }
 0xc4d   : > { %v6309_v21 = vmul.f32 %v6245_v55, %v14200_v3  ;;  %v6356_v51 = vmul.f32 %v6292_v59, %v14204_v4  ;;  %v14211_v59 = vld [vmem:[#allocation116_spill] sm:$0xff] }
 0xc4e   : > { %v6401_v26 = vadd.f32 %v6400_v8, %v6399_v43 }
 0xc4f   : > { %v6409_v6 = vsel %vm6362_vm11, %v6309_v21, 0.0  ;;  %v6406_v16 = vsel %vm6362_vm11, %v6356_v51, 0.0  ;;  %v7561_v21 = vpop.eup %7560 }
 0xc50   : > { %6072 = vrot.lane.b32.xlu0 %v12730_v61, %s7589_s26  ;;  %v6348_v61 = vmul.f32 %v12896_v27, %v14201_v30  ;;  %v6403_v27 = vadd.f32 %v6402_v2, %v6401_v26  ;;  %v14217_v30 = vld [vmem:[#allocation151_spill] sm:$0xff]  ;;  %v6531_v26 = vsel %vm6362_vm11, %v12924_v23, 0.0  ;;  %v14218_v2 = vld [vmem:[#allocation150_spill] sm:$0xff] }
 0xc51   : > { %v6349_v4 = vmul.f32 %v12926_v1, %v14218_v2 }
 0xc52   : > { %v6081_v29 = vpop.permute.xlu1 %6080  ;;  %v6049_v48 = vpop.permute.xlu0 %6048  ;;  %v6404_v53 = vsel %vm6362_vm11, %v6348_v61, 0.0  ;;  %v3914_v61 = vadd.f32 %v14217_v30, %v14216_v49 }
 0xc53   : > { %v6253_v62 = vmul.f32 %v6081_v29, %v3889_v58  ;;  %v6237_v47 = vmul.f32 %v6049_v48, %v3873_v19  ;;  %v6405_v35 = vadd.f32 %v6404_v53, %v6403_v27  ;;  %v3913_v19 = vadd.f32 %v14213_v36, %v14212_v31  ;;  %v14220_v27 = vld [vmem:[#allocation21_spill] sm:$0xff] }
 0xc54   : > { %v3882_v42 = vadd.f32 %v14221_v56, %v14220_v27 }
 0xc55   : > { %v6317_v60 = vmul.f32 %v6253_v62, %v14202_v54  ;;  %v6301_v57 = vmul.f32 %v6237_v47, %v14203_v63  ;;  %v13020_v5 = vadd.f32 %v6406_v16, %v6405_v35  ;;  %v14224_v16 = vld [vmem:[#allocation86_spill] sm:$0xff] }
 0xc57   : > { %v6408_v17 = vsel %vm6362_vm11, %v6301_v57, 0.0  ;;  %v6411_v40 = vsel %vm6362_vm11, %v6317_v60, 0.0  ;;  %v6553_v60 = vmul.f32 %v12924_v23, %v12924_v23 }
 0xc58   : > { %v6410_v20 = vadd.f32 %v6409_v6, %v6408_v17  ;;  %6136 = vrot.lane.b32.xlu0 %v12758_v45, %s7589_s26  ;;  %v14210_v45 = vld [vmem:[#allocation124_spill] sm:$0xff] }
 0xc59   : > { %v6561_v18 = vsel %vm6362_vm11, %v6553_v60, 0.0  ;;  %v14231_v60 = vld [vmem:[#allocation97_spill] sm:$0xff] }
 0xc5a   : > { %v6113_v15 = vpop.permute.xlu1 %6112  ;;  %v6097_v11 = vpop.permute.xlu0 %6096  ;;  %v6412_v28 = vadd.f32 %v6411_v40, %v6410_v20  ;;  %v14222_v40 = vld [vmem:[#allocation71_spill] sm:$0xff] }
 0xc5b   : > { %v6269_v38 = vmul.f32 %v6113_v15, %v3905_v24  ;;  %v6261_v14 = vmul.f32 %v6097_v11, %v3897_v0  ;;  %v6419_v24 = vsel %vm6362_vm11, %v6349_v4, 0.0  ;;  %v6302_v15 = vmul.f32 %v12949_v52, %v14222_v40 }
 0xc5d   : > { %v6333_v13 = vmul.f32 %v6269_v38, %v14210_v45  ;;  %v6325_v55 = vmul.f32 %v6261_v14, %v14211_v59  ;;  %v14223_v38 = vld [vmem:[#allocation101_spill] sm:$0xff]  ;;  %v6085_v59 = vpop.permute.xlu2 %6084 }
 0xc5e   : > { %v6318_v14 = vmul.f32 %v12965_v44, %v14223_v38  ;;  %v14227_v44 = vld [vmem:[#allocation117_spill] sm:$0xff]  ;;  %v14240_v38 = vld [vmem:[#allocation39_spill] sm:$0xff] }
 0xc5f   : > { %v6413_v32 = vsel %vm6362_vm11, %v6325_v55, 0.0  ;;  %v6415_v58 = vsel %vm6362_vm11, %v6333_v13, 0.0  ;;  %v6423_v13 = vsel %vm6362_vm11, %v6302_v15, 0.0 }
 0xc60   : > { %v6414_v43 = vadd.f32 %v6413_v32, %v6412_v28  ;;  %6507 = vrot.lane.b32.xlu0 %v7559_v22, %s7589_s26  ;;  %v14225_v32 = vld [vmem:[#allocation38_spill] sm:$0xff]  ;;  %v6426_v52 = vsel %vm6362_vm11, %v6318_v14, 0.0  ;;  %v14241_v14 = vld [vmem:[#allocation103_spill] sm:$0xff] }
 0xc62   : > { %v6129_v10 = vpop.permute.xlu1 %6128  ;;  %v6416_v34 = vadd.f32 %v6415_v58, %v6414_v43  ;;  %v6161_v29 = vpop.permute.xlu0 %6160  ;;  %v14226_v43 = vld [vmem:[#allocation172_spill] sm:$0xff] }
 0xc63   : > { %v6277_v48 = vmul.f32 %v6129_v10, %v3913_v19  ;;  %v6293_v41 = vmul.f32 %v6161_v29, %v3929_v46  ;;  %v3898_v31 = vadd.f32 %v14226_v43, %v14225_v32  ;;  %v7406_v46 = vld [vmem:[%s7656_s10 + $0xd] ss:$0 sm:$0xff]  ;;  %v7407_v43 = vld [vmem:[%s7656_s10 + $0xe] ss:$0 sm:$0xff] }
 0xc64   : > { %6616 = vrot.lane.b32.xlu1 %v7406_v46, %s7589_s26  ;;  %6630 = vrot.lane.b32.xlu2 %v7407_v43, %s7589_s26  ;;  %v14244_v46 = vld [vmem:[#allocation104_spill] sm:$0xff] }
 0xc65   : > { %v6341_v3 = vmul.f32 %v6277_v48, %v14215_v25  ;;  %v6357_v0 = vmul.f32 %v6293_v41, %v14219_v9  ;;  %v14228_v48 = vld [vmem:[#allocation46_spill] sm:$0xff]  ;;  %v14234_v9 = vld [vmem:[#allocation137_spill] sm:$0xff]  ;;  %v14259_v43 = vld [vmem:[#allocation8_spill] sm:$0xff] }
 0xc66   : > { %v14229_v41 = vld [vmem:[#allocation174_spill] sm:$0xff] }
 0xc67   : > { %v6417_v62 = vsel %vm6362_vm11, %v6341_v3, 0.0  ;;  %v6421_v28 = vsel %vm6362_vm11, %v6357_v0, 0.0  ;;  %v3906_v25 = vadd.f32 %v14229_v41, %v14228_v48  ;;  %v6101_v3 = vpop.permute.xlu2 %6100  ;;  %v14246_v48 = vld [vmem:[#allocation118_spill] sm:$0xff] }
 0xc68   : > { %v6418_v47 = vadd.f32 %v6417_v62, %v6416_v34  ;;  %6513 = vrot.lane.b32.xlu0 %v7561_v21, %s7589_s26 }
 0xc6a   : > { %v6502_v8 = vpop.permute.xlu0 %6501  ;;  %v6131_v54 = vpop.permute.xlu1 %6130  ;;  %v6420_v53 = vadd.f32 %v6419_v24, %v6418_v47  ;;  %v14236_v24 = vld [vmem:[#allocation175_spill] sm:$0xff] }
 0xc6b   : > { %v13042_v63 = vmul.f32 %v6502_v8, %v6392_v12  ;;  %v6278_v57 = vmul.f32 %v6131_v54, %v3914_v61 }
 0xc6c   : > { %v13061_v35 = vadd.f32 %v6421_v28, %v6420_v53 }
 0xc6d   : > { %v6532_v51 = vsel %vm6362_vm11, %v13042_v63, 0.0  ;;  %v6554_v6 = vmul.f32 %v13042_v63, %v13042_v63  ;;  %v6342_v0 = vmul.f32 %v6278_v57, %v14234_v9  ;;  %v14238_v57 = vld [vmem:[#allocation14_spill] sm:$0xff] }
 0xc6e   : > { %v6533_v17 = vadd.f32 %v6532_v51, %v6531_v26  ;;  %v3930_v26 = vadd.f32 %v12801_v37, %v14231_v60  ;;  %v14232_v51 = vld [vmem:[#allocation22_spill] sm:$0xff]  ;;  %v14235_v37 = vld [vmem:[#allocation31_spill] sm:$0xff] }
 0xc6f   : > { %v6562_v12 = vsel %vm6362_vm11, %v6554_v6, 0.0  ;;  %v13083_v2 = vpop.permute.xlu2 %6164  ;;  %v14233_v6 = vld [vmem:[#allocation146_spill] sm:$0xff] }
 0xc70   : > { %v6563_v20 = vadd.f32 %v6562_v12, %v6561_v18  ;;  %v3883_v18 = vadd.f32 %v14233_v6, %v14232_v51 }
 0xc72   : > { %v6163_v1 = vpop.permute.xlu1 %6162  ;;  %v6067_v33 = vpop.permute.xlu0 %6066 }
 0xc73   : > { %v6246_v11 = vmul.f32 %v6067_v33, %v3882_v42  ;;  %v6294_v12 = vmul.f32 %v6163_v1, %v3930_v26  ;;  %v3891_v33 = vadd.f32 %v14236_v24, %v14235_v37  ;;  %v14239_v1 = vld [vmem:[#allocation139_spill] sm:$0xff]  ;;  %v14252_v24 = vld [vmem:[#allocation138_spill] sm:$0xff] }
 0xc75   : > { %v6310_v45 = vmul.f32 %v6246_v11, %v14224_v16  ;;  %v3875_v11 = vadd.f32 %v14239_v1, %v14238_v57  ;;  %v3899_v16 = vadd.f32 %v14241_v14, %v14240_v38 }
 0xc77   : > { %v6424_v55 = vsel %vm6362_vm11, %v6310_v45, 0.0  ;;  %v6255_v45 = vmul.f32 %v6085_v59, %v3891_v33  ;;  %v6103_v59 = vpop.permute.xlu2 %6102 }
 0xc78   : > { %v6425_v22 = vadd.f32 %v6424_v55, %v6423_v13  ;;  %v14242_v13 = vld [vmem:[#allocation161_spill] sm:$0xff] }
 0xc79   : > { %v6358_v55 = vmul.f32 %v6294_v12, %v14242_v13  ;;  %v14257_v13 = vld [vmem:[#allocation154_spill] sm:$0xff] }
 0xc7a   : > { %v6099_v36 = vpop.permute.xlu0 %6098  ;;  %v6427_v19 = vadd.f32 %v6426_v52, %v6425_v22  ;;  %v6069_v50 = vpop.permute.xlu1 %6068  ;;  %v6263_v52 = vmul.f32 %v6101_v3, %v3899_v16 }
 0xc7b   : > { %v6262_v58 = vmul.f32 %v6099_v36, %v3898_v31  ;;  %v6247_v40 = vmul.f32 %v6069_v50, %v3883_v18  ;;  %v14243_v36 = vld [vmem:[#allocation87_spill] sm:$0xff] }
 0xc7c   : > { %v6327_v41 = vmul.f32 %v6263_v52, %v14246_v48 }
 0xc7d   : > { %v6326_v10 = vmul.f32 %v6262_v58, %v14227_v44  ;;  %v6319_v58 = vmul.f32 %v6255_v45, %v14244_v46  ;;  %v14245_v44 = vld [vmem:[#allocation73_spill] sm:$0xff]  ;;  %v14262_v46 = vld [vmem:[#allocation40_spill] sm:$0xff] }
 0xc7e   : > { %v6443_v18 = vsel %vm6362_vm11, %v6327_v41, 0.0  ;;  %v14256_v45 = vld [vmem:[#allocation113_spill] sm:$0xff] }
 0xc7f   : > { %v6428_v34 = vsel %vm6362_vm11, %v6326_v10, 0.0  ;;  %v6441_v60 = vsel %vm6362_vm11, %v6319_v58, 0.0  ;;  %v6135_v37 = vpop.permute.xlu2 %6134  ;;  %v14263_v58 = vld [vmem:[#allocation178_spill] sm:$0xff] }
 0xc80   : > { %v6429_v29 = vadd.f32 %v6428_v34, %v6427_v19  ;;  %v6311_v19 = vmul.f32 %v6247_v40, %v14243_v36  ;;  %v6436_v34 = vsel %vm6362_vm11, %v6358_v55, 0.0  ;;  %v14253_v40 = vld [vmem:[#allocation65_spill] sm:$0xff] }
 0xc82   : > { %v6115_v21 = vpop.permute.xlu0 %6114  ;;  %v6133_v62 = vpop.permute.xlu1 %6132 }
 0xc83   : > { %v6270_v47 = vmul.f32 %v6115_v21, %v3906_v25  ;;  %v6439_v25 = vsel %vm6362_vm11, %v6311_v19, 0.0  ;;  %v14260_v19 = vld [vmem:[#allocation15_spill] sm:$0xff] }
 0xc85   : > { %v6334_v49 = vmul.f32 %v6270_v47, %v14230_v7  ;;  %v14247_v47 = vld [vmem:[#allocation47_spill] sm:$0xff]  ;;  %v14248_v7 = vld [vmem:[#allocation148_spill] sm:$0xff] }
 0xc87   : > { %v6430_v30 = vsel %vm6362_vm11, %v6334_v49, 0.0  ;;  %v3907_v49 = vadd.f32 %v14248_v7, %v14247_v47  ;;  %v14265_v7 = vld [vmem:[#allocation105_spill] sm:$0xff] }
 0xc88   : > { %v6431_v61 = vadd.f32 %v6430_v30, %v6429_v29  ;;  %v14249_v30 = vld [vmem:[#allocation55_spill] sm:$0xff] }
 0xc8a   : > { %v6504_v8 = vpop.permute.xlu0 %6503  ;;  %v13079_v54 = vpop.permute.xlu1 %6070 }
 0xc8b   : > { %v13086_v4 = vmul.f32 %v6504_v8, %v13020_v5  ;;  %v14237_v5 = vld [vmem:[#allocation152_spill] sm:$0xff] }
 0xc8c   : > { %v6350_v53 = vmul.f32 %v12989_v39, %v14237_v5 }
 0xc8d   : > { %v6534_v27 = vsel %vm6362_vm11, %v13086_v4, 0.0  ;;  %v6555_v56 = vmul.f32 %v13086_v4, %v13086_v4 }
 0xc8e   : > { %v13095_v42 = vadd.f32 %v6534_v27, %v6533_v17  ;;  %v6432_v17 = vsel %vm6362_vm11, %v6342_v0, 0.0  ;;  %v6434_v31 = vsel %vm6362_vm11, %v6350_v53, 0.0  ;;  %v14251_v27 = vld [vmem:[#allocation126_spill] sm:$0xff] }
 0xc8f   : > { %v6564_v15 = vsel %vm6362_vm11, %v6555_v56, 0.0  ;;  %v6433_v39 = vadd.f32 %v6432_v17, %v6431_v61  ;;  %v14250_v61 = vld [vmem:[#allocation179_spill] sm:$0xff] }
 0xc90   : > { %v13104_v28 = vadd.f32 %v6564_v15, %v6563_v20  ;;  %v3915_v8 = vadd.f32 %v14250_v61, %v14249_v30  ;;  %v14254_v15 = vld [vmem:[#allocation3_spill] sm:$0xff]  ;;  %v14267_v61 = vld [vmem:[#allocation56_spill] sm:$0xff] }
 0xc91   : > { %v6435_v20 = vadd.f32 %v6434_v31, %v6433_v39  ;;  %v3923_v57 = vadd.f32 %v14254_v15, %v14253_v40 }
 0xc92   : > { %v6053_v22 = vpop.permute.xlu0 %6052  ;;  %v6087_v32 = vpop.permute.xlu1 %6086  ;;  %v6279_v9 = vmul.f32 %v6133_v62, %v3915_v8  ;;  %v14255_v62 = vld [vmem:[#allocation23_spill] sm:$0xff]  ;;  %v14268_v8 = vld [vmem:[#allocation82_spill] sm:$0xff] }
 0xc93   : > { %v6239_v50 = vmul.f32 %v6053_v22, %v3875_v11  ;;  %v13117_v29 = vadd.f32 %v6436_v34, %v6435_v20  ;;  %v3884_v17 = vadd.f32 %v14256_v45, %v14255_v62  ;;  %v14258_v22 = vld [vmem:[#allocation32_spill] sm:$0xff]  ;;  %v14274_v45 = vld [vmem:[#allocation141_spill] sm:$0xff] }
 0xc94   : > { %v6343_v33 = vmul.f32 %v6279_v9, %v14252_v24  ;;  %v3892_v39 = vadd.f32 %v14259_v43, %v14258_v22 }
 0xc95   : > { %v6303_v10 = vmul.f32 %v6239_v50, %v14245_v44  ;;  %v6248_v31 = vmul.f32 %v13079_v54, %v3884_v17  ;;  %v14261_v50 = vld [vmem:[#allocation102_spill] sm:$0xff]  ;;  %v3900_v44 = vadd.f32 %v14263_v58, %v14262_v46 }
 0xc96   : > { %v6447_v38 = vsel %vm6362_vm11, %v6343_v33, 0.0  ;;  %v3876_v20 = vadd.f32 %v14261_v50, %v14260_v19  ;;  %v6256_v34 = vmul.f32 %v6087_v32, %v3892_v39 }
 0xc97   : > { %v6438_v3 = vsel %vm6362_vm11, %v6303_v10, 0.0  ;;  %v6057_v10 = vpop.permute.xlu2 %6056 }
 0xc98   : > { %v6440_v21 = vadd.f32 %v6439_v25, %v6438_v3  ;;  %v6264_v25 = vmul.f32 %v6103_v59, %v3900_v44  ;;  %v14264_v3 = vld [vmem:[#allocation90_spill] sm:$0xff]  ;;  %v6320_v54 = vmul.f32 %v6256_v34, %v14265_v7  ;;  %v14277_v34 = vld [vmem:[#allocation16_spill] sm:$0xff] }
 0xc9a   : > { %v6442_v26 = vadd.f32 %v6441_v60, %v6440_v21  ;;  %v6117_v51 = vpop.permute.xlu0 %6116  ;;  %v6151_v6 = vpop.permute.xlu1 %6150  ;;  %v6312_v21 = vmul.f32 %v6248_v31, %v14264_v3  ;;  %v3916_v60 = vadd.f32 %v14268_v8, %v14267_v61  ;;  %v14279_v3 = vld [vmem:[#allocation33_spill] sm:$0xff]  ;;  %v14284_v61 = vld [vmem:[#allocation171_spill] sm:$0xff] }
 0xc9b   : > { %v6271_v0 = vmul.f32 %v6117_v51, %v3907_v49  ;;  %v14266_v49 = vld [vmem:[#allocation75_spill] sm:$0xff] }
 0xc9c   : > { %v6444_v12 = vadd.f32 %v6443_v18, %v6442_v26  ;;  %v14269_v26 = vld [vmem:[#allocation119_spill] sm:$0xff]  ;;  %v6454_v18 = vsel %vm6362_vm11, %v6312_v21, 0.0  ;;  %v6280_v33 = vmul.f32 %v6135_v37, %v3916_v60  ;;  %v14280_v21 = vld [vmem:[#allocation106_spill] sm:$0xff] }
 0xc9d   : > { %v6335_v56 = vmul.f32 %v6271_v0, %v14251_v27  ;;  %v6328_v51 = vmul.f32 %v6264_v25, %v14269_v26  ;;  %v14270_v0 = vld [vmem:[#allocation48_spill] sm:$0xff]  ;;  %v14272_v27 = vld [vmem:[#allocation69_spill] sm:$0xff]  ;;  %v14285_v26 = vld [vmem:[#allocation107_spill] sm:$0xff] }
 0xc9e   : > { %v6344_v17 = vmul.f32 %v6280_v33, %v14274_v45  ;;  %v14290_v33 = vld [vmem:[#allocation100_spill] sm:$0xff]  ;;  %v14295_v45 = vld [vmem:[#allocation167_spill] sm:$0xff] }
 0xc9f   : > { %v6445_v5 = vsel %vm6362_vm11, %v6335_v56, 0.0  ;;  %v14273_v56 = vld [vmem:[#allocation96_spill] sm:$0xff] }
 0xca0   : > { %v6446_v53 = vadd.f32 %v6445_v5, %v6444_v12  ;;  %v14271_v12 = vld [vmem:[#allocation180_spill] sm:$0xff]  ;;  %v3924_v24 = vadd.f32 %v14273_v56, %v14272_v27  ;;  %v6456_v5 = vsel %vm6362_vm11, %v6320_v54, 0.0  ;;  %v6462_v50 = vsel %vm6362_vm11, %v6344_v17, 0.0 }
 0xca1   : > { %v3908_v59 = vadd.f32 %v14271_v12, %v14270_v0  ;;  %v14281_v54 = vld [vmem:[#allocation24_spill] sm:$0xff]  ;;  %v14288_v0 = vld [vmem:[#allocation177_spill] sm:$0xff] }
 0xca2   : > { %v6149_v1 = vpop.permute.xlu0 %6148  ;;  %v6089_v11 = vpop.permute.xlu1 %6088  ;;  %v6448_v16 = vadd.f32 %v6447_v38, %v6446_v53 }
 0xca3   : > { %v6287_v14 = vmul.f32 %v6149_v1, %v3923_v57  ;;  %v6458_v57 = vsel %vm6362_vm11, %v6328_v51, 0.0  ;;  %v6288_v1 = vmul.f32 %v6151_v6, %v3924_v24  ;;  %v14276_v6 = vld [vmem:[#allocation155_spill] sm:$0xff]  ;;  %v14286_v51 = vld [vmem:[#allocation2_spill] sm:$0xff] }
 0xca5   : > { %v6351_v55 = vmul.f32 %v6287_v14, %v14257_v13  ;;  %v14275_v13 = vld [vmem:[#allocation127_spill] sm:$0xff]  ;;  %v6352_v39 = vmul.f32 %v6288_v1, %v14276_v6  ;;  %v14293_v1 = vld [vmem:[#allocation93_spill] sm:$0xff]  ;;  %v14297_v6 = vld [vmem:[#allocation164_spill] sm:$0xff] }
 0xca7   : > { %v6449_v52 = vsel %vm6362_vm11, %v6351_v55, 0.0  ;;  %v6464_v58 = vsel %vm6362_vm11, %v6352_v39, 0.0 }
 0xca8   : > { %v13141_v36 = vadd.f32 %v6449_v52, %v6448_v16  ;;  %v6105_v16 = vpop.permute.xlu2 %6104 }
 0xcaa   : > { %v6055_v48 = vpop.permute.xlu0 %6054  ;;  %v6121_v41 = vpop.permute.xlu1 %6120 }
 0xcab   : > { %v6240_v47 = vmul.f32 %v6055_v48, %v3876_v20 }
 0xcad   : > { %v6304_v30 = vmul.f32 %v6240_v47, %v14266_v49  ;;  %v3893_v47 = vadd.f32 %v14280_v21, %v14279_v3  ;;  %v14282_v49 = vld [vmem:[#allocation130_spill] sm:$0xff] }
 0xcaf   : > { %v6453_v9 = vsel %vm6362_vm11, %v6304_v30, 0.0  ;;  %v3885_v30 = vadd.f32 %v14282_v49, %v14281_v54  ;;  %v6257_v60 = vmul.f32 %v6089_v11, %v3893_v47  ;;  %v14302_v54 = vld [vmem:[#allocation156_spill] sm:$0xff] }
 0xcb0   : > { %v6455_v32 = vadd.f32 %v6454_v18, %v6453_v9  ;;  %v6153_v25 = vpop.permute.xlu2 %6152  ;;  %v3932_v18 = vadd.f32 %v14286_v51, %v14285_v26 }
 0xcb2   : > { %v6457_v53 = vadd.f32 %v6456_v5, %v6455_v32  ;;  %v6119_v40 = vpop.permute.xlu0 %6118  ;;  %v6506_v15 = vpop.permute.xlu1 %6505  ;;  %v14287_v32 = vld [vmem:[#allocation49_spill] sm:$0xff] }
 0xcb3   : > { %v6272_v38 = vmul.f32 %v6119_v40, %v3908_v59  ;;  %v13162_v14 = vmul.f32 %v6506_v15, %v13061_v35  ;;  %v3909_v12 = vadd.f32 %v14288_v0, %v14287_v32  ;;  %v14289_v59 = vld [vmem:[#allocation76_spill] sm:$0xff] }
 0xcb4   : > { %v6459_v62 = vadd.f32 %v6458_v57, %v6457_v53  ;;  %v14292_v40 = vld [vmem:[#allocation108_spill] sm:$0xff] }
 0xcb5   : > { %v6336_v55 = vmul.f32 %v6272_v38, %v14275_v13  ;;  %v6536_v37 = vsel %vm6362_vm11, %v13162_v14, 0.0  ;;  %v6556_v22 = vmul.f32 %v13162_v14, %v13162_v14  ;;  %v6321_v15 = vmul.f32 %v6257_v60, %v14292_v40  ;;  %v14306_v40 = vld [vmem:[#allocation163_spill] sm:$0xff] }
 0xcb6   : > { %v13171_v43 = vadd.f32 %v6536_v37, %v13095_v42  ;;  %v14278_v42 = vld [vmem:[#allocation153_spill] sm:$0xff]  ;;  %v6273_v57 = vmul.f32 %v6121_v41, %v3909_v12 }
 0xcb7   : > { %v6460_v35 = vsel %vm6362_vm11, %v6336_v55, 0.0  ;;  %v6566_v31 = vsel %vm6362_vm11, %v6556_v22, 0.0  ;;  %v3877_v48 = vadd.f32 %v14278_v42, %v14277_v34  ;;  %v14296_v55 = vld [vmem:[#allocation120_spill] sm:$0xff] }
 0xcb8   : > { %v6461_v52 = vadd.f32 %v6460_v35, %v6459_v62  ;;  %v13177_v19 = vadd.f32 %v6566_v31, %v13104_v28  ;;  %v14283_v28 = vld [vmem:[#allocation41_spill] sm:$0xff]  ;;  %v14294_v62 = vld [vmem:[#allocation74_spill] sm:$0xff]  ;;  %v6169_v22 = vpop.permute.xlu2 %6168 }
 0xcb9   : > { %v6241_v7 = vmul.f32 %v6057_v10, %v3877_v48  ;;  %v3901_v8 = vadd.f32 %v14284_v61, %v14283_v28  ;;  %v14291_v10 = vld [vmem:[#allocation68_spill] sm:$0xff]  ;;  %v3925_v17 = vadd.f32 %v14295_v45, %v14294_v62  ;;  %v14298_v31 = vld [vmem:[#allocation57_spill] sm:$0xff]  ;;  %v14303_v28 = vld [vmem:[#allocation143_spill] sm:$0xff] }
 0xcba   : > { %v6463_v20 = vadd.f32 %v6462_v50, %v6461_v52  ;;  %v6167_v46 = vpop.permute.xlu0 %6166  ;;  %v3931_v5 = vadd.f32 %v14291_v10, %v14290_v33  ;;  %v14299_v52 = vld [vmem:[#allocation9_spill] sm:$0xff]  ;;  %v14304_v61 = vld [vmem:[#allocation114_spill] sm:$0xff]  ;;  %v6510_v26 = vpop.permute.xlu1 %6509 }
 0xcbb   : > { %v6305_v27 = vmul.f32 %v6241_v7, %v14289_v59  ;;  %v6265_v56 = vmul.f32 %v6105_v16, %v3901_v8  ;;  %v6296_v53 = vmul.f32 %v6167_v46, %v3932_v18  ;;  %v3917_v41 = vadd.f32 %v14299_v52, %v14298_v31  ;;  %v14305_v8 = vld [vmem:[#allocation91_spill] sm:$0xff] }
 0xcbc   : > { %v6465_v44 = vadd.f32 %v6464_v58, %v6463_v20  ;;  %v6295_v38 = vmul.f32 %v13083_v2, %v3931_v5  ;;  %v6289_v50 = vmul.f32 %v6153_v25, %v3925_v17  ;;  %v6471_v20 = vsel %vm6362_vm11, %v6321_v15, 0.0  ;;  %v14300_v2 = vld [vmem:[#allocation128_spill] sm:$0xff]  ;;  %v14301_v58 = vld [vmem:[#allocation162_spill] sm:$0xff] }
 0xcbd   : > { %v6468_v13 = vsel %vm6362_vm11, %v6305_v27, 0.0  ;;  %v6329_v37 = vmul.f32 %v6265_v56, %v14296_v55  ;;  %v6360_v39 = vmul.f32 %v6296_v53, %v14297_v6  ;;  %v6337_v46 = vmul.f32 %v6273_v57, %v14300_v2 }
 0xcbe   : > { %v6359_v34 = vmul.f32 %v6295_v38, %v14301_v58  ;;  %v6353_v49 = vmul.f32 %v6289_v50, %v14302_v54  ;;  %v3933_v60 = vadd.f32 %v14305_v8, %v14304_v61 }
 0xcbf   : > { %v6473_v3 = vsel %vm6362_vm11, %v6329_v37, 0.0  ;;  %v6466_v47 = vsel %vm6362_vm11, %v6360_v39, 0.0 }
 0xcc0   : > { %v6451_v51 = vsel %vm6362_vm11, %v6359_v34, 0.0  ;;  %v6297_v12 = vmul.f32 %v6169_v22, %v3933_v60  ;;  %v6479_v27 = vsel %vm6362_vm11, %v6353_v49, 0.0 }
 0xcc1   : > { %v6452_v32 = vadd.f32 %v6451_v51, %v13141_v36 }
 0xcc2   : > { %v6073_v9 = vpop.permute.xlu0 %6072 }
 0xcc3   : > { %v6249_v24 = vmul.f32 %v6073_v9, %v3885_v30  ;;  %v6475_v30 = vsel %vm6362_vm11, %v6337_v46, 0.0  ;;  %v6467_v9 = vadd.f32 %v6466_v47, %v6465_v44  ;;  %v13221_v56 = vmul.f32 %v6510_v26, %v6452_v32  ;;  %v6649_v47 = vld [vmem:[%s13361_s3 + $0x40] sm:$0xff] }
 0xcc4   : > { %v6361_v44 = vmul.f32 %v6297_v12, %v14306_v40  ;;  %6708 = vmatpush.msrb.mxu3 %v6649_v47 }
 0xcc5   : > { %v6313_v11 = vmul.f32 %v6249_v24, %v14293_v1  ;;  %v6512_v24 = vpop.permute.xlu2 %6511  ;;  %v6558_v36 = vmul.f32 %v13221_v56, %v13221_v56 }
 0xcc6   : > { %v13223_v5 = vmul.f32 %v6512_v24, %v6467_v9  ;;  %v6481_v17 = vsel %vm6362_vm11, %v6361_v44, 0.0 }
 0xcc7   : > { %v6469_v16 = vsel %vm6362_vm11, %v6313_v11, 0.0 }
 0xcc8   : > { %v6470_v35 = vadd.f32 %v6469_v16, %v6468_v13  ;;  %v6559_v11 = vmul.f32 %v13223_v5, %v13223_v5  ;;  %v6570_v13 = vsel %vm6362_vm11, %v6558_v36, 0.0  ;;  %v6542_v37 = vsel %vm6362_vm11, %v13223_v5, 0.0 }
 0xcca   : > { %v6472_v42 = vadd.f32 %v6471_v20, %v6470_v35  ;;  %v6137_v48 = vpop.permute.xlu0 %6136  ;;  %v6572_v39 = vsel %vm6362_vm11, %v6559_v11, 0.0 }
 0xccb   : > { %v6281_v21 = vmul.f32 %v6137_v48, %v3917_v41 }
 0xccc   : > { %v6474_v7 = vadd.f32 %v6473_v3, %v6472_v42 }
 0xccd   : > { %v6345_v25 = vmul.f32 %v6281_v21, %v14303_v28 }
 0xcce   : > { %v6476_v18 = vadd.f32 %v6475_v30, %v6474_v7 }
 0xccf   : > { %v6477_v0 = vsel %vm6362_vm11, %v6345_v25, 0.0 }
 0xcd0   : > { %v6478_v59 = vadd.f32 %v6477_v0, %v6476_v18 }
 0xcd2   : > { %v6508_v33 = vpop.permute.xlu0 %6507  ;;  %v6480_v10 = vadd.f32 %v6479_v27, %v6478_v59 }
 0xcd3   : > { %v13226_v53 = vmul.f32 %v6508_v33, %v13117_v29  ;;  %v6540_v29 = vsel %vm6362_vm11, %v13221_v56, 0.0 }
 0xcd4   : > { %v6482_v55 = vadd.f32 %v6481_v17, %v6480_v10 }
 0xcd5   : > { %v6538_v15 = vsel %vm6362_vm11, %v13226_v53, 0.0  ;;  %v6557_v57 = vmul.f32 %v13226_v53, %v13226_v53 }
 0xcd6   : > { %v6539_v1 = vadd.f32 %v6538_v15, %v13171_v43 }
 0xcd7   : > { %v6568_v38 = vsel %vm6362_vm11, %v6557_v57, 0.0 }
 0xcd8   : > { %v6541_v62 = vadd.f32 %v6540_v29, %v6539_v1  ;;  %v6569_v45 = vadd.f32 %v6568_v38, %v13177_v19 }
 0xcda   : > { %v6571_v43 = vadd.f32 %v6570_v13, %v6569_v45  ;;  %v6514_v16 = vpop.permute.xlu0 %6513  ;;  %v6543_v22 = vadd.f32 %v6542_v37, %v6541_v62 }
 0xcdb   : > { %v6530_v6 = vmul.f32 %v6514_v16, %v6482_v55 }
 0xcdc   : > { %v6573_v35 = vadd.f32 %v6572_v39, %v6571_v43 }
 0xcdd   : > { %v6544_v31 = vsel %vm6362_vm11, %v6530_v6, 0.0  ;;  %v6560_v52 = vmul.f32 %v6530_v6, %v6530_v6 }
 0xcde   : > { %v6545_v41 = vadd.f32 %v6544_v31, %v6543_v22 }
 0xcdf   : > { %v6574_v19 = vsel %vm6362_vm11, %v6560_v52, 0.0 }
 0xce0   : > { %v6546_v50 = vrot.slane %v6545_v41, 4  ;;  %v6575_v20 = vadd.f32 %v6574_v19, %v6573_v35 }
 0xce2   : > { %v6547_v2 = vadd.f32 %v6546_v50, %v6545_v41  ;;  %v6576_v46 = vrot.slane %v6575_v20, 4 }
 0xce4   : > { %v6548_v58 = vrot.slane %v6547_v2, 2  ;;  %v6577_v34 = vadd.f32 %v6576_v46, %v6575_v20 }
 0xce6   : > { %v6549_v42 = vadd.f32 %v6548_v58, %v6547_v2  ;;  %v6578_v48 = vrot.slane %v6577_v34, 2 }
 0xce8   : > { %v6550_v3 = vrot.slane %v6549_v42, 1  ;;  %v6579_v21 = vadd.f32 %v6578_v48, %v6577_v34 }
 0xcea   : > { %v6551_v7 = vadd.f32 %v6550_v3, %v6549_v42  ;;  %v6580_v54 = vrot.slane %v6579_v21, 1 }
 0xcec   : > { %v6552_v49 = vmul.f32 0.015625, %v6551_v7  ;;  %v6581_v30 = vadd.f32 %v6580_v54, %v6579_v21 }
 0xcee   : > { %v6582_v28 = vmul.f32 0.015625, %v6581_v30  ;;  %v6583_v25 = vmul.f32 %v6552_v49, %v6552_v49  ;;  %v6593_v61 = vsub.f32 %v6530_v6, %v6552_v49  ;;  %v6588_v8 = vsub.f32 %v13086_v4, %v6552_v49 }
 0xcef   : > { %v6587_v26 = vsub.f32 %v13042_v63, %v6552_v49  ;;  %v6586_v51 = vsub.f32 %v12924_v23, %v6552_v49  ;;  %v6591_v18 = vsub.f32 %v13221_v56, %v6552_v49  ;;  %v6590_v0 = vsub.f32 %v13226_v53, %v6552_v49  ;;  %v6617_v56 = vpop.permute.xlu1 %6616  ;;  %v6631_v53 = vpop.permute.xlu2 %6630 }
 0xcf0   : > { %v6584_v60 = vsub.f32 %v6582_v28, %v6583_v25  ;;  %v6589_v12 = vsub.f32 %v13162_v14, %v6552_v49  ;;  %v6592_v59 = vsub.f32 %v13223_v5, %v6552_v49 }
 0xcf2   : > { %v6585_v9 = vmax.f32 %v6584_v60, 0.0 }
 0xcf4   : > { %v6594_v32 = vadd.f32 0.001, %v6585_v9 }
 0xcf6   : > { %7562 = vrsqrt.f32 %v6594_v32  ;;  %vm6601_vm13 = vweird.f32 %v6594_v32 }
 0xcfc   : > { %v7563_v27 = vpop.eup %7562 }
 0xcfd   : > { %v6596_v24 = vmul.f32 %v7563_v27, %v6594_v32  ;;  %vm6602_vm12 = vweird.f32 %v7563_v27 }
 0xcfe   : > { %vm6603_vm14 = vmor %vm6601_vm13, %vm6602_vm12 }
 0xcff   : > { %v6597_v33 = vmul.f32 %v7563_v27, %v6596_v24 }
 0xd01   : > { %v6598_v4 = vmul.f32 0.5, %v6597_v33 }
 0xd03   : > { %v6599_v10 = vsub.f32 1.5, %v6598_v4 }
 0xd05   : > { %v6600_v63 = vmul.f32 %v7563_v27, %v6599_v10 }
 0xd07   : > { %v6604_v23 = vsel %vm6603_vm14, %v7563_v27, %v6600_v63 }
 0xd08   : > { %v6612_v40 = vmul.f32 %v6604_v23, %v6593_v61  ;;  %v6607_v44 = vmul.f32 %v6604_v23, %v6588_v8  ;;  %v6606_v36 = vmul.f32 %v6604_v23, %v6587_v26  ;;  %v6605_v15 = vmul.f32 %v6604_v23, %v6586_v51 }
 0xd09   : > { %v6610_v57 = vmul.f32 %v6604_v23, %v6591_v18  ;;  %v6609_v14 = vmul.f32 %v6604_v23, %v6590_v0  ;;  %v6608_v1 = vmul.f32 %v6604_v23, %v6589_v12  ;;  %v6611_v5 = vmul.f32 %v6604_v23, %v6592_v59 }
 0xd0a   : > { %v6621_v11 = vmul.f32 %v6617_v56, %v6607_v44  ;;  %v6620_v29 = vmul.f32 %v6617_v56, %v6606_v36  ;;  %v6619_v38 = vmul.f32 %v6617_v56, %v6605_v15  ;;  %v6626_v41 = vmul.f32 %v6617_v56, %v6612_v40 }
 0xd0b   : > { %v6624_v13 = vmul.f32 %v6617_v56, %v6610_v57  ;;  %v6623_v16 = vmul.f32 %v6617_v56, %v6609_v14  ;;  %v6622_v22 = vmul.f32 %v6617_v56, %v6608_v1  ;;  %v6625_v50 = vmul.f32 %v6617_v56, %v6611_v5 }
 0xd0c   : > { %v6635_v62 = vadd.f32 %v6631_v53, %v6621_v11  ;;  %v6634_v45 = vadd.f32 %v6631_v53, %v6620_v29  ;;  %v6633_v17 = vadd.f32 %v6631_v53, %v6619_v38  ;;  %v6640_v20 = vadd.f32 %v6631_v53, %v6626_v41 }
 0xd0d   : > { %v6638_v6 = vadd.f32 %v6631_v53, %v6624_v13  ;;  %v6637_v39 = vadd.f32 %v6631_v53, %v6623_v16  ;;  %v6636_v35 = vadd.f32 %v6631_v53, %v6622_v22  ;;  %v6639_v2 = vadd.f32 %v6631_v53, %v6625_v50 }
 0xd0e   : > { %v6643_v55 = vmax.f32 %v6635_v62, 0.0  ;;  %v6642_v37 = vmax.f32 %v6634_v45, 0.0  ;;  %v6641_v43 = vmax.f32 %v6633_v17, 0.0  ;;  %v6648_v46 = vmax.f32 %v6640_v20, 0.0 }
 0xd0f   : > { %v6646_v31 = vmax.f32 %v6638_v6, 0.0  ;;  %v6645_v52 = vmax.f32 %v6637_v39, 0.0  ;;  %v6644_v19 = vmax.f32 %v6636_v35, 0.0  ;;  %v6647_v58 = vmax.f32 %v6639_v2, 0.0 }
 0xd10   : > { %6665 = vrot.lane.b32.xlu2 %v6643_v55, %s7586_s27  ;;  %6663 = vrot.lane.b32.xlu1 %v6642_v37, %s7586_s27 }
 0xd11   : > { %6661 = vrot.lane.b32.xlu0 %v6641_v43, %s7586_s27 }
 0xd18   : > { %6671 = vrot.lane.b32.xlu2 %v6646_v31, %s7586_s27  ;;  %6669 = vrot.lane.b32.xlu1 %v6645_v52, %s7586_s27 }
 0xd19   : > { %6667 = vrot.lane.b32.xlu0 %v6644_v19, %s7586_s27 }
 0xd20   : > { %6675 = vrot.lane.b32.xlu1 %v6648_v46, %s7586_s27 }
 0xd21   : > { %6673 = vrot.lane.b32.xlu0 %v6647_v58, %s7586_s27 }
 0xd6a   : > { %v6666_v48 = vpop.permute.xlu2 %6665 }
 0xd72   : > { %v6672_v47 = vpop.permute.xlu2 %6671 }
 0xd82   : > { %v6664_v42 = vpop.permute.xlu1 %6663 }
 0xd83   : > { %v6662_v34 = vpop.permute.xlu0 %6661 }
 0xd84   : > { %7310 = vmatmul.msk.f32.vlgmr.msrb.gmra.mxu3 %vm305_vm0, %v6662_v34 }
 0xd8a   : > { %v6670_v21 = vpop.permute.xlu1 %6669 }
 0xd8b   : > { %v6668_v3 = vpop.permute.xlu0 %6667 }
 0xd8c   : > { %7311 = vmatmul.msk.f32.gmra.mxu3 %vm305_vm0, %v6664_v42 }
 0xd92   : > { %v6676_v54 = vpop.permute.xlu1 %6675 }
 0xd93   : > { %v6674_v7 = vpop.permute.xlu0 %6673 }
 0xd94   : > { %7312 = vmatmul.msk.f32.gmra.mxu3 %vm305_vm0, %v6666_v48 }
 0xd9c   : > { %7313 = vmatmul.msk.f32.gmra.mxu3 %vm305_vm0, %v6668_v3 }
 0xda4   : > { %7314 = vmatmul.msk.f32.gmra.mxu3 %vm305_vm0, %v6670_v21 }
 0xdac   : > { %7315 = vmatmul.msk.f32.gmra.mxu3 %vm305_vm0, %v6672_v47 }
 0xdb4   : > { %7316 = vmatmul.msk.f32.gmra.mxu3 %vm305_vm0, %v6674_v7 }
 0xdbc   : > { %7317 = vmatmul.msk.f32.gmra.mxu3 %vm305_vm0, %v6676_v54 }
 0xe07   : > { %v13275_v49 = vpop.f32.mrf.mxu3 }
 0xe08   : > { %v6756_v26 = vmul.f32 %v13275_v49, %v13275_v49  ;;  %v6734_v9 = vsel %vm305_vm0, %v13275_v49, 0.0 }
 0xe0a   : > { %v6764_v27 = vsel %vm305_vm0, %v6756_v26, 0.0 }
 0xe0f   : > { %v13277_v30 = vpop.f32.mrf.mxu3 }
 0xe10   : > { %v6757_v60 = vmul.f32 %v13277_v30, %v13277_v30  ;;  %v6735_v51 = vsel %vm305_vm0, %v13277_v30, 0.0 }
 0xe11   : > { %v6736_v59 = vadd.f32 %v6735_v51, %v6734_v9 }
 0xe12   : > { %v6765_v32 = vsel %vm305_vm0, %v6757_v60, 0.0 }
 0xe13   : > { %v6766_v10 = vadd.f32 %v6765_v32, %v6764_v27 }
 0xe17   : > { %v13279_v28 = vpop.f32.mrf.mxu3 }
 0xe18   : > { %v6758_v18 = vmul.f32 %v13279_v28, %v13279_v28  ;;  %v6737_v0 = vsel %vm305_vm0, %v13279_v28, 0.0 }
 0xe19   : > { %v6738_v63 = vadd.f32 %v6737_v0, %v6736_v59 }
 0xe1a   : > { %v6767_v24 = vsel %vm305_vm0, %v6758_v18, 0.0 }
 0xe1b   : > { %v6768_v36 = vadd.f32 %v6767_v24, %v6766_v10 }
 0xe1f   : > { %v13281_v25 = vpop.f32.mrf.mxu3 }
 0xe20   : > { %v6759_v12 = vmul.f32 %v13281_v25, %v13281_v25  ;;  %v6739_v33 = vsel %vm305_vm0, %v13281_v25, 0.0 }
 0xe21   : > { %v6740_v15 = vadd.f32 %v6739_v33, %v6738_v63  ;;  %v7408_v33 = vld [vmem:[%s7656_s10 + $0xf] ss:$0 sm:$0xff] }
 0xe22   : > { %v6769_v56 = vsel %vm305_vm0, %v6759_v12, 0.0 }
 0xe23   : > { %v6770_v1 = vadd.f32 %v6769_v56, %v6768_v36 }
 0xe27   : > { %v13283_v61 = vpop.f32.mrf.mxu3 }
 0xe28   : > { %v6760_v4 = vmul.f32 %v13283_v61, %v13283_v61  ;;  %v6741_v40 = vsel %vm305_vm0, %v13283_v61, 0.0 }
 0xe29   : > { %v6742_v5 = vadd.f32 %v6741_v40, %v6740_v15  ;;  %v7409_v15 = vld [vmem:[%s7656_s10 + $0x10] ss:$0 sm:$0xff] }
 0xe2a   : > { %v6771_v53 = vsel %vm305_vm0, %v6760_v4, 0.0 }
 0xe2b   : > { %v6772_v38 = vadd.f32 %v6771_v53, %v6770_v1 }
 0xe2f   : > { %v13285_v8 = vpop.f32.mrf.mxu3 }
 0xe30   : > { %v6761_v44 = vmul.f32 %v13285_v8, %v13285_v8  ;;  %v6743_v57 = vsel %vm305_vm0, %v13285_v8, 0.0 }
 0xe31   : > { %v6744_v62 = vadd.f32 %v6743_v57, %v6742_v5 }
 0xe32   : > { %v6773_v11 = vsel %vm305_vm0, %v6761_v44, 0.0 }
 0xe33   : > { %v6774_v17 = vadd.f32 %v6773_v11, %v6772_v38 }
 0xe37   : > { %v13308_v23 = vpop.f32.mrf.mxu3 }
 0xe38   : > { %v6762_v14 = vmul.f32 %v13308_v23, %v13308_v23  ;;  %v6745_v29 = vsel %vm305_vm0, %v13308_v23, 0.0 }
 0xe39   : > { %v6746_v13 = vadd.f32 %v6745_v29, %v6744_v62 }
 0xe3a   : > { %v6775_v45 = vsel %vm305_vm0, %v6762_v14, 0.0 }
 0xe3b   : > { %v6776_v16 = vadd.f32 %v6775_v45, %v6774_v17 }
 0xe3f   : > { %v6731_v55 = vpop.f32.mrf.mxu3 }
 0xe40   : > { %v6747_v37 = vsel %vm305_vm0, %v6731_v55, 0.0  ;;  %v6763_v43 = vmul.f32 %v6731_v55, %v6731_v55 }
 0xe41   : > { %v6748_v22 = vadd.f32 %v6747_v37, %v6746_v13 }
 0xe42   : > { %v6777_v6 = vsel %vm305_vm0, %v6763_v43, 0.0  ;;  %v7568_v43 = vld [vmem:[%s7649_s6] sm:$0xff] }
 0xe43   : > { %v6749_v39 = vrot.slane %v6748_v22, 4  ;;  %v6778_v35 = vadd.f32 %v6777_v6, %v6776_v16 }
 0xe45   : > { %v6750_v31 = vadd.f32 %v6749_v39, %v6748_v22  ;;  %v6779_v52 = vrot.slane %v6778_v35, 4  ;;  %v7569_v22 = vld [vmem:[%s7649_s6 + $0x8] sm:$0xff]  ;;  %v7570_v39 = vld [vmem:[%s7649_s6 + $0x10] sm:$0xff] }
 0xe47   : > { %v6751_v41 = vrot.slane %v6750_v31, 2  ;;  %v6780_v19 = vadd.f32 %v6779_v52, %v6778_v35 }
 0xe49   : > { %v6752_v50 = vadd.f32 %v6751_v41, %v6750_v31  ;;  %v6781_v20 = vrot.slane %v6780_v19, 2  ;;  %v7571_v31 = vld [vmem:[%s7649_s6 + $0x18] sm:$0xff]  ;;  %v7572_v41 = vld [vmem:[%s7649_s6 + $0x20] sm:$0xff] }
 0xe4b   : > { %v6753_v2 = vrot.slane %v6752_v50, 1  ;;  %v6782_v46 = vadd.f32 %v6781_v20, %v6780_v19 }
 0xe4d   : > { %v6754_v58 = vadd.f32 %v6753_v2, %v6752_v50  ;;  %v6783_v34 = vrot.slane %v6782_v46, 1  ;;  %v7573_v50 = vld [vmem:[%s7649_s6 + $0x28] sm:$0xff]  ;;  %v7574_v2 = vld [vmem:[%s7649_s6 + $0x30] sm:$0xff] }
 0xe4f   : > { %v6755_v42 = vmul.f32 0.015625, %v6754_v58  ;;  %v6784_v48 = vadd.f32 %v6783_v34, %v6782_v46 }
 0xe51   : > { %v6785_v3 = vmul.f32 0.015625, %v6784_v48  ;;  %v6786_v21 = vmul.f32 %v6755_v42, %v6755_v42  ;;  %v6789_v32 = vsub.f32 %v13275_v49, %v6755_v42  ;;  %v6790_v12 = vsub.f32 %v13277_v30, %v6755_v42  ;;  %v7575_v48 = vld [vmem:[%s7649_s6 + $0x38] sm:$0xff] }
 0xe52   : > { %v6791_v59 = vsub.f32 %v13279_v28, %v6755_v42  ;;  %v6792_v27 = vsub.f32 %v13281_v25, %v6755_v42  ;;  %v6793_v24 = vsub.f32 %v13283_v61, %v6755_v42  ;;  %v6794_v4 = vsub.f32 %v13285_v8, %v6755_v42 }
 0xe53   : > { %v6787_v47 = vsub.f32 %v6785_v3, %v6786_v21  ;;  %v6795_v10 = vsub.f32 %v13308_v23, %v6755_v42  ;;  %v6796_v63 = vsub.f32 %v6731_v55, %v6755_v42 }
 0xe55   : > { %v6788_v7 = vmax.f32 %v6787_v47, 0.0 }
 0xe57   : > { %v6797_v54 = vadd.f32 0.001, %v6788_v7 }
 0xe59   : > { %7564 = vrsqrt.f32 %v6797_v54  ;;  %vm6804_vm1 = vweird.f32 %v6797_v54 }
 0xe5f   : > { %v7565_v60 = vpop.eup %7564 }
 0xe60   : > { %v6799_v26 = vmul.f32 %v7565_v60, %v6797_v54  ;;  %vm6805_vm15 = vweird.f32 %v7565_v60 }
 0xe61   : > { %vm6806_vm2 = vmor %vm6804_vm1, %vm6805_vm15 }
 0xe62   : > { %v6800_v51 = vmul.f32 %v7565_v60, %v6799_v26 }
 0xe64   : > { %v6801_v18 = vmul.f32 0.5, %v6800_v51 }
 0xe66   : > { %v6802_v9 = vsub.f32 1.5, %v6801_v18 }
 0xe68   : > { %v6803_v0 = vmul.f32 %v7565_v60, %v6802_v9 }
 0xe6a   : > { %v6807_v56 = vsel %vm6806_vm2, %v7565_v60, %v6803_v0 }
 0xe6b   : > { %v6808_v49 = vmul.f32 %v6807_v56, %v6789_v32  ;;  %v6809_v40 = vmul.f32 %v6807_v56, %v6790_v12  ;;  %v6810_v44 = vmul.f32 %v6807_v56, %v6791_v59  ;;  %v6811_v36 = vmul.f32 %v6807_v56, %v6792_v27 }
 0xe6c   : > { %v6812_v30 = vmul.f32 %v6807_v56, %v6793_v24  ;;  %v6813_v53 = vmul.f32 %v6807_v56, %v6794_v4  ;;  %v6814_v28 = vmul.f32 %v6807_v56, %v6795_v10  ;;  %v6815_v57 = vmul.f32 %v6807_v56, %v6796_v63 }
 0xe6d   : > { %v6818_v25 = vmul.f32 %v7408_v33, %v6808_v49  ;;  %v6819_v61 = vmul.f32 %v7408_v33, %v6809_v40  ;;  %v6820_v14 = vmul.f32 %v7408_v33, %v6810_v44  ;;  %v6821_v1 = vmul.f32 %v7408_v33, %v6811_v36 }
 0xe6e   : > { %v6822_v8 = vmul.f32 %v7408_v33, %v6812_v30  ;;  %v6823_v23 = vmul.f32 %v7408_v33, %v6813_v53  ;;  %v6824_v5 = vmul.f32 %v7408_v33, %v6814_v28  ;;  %v6825_v11 = vmul.f32 %v7408_v33, %v6815_v57 }
 0xe6f   : > { %v6828_v29 = vadd.f32 %v7409_v15, %v6818_v25  ;;  %v6829_v38 = vadd.f32 %v7409_v15, %v6819_v61  ;;  %v6830_v62 = vadd.f32 %v7409_v15, %v6820_v14  ;;  %v6831_v45 = vadd.f32 %v7409_v15, %v6821_v1 }
 0xe70   : > { %v6832_v17 = vadd.f32 %v7409_v15, %v6822_v8  ;;  %v6833_v13 = vadd.f32 %v7409_v15, %v6823_v23  ;;  %v6834_v55 = vadd.f32 %v7409_v15, %v6824_v5  ;;  %v6835_v37 = vadd.f32 %v7409_v15, %v6825_v11 }
 0xe71   : > { %v6836_v16 = vadd.f32 %v7568_v43, %v6828_v29  ;;  %v6837_v6 = vadd.f32 %v7569_v22, %v6829_v38  ;;  %v6838_v35 = vadd.f32 %v7570_v39, %v6830_v62  ;;  %v6839_v52 = vadd.f32 %v7571_v31, %v6831_v45 }
 0xe72   : > { %v6840_v19 = vadd.f32 %v7572_v41, %v6832_v17  ;;  %v6841_v20 = vadd.f32 %v7573_v50, %v6833_v13  ;;  %v6842_v46 = vadd.f32 %v7574_v2, %v6834_v55  ;;  %v6843_v3 = vadd.f32 %v7575_v48, %v6835_v37 }
 0xe73   : > { %v6844_v58 = vmax.f32 %v6836_v16, 0.0  ;;  %v6845_v34 = vmax.f32 %v6837_v6, 0.0  ;;  %v6846_v42 = vmax.f32 %v6838_v35, 0.0  ;;  %v6847_v21 = vmax.f32 %v6839_v52, 0.0 }
 0xe74   : > { %v6848_v47 = vmax.f32 %v6840_v19, 0.0  ;;  %v6849_v7 = vmax.f32 %v6841_v20, 0.0  ;;  %v6850_v54 = vmax.f32 %v6842_v46, 0.0  ;;  %v6851_v60 = vmax.f32 %v6843_v3, 0.0 }
 0xe75   : > { %6852 = vst.msk [vmem:[%s284_s24] sm:$0xff] %vm305_vm0, %v6844_v58 }
 0xe76   : > { %6853 = vst.msk [vmem:[%s284_s24 + $0x8] sm:$0xff] %vm305_vm0, %v6845_v34 }
 0xe77   : > { %6854 = vst.msk [vmem:[%s284_s24 + $0x10] sm:$0xff] %vm305_vm0, %v6846_v42 }
 0xe78   : > { %6855 = vst.msk [vmem:[%s284_s24 + $0x18] sm:$0xff] %vm305_vm0, %v6847_v21 }
 0xe79   : > { %6856 = vst.msk [vmem:[%s284_s24 + $0x20] sm:$0xff] %vm305_vm0, %v6848_v47 }
 0xe7a   : > { %6857 = vst.msk [vmem:[%s284_s24 + $0x28] sm:$0xff] %vm305_vm0, %v6849_v7 }
 0xe7b   : > { %6858 = vst.msk [vmem:[%s284_s24 + $0x30] sm:$0xff] %vm305_vm0, %v6850_v54 }
 0xe7c   : > { %6859 = vst.msk [vmem:[%s284_s24 + $0x38] sm:$0xff] %vm305_vm0, %v6851_v60 }
 0xe7d PF: > { %s15_s18 = sadd.s32 1, %s7582_s18  }
 0xe7e   : > { %p12_p4 = scmp.ge.s32.totalorder %s15_s18, 6  }
 0xe80   :  { %14 = sbr.rel (!%p12_p4) target bundleno = 1 (0x1), region = 79 }

</bundles_post_ra>
